<compile_context>
chip_gen: v7x
topology: tpu7x:2x2x1
jax: 0.10.0
libtpu: 0.0.40
codegen_flags: <defaults>
</compile_context>

<pallas_src>
import functools

import jax
import jax.numpy as jnp
from jax import lax
from jax.experimental import pallas as pl
from jax.experimental.pallas import tpu as pltpu

_VMEM_LIMIT = 32 * 1024 * 1024   # explicit scoped-VMEM budget (safe on v5e/v6e/v7x)


def _round_up(x, m):
    return (x + m - 1) // m * m


# ----------------------------------------------------------------------------
# Pallas kernels
# ----------------------------------------------------------------------------
def _conv_crelu_kernel(p_ref, w_ref, b_ref, o_ref, *, fold, cout):
    """One row-tile of: out = CReLU(patches @ W + b).

    p_ref: (TM, K) bf16 patches; w_ref: (K, NCOLS) bf16; b_ref: (1, NCOLS) f32.
    fold=True  -> W already holds [W, -W]: one relu, one lane-dense store.
    fold=False -> NCOLS == cout: store relu(acc) / relu(-acc) halves (>=128 lanes).
    """
    acc = jnp.dot(p_ref[...], w_ref[...], preferred_element_type=jnp.float32)
    acc = acc + b_ref[...]
    if fold:
        o_ref[...] = jnp.maximum(acc, 0.0).astype(o_ref.dtype)
    else:
        o_ref[:, :cout] = jnp.maximum(acc, 0.0).astype(o_ref.dtype)
        o_ref[:, cout:] = jnp.maximum(-acc, 0.0).astype(o_ref.dtype)


def _l2norm_kernel(x_ref, o_ref):
    # Row-wise L2 normalization (F.normalize p=2, dim=1, eps=1e-12); rsqrt -> EUP.
    x = x_ref[...].astype(jnp.float32)
    ss = jnp.sum(x * x, axis=-1, keepdims=True)
    o_ref[...] = x * lax.rsqrt(jnp.maximum(ss, 1e-24))


# ----------------------------------------------------------------------------
# Pallas wrappers
# ----------------------------------------------------------------------------
def conv_crelu(patches, w_flat, b_row, *, fold, cout, tm_max=256):
    """Tiled (patches @ W + b) -> CReLU.  patches: (R, K) bf16 -> (R, 2*cout) bf16."""
    R, Kp = patches.shape
    ncols = w_flat.shape[1]
    nout = 2 * cout
    tm = min(tm_max, _round_up(R, 16))
    r_pad = _round_up(R, tm)
    if r_pad != R:
        patches = jnp.pad(patches, ((0, r_pad - R), (0, 0)))
    kernel = functools.partial(_conv_crelu_kernel, fold=fold, cout=cout)
    y = pl.pallas_call(
        kernel,
        out_shape=jax.ShapeDtypeStruct((r_pad, nout), jnp.bfloat16),
        grid=(r_pad // tm,),
        in_specs=[
            pl.BlockSpec((tm, Kp), lambda i: (i, 0)),      # streamed row tiles
            pl.BlockSpec((Kp, ncols), lambda i: (0, 0)),   # weights VMEM-resident
            pl.BlockSpec((1, ncols), lambda i: (0, 0)),    # bias VMEM-resident
        ],
        out_specs=pl.BlockSpec((tm, nout), lambda i: (i, 0)),
        compiler_params=pltpu.CompilerParams(
            dimension_semantics=("parallel",),
            vmem_limit_bytes=_VMEM_LIMIT),
    )(patches, w_flat, b_row)
    return y[:R] if r_pad != R else y


def l2_normalize(x):
    """Row-wise L2 normalize.  Whole array fits VMEM trivially at these sizes."""
    return pl.pallas_call(
        _l2norm_kernel,
        out_shape=jax.ShapeDtypeStruct(x.shape, jnp.float32),
        in_specs=[pl.BlockSpec(memory_space=pltpu.MemorySpace.VMEM)],
        out_specs=pl.BlockSpec(memory_space=pltpu.MemorySpace.VMEM),
    )(x)


# ----------------------------------------------------------------------------
# Glue (im2col, parameter prep, forward driver)
# ----------------------------------------------------------------------------
def im2col(x_nhwc, k, stride):
    """k x k patch extraction with pad=(k-1)//2 (odd kernels), NHWC layout."""
    N, H, W, C = x_nhwc.shape
    pad = (k - 1) // 2
    xp = jnp.pad(x_nhwc, ((0, 0), (pad, pad), (pad, pad), (0, 0)))
    Ho = (H + 2 * pad - k) // stride + 1
    Wo = (W + 2 * pad - k) // stride + 1
    cols = []
    for kh in range(k):
        for kw in range(k):
            cols.append(
                xp[:, kh:kh + Ho * stride:stride, kw:kw + Wo * stride:stride, :])
    patches = jnp.concatenate(cols, axis=-1)           # (N, Ho, Wo, k*k*C)
    return patches.reshape(N * Ho * Wo, k * k * C), (N, Ho, Wo)


def init_params(key, in_channel=3, kernel_size=5):
    """PyTorch-default-style uniform init, deterministic."""
    c1 = 64
    shapes = [
        (c1, in_channel, kernel_size, kernel_size),        # conv1
        (2 * c1, 2 * c1, kernel_size, kernel_size),        # conv2
        (4 * c1, 4 * c1, kernel_size, kernel_size),        # conv3
    ]
    params = []
    for shp in shapes:
        key, kw_, kb_ = jax.random.split(key, 3)
        fan_in = shp[1] * shp[2] * shp[3]
        bound = 1.0 / jnp.sqrt(fan_in)
        w = jax.random.uniform(kw_, shp, jnp.float32, -bound, bound)
        b = jax.random.uniform(kb_, (shp[0],), jnp.float32, -bound, bound)
        params.append((w, b))
    return params


def prepare_params(params):
    """One-time weight prep: flatten, CReLU fold (conv1), K pad, bf16 cast."""
    prepped = []
    for w, b in params:
        cout, cin, kh, kw = w.shape
        k_dim = kh * kw * cin
        # torch (Cout, Cin, KH, KW) -> (KH, KW, Cin, Cout) -> (K, Cout)
        w_flat = jnp.transpose(w, (2, 3, 1, 0)).reshape(k_dim, cout)
        fold = cout < 128                      # lane-dense store only needed < 128
        if fold:
            w_flat = jnp.concatenate([w_flat, -w_flat], axis=1)
            b_row = jnp.concatenate([b, -b]).reshape(1, 2 * cout)
        else:
            b_row = b.reshape(1, cout)
        k_pad = _round_up(k_dim, 128)
        if k_pad != k_dim:
            w_flat = jnp.pad(w_flat, ((0, k_pad - k_dim), (0, 0)))
        prepped.append(dict(
            w=w_flat.astype(jnp.bfloat16),
            b=b_row.astype(jnp.float32),
            k=kh, cout=cout, fold=fold, k_dim=k_dim, k_pad=k_pad))
    return prepped


def discriminator_forward(x_nchw, params):
    """params = prepare_params(...).  Returns (N, C*H*W) f32 in torch Flatten order."""
    x = jnp.transpose(x_nchw, (0, 2, 3, 1)).astype(jnp.bfloat16)   # NHWC bf16
    strides = (1, 2, 2)
    # TODO(synk): im2col patches are still materialized in HBM (though in bf16
    # and streamed/pipelined through the kernel); fusing the k*k tap loop /
    # halo DMA into the matmul kernel and fusing the three tiny layers into one
    # pallas_call is the remaining HBM-traffic / launch-overhead optimization.
    for p, stride in zip(params, strides):
        patches, (N, Ho, Wo) = im2col(x, p["k"], stride)
        if p["k_pad"] != p["k_dim"]:
            patches = jnp.pad(patches, ((0, 0), (0, p["k_pad"] - p["k_dim"])))
        y = conv_crelu(patches, p["w"], p["b"], fold=p["fold"], cout=p["cout"])
        x = y.reshape(N, Ho, Wo, 2 * p["cout"])
    N, H, W, C = x.shape
    normed = l2_normalize(x.reshape(N, H * W * C))     # reduce on NHWC-contiguous rows
    # nn.Flatten() on NCHW is channel-major -> pure layout reorder afterwards.
    return normed.reshape(N, H, W, C).transpose(0, 3, 1, 2).reshape(N, C * H * W)


# ----------------------------------------------------------------------------
# Pure-JAX references (for correctness check)
# ----------------------------------------------------------------------------
def reference_forward(x_nchw, params, bf16):
    x = x_nchw
    strides = (1, 2, 2)
    for (w, b), stride in zip(params, strides):
        pad = (w.shape[2] - 1) // 2
        if bf16:
            y = lax.conv_general_dilated(
                x.astype(jnp.bfloat16), w.astype(jnp.bfloat16),
                (stride, stride), [(pad, pad), (pad, pad)],
                dimension_numbers=("NCHW", "OIHW", "NCHW"),
                preferred_element_type=jnp.float32)
        else:
            y = lax.conv_general_dilated(
                x, w, (stride, stride), [(pad, pad), (pad, pad)],
                dimension_numbers=("NCHW", "OIHW", "NCHW"),
                precision=lax.Precision.HIGHEST)
        y = y + b[None, :, None, None]
        x = jnp.concatenate([jnp.maximum(y, 0.0), jnp.maximum(-y, 0.0)], axis=1)
        if bf16:
            x = x.astype(jnp.bfloat16)
    flat = x.astype(jnp.float32).reshape(x.shape[0], -1)
    nrm = jnp.maximum(jnp.sqrt(jnp.sum(flat * flat, axis=1, keepdims=True)), 1e-12)
    return flat / nrm


if __name__ == "__main__":
    key = jax.random.PRNGKey(0)
    k_x, k_p = jax.random.split(key)

    batch, in_channel, spatial = 2, 3, 16
    x = jax.random.normal(k_x, (batch, in_channel, spatial, spatial), jnp.float32)
    params = init_params(k_p, in_channel=in_channel, kernel_size=5)
    prepped = prepare_params(params)

    fwd = jax.jit(lambda inp: discriminator_forward(inp, prepped))
    out = jax.block_until_ready(fwd(x))

    ref_bf16 = jax.block_until_ready(reference_forward(x, params, bf16=True))
    ref_f32 = jax.block_until_ready(reference_forward(x, params, bf16=False))

    assert out.shape == (batch, 512 * (spatial // 4) * (spatial // 4)), out.shape
    err_b = float(jnp.max(jnp.abs(out - ref_bf16)))
    err_f = float(jnp.max(jnp.abs(out - ref_f32)))
    assert err_b < 1e-3, f"mismatch vs bf16-matched reference: {err_b}"
    assert err_f < 2e-2, f"mismatch vs f32 reference: {err_f}"

    print("KERNEL_OK")
</pallas_src>

<mosaic_0001>
module attributes {stable_mosaic.version = 11 : i64} {
  func.func @_conv_crelu_kernel(%arg0: i32, %arg1: memref<256x128xbf16, #tpu.memory_space<vmem>>, %arg2: memref<128x128xbf16, #tpu.memory_space<vmem>>, %arg3: memref<1x128xf32, #tpu.memory_space<vmem>>, %arg4: memref<256x128xbf16, #tpu.memory_space<vmem>>) attributes {dimension_semantics = [#tpu.dimension_semantics<parallel>], iteration_bounds = array<i64: 2>, scalar_prefetch = 0 : i64, scratch_operands = 0 : i64, tpu.core_type = #tpu.core_type<tc>, window_params = [{transform_indices = @transform_0, window_bounds = array<i64: 256, 128>}, {pipeline_mode = #tpu.pipeline_mode<synchronous>, transform_indices = @transform_1, window_bounds = array<i64: 128, 128>}, {pipeline_mode = #tpu.pipeline_mode<synchronous>, transform_indices = @transform_2, window_bounds = array<i64: 1, 128>}, {transform_indices = @transform_3, window_bounds = array<i64: 256, 128>}]} {
    %c0 = arith.constant 0 : index
    %c0_0 = arith.constant 0 : index
    %0 = vector.load %arg1[%c0, %c0_0] : memref<256x128xbf16, #tpu.memory_space<vmem>>, vector<256x128xbf16>
    %c0_1 = arith.constant 0 : index
    %c0_2 = arith.constant 0 : index
    %1 = vector.load %arg2[%c0_1, %c0_2] : memref<128x128xbf16, #tpu.memory_space<vmem>>, vector<128x128xbf16>
    %cst = arith.constant dense<0.000000e+00> : vector<256x128xf32>
    %2 = tpu.matmul %0, %1, %cst {dimension_numbers = #tpu.dot_dimension_numbers<[1], [0], [0], [1], [0, 0, 1, 1], [], []>} : vector<256x128xbf16>, vector<128x128xbf16>, vector<256x128xf32> -> vector<256x128xf32>
    %c0_3 = arith.constant 0 : index
    %c0_4 = arith.constant 0 : index
    %3 = vector.load %arg3[%c0_3, %c0_4] : memref<1x128xf32, #tpu.memory_space<vmem>>, vector<1x128xf32>
    %4 = vector.broadcast %3 : vector<1x128xf32> to vector<256x128xf32>
    %5 = arith.addf %2, %4 : vector<256x128xf32>
    %cst_5 = arith.constant 0.000000e+00 : f32
    %6 = vector.broadcast %cst_5 : f32 to vector<256x128xf32>
    %7 = arith.maximumf %5, %6 : vector<256x128xf32>
    %8 = arith.truncf %7 : vector<256x128xf32> to vector<256x128xbf16>
    %c0_6 = arith.constant 0 : index
    %c0_7 = arith.constant 0 : index
    %9 = vector.load %arg4[%c0_6, %c0_7] : memref<256x128xbf16, #tpu.memory_space<vmem>>, vector<256x128xbf16>
    tpu.vector_store %arg4[%c0_6, %c0_7], %8 {strides = array<i32>} : memref<256x128xbf16, #tpu.memory_space<vmem>>, vector<256x128xbf16>,
    return
  }
  func.func @transform_0(%arg0: i32) -> (i32, i32) {
    %c0_i32 = arith.constant 0 : i32
    %c0_i32_0 = arith.constant 0 : i32
    return %arg0, %c0_i32 : i32, i32
  }
  func.func @transform_1(%arg0: i32) -> (i32, i32) {
    %c0_i32 = arith.constant 0 : i32
    %c0_i32_0 = arith.constant 0 : i32
    %c0_i32_1 = arith.constant 0 : i32
    return %c0_i32, %c0_i32_0 : i32, i32
  }
  func.func @transform_2(%arg0: i32) -> (i32, i32) {
    %c0_i32 = arith.constant 0 : i32
    %c0_i32_0 = arith.constant 0 : i32
    %c0_i32_1 = arith.constant 0 : i32
    return %c0_i32, %c0_i32_0 : i32, i32
  }
  func.func @transform_3(%arg0: i32) -> (i32, i32) {
    %c0_i32 = arith.constant 0 : i32
    %c0_i32_0 = arith.constant 0 : i32
    return %arg0, %c0_i32 : i32, i32
  }
}

module attributes {stable_mosaic.version = 11 : i64} {
  func.func @_conv_crelu_kernel(%arg0: i32, %arg1: memref<128x3200xbf16, #tpu.memory_space<vmem>>, %arg2: memref<3200x128xbf16, #tpu.memory_space<vmem>>, %arg3: memref<1x128xf32, #tpu.memory_space<vmem>>, %arg4: memref<128x256xbf16, #tpu.memory_space<vmem>>) attributes {dimension_semantics = [#tpu.dimension_semantics<parallel>], iteration_bounds = array<i64: 1>, scalar_prefetch = 0 : i64, scratch_operands = 0 : i64, tpu.core_type = #tpu.core_type<tc>, window_params = [{transform_indices = @transform_0, window_bounds = array<i64: 128, 3200>}, {pipeline_mode = #tpu.pipeline_mode<synchronous>, transform_indices = @transform_1, window_bounds = array<i64: 3200, 128>}, {pipeline_mode = #tpu.pipeline_mode<synchronous>, transform_indices = @transform_2, window_bounds = array<i64: 1, 128>}, {transform_indices = @transform_3, window_bounds = array<i64: 128, 256>}]} {
    %c0 = arith.constant 0 : index
    %c0_0 = arith.constant 0 : index
    %0 = vector.load %arg1[%c0, %c0_0] : memref<128x3200xbf16, #tpu.memory_space<vmem>>, vector<128x3200xbf16>
    %c0_1 = arith.constant 0 : index
    %c0_2 = arith.constant 0 : index
    %1 = vector.load %arg2[%c0_1, %c0_2] : memref<3200x128xbf16, #tpu.memory_space<vmem>>, vector<3200x128xbf16>
    %cst = arith.constant dense<0.000000e+00> : vector<128x128xf32>
    %2 = tpu.matmul %0, %1, %cst {dimension_numbers = #tpu.dot_dimension_numbers<[1], [0], [0], [1], [0, 0, 1, 1], [], []>} : vector<128x3200xbf16>, vector<3200x128xbf16>, vector<128x128xf32> -> vector<128x128xf32>
    %c0_3 = arith.constant 0 : index
    %c0_4 = arith.constant 0 : index
    %3 = vector.load %arg3[%c0_3, %c0_4] : memref<1x128xf32, #tpu.memory_space<vmem>>, vector<1x128xf32>
    %4 = vector.broadcast %3 : vector<1x128xf32> to vector<128x128xf32>
    %5 = arith.addf %2, %4 : vector<128x128xf32>
    %cst_5 = arith.constant 0.000000e+00 : f32
    %6 = vector.broadcast %cst_5 : f32 to vector<128x128xf32>
    %7 = arith.maximumf %5, %6 : vector<128x128xf32>
    %8 = arith.truncf %7 : vector<128x128xf32> to vector<128x128xbf16>
    %c0_6 = arith.constant 0 : index
    %c0_7 = arith.constant 0 : index
    %9 = vector.load %arg4[%c0_6, %c0_7] : memref<128x256xbf16, #tpu.memory_space<vmem>>, vector<128x128xbf16>
    tpu.vector_store %arg4[%c0_6, %c0_7], %8 {strides = array<i32>} : memref<128x256xbf16, #tpu.memory_space<vmem>>, vector<128x128xbf16>,
    %cst_8 = arith.constant 0.000000e+00 : f32
    %10 = vector.broadcast %cst_8 : f32 to vector<128x128xf32>
    %11 = arith.subf %10, %5 : vector<128x128xf32>
    %cst_9 = arith.constant 0.000000e+00 : f32
    %12 = vector.broadcast %cst_9 : f32 to vector<128x128xf32>
    %13 = arith.maximumf %11, %12 : vector<128x128xf32>
    %14 = arith.truncf %13 : vector<128x128xf32> to vector<128x128xbf16>
    %c0_10 = arith.constant 0 : index
    %c128 = arith.constant 128 : index
    %15 = vector.load %arg4[%c0_10, %c128] : memref<128x256xbf16, #tpu.memory_space<vmem>>, vector<128x128xbf16>
    tpu.vector_store %arg4[%c0_10, %c128], %14 {strides = array<i32>} : memref<128x256xbf16, #tpu.memory_space<vmem>>, vector<128x128xbf16>,
    return
  }
  func.func @transform_0(%arg0: i32) -> (i32, i32) {
    %c0_i32 = arith.constant 0 : i32
    %c0_i32_0 = arith.constant 0 : i32
    return %arg0, %c0_i32 : i32, i32
  }
  func.func @transform_1(%arg0: i32) -> (i32, i32) {
    %c0_i32 = arith.constant 0 : i32
    %c0_i32_0 = arith.constant 0 : i32
    %c0_i32_1 = arith.constant 0 : i32
    return %c0_i32, %c0_i32_0 : i32, i32
  }
  func.func @transform_2(%arg0: i32) -> (i32, i32) {
    %c0_i32 = arith.constant 0 : i32
    %c0_i32_0 = arith.constant 0 : i32
    %c0_i32_1 = arith.constant 0 : i32
    return %c0_i32, %c0_i32_0 : i32, i32
  }
  func.func @transform_3(%arg0: i32) -> (i32, i32) {
    %c0_i32 = arith.constant 0 : i32
    %c0_i32_0 = arith.constant 0 : i32
    return %arg0, %c0_i32 : i32, i32
  }
}

module attributes {stable_mosaic.version = 11 : i64} {
  func.func @_conv_crelu_kernel(%arg0: i32, %arg1: memref<32x6400xbf16, #tpu.memory_space<vmem>>, %arg2: memref<6400x256xbf16, #tpu.memory_space<vmem>>, %arg3: memref<1x256xf32, #tpu.memory_space<vmem>>, %arg4: memref<32x512xbf16, #tpu.memory_space<vmem>>) attributes {dimension_semantics = [#tpu.dimension_semantics<parallel>], iteration_bounds = array<i64: 1>, scalar_prefetch = 0 : i64, scratch_operands = 0 : i64, tpu.core_type = #tpu.core_type<tc>, window_params = [{transform_indices = @transform_0, window_bounds = array<i64: 32, 6400>}, {pipeline_mode = #tpu.pipeline_mode<synchronous>, transform_indices = @transform_1, window_bounds = array<i64: 6400, 256>}, {pipeline_mode = #tpu.pipeline_mode<synchronous>, transform_indices = @transform_2, window_bounds = array<i64: 1, 256>}, {transform_indices = @transform_3, window_bounds = array<i64: 32, 512>}]} {
    %c0 = arith.constant 0 : index
    %c0_0 = arith.constant 0 : index
    %0 = vector.load %arg1[%c0, %c0_0] : memref<32x6400xbf16, #tpu.memory_space<vmem>>, vector<32x6400xbf16>
    %c0_1 = arith.constant 0 : index
    %c0_2 = arith.constant 0 : index
    %1 = vector.load %arg2[%c0_1, %c0_2] : memref<6400x256xbf16, #tpu.memory_space<vmem>>, vector<6400x256xbf16>
    %cst = arith.constant dense<0.000000e+00> : vector<32x256xf32>
    %2 = tpu.matmul %0, %1, %cst {dimension_numbers = #tpu.dot_dimension_numbers<[1], [0], [0], [1], [0, 0, 1, 1], [], []>} : vector<32x6400xbf16>, vector<6400x256xbf16>, vector<32x256xf32> -> vector<32x256xf32>
    %c0_3 = arith.constant 0 : index
    %c0_4 = arith.constant 0 : index
    %3 = vector.load %arg3[%c0_3, %c0_4] : memref<1x256xf32, #tpu.memory_space<vmem>>, vector<1x256xf32>
    %4 = vector.broadcast %3 : vector<1x256xf32> to vector<32x256xf32>
    %5 = arith.addf %2, %4 : vector<32x256xf32>
    %cst_5 = arith.constant 0.000000e+00 : f32
    %6 = vector.broadcast %cst_5 : f32 to vector<32x256xf32>
    %7 = arith.maximumf %5, %6 : vector<32x256xf32>
    %8 = arith.truncf %7 : vector<32x256xf32> to vector<32x256xbf16>
    %c0_6 = arith.constant 0 : index
    %c0_7 = arith.constant 0 : index
    %9 = vector.load %arg4[%c0_6, %c0_7] : memref<32x512xbf16, #tpu.memory_space<vmem>>, vector<32x256xbf16>
    tpu.vector_store %arg4[%c0_6, %c0_7], %8 {strides = array<i32>} : memref<32x512xbf16, #tpu.memory_space<vmem>>, vector<32x256xbf16>,
    %cst_8 = arith.constant 0.000000e+00 : f32
    %10 = vector.broadcast %cst_8 : f32 to vector<32x256xf32>
    %11 = arith.subf %10, %5 : vector<32x256xf32>
    %cst_9 = arith.constant 0.000000e+00 : f32
    %12 = vector.broadcast %cst_9 : f32 to vector<32x256xf32>
    %13 = arith.maximumf %11, %12 : vector<32x256xf32>
    %14 = arith.truncf %13 : vector<32x256xf32> to vector<32x256xbf16>
    %c0_10 = arith.constant 0 : index
    %c256 = arith.constant 256 : index
    %15 = vector.load %arg4[%c0_10, %c256] : memref<32x512xbf16, #tpu.memory_space<vmem>>, vector<32x256xbf16>
    tpu.vector_store %arg4[%c0_10, %c256], %14 {strides = array<i32>} : memref<32x512xbf16, #tpu.memory_space<vmem>>, vector<32x256xbf16>,
    return
  }
  func.func @transform_0(%arg0: i32) -> (i32, i32) {
    %c0_i32 = arith.constant 0 : i32
    %c0_i32_0 = arith.constant 0 : i32
    return %arg0, %c0_i32 : i32, i32
  }
  func.func @transform_1(%arg0: i32) -> (i32, i32) {
    %c0_i32 = arith.constant 0 : i32
    %c0_i32_0 = arith.constant 0 : i32
    %c0_i32_1 = arith.constant 0 : i32
    return %c0_i32, %c0_i32_0 : i32, i32
  }
  func.func @transform_2(%arg0: i32) -> (i32, i32) {
    %c0_i32 = arith.constant 0 : i32
    %c0_i32_0 = arith.constant 0 : i32
    %c0_i32_1 = arith.constant 0 : i32
    return %c0_i32, %c0_i32_0 : i32, i32
  }
  func.func @transform_3(%arg0: i32) -> (i32, i32) {
    %c0_i32 = arith.constant 0 : i32
    %c0_i32_0 = arith.constant 0 : i32
    return %arg0, %c0_i32 : i32, i32
  }
}

module attributes {stable_mosaic.version = 11 : i64} {
  func.func @_l2norm_kernel(%arg0: memref<2x8192xbf16, #tpu.memory_space<vmem>>, %arg1: memref<2x8192xf32, #tpu.memory_space<vmem>>) attributes {dimension_semantics = [], scalar_prefetch = 0 : i64, scratch_operands = 0 : i64, tpu.core_type = #tpu.core_type<tc>} {
    %c0 = arith.constant 0 : index
    %c0_0 = arith.constant 0 : index
    %0 = vector.load %arg0[%c0, %c0_0] : memref<2x8192xbf16, #tpu.memory_space<vmem>>, vector<2x8192xbf16>
    %1 = arith.extf %0 : vector<2x8192xbf16> to vector<2x8192xf32>
    %2 = arith.mulf %1, %1 : vector<2x8192xf32>
    %cst = arith.constant dense<0.000000e+00> : vector<2xf32>
    %3 = vector.multi_reduction <add>, %2, %cst [1] : vector<2x8192xf32> to vector<2xf32>
    %4 = vector.shape_cast %3 : vector<2xf32> to vector<2x1xf32>
    %cst_1 = arith.constant 1.000000e-24 : f32
    %5 = vector.broadcast %cst_1 : f32 to vector<2x1xf32>
    %6 = arith.maximumf %4, %5 : vector<2x1xf32>
    %7 = math.rsqrt %6 : vector<2x1xf32>
    %8 = vector.broadcast %7 : vector<2x1xf32> to vector<2x8192xf32>
    %9 = arith.mulf %1, %8 : vector<2x8192xf32>
    %c0_2 = arith.constant 0 : index
    %c0_3 = arith.constant 0 : index
    %10 = vector.load %arg1[%c0_2, %c0_3] : memref<2x8192xf32, #tpu.memory_space<vmem>>, vector<2x8192xf32>
    tpu.vector_store %arg1[%c0_2, %c0_3], %9 {strides = array<i32>} : memref<2x8192xf32, #tpu.memory_space<vmem>>, vector<2x8192xf32>,
    return
  }
}

</mosaic_0001>

<bundles_post_ra>
// kernel: _lambda_.4
= control target key start
LH: loop header
LB: loop body
LE: loop exit
PB: predicated region body
PF: predicated region fallthrough
CT: control target
= control target key end

     0   :  { %s1126_s12 = smov 0   ;;  %s1247_s0 = inlined_call_operand.vmem [shape: bf16[512,128], index: 0, kind: input, shape index: {}]   ;;  %s1248_s1 = inlined_call_operand.vmem [shape: bf16[128,128], index: 1, kind: input, shape index: {}]   ;;  %s1249_s2 = inlined_call_operand.vmem [shape: f32[1,128], index: 2, kind: input, shape index: {}]   ;;  %s1250_s3 = inlined_call_operand.vmem [shape: bf16[512,128], index: 3, kind: output, shape index: {}]  }
   0x1 LB: > { %s783_s13 = sadd.s32 4294967295, %s1104_s12   ;;  %p787_p0 = scmp.ge.s32.totalorder %s1104_s12, 1  ;;  %s1104_s12 = sphi %s1126_s12, %s13_s12  }
   0x2   : > { %p138_p1 = scmp.lt.s32.totalorder %s1104_s12, 3 }
   0x4   : > { %p139_p2 = pnand %p787_p0, %p138_p1 }
   0x5   : > { %v1074_v0 = vld [vmem:[%s1248_s1] sm:$0xff] (!%p139_p2)   ;;  %s788_s16 = sshll.u32 (!%p139_p2), %s783_s13, 5  ;;  %v1075_v1 = vld [vmem:[%s1248_s1 + $0x8] sm:$0xff] (!%p139_p2)   ;;  %v1076_v2 = vld [vmem:[%s1248_s1 + $0x10] sm:$0xff] (!%p139_p2)  }
   0x6   : > { %142 = sbr.rel (%p139_p2) target bundleno = 284 (0x11c), region = 32  ;;  %p163_p3 = scmp.lt.s32.totalorder (!%p139_p2), %s788_s16, 63  ;;  %1002 = vmatprep.subr.bf16.mxu0 (!%p139_p2), %v1074_v0  ;;  %1050 = vmatprep.subr.bf16.mxu1 (!%p139_p2), %v1074_v0  ;;  %v1077_v3 = vld [vmem:[%s1248_s1 + $0x18] sm:$0xff] (!%p139_p2)   ;;  %v1078_v6 = vld [vmem:[%s1248_s1 + $0x20] sm:$0xff] (!%p139_p2)   ;;  %v1079_v7 = vld [vmem:[%s1248_s1 + $0x28] sm:$0xff] (!%p139_p2)  }
   0x7   : > { %1003 = vmatpush3.bf16.msra.mxu0 (!%p139_p2), %v1074_v0  ;;  %1058 = vmatpush3.bf16.msra.mxu1 (!%p139_p2), %v1074_v0  ;;  %v1080_v8 = vld [vmem:[%s1248_s1 + $0x30] sm:$0xff] (!%p139_p2)   ;;  %v1081_v9 = vld [vmem:[%s1248_s1 + $0x38] sm:$0xff] (!%p139_p2)   ;;  %v1187_v24 = vld [vmem:[%s1249_s2] ss:$0 sm:$0xff] (!%p139_p2) }
   0x8   : > { %1004 = vmatprep.subr.bf16.mxu0 (!%p139_p2), %v1075_v1  ;;  %1051 = vmatprep.subr.bf16.mxu1 (!%p139_p2), %v1075_v1 }
   0xb   : > { %1005 = vmatpush3.bf16.msra.mxu0 (!%p139_p2), %v1075_v1  ;;  %1059 = vmatpush3.bf16.msra.mxu1 (!%p139_p2), %v1075_v1 }
   0xc   : > { %1006 = vmatprep.subr.bf16.mxu0 (!%p139_p2), %v1076_v2  ;;  %1052 = vmatprep.subr.bf16.mxu1 (!%p139_p2), %v1076_v2 }
   0xd   : > { %s1252_s16 = smov (!%p163_p3, %s788_s16), 63 }
   0xe   : > { %s789_s21 = sshll.u32 %s1252_s16, 2 }
   0xf   : > { %s1151_s24 = scalar_lea.vmem %s1247_s0, %s789_s21  ;;  %1007 = vmatpush3.bf16.msra.mxu0 %v1076_v2  ;;  %1060 = vmatpush3.bf16.msra.mxu1 %v1076_v2  ;;  %s1202_s13 = scalar_lea.vmem %s1250_s3, %s789_s21 }
  0x10   : > { %v1082_v4 = vld [vmem:[%s1151_s24] sm:$0xff]   ;;  %1008 = vmatprep.subr.bf16.mxu0 %v1077_v3  ;;  %1053 = vmatprep.subr.bf16.mxu1 %v1077_v3  ;;  %v1084_v10 = vld [vmem:[%s1151_s24 + $0x8] sm:$0xff]   ;;  %v1086_v12 = vld [vmem:[%s1151_s24 + $0x10] sm:$0xff]  }
  0x11   : > { %v1083_v5 = vld [vmem:[%s1151_s24 + $0x40] sm:$0xff]   ;;  %1018 = vmatprep.mubr.bf16.mxu0 %v1082_v4  ;;  %v1085_v11 = vld [vmem:[%s1151_s24 + $0x48] sm:$0xff]   ;;  %v1087_v13 = vld [vmem:[%s1151_s24 + $0x50] sm:$0xff]  }
  0x12   : > { %1034 = vmatprep.mubr.bf16.mxu1 %v1083_v5  ;;  %v1088_v14 = vld [vmem:[%s1151_s24 + $0x18] sm:$0xff]   ;;  %v1090_v16 = vld [vmem:[%s1151_s24 + $0x20] sm:$0xff]   ;;  %v1092_v18 = vld [vmem:[%s1151_s24 + $0x28] sm:$0xff]  }
  0x13   : > { %1009 = vmatpush3.bf16.msra.mxu0 %v1077_v3  ;;  %1061 = vmatpush3.bf16.msra.mxu1 %v1077_v3  ;;  %v1089_v15 = vld [vmem:[%s1151_s24 + $0x58] sm:$0xff]   ;;  %v1091_v17 = vld [vmem:[%s1151_s24 + $0x60] sm:$0xff]   ;;  %v1093_v19 = vld [vmem:[%s1151_s24 + $0x68] sm:$0xff]  }
  0x14   : > { %1010 = vmatprep.subr.bf16.mxu0 %v1078_v6  ;;  %1054 = vmatprep.subr.bf16.mxu1 %v1078_v6  ;;  %v1094_v20 = vld [vmem:[%s1151_s24 + $0x30] sm:$0xff]   ;;  %v1096_v22 = vld [vmem:[%s1151_s24 + $0x38] sm:$0xff]  }
  0x15   : > { %v1095_v21 = vld [vmem:[%s1151_s24 + $0x70] sm:$0xff]   ;;  %v1097_v23 = vld [vmem:[%s1151_s24 + $0x78] sm:$0xff]  }
  0x17   : > { %1011 = vmatpush3.bf16.msra.mxu0 %v1078_v6  ;;  %1062 = vmatpush3.bf16.msra.mxu1 %v1078_v6 }
  0x18   : > { %1012 = vmatprep.subr.bf16.mxu0 %v1079_v7  ;;  %1055 = vmatprep.subr.bf16.mxu1 %v1079_v7 }
  0x1b   : > { %1013 = vmatpush3.bf16.msra.mxu0 %v1079_v7  ;;  %1063 = vmatpush3.bf16.msra.mxu1 %v1079_v7 }
  0x1c   : > { %1014 = vmatprep.subr.bf16.mxu0 %v1080_v8  ;;  %1056 = vmatprep.subr.bf16.mxu1 %v1080_v8 }
  0x1f   : > { %1015 = vmatpush3.bf16.msra.mxu0 %v1080_v8  ;;  %1064 = vmatpush3.bf16.msra.mxu1 %v1080_v8 }
  0x20   : > { %1016 = vmatprep.subr.bf16.mxu0 %v1081_v9  ;;  %1057 = vmatprep.subr.bf16.mxu1 %v1081_v9 }
  0x23   : > { %1017 = vmatpush3.bf16.msra.mxu0 %v1081_v9  ;;  %1065 = vmatpush3.bf16.msra.mxu1 %v1081_v9 }
  0x26   : > { %1019 = vmatmul.mubr.bf16.vlgmr.msra.gmra.mrb[0].mxu0 %v1084_v10  ;;  %1035 = vmatmul.mubr.bf16.vlgmr.msra.gmra.mrb[0].mxu1 %v1085_v11 }
  0x27   : > { %1022 = vmatprep.mubr.bf16.mxu0 %v1086_v12  ;;  %1038 = vmatprep.mubr.bf16.mxu1 %v1087_v13 }
  0x2e   : > { %1023 = vmatmul.mubr.bf16.gmra.mrb[4].mxu0 %v1088_v14  ;;  %1039 = vmatmul.mubr.bf16.gmra.mrb[4].mxu1 %v1089_v15 }
  0x2f   : > { %1026 = vmatprep.mubr.bf16.mxu0 %v1090_v16  ;;  %1042 = vmatprep.mubr.bf16.mxu1 %v1091_v17 }
  0x36   : > { %1027 = vmatmul.mubr.bf16.gmra.mrb[8].mxu0 %v1092_v18  ;;  %1043 = vmatmul.mubr.bf16.gmra.mrb[8].mxu1 %v1093_v19 }
  0x37   : > { %1030 = vmatprep.mubr.bf16.mxu0 %v1094_v20  ;;  %1046 = vmatprep.mubr.bf16.mxu1 %v1095_v21 }
  0x3e   : > { %1031 = vmatmul.mubr.bf16.gmra.mrb[12].mxu0 %v1096_v22  ;;  %1047 = vmatmul.mubr.bf16.gmra.mrb[12].mxu1 %v1097_v23 }
  0xf9   : > { %v1020_v25 = vpop.f32.mrb[0].mxu0  ;;  %v1036_v26 = vpop.f32.mrb[0].mxu1 }
  0xfa   : > { %v417_v27 = vadd.f32 %v1020_v25, %v1187_v24  ;;  %v481_v28 = vadd.f32 %v1036_v26, %v1187_v24  ;;  %v408_v29 = vpop.f32.mrb[1].mxu0  ;;  %v472_v30 = vpop.f32.mrb[1].mxu1 }
  0xfb   : > { %v409_v31 = vadd.f32 %v1187_v24, %v408_v29  ;;  %v473_v32 = vadd.f32 %v1187_v24, %v472_v30  ;;  %v1021_v33 = vpop.f32.mrb[2].mxu0  ;;  %v1037_v34 = vpop.f32.mrb[2].mxu1 }
  0xfc   : > { %v420_v35 = vadd.f32 %v1021_v33, %v1187_v24  ;;  %v484_v36 = vadd.f32 %v1037_v34, %v1187_v24  ;;  %v411_v37 = vpop.f32.mrb[3].mxu0  ;;  %v475_v38 = vpop.f32.mrb[3].mxu1  ;;  %v537_v41 = vmax.f32 %v417_v27, 0.0  ;;  %v553_v42 = vmax.f32 %v481_v28, 0.0 }
  0xfd   : > { %v412_v39 = vadd.f32 %v1187_v24, %v411_v37  ;;  %v476_v40 = vadd.f32 %v1187_v24, %v475_v38  ;;  %v535_v45 = vmax.f32 %v409_v31, 0.0  ;;  %v551_v46 = vmax.f32 %v473_v32, 0.0 }
  0xfe   : > { %v538_v43 = vmax.f32 %v420_v35, 0.0  ;;  %v554_v44 = vmax.f32 %v484_v36, 0.0 }
  0xff   : > { %v536_v47 = vmax.f32 %v412_v39, 0.0  ;;  %v552_v48 = vmax.f32 %v476_v40, 0.0 }
 0x100   : > { %v891_v49 = vpack.c.bf16 %v538_v43, %v537_v41  ;;  %v931_v50 = vpack.c.bf16 %v554_v44, %v553_v42 }
 0x101   : > { %v886_v51 = vpack.c.bf16 %v536_v47, %v535_v45  ;;  %v926_v52 = vpack.c.bf16 %v552_v48, %v551_v46  ;;  %v1024_v53 = vpop.f32.mrb[4].mxu0  ;;  %v1040_v54 = vpop.f32.mrb[4].mxu1 }
 0x102   : > { %963 = vst [vmem:[%s1202_s13 + $0x8] sm:$0xff] %v891_v49   ;;  %971 = vst [vmem:[%s1202_s13 + $0x48] sm:$0xff] %v931_v50   ;;  %v433_v55 = vadd.f32 %v1024_v53, %v1187_v24  ;;  %v497_v56 = vadd.f32 %v1040_v54, %v1187_v24  ;;  %v424_v57 = vpop.f32.mrb[5].mxu0  ;;  %v488_v58 = vpop.f32.mrb[5].mxu1 }
 0x103   : > { %887 = vst [vmem:[%s1202_s13] sm:$0xff] %v886_v51   ;;  %970 = vst [vmem:[%s1202_s13 + $0x40] sm:$0xff] %v926_v52   ;;  %v425_v59 = vadd.f32 %v1187_v24, %v424_v57  ;;  %v489_v60 = vadd.f32 %v1187_v24, %v488_v58  ;;  %v1025_v61 = vpop.f32.mrb[6].mxu0  ;;  %v1041_v62 = vpop.f32.mrb[6].mxu1 }
 0x104   : > { %v436_v63 = vadd.f32 %v1025_v61, %v1187_v24  ;;  %v500_v0 = vadd.f32 %v1041_v62, %v1187_v24  ;;  %v427_v1 = vpop.f32.mrb[7].mxu0  ;;  %v491_v2 = vpop.f32.mrb[7].mxu1  ;;  %v541_v5 = vmax.f32 %v433_v55, 0.0  ;;  %v557_v6 = vmax.f32 %v497_v56, 0.0 }
 0x105   : > { %v428_v3 = vadd.f32 %v1187_v24, %v427_v1  ;;  %v492_v4 = vadd.f32 %v1187_v24, %v491_v2  ;;  %v539_v9 = vmax.f32 %v425_v59, 0.0  ;;  %v555_v10 = vmax.f32 %v489_v60, 0.0 }
 0x106   : > { %v542_v7 = vmax.f32 %v436_v63, 0.0  ;;  %v558_v8 = vmax.f32 %v500_v0, 0.0 }
 0x107   : > { %v540_v11 = vmax.f32 %v428_v3, 0.0  ;;  %v556_v12 = vmax.f32 %v492_v4, 0.0 }
 0x108   : > { %v901_v13 = vpack.c.bf16 %v542_v7, %v541_v5  ;;  %v941_v14 = vpack.c.bf16 %v558_v8, %v557_v6 }
 0x109   : > { %v896_v15 = vpack.c.bf16 %v540_v11, %v539_v9  ;;  %v936_v16 = vpack.c.bf16 %v556_v12, %v555_v10  ;;  %v1028_v17 = vpop.f32.mrb[8].mxu0  ;;  %v1044_v18 = vpop.f32.mrb[8].mxu1 }
 0x10a   : > { %965 = vst [vmem:[%s1202_s13 + $0x18] sm:$0xff] %v901_v13   ;;  %973 = vst [vmem:[%s1202_s13 + $0x58] sm:$0xff] %v941_v14   ;;  %v449_v19 = vadd.f32 %v1028_v17, %v1187_v24  ;;  %v513_v20 = vadd.f32 %v1044_v18, %v1187_v24  ;;  %v440_v21 = vpop.f32.mrb[9].mxu0  ;;  %v504_v22 = vpop.f32.mrb[9].mxu1 }
 0x10b   : > { %964 = vst [vmem:[%s1202_s13 + $0x10] sm:$0xff] %v896_v15   ;;  %972 = vst [vmem:[%s1202_s13 + $0x50] sm:$0xff] %v936_v16   ;;  %v441_v23 = vadd.f32 %v1187_v24, %v440_v21  ;;  %v505_v25 = vadd.f32 %v1187_v24, %v504_v22  ;;  %v1029_v26 = vpop.f32.mrb[10].mxu0  ;;  %v1045_v27 = vpop.f32.mrb[10].mxu1 }
 0x10c   : > { %v452_v28 = vadd.f32 %v1029_v26, %v1187_v24  ;;  %v516_v29 = vadd.f32 %v1045_v27, %v1187_v24  ;;  %v443_v30 = vpop.f32.mrb[11].mxu0  ;;  %v507_v31 = vpop.f32.mrb[11].mxu1  ;;  %v545_v34 = vmax.f32 %v449_v19, 0.0  ;;  %v561_v35 = vmax.f32 %v513_v20, 0.0 }
 0x10d   : > { %v444_v32 = vadd.f32 %v1187_v24, %v443_v30  ;;  %v508_v33 = vadd.f32 %v1187_v24, %v507_v31  ;;  %v543_v38 = vmax.f32 %v441_v23, 0.0  ;;  %v559_v39 = vmax.f32 %v505_v25, 0.0 }
 0x10e   : > { %v546_v36 = vmax.f32 %v452_v28, 0.0  ;;  %v562_v37 = vmax.f32 %v516_v29, 0.0 }
 0x10f   : > { %v544_v40 = vmax.f32 %v444_v32, 0.0  ;;  %v560_v41 = vmax.f32 %v508_v33, 0.0 }
 0x110   : > { %v911_v42 = vpack.c.bf16 %v546_v36, %v545_v34  ;;  %v951_v43 = vpack.c.bf16 %v562_v37, %v561_v35 }
 0x111   : > { %v906_v44 = vpack.c.bf16 %v544_v40, %v543_v38  ;;  %v946_v45 = vpack.c.bf16 %v560_v41, %v559_v39  ;;  %v1032_v46 = vpop.f32.mrb[12].mxu0  ;;  %v1048_v47 = vpop.f32.mrb[12].mxu1 }
 0x112   : > { %967 = vst [vmem:[%s1202_s13 + $0x28] sm:$0xff] %v911_v42   ;;  %975 = vst [vmem:[%s1202_s13 + $0x68] sm:$0xff] %v951_v43   ;;  %v465_v48 = vadd.f32 %v1032_v46, %v1187_v24  ;;  %v529_v49 = vadd.f32 %v1048_v47, %v1187_v24  ;;  %v456_v50 = vpop.f32.mrb[13].mxu0  ;;  %v520_v51 = vpop.f32.mrb[13].mxu1 }
 0x113   : > { %966 = vst [vmem:[%s1202_s13 + $0x20] sm:$0xff] %v906_v44   ;;  %974 = vst [vmem:[%s1202_s13 + $0x60] sm:$0xff] %v946_v45   ;;  %v457_v52 = vadd.f32 %v1187_v24, %v456_v50  ;;  %v521_v53 = vadd.f32 %v1187_v24, %v520_v51  ;;  %v1033_v54 = vpop.f32.mrb[14].mxu0  ;;  %v1049_v55 = vpop.f32.mrb[14].mxu1 }
 0x114   : > { %v468_v56 = vadd.f32 %v1033_v54, %v1187_v24  ;;  %v532_v57 = vadd.f32 %v1049_v55, %v1187_v24  ;;  %v459_v58 = vpop.f32.mrb[15].mxu0  ;;  %v523_v59 = vpop.f32.mrb[15].mxu1  ;;  %v549_v62 = vmax.f32 %v465_v48, 0.0  ;;  %v565_v63 = vmax.f32 %v529_v49, 0.0 }
 0x115   : > { %v460_v60 = vadd.f32 %v1187_v24, %v459_v58  ;;  %v524_v61 = vadd.f32 %v1187_v24, %v523_v59  ;;  %v547_v2 = vmax.f32 %v457_v52, 0.0  ;;  %v563_v3 = vmax.f32 %v521_v53, 0.0 }
 0x116   : > { %v550_v0 = vmax.f32 %v468_v56, 0.0  ;;  %v566_v1 = vmax.f32 %v532_v57, 0.0 }
 0x117   : > { %v548_v4 = vmax.f32 %v460_v60, 0.0  ;;  %v564_v5 = vmax.f32 %v524_v61, 0.0 }
 0x118   : > { %v921_v6 = vpack.c.bf16 %v550_v0, %v549_v62  ;;  %v961_v7 = vpack.c.bf16 %v566_v1, %v565_v63 }
 0x119   : > { %v916_v8 = vpack.c.bf16 %v548_v4, %v547_v2  ;;  %v956_v9 = vpack.c.bf16 %v564_v5, %v563_v3 }
 0x11a   : > { %969 = vst [vmem:[%s1202_s13 + $0x38] sm:$0xff] %v921_v6   ;;  %977 = vst [vmem:[%s1202_s13 + $0x78] sm:$0xff] %v961_v7  }
 0x11b   : > { %968 = vst [vmem:[%s1202_s13 + $0x30] sm:$0xff] %v916_v8   ;;  %976 = vst [vmem:[%s1202_s13 + $0x70] sm:$0xff] %v956_v9  }
 0x11c PF: > { %s13_s12 = sadd.s32 1, %s1104_s12  }
 0x11d   : > { %p10_p4 = scmp.ge.s32.totalorder %s13_s12, 4  }
 0x11f   :  { %12 = sbr.rel (!%p10_p4) target bundleno = 1 (0x1), region = 62 }

// kernel: _lambda_.5
= control target key start
LH: loop header
LB: loop body
LE: loop exit
PB: predicated region body
PF: predicated region fallthrough
CT: control target
= control target key end

     0   :  { %s7729_s1 = inlined_call_operand.vmem [shape: bf16[3200,128], index: 1, kind: input, shape index: {}]   ;;  %s7730_s0 = inlined_call_operand.vmem [shape: bf16[128,3200], index: 0, kind: input, shape index: {}]   ;;  %s7731_s2 = inlined_call_operand.vmem [shape: f32[1,128], index: 2, kind: input, shape index: {}]   ;;  %s7732_s3 = inlined_call_operand.vmem [shape: bf16[128,256], index: 3, kind: output, shape index: {}]  }
   0x1   :  { %v5608_v0 = vld [vmem:[%s7729_s1 + $0x40] sm:$0xff]   ;;  %v5612_v4 = vld [vmem:[%s7729_s1 + $0x48] sm:$0xff]   ;;  %v5616_v8 = vld [vmem:[%s7729_s1 + $0x50] sm:$0xff]  }
   0x2   :  { %v5609_v1 = vld [vmem:[%s7729_s1 + $0xc0] sm:$0xff]   ;;  %4776 = vmatprep.subr.bf16.mxu0 %v5608_v0  ;;  %v5613_v5 = vld [vmem:[%s7729_s1 + $0xc8] sm:$0xff]   ;;  %v5617_v9 = vld [vmem:[%s7729_s1 + $0xd0] sm:$0xff]  }
   0x3   :  { %v5610_v2 = vld [vmem:[%s7729_s1] sm:$0xff]   ;;  %4840 = vmatprep.subr.bf16.mxu1 %v5609_v1  ;;  %v5614_v6 = vld [vmem:[%s7729_s1 + $0x8] sm:$0xff]   ;;  %v5618_v10 = vld [vmem:[%s7729_s1 + $0x10] sm:$0xff]  }
   0x4   :  { %v5611_v3 = vld [vmem:[%s7729_s1 + $0x80] sm:$0xff]   ;;  %4777 = vmatpush3.bf16.msra.mxu0 %v5610_v2  ;;  %v5615_v7 = vld [vmem:[%s7729_s1 + $0x88] sm:$0xff]   ;;  %v5619_v11 = vld [vmem:[%s7729_s1 + $0x90] sm:$0xff]  }
   0x5   :  { %4841 = vmatpush3.bf16.msra.mxu1 %v5611_v3  ;;  %4778 = vmatprep.subr.bf16.mxu0 %v5612_v4  ;;  %v5620_v12 = vld [vmem:[%s7729_s1 + $0x58] sm:$0xff]   ;;  %v5624_v16 = vld [vmem:[%s7729_s1 + $0x60] sm:$0xff]   ;;  %v5628_v20 = vld [vmem:[%s7729_s1 + $0x68] sm:$0xff]  }
   0x6   :  { %4842 = vmatprep.subr.bf16.mxu1 %v5613_v5  ;;  %v5621_v13 = vld [vmem:[%s7729_s1 + $0xd8] sm:$0xff]   ;;  %v5625_v17 = vld [vmem:[%s7729_s1 + $0xe0] sm:$0xff]   ;;  %v5629_v21 = vld [vmem:[%s7729_s1 + $0xe8] sm:$0xff]  }
   0x7   :  { %v5622_v14 = vld [vmem:[%s7729_s1 + $0x18] sm:$0xff]   ;;  %v5626_v18 = vld [vmem:[%s7729_s1 + $0x20] sm:$0xff]   ;;  %v5630_v22 = vld [vmem:[%s7729_s1 + $0x28] sm:$0xff]  }
   0x8   :  { %4779 = vmatpush3.bf16.msra.mxu0 %v5614_v6  ;;  %v5623_v15 = vld [vmem:[%s7729_s1 + $0x98] sm:$0xff]   ;;  %v5627_v19 = vld [vmem:[%s7729_s1 + $0xa0] sm:$0xff]   ;;  %v5631_v23 = vld [vmem:[%s7729_s1 + $0xa8] sm:$0xff]  }
   0x9   :  { %4843 = vmatpush3.bf16.msra.mxu1 %v5615_v7  ;;  %4780 = vmatprep.subr.bf16.mxu0 %v5616_v8  ;;  %v5632_v24 = vld [vmem:[%s7729_s1 + $0x70] sm:$0xff]   ;;  %v5636_v28 = vld [vmem:[%s7729_s1 + $0x78] sm:$0xff]   ;;  %v5640_v32 = vld [vmem:[%s7730_s0] ss:$100 sps:$4 sm:$0xff]  }
   0xa   :  { %4844 = vmatprep.subr.bf16.mxu1 %v5617_v9  ;;  %v5633_v25 = vld [vmem:[%s7729_s1 + $0xf0] sm:$0xff]   ;;  %v5637_v29 = vld [vmem:[%s7729_s1 + $0xf8] sm:$0xff]   ;;  %v5642_v33 = vld [vmem:[%s7730_s0 + $0x4] ss:$100 sps:$4 sm:$0xff]  }
   0xb   :  { %v5634_v26 = vld [vmem:[%s7729_s1 + $0x30] sm:$0xff]   ;;  %v5638_v30 = vld [vmem:[%s7729_s1 + $0x38] sm:$0xff]   ;;  %v5643_v34 = vld [vmem:[%s7730_s0 + $0x8] ss:$100 sps:$4 sm:$0xff]   ;;  %2870 = vmatprep.mubr.bf16.mxu0 %v5642_v33 }
   0xc   :  { %4781 = vmatpush3.bf16.msra.mxu0 %v5618_v10  ;;  %v5635_v27 = vld [vmem:[%s7729_s1 + $0xb0] sm:$0xff]   ;;  %v5639_v31 = vld [vmem:[%s7729_s1 + $0xb8] sm:$0xff]   ;;  %v5646_v36 = vld [vmem:[%s7729_s1 + $0x140] sm:$0xff]  }
   0xd   :  { %4845 = vmatpush3.bf16.msra.mxu1 %v5619_v11  ;;  %4782 = vmatprep.subr.bf16.mxu0 %v5620_v12  ;;  %v5645_v35 = vld [vmem:[%s7730_s0 + $0xc] ss:$100 sps:$4 sm:$0xff]   ;;  %v5647_v37 = vld [vmem:[%s7729_s1 + $0x1c0] sm:$0xff]   ;;  %v5652_v41 = vld [vmem:[%s7730_s0 + $0xd4] ss:$100 sps:$4 sm:$0xff]  }
   0xe   :  { %4846 = vmatprep.subr.bf16.mxu1 %v5621_v13  ;;  %2967 = vmatprep.mubr.bf16.mxu1 %v5645_v35  ;;  %v5648_v38 = vld [vmem:[%s7729_s1 + $0x100] sm:$0xff]   ;;  %v5650_v40 = vld [vmem:[%s7730_s0 + $0xcc] ss:$100 sps:$4 sm:$0xff]   ;;  %v5660_v48 = vld [vmem:[%s7730_s0 + $0x194] ss:$100 sps:$4 sm:$0xff]  }
   0xf   :  { %v5649_v39 = vld [vmem:[%s7729_s1 + $0x180] sm:$0xff]   ;;  %v5654_v42 = vld [vmem:[%s7730_s0 + $0xc8] ss:$100 sps:$4 sm:$0xff]   ;;  %v5655_v43 = vld [vmem:[%s7730_s0 + $0xd0] ss:$100 sps:$4 sm:$0xff]  }
  0x10   :  { %4783 = vmatpush3.bf16.msra.mxu0 %v5622_v14  ;;  %v5656_v44 = vld [vmem:[%s7729_s1 + $0x148] sm:$0xff]   ;;  %v5662_v49 = vld [vmem:[%s7730_s0 + $0x19c] ss:$100 sps:$4 sm:$0xff]   ;;  %v5664_v50 = vld [vmem:[%s7730_s0 + $0x190] ss:$100 sps:$4 sm:$0xff]  }
  0x11   :  { %4847 = vmatpush3.bf16.msra.mxu1 %v5623_v15  ;;  %4784 = vmatprep.subr.bf16.mxu0 %v5624_v16  ;;  %v5657_v45 = vld [vmem:[%s7729_s1 + $0x1c8] sm:$0xff]   ;;  %v5665_v51 = vld [vmem:[%s7730_s0 + $0x198] ss:$100 sps:$4 sm:$0xff]   ;;  %v5666_v52 = vld [vmem:[%s7729_s1 + $0x150] sm:$0xff]  }
  0x12   :  { %4848 = vmatprep.subr.bf16.mxu1 %v5625_v17  ;;  %v5658_v46 = vld [vmem:[%s7729_s1 + $0x108] sm:$0xff]   ;;  %v5667_v53 = vld [vmem:[%s7729_s1 + $0x1d0] sm:$0xff]   ;;  %v5670_v56 = vld [vmem:[%s7730_s0 + $0x25c] ss:$100 sps:$4 sm:$0xff]  }
  0x13   :  { %v5659_v47 = vld [vmem:[%s7729_s1 + $0x188] sm:$0xff]   ;;  %v5668_v54 = vld [vmem:[%s7729_s1 + $0x110] sm:$0xff]   ;;  %v5674_v58 = vld [vmem:[%s7730_s0 + $0x258] ss:$100 sps:$4 sm:$0xff]  }
  0x14   :  { %4785 = vmatpush3.bf16.msra.mxu0 %v5626_v18  ;;  %v5669_v55 = vld [vmem:[%s7729_s1 + $0x190] sm:$0xff]   ;;  %v5672_v57 = vld [vmem:[%s7730_s0 + $0x264] ss:$100 sps:$4 sm:$0xff]   ;;  %v5676_v60 = vld [vmem:[%s7729_s1 + $0x158] sm:$0xff]  }
  0x15   :  { %4849 = vmatpush3.bf16.msra.mxu1 %v5627_v19  ;;  %4786 = vmatprep.subr.bf16.mxu0 %v5628_v20  ;;  %v5675_v59 = vld [vmem:[%s7730_s0 + $0x260] ss:$100 sps:$4 sm:$0xff]   ;;  %v5677_v61 = vld [vmem:[%s7729_s1 + $0x1d8] sm:$0xff]   ;;  %v5682_v1 = vld [vmem:[%s7730_s0 + $0x32c] ss:$100 sps:$4 sm:$0xff]  }
  0x16   :  { %4850 = vmatprep.subr.bf16.mxu1 %v5629_v21  ;;  %v5678_v62 = vld [vmem:[%s7729_s1 + $0x118] sm:$0xff]   ;;  %v5680_v0 = vld [vmem:[%s7730_s0 + $0x324] ss:$100 sps:$4 sm:$0xff]   ;;  %v5690_v8 = vld [vmem:[%s7730_s0 + $0x3ec] ss:$100 sps:$4 sm:$0xff]  }
  0x17   :  { %v5679_v63 = vld [vmem:[%s7729_s1 + $0x198] sm:$0xff]   ;;  %v5684_v2 = vld [vmem:[%s7730_s0 + $0x320] ss:$100 sps:$4 sm:$0xff]   ;;  %v5685_v4 = vld [vmem:[%s7730_s0 + $0x328] ss:$100 sps:$4 sm:$0xff]  }
  0x18   :  { %4787 = vmatpush3.bf16.msra.mxu0 %v5630_v22  ;;  %v5686_v3 = vld [vmem:[%s7729_s1 + $0x160] sm:$0xff]   ;;  %v5692_v9 = vld [vmem:[%s7730_s0 + $0x3f4] ss:$100 sps:$4 sm:$0xff]   ;;  %v5696_v10 = vld [vmem:[%s7729_s1 + $0x168] sm:$0xff]  }
  0x19   :  { %4851 = vmatpush3.bf16.msra.mxu1 %v5631_v23  ;;  %4788 = vmatprep.subr.bf16.mxu0 %v5632_v24  ;;  %v5687_v5 = vld [vmem:[%s7729_s1 + $0x1e0] sm:$0xff]   ;;  %v5697_v11 = vld [vmem:[%s7729_s1 + $0x1e8] sm:$0xff]   ;;  %v5695_v15 = vld [vmem:[%s7730_s0 + $0x3f0] ss:$100 sps:$4 sm:$0xff]  }
  0x1a   :  { %4852 = vmatprep.subr.bf16.mxu1 %v5633_v25  ;;  %v5688_v6 = vld [vmem:[%s7729_s1 + $0x120] sm:$0xff]   ;;  %v5694_v12 = vld [vmem:[%s7730_s0 + $0x3e8] ss:$100 sps:$4 sm:$0xff]   ;;  %v5700_v16 = vld [vmem:[%s7730_s0 + $0x4b4] ss:$100 sps:$4 sm:$0xff]  }
  0x1b   :  { %v5689_v7 = vld [vmem:[%s7729_s1 + $0x1a0] sm:$0xff]   ;;  %v5698_v13 = vld [vmem:[%s7729_s1 + $0x128] sm:$0xff]   ;;  %v5706_v18 = vld [vmem:[%s7729_s1 + $0x170] sm:$0xff]  }
  0x1c   :  { %4789 = vmatpush3.bf16.msra.mxu0 %v5634_v26  ;;  %v5699_v14 = vld [vmem:[%s7729_s1 + $0x1a8] sm:$0xff]   ;;  %v5702_v17 = vld [vmem:[%s7730_s0 + $0x4bc] ss:$100 sps:$4 sm:$0xff]   ;;  %v5707_v19 = vld [vmem:[%s7729_s1 + $0x1f0] sm:$0xff]  }
  0x1d   :  { %4853 = vmatpush3.bf16.msra.mxu1 %v5635_v27  ;;  %4790 = vmatprep.subr.bf16.mxu0 %v5636_v28  ;;  %v5708_v20 = vld [vmem:[%s7729_s1 + $0x130] sm:$0xff]   ;;  %v5705_v23 = vld [vmem:[%s7730_s0 + $0x4b8] ss:$100 sps:$4 sm:$0xff]   ;;  %v5712_v25 = vld [vmem:[%s7730_s0 + $0x584] ss:$100 sps:$4 sm:$0xff]  }
  0x1e   :  { %4854 = vmatprep.subr.bf16.mxu1 %v5637_v29  ;;  %v5709_v21 = vld [vmem:[%s7729_s1 + $0x1b0] sm:$0xff]   ;;  %v5710_v24 = vld [vmem:[%s7730_s0 + $0x57c] ss:$100 sps:$4 sm:$0xff]  }
  0x1f   :  { %v5704_v22 = vld [vmem:[%s7730_s0 + $0x4b0] ss:$100 sps:$4 sm:$0xff]   ;;  %v5716_v26 = vld [vmem:[%s7729_s1 + $0x178] sm:$0xff]   ;;  %v5726_v33 = vld [vmem:[%s7729_s1 + $0x240] sm:$0xff]  }
  0x20   :  { %4791 = vmatpush3.bf16.msra.mxu0 %v5638_v30  ;;  %v5717_v27 = vld [vmem:[%s7729_s1 + $0x1f8] sm:$0xff]  }
  0x21   :  { %4855 = vmatpush3.bf16.msra.mxu1 %v5639_v31  ;;  %4904 = vmatprep.subr.bf16.mxu0 %v5646_v36  ;;  %v5718_v28 = vld [vmem:[%s7729_s1 + $0x138] sm:$0xff]   ;;  %v5715_v31 = vld [vmem:[%s7730_s0 + $0x580] ss:$100 sps:$4 sm:$0xff]   ;;  %v5720_v36 = vld [vmem:[%s7730_s0 + $0x10] ss:$100 sps:$4 sm:$0xff]  }
  0x22   :  { %4968 = vmatprep.subr.bf16.mxu1 %v5647_v37  ;;  %v5719_v29 = vld [vmem:[%s7729_s1 + $0x1b8] sm:$0xff]  }
  0x23   :  { %2871 = vmatmul.mubr.bf16.vlgmr.msra.gmra.mrb[0].mxu0 %v5640_v32  ;;  %v5714_v30 = vld [vmem:[%s7730_s0 + $0x578] ss:$100 sps:$4 sm:$0xff]  }
  0x24   :  { %2968 = vmatmul.mubr.bf16.vlgmr.msra.gmra.mrb[0].mxu1 %v5643_v34  ;;  %4905 = vmatpush3.bf16.msra.mxu0 %v5648_v38  ;;  %v5722_v32 = vld [vmem:[%s7730_s0 + $0x14] ss:$100 sps:$4 sm:$0xff]   ;;  %v5727_v34 = vld [vmem:[%s7729_s1 + $0x2c0] sm:$0xff]  }
  0x25   :  { %4969 = vmatpush3.bf16.msra.mxu1 %v5649_v39  ;;  %2878 = vmatprep.mubr.bf16.mxu0 %v5650_v40  ;;  %v5725_v35 = vld [vmem:[%s7730_s0 + $0x1c] ss:$100 sps:$4 sm:$0xff]  }
  0x26   :  { %2975 = vmatprep.mubr.bf16.mxu1 %v5652_v41  ;;  %4906 = vmatprep.subr.bf16.mxu0 %v5656_v44  ;;  %v5723_v37 = vld [vmem:[%s7730_s0 + $0x18] ss:$100 sps:$4 sm:$0xff]   ;;  %v5728_v38 = vld [vmem:[%s7729_s1 + $0x200] sm:$0xff]   ;;  %v5738_v44 = vld [vmem:[%s7729_s1 + $0x208] sm:$0xff]  }
  0x27   :  { %4970 = vmatprep.subr.bf16.mxu1 %v5657_v45  ;;  %v5729_v39 = vld [vmem:[%s7729_s1 + $0x280] sm:$0xff]   ;;  %v5739_v45 = vld [vmem:[%s7729_s1 + $0x288] sm:$0xff]  }
  0x28   :  { %4907 = vmatpush3.bf16.msra.mxu0 %v5658_v46  ;;  %v5730_v40 = vld [vmem:[%s7730_s0 + $0xdc] ss:$100 sps:$4 sm:$0xff]   ;;  %v5732_v41 = vld [vmem:[%s7730_s0 + $0xe4] ss:$100 sps:$4 sm:$0xff]  }
  0x29   :  { %4971 = vmatpush3.bf16.msra.mxu1 %v5659_v47  ;;  %4908 = vmatprep.subr.bf16.mxu0 %v5666_v52  ;;  %v5734_v46 = vld [vmem:[%s7730_s0 + $0xd8] ss:$100 sps:$4 sm:$0xff]   ;;  %v5746_v47 = vld [vmem:[%s7729_s1 + $0x250] sm:$0xff]  }
  0x2a   :  { %4972 = vmatprep.subr.bf16.mxu1 %v5667_v53  ;;  %v5748_v52 = vld [vmem:[%s7729_s1 + $0x210] sm:$0xff]  }
  0x2b   :  { %2879 = vmatmul.mubr.bf16.gmra.mrb[4].mxu0 %v5654_v42  ;;  %v5736_v42 = vld [vmem:[%s7729_s1 + $0x248] sm:$0xff]   ;;  %v5749_v53 = vld [vmem:[%s7729_s1 + $0x290] sm:$0xff]  }
  0x2c   :  { %2976 = vmatmul.mubr.bf16.gmra.mrb[4].mxu1 %v5655_v43  ;;  %2886 = vmatprep.mubr.bf16.mxu0 %v5660_v48  ;;  %v5737_v43 = vld [vmem:[%s7729_s1 + $0x2c8] sm:$0xff]   ;;  %v5735_v48 = vld [vmem:[%s7730_s0 + $0xe0] ss:$100 sps:$4 sm:$0xff]  }
  0x2d   :  { %2983 = vmatprep.mubr.bf16.mxu1 %v5662_v49  ;;  %4909 = vmatpush3.bf16.msra.mxu0 %v5668_v54  ;;  %v5747_v49 = vld [vmem:[%s7729_s1 + $0x2d0] sm:$0xff]   ;;  %v5756_v54 = vld [vmem:[%s7729_s1 + $0x258] sm:$0xff]  }
  0x2e   :  { %4973 = vmatpush3.bf16.msra.mxu1 %v5669_v55  ;;  %4910 = vmatprep.subr.bf16.mxu0 %v5676_v60  ;;  %v5757_v55 = vld [vmem:[%s7729_s1 + $0x2d8] sm:$0xff]   ;;  %v5750_v60 = vld [vmem:[%s7730_s0 + $0x26c] ss:$100 sps:$4 sm:$0xff]  }
  0x2f   :  { %4974 = vmatprep.subr.bf16.mxu1 %v5677_v61  ;;  %v5752_v61 = vld [vmem:[%s7730_s0 + $0x274] ss:$100 sps:$4 sm:$0xff]  }
  0x31   :  { %4911 = vmatpush3.bf16.msra.mxu0 %v5678_v62  ;;  %v5766_v62 = vld [vmem:[%s7729_s1 + $0x260] sm:$0xff]  }
  0x32   :  { %4975 = vmatpush3.bf16.msra.mxu1 %v5679_v63  ;;  %4912 = vmatprep.subr.bf16.mxu0 %v5686_v3  ;;  %v5767_v63 = vld [vmem:[%s7729_s1 + $0x2e0] sm:$0xff]   ;;  %v5755_v3 = vld [vmem:[%s7730_s0 + $0x270] ss:$100 sps:$4 sm:$0xff]  }
  0x33   :  { %2887 = vmatmul.mubr.bf16.gmra.mrb[8].mxu0 %v5664_v50  ;;  %4976 = vmatprep.subr.bf16.mxu1 %v5687_v5  ;;  %v5740_v50 = vld [vmem:[%s7730_s0 + $0x1a4] ss:$100 sps:$4 sm:$0xff]   ;;  %v5762_v5 = vld [vmem:[%s7730_s0 + $0x33c] ss:$100 sps:$4 sm:$0xff]  }
  0x34   :  { %2984 = vmatmul.mubr.bf16.gmra.mrb[8].mxu1 %v5665_v51  ;;  %2894 = vmatprep.mubr.bf16.mxu0 %v5670_v56  ;;  %v5742_v51 = vld [vmem:[%s7730_s0 + $0x1ac] ss:$100 sps:$4 sm:$0xff]   ;;  %v5744_v56 = vld [vmem:[%s7730_s0 + $0x1a0] ss:$100 sps:$4 sm:$0xff]  }
  0x35   :  { %2991 = vmatprep.mubr.bf16.mxu1 %v5672_v57  ;;  %4913 = vmatpush3.bf16.msra.mxu0 %v5688_v6  ;;  %v5758_v57 = vld [vmem:[%s7729_s1 + $0x218] sm:$0xff]   ;;  %v5776_v6 = vld [vmem:[%s7729_s1 + $0x268] sm:$0xff]  }
  0x36   :  { %4977 = vmatpush3.bf16.msra.mxu1 %v5689_v7  ;;  %4914 = vmatprep.subr.bf16.mxu0 %v5696_v10  ;;  %v5777_v7 = vld [vmem:[%s7729_s1 + $0x2e8] sm:$0xff]   ;;  %v5764_v10 = vld [vmem:[%s7730_s0 + $0x330] ss:$100 sps:$4 sm:$0xff]  }
  0x37   :  { %4978 = vmatprep.subr.bf16.mxu1 %v5697_v11  ;;  %v5765_v11 = vld [vmem:[%s7730_s0 + $0x338] ss:$100 sps:$4 sm:$0xff]  }
  0x39   :  { %4915 = vmatpush3.bf16.msra.mxu0 %v5698_v13  ;;  %v5772_v13 = vld [vmem:[%s7730_s0 + $0x404] ss:$100 sps:$4 sm:$0xff]  }
  0x3a   :  { %4979 = vmatpush3.bf16.msra.mxu1 %v5699_v14  ;;  %4916 = vmatprep.subr.bf16.mxu0 %v5706_v18  ;;  %v5786_v14 = vld [vmem:[%s7729_s1 + $0x270] sm:$0xff]   ;;  %v5774_v18 = vld [vmem:[%s7730_s0 + $0x3f8] ss:$100 sps:$4 sm:$0xff]  }
  0x3b   :  { %2895 = vmatmul.mubr.bf16.gmra.mrb[12].mxu0 %v5674_v58  ;;  %4980 = vmatprep.subr.bf16.mxu1 %v5707_v19  ;;  %v5759_v58 = vld [vmem:[%s7729_s1 + $0x298] sm:$0xff]   ;;  %v5775_v19 = vld [vmem:[%s7730_s0 + $0x400] ss:$100 sps:$4 sm:$0xff]  }
  0x3c   :  { %2992 = vmatmul.mubr.bf16.gmra.mrb[12].mxu1 %v5675_v59  ;;  %2902 = vmatprep.mubr.bf16.mxu0 %v5680_v0  ;;  %v5745_v59 = vld [vmem:[%s7730_s0 + $0x1a8] ss:$100 sps:$4 sm:$0xff]   ;;  %v5768_v0 = vld [vmem:[%s7729_s1 + $0x220] sm:$0xff]  }
  0x3d   :  { %2999 = vmatprep.mubr.bf16.mxu1 %v5682_v1  ;;  %4917 = vmatpush3.bf16.msra.mxu0 %v5708_v20  ;;  %v5769_v1 = vld [vmem:[%s7729_s1 + $0x2a0] sm:$0xff]  }
  0x3e   :  { %4981 = vmatpush3.bf16.msra.mxu1 %v5709_v21  ;;  %4918 = vmatprep.subr.bf16.mxu0 %v5716_v26  ;;  %v5780_v20 = vld [vmem:[%s7730_s0 + $0x4c4] ss:$100 sps:$4 sm:$0xff]   ;;  %v5796_v21 = vld [vmem:[%s7729_s1 + $0x278] sm:$0xff]  }
  0x3f   :  { %4982 = vmatprep.subr.bf16.mxu1 %v5717_v27  ;;  %v5784_v26 = vld [vmem:[%s7730_s0 + $0x4c0] ss:$100 sps:$4 sm:$0xff]  }
  0x40   :  { %v5806_v27 = vld [vmem:[%s7729_s1 + $0x340] sm:$0xff]  }
  0x41   :  { %4919 = vmatpush3.bf16.msra.mxu0 %v5718_v28  ;;  %v5807_v28 = vld [vmem:[%s7729_s1 + $0x3c0] sm:$0xff]  }
  0x42   :  { %4983 = vmatpush3.bf16.msra.mxu1 %v5719_v29  ;;  %5032 = vmatprep.subr.bf16.mxu0 %v5726_v33  ;;  %v5785_v29 = vld [vmem:[%s7730_s0 + $0x4c8] ss:$100 sps:$4 sm:$0xff]   ;;  %v5795_v33 = vld [vmem:[%s7730_s0 + $0x590] ss:$100 sps:$4 sm:$0xff]  }
  0x43   :  { %2903 = vmatmul.mubr.bf16.gmra.mrb[16].mxu0 %v5684_v2  ;;  %5096 = vmatprep.subr.bf16.mxu1 %v5727_v34  ;;  %v5754_v2 = vld [vmem:[%s7730_s0 + $0x268] ss:$100 sps:$4 sm:$0xff]  }
  0x44   :  { %3000 = vmatmul.mubr.bf16.gmra.mrb[16].mxu1 %v5685_v4  ;;  %2910 = vmatprep.mubr.bf16.mxu0 %v5690_v8  ;;  %v5760_v4 = vld [vmem:[%s7730_s0 + $0x334] ss:$100 sps:$4 sm:$0xff]   ;;  %v5778_v8 = vld [vmem:[%s7729_s1 + $0x228] sm:$0xff]  }
  0x45   :  { %3007 = vmatprep.mubr.bf16.mxu1 %v5692_v9  ;;  %v5779_v9 = vld [vmem:[%s7729_s1 + $0x2a8] sm:$0xff]  }
  0x46   :  { %v5802_v34 = vld [vmem:[%s7730_s0 + $0x24] ss:$100 sps:$4 sm:$0xff]  }
  0x4b   :  { %2911 = vmatmul.mubr.bf16.gmra.mrb[20].mxu0 %v5694_v12  ;;  %v5770_v12 = vld [vmem:[%s7730_s0 + $0x3fc] ss:$100 sps:$4 sm:$0xff]  }
  0x4c   :  { %3008 = vmatmul.mubr.bf16.gmra.mrb[20].mxu1 %v5695_v15  ;;  %2918 = vmatprep.mubr.bf16.mxu0 %v5700_v16  ;;  %v5787_v15 = vld [vmem:[%s7729_s1 + $0x2f0] sm:$0xff]  }
  0x4d   :  { %3015 = vmatprep.mubr.bf16.mxu1 %v5702_v17  ;;  %v5788_v16 = vld [vmem:[%s7729_s1 + $0x230] sm:$0xff]  }
  0x4e   :  { %v5789_v17 = vld [vmem:[%s7729_s1 + $0x2b0] sm:$0xff]  }
  0x53   :  { %2919 = vmatmul.mubr.bf16.gmra.mrb[24].mxu0 %v5704_v22  ;;  %v5782_v22 = vld [vmem:[%s7730_s0 + $0x4cc] ss:$100 sps:$4 sm:$0xff]  }
  0x54   :  { %3016 = vmatmul.mubr.bf16.gmra.mrb[24].mxu1 %v5705_v23  ;;  %2926 = vmatprep.mubr.bf16.mxu0 %v5710_v24  ;;  %v5797_v23 = vld [vmem:[%s7729_s1 + $0x2f8] sm:$0xff]  }
  0x55   :  { %3023 = vmatprep.mubr.bf16.mxu1 %v5712_v25  ;;  %v5798_v24 = vld [vmem:[%s7729_s1 + $0x238] sm:$0xff]  }
  0x56   :  { %v5799_v25 = vld [vmem:[%s7729_s1 + $0x2b8] sm:$0xff]  }
  0x5b   :  { %2927 = vmatmul.mubr.bf16.gmra.mrb[28].mxu0 %v5714_v30  ;;  %v5790_v30 = vld [vmem:[%s7730_s0 + $0x58c] ss:$100 sps:$4 sm:$0xff]  }
  0x5c   :  { %3024 = vmatmul.mubr.bf16.gmra.mrb[28].mxu1 %v5715_v31  ;;  %3064 = vmatprep.mubr.bf16.mxu0 %v5722_v32  ;;  %v5792_v31 = vld [vmem:[%s7730_s0 + $0x594] ss:$100 sps:$4 sm:$0xff]   ;;  %v5794_v32 = vld [vmem:[%s7730_s0 + $0x588] ss:$100 sps:$4 sm:$0xff]  }
  0x5d   :  { %3161 = vmatprep.mubr.bf16.mxu1 %v5725_v35  ;;  %v5805_v35 = vld [vmem:[%s7730_s0 + $0x2c] ss:$100 sps:$4 sm:$0xff]  }
  0x63   :  { %3065 = vmatmul.mubr.bf16.vlgmr.msra.gmra.mrb[32].mxu0 %v5720_v36  ;;  %v5800_v36 = vld [vmem:[%s7730_s0 + $0x20] ss:$100 sps:$4 sm:$0xff]  }
  0x64   :  { %3162 = vmatmul.mubr.bf16.vlgmr.msra.gmra.mrb[32].mxu1 %v5723_v37  ;;  %5033 = vmatpush3.bf16.msra.mxu0 %v5728_v38  ;;  %v5803_v37 = vld [vmem:[%s7730_s0 + $0x28] ss:$100 sps:$4 sm:$0xff]   ;;  %v5808_v38 = vld [vmem:[%s7729_s1 + $0x300] sm:$0xff]  }
  0x65   :  { %5097 = vmatpush3.bf16.msra.mxu1 %v5729_v39  ;;  %3072 = vmatprep.mubr.bf16.mxu0 %v5730_v40  ;;  %v5809_v39 = vld [vmem:[%s7729_s1 + $0x380] sm:$0xff]   ;;  %v5810_v40 = vld [vmem:[%s7730_s0 + $0xec] ss:$100 sps:$4 sm:$0xff]  }
  0x66   :  { %3169 = vmatprep.mubr.bf16.mxu1 %v5732_v41  ;;  %5034 = vmatprep.subr.bf16.mxu0 %v5736_v42  ;;  %v5812_v41 = vld [vmem:[%s7730_s0 + $0xf4] ss:$100 sps:$4 sm:$0xff]   ;;  %v5816_v42 = vld [vmem:[%s7729_s1 + $0x348] sm:$0xff]  }
  0x67   :  { %5098 = vmatprep.subr.bf16.mxu1 %v5737_v43  ;;  %v5817_v43 = vld [vmem:[%s7729_s1 + $0x3c8] sm:$0xff]  }
  0x68   :  { %5035 = vmatpush3.bf16.msra.mxu0 %v5738_v44  ;;  %v5818_v44 = vld [vmem:[%s7729_s1 + $0x308] sm:$0xff]  }
  0x69   :  { %5099 = vmatpush3.bf16.msra.mxu1 %v5739_v45  ;;  %5036 = vmatprep.subr.bf16.mxu0 %v5746_v47  ;;  %v5819_v45 = vld [vmem:[%s7729_s1 + $0x388] sm:$0xff]   ;;  %v5826_v47 = vld [vmem:[%s7729_s1 + $0x350] sm:$0xff]  }
  0x6a   :  { %5100 = vmatprep.subr.bf16.mxu1 %v5747_v49  ;;  %v5820_v49 = vld [vmem:[%s7730_s0 + $0x1b4] ss:$100 sps:$4 sm:$0xff]  }
  0x6b   :  { %3073 = vmatmul.mubr.bf16.gmra.mrb[36].mxu0 %v5734_v46  ;;  %v5814_v46 = vld [vmem:[%s7730_s0 + $0xe8] ss:$100 sps:$4 sm:$0xff]  }
  0x6c   :  { %3170 = vmatmul.mubr.bf16.gmra.mrb[36].mxu1 %v5735_v48  ;;  %3080 = vmatprep.mubr.bf16.mxu0 %v5740_v50  ;;  %v5815_v48 = vld [vmem:[%s7730_s0 + $0xf0] ss:$100 sps:$4 sm:$0xff]  }
  0x6d   :  { %3177 = vmatprep.mubr.bf16.mxu1 %v5742_v51  ;;  %5037 = vmatpush3.bf16.msra.mxu0 %v5748_v52  ;;  %v5827_v50 = vld [vmem:[%s7729_s1 + $0x3d0] sm:$0xff]   ;;  %v5822_v51 = vld [vmem:[%s7730_s0 + $0x1bc] ss:$100 sps:$4 sm:$0xff]  }
  0x6e   :  { %5101 = vmatpush3.bf16.msra.mxu1 %v5749_v53  ;;  %5038 = vmatprep.subr.bf16.mxu0 %v5756_v54  ;;  %v5828_v52 = vld [vmem:[%s7729_s1 + $0x310] sm:$0xff]   ;;  %v5836_v54 = vld [vmem:[%s7729_s1 + $0x358] sm:$0xff]  }
  0x6f   :  { %5102 = vmatprep.subr.bf16.mxu1 %v5757_v55  ;;  %v5829_v53 = vld [vmem:[%s7729_s1 + $0x390] sm:$0xff]   ;;  %v5837_v55 = vld [vmem:[%s7729_s1 + $0x3d8] sm:$0xff]  }
  0x71   :  { %5039 = vmatpush3.bf16.msra.mxu0 %v5758_v57  ;;  %v5838_v57 = vld [vmem:[%s7729_s1 + $0x318] sm:$0xff]  }
  0x72   :  { %5103 = vmatpush3.bf16.msra.mxu1 %v5759_v58  ;;  %5040 = vmatprep.subr.bf16.mxu0 %v5766_v62  ;;  %v5839_v58 = vld [vmem:[%s7729_s1 + $0x398] sm:$0xff]   ;;  %v5832_v62 = vld [vmem:[%s7730_s0 + $0x284] ss:$100 sps:$4 sm:$0xff]  }
  0x73   :  { %3081 = vmatmul.mubr.bf16.gmra.mrb[40].mxu0 %v5744_v56  ;;  %5104 = vmatprep.subr.bf16.mxu1 %v5767_v63  ;;  %v5824_v56 = vld [vmem:[%s7730_s0 + $0x1b0] ss:$100 sps:$4 sm:$0xff]   ;;  %v5847_v63 = vld [vmem:[%s7729_s1 + $0x3e0] sm:$0xff]  }
  0x74   :  { %3178 = vmatmul.mubr.bf16.gmra.mrb[40].mxu1 %v5745_v59  ;;  %3088 = vmatprep.mubr.bf16.mxu0 %v5750_v60  ;;  %v5825_v59 = vld [vmem:[%s7730_s0 + $0x1b8] ss:$100 sps:$4 sm:$0xff]  }
  0x75   :  { %3185 = vmatprep.mubr.bf16.mxu1 %v5752_v61  ;;  %5041 = vmatpush3.bf16.msra.mxu0 %v5768_v0  ;;  %v5830_v60 = vld [vmem:[%s7730_s0 + $0x27c] ss:$100 sps:$4 sm:$0xff]  }
  0x76   :  { %5105 = vmatpush3.bf16.msra.mxu1 %v5769_v1  ;;  %5042 = vmatprep.subr.bf16.mxu0 %v5776_v6  ;;  %v5846_v61 = vld [vmem:[%s7729_s1 + $0x360] sm:$0xff]   ;;  %v5859_v6 = vld [vmem:[%s7729_s1 + $0x3a8] sm:$0xff]  }
  0x77   :  { %5106 = vmatprep.subr.bf16.mxu1 %v5777_v7  ;;  %v5848_v0 = vld [vmem:[%s7729_s1 + $0x320] sm:$0xff]  }
  0x78   :  { %v5849_v1 = vld [vmem:[%s7729_s1 + $0x3a0] sm:$0xff]  }
  0x79   :  { %5043 = vmatpush3.bf16.msra.mxu0 %v5778_v8  ;;  %v5835_v7 = vld [vmem:[%s7730_s0 + $0x280] ss:$100 sps:$4 sm:$0xff]  }
  0x7a   :  { %5107 = vmatpush3.bf16.msra.mxu1 %v5779_v9  ;;  %5044 = vmatprep.subr.bf16.mxu0 %v5786_v14  ;;  %v5840_v8 = vld [vmem:[%s7730_s0 + $0x344] ss:$100 sps:$4 sm:$0xff]   ;;  %v5866_v9 = vld [vmem:[%s7729_s1 + $0x370] sm:$0xff]   ;;  %v5876_v14 = vld [vmem:[%s7729_s1 + $0x378] sm:$0xff]  }
  0x7b   :  { %3089 = vmatmul.mubr.bf16.gmra.mrb[44].mxu0 %v5754_v2  ;;  %5108 = vmatprep.subr.bf16.mxu1 %v5787_v15  ;;  %v5856_v2 = vld [vmem:[%s7729_s1 + $0x368] sm:$0xff]   ;;  %v5877_v15 = vld [vmem:[%s7729_s1 + $0x3f8] sm:$0xff]  }
  0x7c   :  { %3186 = vmatmul.mubr.bf16.gmra.mrb[44].mxu1 %v5755_v3  ;;  %3096 = vmatprep.mubr.bf16.mxu0 %v5760_v4  ;;  %v5857_v3 = vld [vmem:[%s7729_s1 + $0x3e8] sm:$0xff]  }
  0x7d   :  { %3193 = vmatprep.mubr.bf16.mxu1 %v5762_v5  ;;  %5045 = vmatpush3.bf16.msra.mxu0 %v5788_v16  ;;  %v5858_v4 = vld [vmem:[%s7729_s1 + $0x328] sm:$0xff]   ;;  %v5834_v5 = vld [vmem:[%s7730_s0 + $0x278] ss:$100 sps:$4 sm:$0xff]   ;;  %v5844_v16 = vld [vmem:[%s7730_s0 + $0x340] ss:$100 sps:$4 sm:$0xff]  }
  0x7e   :  { %5109 = vmatpush3.bf16.msra.mxu1 %v5789_v17  ;;  %5046 = vmatprep.subr.bf16.mxu0 %v5796_v21  ;;  %v5878_v17 = vld [vmem:[%s7729_s1 + $0x338] sm:$0xff]  }
  0x7f   :  { %5110 = vmatprep.subr.bf16.mxu1 %v5797_v23  ;;  %v5852_v21 = vld [vmem:[%s7730_s0 + $0x414] ss:$100 sps:$4 sm:$0xff]   ;;  %v5887_v23 = vld [vmem:[%s7729_s1 + $0x4c0] sm:$0xff]  }
  0x81   :  { %5047 = vmatpush3.bf16.msra.mxu0 %v5798_v24  ;;  %v5854_v24 = vld [vmem:[%s7730_s0 + $0x408] ss:$100 sps:$4 sm:$0xff]  }
  0x82   :  { %5111 = vmatpush3.bf16.msra.mxu1 %v5799_v25  ;;  %5160 = vmatprep.subr.bf16.mxu0 %v5806_v27  ;;  %v5855_v25 = vld [vmem:[%s7730_s0 + $0x410] ss:$100 sps:$4 sm:$0xff]   ;;  %v5862_v27 = vld [vmem:[%s7730_s0 + $0x4dc] ss:$100 sps:$4 sm:$0xff]  }
  0x83   :  { %3097 = vmatmul.mubr.bf16.gmra.mrb[48].mxu0 %v5764_v10  ;;  %5224 = vmatprep.subr.bf16.mxu1 %v5807_v28  ;;  %v5867_v10 = vld [vmem:[%s7729_s1 + $0x3f0] sm:$0xff]  }
  0x84   :  { %3194 = vmatmul.mubr.bf16.gmra.mrb[48].mxu1 %v5765_v11  ;;  %3104 = vmatprep.mubr.bf16.mxu0 %v5770_v12  ;;  %v5842_v11 = vld [vmem:[%s7730_s0 + $0x34c] ss:$100 sps:$4 sm:$0xff]  }
  0x85   :  { %3201 = vmatprep.mubr.bf16.mxu1 %v5772_v13  ;;  %v5868_v12 = vld [vmem:[%s7729_s1 + $0x330] sm:$0xff]  }
  0x86   :  { %v5869_v13 = vld [vmem:[%s7729_s1 + $0x3b0] sm:$0xff]  }
  0x87   :  { %v5864_v28 = vld [vmem:[%s7730_s0 + $0x4d0] ss:$100 sps:$4 sm:$0xff]  }
  0x8b   :  { %3105 = vmatmul.mubr.bf16.gmra.mrb[52].mxu0 %v5774_v18  ;;  %v5879_v18 = vld [vmem:[%s7729_s1 + $0x3b8] sm:$0xff]  }
  0x8c   :  { %3202 = vmatmul.mubr.bf16.gmra.mrb[52].mxu1 %v5775_v19  ;;  %3112 = vmatprep.mubr.bf16.mxu0 %v5780_v20  ;;  %v5845_v19 = vld [vmem:[%s7730_s0 + $0x348] ss:$100 sps:$4 sm:$0xff]  }
  0x8d   :  { %3209 = vmatprep.mubr.bf16.mxu1 %v5782_v22  ;;  %v5850_v20 = vld [vmem:[%s7730_s0 + $0x40c] ss:$100 sps:$4 sm:$0xff]   ;;  %v5886_v22 = vld [vmem:[%s7729_s1 + $0x440] sm:$0xff]  }
  0x93   :  { %3113 = vmatmul.mubr.bf16.gmra.mrb[56].mxu0 %v5784_v26  ;;  %v5860_v26 = vld [vmem:[%s7730_s0 + $0x4d4] ss:$100 sps:$4 sm:$0xff]  }
  0x94   :  { %3210 = vmatmul.mubr.bf16.gmra.mrb[56].mxu1 %v5785_v29  ;;  %3120 = vmatprep.mubr.bf16.mxu0 %v5790_v30  ;;  %v5865_v29 = vld [vmem:[%s7730_s0 + $0x4d8] ss:$100 sps:$4 sm:$0xff]  }
  0x95   :  { %3217 = vmatprep.mubr.bf16.mxu1 %v5792_v31  ;;  %v5870_v30 = vld [vmem:[%s7730_s0 + $0x59c] ss:$100 sps:$4 sm:$0xff]   ;;  %v5872_v31 = vld [vmem:[%s7730_s0 + $0x5a4] ss:$100 sps:$4 sm:$0xff]  }
  0x9b   :  { %3121 = vmatmul.mubr.bf16.gmra.mrb[60].mxu0 %v5794_v32  ;;  %v5874_v32 = vld [vmem:[%s7730_s0 + $0x598] ss:$100 sps:$4 sm:$0xff]  }
  0x9c   :  { %3218 = vmatmul.mubr.bf16.gmra.mrb[60].mxu1 %v5795_v33  ;;  %3258 = vmatprep.mubr.bf16.mxu0 %v5802_v34  ;;  %v5875_v33 = vld [vmem:[%s7730_s0 + $0x5a0] ss:$100 sps:$4 sm:$0xff]   ;;  %v5882_v34 = vld [vmem:[%s7730_s0 + $0x34] ss:$100 sps:$4 sm:$0xff]  }
  0x9d   :  { %3355 = vmatprep.mubr.bf16.mxu1 %v5805_v35  ;;  %v5885_v35 = vld [vmem:[%s7730_s0 + $0x3c] ss:$100 sps:$4 sm:$0xff]  }
  0xa3   :  { %3259 = vmatmul.mubr.bf16.vlgmr.msra.gmra.mrb[64].mxu0 %v5800_v36  ;;  %v5880_v36 = vld [vmem:[%s7730_s0 + $0x30] ss:$100 sps:$4 sm:$0xff]  }
  0xa4   :  { %3356 = vmatmul.mubr.bf16.vlgmr.msra.gmra.mrb[64].mxu1 %v5803_v37  ;;  %5161 = vmatpush3.bf16.msra.mxu0 %v5808_v38  ;;  %v5883_v37 = vld [vmem:[%s7730_s0 + $0x38] ss:$100 sps:$4 sm:$0xff]   ;;  %v5888_v38 = vld [vmem:[%s7729_s1 + $0x400] sm:$0xff]  }
  0xa5   :  { %5225 = vmatpush3.bf16.msra.mxu1 %v5809_v39  ;;  %3266 = vmatprep.mubr.bf16.mxu0 %v5810_v40  ;;  %v5889_v39 = vld [vmem:[%s7729_s1 + $0x480] sm:$0xff]  }
  0xa6   :  { %3363 = vmatprep.mubr.bf16.mxu1 %v5812_v41  ;;  %5162 = vmatprep.subr.bf16.mxu0 %v5816_v42  ;;  %v5890_v40 = vld [vmem:[%s7730_s0 + $0xfc] ss:$100 sps:$4 sm:$0xff]   ;;  %v5892_v41 = vld [vmem:[%s7730_s0 + $0x104] ss:$100 sps:$4 sm:$0xff]  }
  0xa7   :  { %5226 = vmatprep.subr.bf16.mxu1 %v5817_v43  ;;  %v5896_v42 = vld [vmem:[%s7729_s1 + $0x448] sm:$0xff]  }
  0xa8   :  { %5163 = vmatpush3.bf16.msra.mxu0 %v5818_v44  ;;  %v5897_v43 = vld [vmem:[%s7729_s1 + $0x4c8] sm:$0xff]  }
  0xa9   :  { %5227 = vmatpush3.bf16.msra.mxu1 %v5819_v45  ;;  %5164 = vmatprep.subr.bf16.mxu0 %v5826_v47  ;;  %v5898_v44 = vld [vmem:[%s7729_s1 + $0x408] sm:$0xff]   ;;  %v5906_v47 = vld [vmem:[%s7729_s1 + $0x450] sm:$0xff]  }
  0xaa   :  { %5228 = vmatprep.subr.bf16.mxu1 %v5827_v50  ;;  %v5899_v45 = vld [vmem:[%s7729_s1 + $0x488] sm:$0xff]  }
  0xab   :  { %3267 = vmatmul.mubr.bf16.gmra.mrb[68].mxu0 %v5814_v46  ;;  %v5894_v46 = vld [vmem:[%s7730_s0 + $0xf8] ss:$100 sps:$4 sm:$0xff]   ;;  %v5900_v50 = vld [vmem:[%s7730_s0 + $0x1c4] ss:$100 sps:$4 sm:$0xff]  }
  0xac   :  { %3364 = vmatmul.mubr.bf16.gmra.mrb[68].mxu1 %v5815_v48  ;;  %3274 = vmatprep.mubr.bf16.mxu0 %v5820_v49  ;;  %v5907_v48 = vld [vmem:[%s7729_s1 + $0x4d0] sm:$0xff]   ;;  %v5895_v49 = vld [vmem:[%s7730_s0 + $0x100] ss:$100 sps:$4 sm:$0xff]  }
  0xad   :  { %3371 = vmatprep.mubr.bf16.mxu1 %v5822_v51  ;;  %5165 = vmatpush3.bf16.msra.mxu0 %v5828_v52  ;;  %v5902_v51 = vld [vmem:[%s7730_s0 + $0x1cc] ss:$100 sps:$4 sm:$0xff]  }
  0xae   :  { %5229 = vmatpush3.bf16.msra.mxu1 %v5829_v53  ;;  %5166 = vmatprep.subr.bf16.mxu0 %v5836_v54  ;;  %v5908_v52 = vld [vmem:[%s7729_s1 + $0x410] sm:$0xff]   ;;  %v5916_v54 = vld [vmem:[%s7729_s1 + $0x458] sm:$0xff]  }
  0xaf   :  { %5230 = vmatprep.subr.bf16.mxu1 %v5837_v55  ;;  %v5909_v53 = vld [vmem:[%s7729_s1 + $0x490] sm:$0xff]   ;;  %v5917_v55 = vld [vmem:[%s7729_s1 + $0x4d8] sm:$0xff]  }
  0xb1   :  { %5167 = vmatpush3.bf16.msra.mxu0 %v5838_v57  ;;  %v5904_v57 = vld [vmem:[%s7730_s0 + $0x1c0] ss:$100 sps:$4 sm:$0xff]  }
  0xb2   :  { %5231 = vmatpush3.bf16.msra.mxu1 %v5839_v58  ;;  %5168 = vmatprep.subr.bf16.mxu0 %v5846_v61  ;;  %v5919_v58 = vld [vmem:[%s7729_s1 + $0x498] sm:$0xff]   ;;  %v5926_v61 = vld [vmem:[%s7729_s1 + $0x460] sm:$0xff]  }
  0xb3   :  { %3275 = vmatmul.mubr.bf16.gmra.mrb[72].mxu0 %v5824_v56  ;;  %5232 = vmatprep.subr.bf16.mxu1 %v5847_v63  ;;  %v5918_v56 = vld [vmem:[%s7729_s1 + $0x418] sm:$0xff]  }
  0xb4   :  { %3372 = vmatmul.mubr.bf16.gmra.mrb[72].mxu1 %v5825_v59  ;;  %3282 = vmatprep.mubr.bf16.mxu0 %v5830_v60  ;;  %v5905_v59 = vld [vmem:[%s7730_s0 + $0x1c8] ss:$100 sps:$4 sm:$0xff]   ;;  %v5912_v63 = vld [vmem:[%s7730_s0 + $0x294] ss:$100 sps:$4 sm:$0xff]  }
  0xb5   :  { %3379 = vmatprep.mubr.bf16.mxu1 %v5832_v62  ;;  %5169 = vmatpush3.bf16.msra.mxu0 %v5848_v0  ;;  %v5910_v60 = vld [vmem:[%s7730_s0 + $0x28c] ss:$100 sps:$4 sm:$0xff]   ;;  %v5927_v62 = vld [vmem:[%s7729_s1 + $0x4e0] sm:$0xff]  }
  0xb6   :  { %5233 = vmatpush3.bf16.msra.mxu1 %v5849_v1  ;;  %5170 = vmatprep.subr.bf16.mxu0 %v5856_v2  ;;  %v5928_v0 = vld [vmem:[%s7729_s1 + $0x420] sm:$0xff]   ;;  %v5936_v2 = vld [vmem:[%s7729_s1 + $0x468] sm:$0xff]  }
  0xb7   :  { %5234 = vmatprep.subr.bf16.mxu1 %v5857_v3  ;;  %v5929_v1 = vld [vmem:[%s7729_s1 + $0x4a0] sm:$0xff]   ;;  %v5937_v3 = vld [vmem:[%s7729_s1 + $0x4e8] sm:$0xff]  }
  0xb9   :  { %5171 = vmatpush3.bf16.msra.mxu0 %v5858_v4  ;;  %v6907_v4 = vld [vmem:[%s7731_s2] ss:$0 sm:$0xff] }
  0xba   :  { %5235 = vmatpush3.bf16.msra.mxu1 %v5859_v6  ;;  %5172 = vmatprep.subr.bf16.mxu0 %v5866_v9  ;;  %v5938_v6 = vld [vmem:[%s7729_s1 + $0x428] sm:$0xff]   ;;  %v5915_v9 = vld [vmem:[%s7730_s0 + $0x290] ss:$100 sps:$4 sm:$0xff]  }
  0xbb   :  { %3283 = vmatmul.mubr.bf16.gmra.mrb[76].mxu0 %v5834_v5  ;;  %5236 = vmatprep.subr.bf16.mxu1 %v5867_v10  ;;  %v5914_v5 = vld [vmem:[%s7730_s0 + $0x288] ss:$100 sps:$4 sm:$0xff]   ;;  %v5920_v10 = vld [vmem:[%s7730_s0 + $0x354] ss:$100 sps:$4 sm:$0xff]  }
  0xbc   :  { %3380 = vmatmul.mubr.bf16.gmra.mrb[76].mxu1 %v5835_v7  ;;  %3290 = vmatprep.mubr.bf16.mxu0 %v5840_v8  ;;  %v5939_v7 = vld [vmem:[%s7729_s1 + $0x4a8] sm:$0xff]  }
  0xbd   :  { %3387 = vmatprep.mubr.bf16.mxu1 %v5842_v11  ;;  %5173 = vmatpush3.bf16.msra.mxu0 %v5868_v12  ;;  %v5946_v11 = vld [vmem:[%s7729_s1 + $0x470] sm:$0xff]  }
  0xbe   :  { %5237 = vmatpush3.bf16.msra.mxu1 %v5869_v13  ;;  %5174 = vmatprep.subr.bf16.mxu0 %v5876_v14  ;;  %v5922_v14 = vld [vmem:[%s7730_s0 + $0x35c] ss:$100 sps:$4 sm:$0xff]  }
  0xbf   :  { %5238 = vmatprep.subr.bf16.mxu1 %v5877_v15  ;;  %v5947_v15 = vld [vmem:[%s7729_s1 + $0x4f0] sm:$0xff]  }
  0xc1   :  { %5175 = vmatpush3.bf16.msra.mxu0 %v5878_v17 }
  0xc2   :  { %5239 = vmatpush3.bf16.msra.mxu1 %v5879_v18  ;;  %5288 = vmatprep.subr.bf16.mxu0 %v5886_v22 }
  0xc3   :  { %3291 = vmatmul.mubr.bf16.gmra.mrb[80].mxu0 %v5844_v16  ;;  %5352 = vmatprep.subr.bf16.mxu1 %v5887_v23 }
  0xc4   :  { %3388 = vmatmul.mubr.bf16.gmra.mrb[80].mxu1 %v5845_v19  ;;  %3298 = vmatprep.mubr.bf16.mxu0 %v5850_v20  ;;  %v5948_v19 = vld [vmem:[%s7729_s1 + $0x430] sm:$0xff]  }
  0xc5   :  { %3395 = vmatprep.mubr.bf16.mxu1 %v5852_v21  ;;  %v5949_v20 = vld [vmem:[%s7729_s1 + $0x4b0] sm:$0xff]  }
  0xcb   :  { %3299 = vmatmul.mubr.bf16.gmra.mrb[84].mxu0 %v5854_v24 }
  0xcc   :  { %3396 = vmatmul.mubr.bf16.gmra.mrb[84].mxu1 %v5855_v25  ;;  %3306 = vmatprep.mubr.bf16.mxu0 %v5860_v26 }
  0xcd   :  { %3403 = vmatprep.mubr.bf16.mxu1 %v5862_v27  ;;  %v5956_v27 = vld [vmem:[%s7729_s1 + $0x478] sm:$0xff]  }
  0xd3   :  { %3307 = vmatmul.mubr.bf16.gmra.mrb[88].mxu0 %v5864_v28 }
  0xd4   :  { %3404 = vmatmul.mubr.bf16.gmra.mrb[88].mxu1 %v5865_v29  ;;  %3314 = vmatprep.mubr.bf16.mxu0 %v5870_v30  ;;  %v5957_v29 = vld [vmem:[%s7729_s1 + $0x4f8] sm:$0xff]  }
  0xd5   :  { %3411 = vmatprep.mubr.bf16.mxu1 %v5872_v31 }
  0xdb   :  { %3315 = vmatmul.mubr.bf16.gmra.mrb[92].mxu0 %v5874_v32  ;;  %v5924_v32 = vld [vmem:[%s7730_s0 + $0x350] ss:$100 sps:$4 sm:$0xff]  }
  0xdc   :  { %3412 = vmatmul.mubr.bf16.gmra.mrb[92].mxu1 %v5875_v33  ;;  %3452 = vmatprep.mubr.bf16.mxu0 %v5882_v34  ;;  %v5958_v33 = vld [vmem:[%s7729_s1 + $0x438] sm:$0xff]  }
  0xdd   :  { %3549 = vmatprep.mubr.bf16.mxu1 %v5885_v35 }
  0xe3   :  { %3453 = vmatmul.mubr.bf16.vlgmr.msra.gmra.mrb[96].mxu0 %v5880_v36  ;;  %v5925_v36 = vld [vmem:[%s7730_s0 + $0x358] ss:$100 sps:$4 sm:$0xff]  }
  0xe4   :  { %3550 = vmatmul.mubr.bf16.vlgmr.msra.gmra.mrb[96].mxu1 %v5883_v37  ;;  %5289 = vmatpush3.bf16.msra.mxu0 %v5888_v38  ;;  %v5930_v37 = vld [vmem:[%s7730_s0 + $0x41c] ss:$100 sps:$4 sm:$0xff]  }
  0xe5   :  { %5353 = vmatpush3.bf16.msra.mxu1 %v5889_v39  ;;  %3460 = vmatprep.mubr.bf16.mxu0 %v5890_v40  ;;  %v5959_v38 = vld [vmem:[%s7729_s1 + $0x4b8] sm:$0xff]   ;;  %v5966_v39 = vld [vmem:[%s7729_s1 + $0x540] sm:$0xff]  }
  0xe6   :  { %3557 = vmatprep.mubr.bf16.mxu1 %v5892_v41  ;;  %5290 = vmatprep.subr.bf16.mxu0 %v5896_v42  ;;  %v5967_v40 = vld [vmem:[%s7729_s1 + $0x5c0] sm:$0xff]  }
  0xe7   :  { %5354 = vmatprep.subr.bf16.mxu1 %v5897_v43 }
  0xe8   :  { %5291 = vmatpush3.bf16.msra.mxu0 %v5898_v44 }
  0xe9   :  { %5355 = vmatpush3.bf16.msra.mxu1 %v5899_v45  ;;  %5292 = vmatprep.subr.bf16.mxu0 %v5906_v47 }
  0xea   :  { %5356 = vmatprep.subr.bf16.mxu1 %v5907_v48 }
  0xeb   :  { %3461 = vmatmul.mubr.bf16.gmra.mrb[100].mxu0 %v5894_v46 }
  0xec   :  { %3558 = vmatmul.mubr.bf16.gmra.mrb[100].mxu1 %v5895_v49  ;;  %3468 = vmatprep.mubr.bf16.mxu0 %v5900_v50  ;;  %v5932_v49 = vld [vmem:[%s7730_s0 + $0x424] ss:$100 sps:$4 sm:$0xff]  }
  0xed   :  { %3565 = vmatprep.mubr.bf16.mxu1 %v5902_v51  ;;  %5293 = vmatpush3.bf16.msra.mxu0 %v5908_v52 }
  0xee   :  { %5357 = vmatpush3.bf16.msra.mxu1 %v5909_v53  ;;  %5294 = vmatprep.subr.bf16.mxu0 %v5916_v54 }
  0xef   :  { %5358 = vmatprep.subr.bf16.mxu1 %v5917_v55 }
  0xf1   :  { %5295 = vmatpush3.bf16.msra.mxu0 %v5918_v56  ;;  %v5934_v56 = vld [vmem:[%s7730_s0 + $0x418] ss:$100 sps:$4 sm:$0xff]  }
  0xf2   :  { %5359 = vmatpush3.bf16.msra.mxu1 %v5919_v58  ;;  %5296 = vmatprep.subr.bf16.mxu0 %v5926_v61 }
  0xf3   :  { %3469 = vmatmul.mubr.bf16.gmra.mrb[104].mxu0 %v5904_v57  ;;  %5360 = vmatprep.subr.bf16.mxu1 %v5927_v62 }
  0xf4   :  { %3566 = vmatmul.mubr.bf16.gmra.mrb[104].mxu1 %v5905_v59  ;;  %3476 = vmatprep.mubr.bf16.mxu0 %v5910_v60  ;;  %v5935_v59 = vld [vmem:[%s7730_s0 + $0x420] ss:$100 sps:$4 sm:$0xff]  }
  0xf5   :  { %3573 = vmatprep.mubr.bf16.mxu1 %v5912_v63  ;;  %5297 = vmatpush3.bf16.msra.mxu0 %v5928_v0  ;;  %v5940_v60 = vld [vmem:[%s7730_s0 + $0x4e4] ss:$100 sps:$4 sm:$0xff]  }
  0xf6   :  { %v4792_v8 = vpop.f32.mrb[0].mxu0  ;;  %5361 = vmatpush3.bf16.msra.mxu1 %v5929_v1  ;;  %5298 = vmatprep.subr.bf16.mxu0 %v5936_v2  ;;  %v5942_v2 = vld [vmem:[%s7730_s0 + $0x4ec] ss:$100 sps:$4 sm:$0xff]  }
  0xf7   :  { %v4856_v12 = vpop.f32.mrb[0].mxu1  ;;  %v4793_v13 = vpop.f32.mrb[1].mxu0  ;;  %5362 = vmatprep.subr.bf16.mxu1 %v5937_v3 }
  0xf8   :  { %v4794_v16 = vadd.f32 %v4793_v13, %v4792_v8  ;;  %v4857_v17 = vpop.f32.mrb[1].mxu1  ;;  %v4795_v18 = vpop.f32.mrb[2].mxu0  ;;  %v5944_v13 = vld [vmem:[%s7730_s0 + $0x4e0] ss:$100 sps:$4 sm:$0xff]  }
  0xf9   :  { %v4858_v21 = vadd.f32 %v4857_v17, %v4856_v12  ;;  %v4859_v22 = vpop.f32.mrb[2].mxu1  ;;  %v4796_v23 = vpop.f32.mrb[3].mxu0  ;;  %5299 = vmatpush3.bf16.msra.mxu0 %v5938_v6  ;;  %v5950_v17 = vld [vmem:[%s7730_s0 + $0x5ac] ss:$100 sps:$4 sm:$0xff]  }
  0xfa   :  { %v2873_v24 = vadd.f32 %v4794_v16, %v6907_v4  ;;  %v4797_v25 = vadd.f32 %v4796_v23, %v4795_v18  ;;  %v4860_v26 = vpop.f32.mrb[3].mxu1  ;;  %5363 = vmatpush3.bf16.msra.mxu1 %v5939_v7  ;;  %5300 = vmatprep.subr.bf16.mxu0 %v5946_v11  ;;  %v5945_v16 = vld [vmem:[%s7730_s0 + $0x4e8] ss:$100 sps:$4 sm:$0xff]  }
  0xfb   :  { %v4861_v28 = vadd.f32 %v4860_v26, %v4859_v22  ;;  %3477 = vmatmul.mubr.bf16.gmra.mrb[108].mxu0 %v5914_v5  ;;  %5364 = vmatprep.subr.bf16.mxu1 %v5947_v15 }
  0xfc   :  { %v6946_v30 = vadd.f32 %v4858_v21, %v2873_v24  ;;  %v2876_v31 = vadd.f32 %v4797_v25, %v6907_v4  ;;  %3574 = vmatmul.mubr.bf16.gmra.mrb[108].mxu1 %v5915_v9  ;;  %3484 = vmatprep.mubr.bf16.mxu0 %v5920_v10 }
  0xfd   :  { %3581 = vmatprep.mubr.bf16.mxu1 %v5922_v14  ;;  %5301 = vmatpush3.bf16.msra.mxu0 %v5948_v19 }
  0xfe   :  { %v6955_v34 = vadd.f32 %v4861_v28, %v2876_v31  ;;  %v4798_v35 = vpop.f32.mrb[4].mxu0  ;;  %5365 = vmatpush3.bf16.msra.mxu1 %v5949_v20  ;;  %5302 = vmatprep.subr.bf16.mxu0 %v5956_v27  ;;  %v5952_v20 = vld [vmem:[%s7730_s0 + $0x5b4] ss:$100 sps:$4 sm:$0xff]  }
  0xff   :  { %v4862_v41 = vpop.f32.mrb[4].mxu1  ;;  %v4799_v42 = vpop.f32.mrb[5].mxu0  ;;  %5366 = vmatprep.subr.bf16.mxu1 %v5957_v29 }
 0x100   :  { %v4800_v43 = vadd.f32 %v4799_v42, %v4798_v35  ;;  %v4863_v44 = vpop.f32.mrb[5].mxu1  ;;  %v4801_v45 = vpop.f32.mrb[6].mxu0  ;;  %v5954_v35 = vld [vmem:[%s7730_s0 + $0x5a8] ss:$100 sps:$4 sm:$0xff]  }
 0x101   :  { %v4864_v46 = vadd.f32 %v4863_v44, %v4862_v41  ;;  %v4865_v47 = vpop.f32.mrb[6].mxu1  ;;  %v4802_v48 = vpop.f32.mrb[7].mxu0  ;;  %5303 = vmatpush3.bf16.msra.mxu0 %v5958_v33  ;;  %v5962_v41 = vld [vmem:[%s7730_s0 + $0x44] ss:$100 sps:$4 sm:$0xff]  }
 0x102   :  { %v2881_v50 = vadd.f32 %v4800_v43, %v6907_v4  ;;  %v4803_v51 = vadd.f32 %v4802_v48, %v4801_v45  ;;  %v4866_v52 = vpop.f32.mrb[7].mxu1  ;;  %5367 = vmatpush3.bf16.msra.mxu1 %v5959_v38  ;;  %5416 = vmatprep.subr.bf16.mxu0 %v5966_v39  ;;  %v5955_v38 = vld [vmem:[%s7730_s0 + $0x5b0] ss:$100 sps:$4 sm:$0xff]  }
 0x103   :  { %v4867_v53 = vadd.f32 %v4866_v52, %v4865_v47  ;;  %3485 = vmatmul.mubr.bf16.gmra.mrb[112].mxu0 %v5924_v32  ;;  %5480 = vmatprep.subr.bf16.mxu1 %v5967_v40  ;;  %v5965_v48 = vld [vmem:[%s7730_s0 + $0x4c] ss:$100 sps:$4 sm:$0xff]  }
 0x104   :  { %v6976_v54 = vadd.f32 %v4864_v46, %v2881_v50  ;;  %v2884_v55 = vadd.f32 %v4803_v51, %v6907_v4  ;;  %3582 = vmatmul.mubr.bf16.gmra.mrb[112].mxu1 %v5925_v36  ;;  %3492 = vmatprep.mubr.bf16.mxu0 %v5930_v37 }
 0x105   :  { %3589 = vmatprep.mubr.bf16.mxu1 %v5932_v49 }
 0x106   :  { %v6982_v57 = vadd.f32 %v4867_v53, %v2884_v55  ;;  %v4804_v58 = vpop.f32.mrb[8].mxu0 }
 0x107   :  { %v4868_v61 = vpop.f32.mrb[8].mxu1  ;;  %v4805_v62 = vpop.f32.mrb[9].mxu0 }
 0x108   :  { %v4806_v63 = vadd.f32 %v4805_v62, %v4804_v58  ;;  %v4869_v0 = vpop.f32.mrb[9].mxu1  ;;  %v4807_v1 = vpop.f32.mrb[10].mxu0 }
 0x109   :  { %v4870_v3 = vadd.f32 %v4869_v0, %v4868_v61  ;;  %v4871_v5 = vpop.f32.mrb[10].mxu1  ;;  %v4808_v6 = vpop.f32.mrb[11].mxu0 }
 0x10a   :  { %v2889_v7 = vadd.f32 %v4806_v63, %v6907_v4  ;;  %v4809_v8 = vadd.f32 %v4808_v6, %v4807_v1  ;;  %v4872_v9 = vpop.f32.mrb[11].mxu1  ;;  %v5968_v63 = vld [vmem:[%s7729_s1 + $0x500] sm:$0xff]  }
 0x10b   :  { %v4873_v10 = vadd.f32 %v4872_v9, %v4871_v5  ;;  %3493 = vmatmul.mubr.bf16.gmra.mrb[116].mxu0 %v5934_v56  ;;  %v5960_v56 = vld [vmem:[%s7730_s0 + $0x40] ss:$100 sps:$4 sm:$0xff]   ;;  %v5972_v9 = vld [vmem:[%s7730_s0 + $0x114] ss:$100 sps:$4 sm:$0xff]  }
 0x10c   :  { %v6994_v11 = vadd.f32 %v4870_v3, %v2889_v7  ;;  %v2892_v12 = vadd.f32 %v4809_v8, %v6907_v4  ;;  %3590 = vmatmul.mubr.bf16.gmra.mrb[116].mxu1 %v5935_v59  ;;  %3500 = vmatprep.mubr.bf16.mxu0 %v5940_v60  ;;  %v5963_v60 = vld [vmem:[%s7730_s0 + $0x48] ss:$100 sps:$4 sm:$0xff]   ;;  %v5969_v8 = vld [vmem:[%s7729_s1 + $0x580] sm:$0xff]  }
 0x10d   :  { %3597 = vmatprep.mubr.bf16.mxu1 %v5942_v2  ;;  %v5970_v3 = vld [vmem:[%s7730_s0 + $0x10c] ss:$100 sps:$4 sm:$0xff]  }
 0x10e   :  { %v7000_v14 = vadd.f32 %v4873_v10, %v2892_v12  ;;  %v4810_v15 = vpop.f32.mrb[12].mxu0  ;;  %v5976_v10 = vld [vmem:[%s7729_s1 + $0x548] sm:$0xff]  }
 0x10f   :  { %v4874_v18 = vpop.f32.mrb[12].mxu1  ;;  %v4811_v19 = vpop.f32.mrb[13].mxu0 }
 0x110   :  { %v4812_v21 = vadd.f32 %v4811_v19, %v4810_v15  ;;  %v4875_v22 = vpop.f32.mrb[13].mxu1  ;;  %v4813_v23 = vpop.f32.mrb[14].mxu0 }
 0x111   :  { %v4876_v24 = vadd.f32 %v4875_v22, %v4874_v18  ;;  %v4877_v25 = vpop.f32.mrb[14].mxu1  ;;  %v4814_v26 = vpop.f32.mrb[15].mxu0  ;;  %v5978_v18 = vld [vmem:[%s7729_s1 + $0x508] sm:$0xff]  }
 0x112   :  { %v2897_v27 = vadd.f32 %v4812_v21, %v6907_v4  ;;  %v4815_v28 = vadd.f32 %v4814_v26, %v4813_v23  ;;  %v4878_v29 = vpop.f32.mrb[15].mxu1  ;;  %v5979_v21 = vld [vmem:[%s7729_s1 + $0x588] sm:$0xff]   ;;  %v5986_v23 = vld [vmem:[%s7729_s1 + $0x550] sm:$0xff]  }
 0x113   :  { %v4879_v31 = vadd.f32 %v4878_v29, %v4877_v25  ;;  %3501 = vmatmul.mubr.bf16.gmra.mrb[120].mxu0 %v5944_v13  ;;  %v5974_v22 = vld [vmem:[%s7730_s0 + $0x108] ss:$100 sps:$4 sm:$0xff]   ;;  %v5975_v26 = vld [vmem:[%s7730_s0 + $0x110] ss:$100 sps:$4 sm:$0xff]  }
 0x114   :  { %v7012_v32 = vadd.f32 %v4876_v24, %v2897_v27  ;;  %v2900_v33 = vadd.f32 %v4815_v28, %v6907_v4  ;;  %3598 = vmatmul.mubr.bf16.gmra.mrb[120].mxu1 %v5945_v16  ;;  %3508 = vmatprep.mubr.bf16.mxu0 %v5950_v17  ;;  %v5977_v16 = vld [vmem:[%s7729_s1 + $0x5c8] sm:$0xff]   ;;  %v5987_v27 = vld [vmem:[%s7729_s1 + $0x5d0] sm:$0xff]  }
 0x115   :  { %3605 = vmatprep.mubr.bf16.mxu1 %v5952_v20 }
 0x116   :  { %v7018_v36 = vadd.f32 %v4879_v31, %v2900_v33  ;;  %v4816_v37 = vpop.f32.mrb[16].mxu0  ;;  %v5980_v31 = vld [vmem:[%s7730_s0 + $0x1d4] ss:$100 sps:$4 sm:$0xff]  }
 0x117   :  { %v4880_v39 = vpop.f32.mrb[16].mxu1  ;;  %v4817_v40 = vpop.f32.mrb[17].mxu0 }
 0x118   :  { %v4818_v42 = vadd.f32 %v4817_v40, %v4816_v37  ;;  %v4881_v43 = vpop.f32.mrb[17].mxu1  ;;  %v4819_v44 = vpop.f32.mrb[18].mxu0  ;;  %v5989_v40 = vld [vmem:[%s7729_s1 + $0x590] sm:$0xff]  }
 0x119   :  { %v4882_v45 = vadd.f32 %v4881_v43, %v4880_v39  ;;  %v4883_v46 = vpop.f32.mrb[18].mxu1  ;;  %v4820_v47 = vpop.f32.mrb[19].mxu0  ;;  %v5988_v39 = vld [vmem:[%s7729_s1 + $0x510] sm:$0xff]  }
 0x11a   :  { %v2905_v49 = vadd.f32 %v4818_v42, %v6907_v4  ;;  %v4821_v50 = vadd.f32 %v4820_v47, %v4819_v44  ;;  %v4884_v51 = vpop.f32.mrb[19].mxu1  ;;  %v5996_v47 = vld [vmem:[%s7729_s1 + $0x558] sm:$0xff]  }
 0x11b   :  { %v4885_v52 = vadd.f32 %v4884_v51, %v4883_v46  ;;  %3509 = vmatmul.mubr.bf16.gmra.mrb[124].mxu0 %v5954_v35 }
 0x11c   :  { %v7030_v53 = vadd.f32 %v4882_v45, %v2905_v49  ;;  %v2908_v55 = vadd.f32 %v4821_v50, %v6907_v4  ;;  %3606 = vmatmul.mubr.bf16.gmra.mrb[124].mxu1 %v5955_v38  ;;  %3646 = vmatprep.mubr.bf16.mxu0 %v5962_v41  ;;  %v5982_v38 = vld [vmem:[%s7730_s0 + $0x1dc] ss:$100 sps:$4 sm:$0xff]  }
 0x11d   :  { %3743 = vmatprep.mubr.bf16.mxu1 %v5965_v48  ;;  %v5997_v49 = vld [vmem:[%s7729_s1 + $0x5d8] sm:$0xff]  }
 0x11e   :  { %v7036_v58 = vadd.f32 %v4885_v52, %v2908_v55  ;;  %v4822_v59 = vpop.f32.mrb[20].mxu0  ;;  %v5984_v52 = vld [vmem:[%s7730_s0 + $0x1d0] ss:$100 sps:$4 sm:$0xff]   ;;  %v5998_v55 = vld [vmem:[%s7729_s1 + $0x518] sm:$0xff]  }
 0x11f   :  { %v4886_v61 = vpop.f32.mrb[20].mxu1  ;;  %v4823_v62 = vpop.f32.mrb[21].mxu0 }
 0x120   :  { %v4824_v0 = vadd.f32 %v4823_v62, %v4822_v59  ;;  %v4887_v1 = vpop.f32.mrb[21].mxu1  ;;  %v4825_v2 = vpop.f32.mrb[22].mxu0  ;;  %v5999_v62 = vld [vmem:[%s7729_s1 + $0x598] sm:$0xff]  }
 0x121   :  { %v4888_v5 = vadd.f32 %v4887_v1, %v4886_v61  ;;  %v4889_v6 = vpop.f32.mrb[22].mxu1  ;;  %v4826_v7 = vpop.f32.mrb[23].mxu0  ;;  %v5990_v61 = vld [vmem:[%s7730_s0 + $0x29c] ss:$100 sps:$4 sm:$0xff]  }
 0x122   :  { %v2913_v12 = vadd.f32 %v4824_v0, %v6907_v4  ;;  %v4827_v13 = vadd.f32 %v4826_v7, %v4825_v2  ;;  %v4890_v15 = vpop.f32.mrb[23].mxu1  ;;  %v5992_v2 = vld [vmem:[%s7730_s0 + $0x2a4] ss:$100 sps:$4 sm:$0xff]  }
 0x123   :  { %v4891_v17 = vadd.f32 %v4890_v15, %v4889_v6  ;;  %3647 = vmatmul.mubr.bf16.vlgmr.msra.gmra.mrb[128].mxu0 %v5960_v56 }
 0x124   :  { %v7063_v19 = vadd.f32 %v4888_v5, %v2913_v12  ;;  %v2916_v20 = vadd.f32 %v4827_v13, %v6907_v4  ;;  %3744 = vmatmul.mubr.bf16.vlgmr.msra.gmra.mrb[128].mxu1 %v5963_v60  ;;  %5417 = vmatpush3.bf16.msra.mxu0 %v5968_v63  ;;  %v5985_v60 = vld [vmem:[%s7730_s0 + $0x1d8] ss:$100 sps:$4 sm:$0xff]   ;;  %v6006_v63 = vld [vmem:[%s7729_s1 + $0x560] sm:$0xff]  }
 0x125   :  { %5481 = vmatpush3.bf16.msra.mxu1 %v5969_v8  ;;  %3654 = vmatprep.mubr.bf16.mxu0 %v5970_v3  ;;  %v6007_v3 = vld [vmem:[%s7729_s1 + $0x5e0] sm:$0xff]  }
 0x126   :  { %v7075_v24 = vadd.f32 %v4891_v17, %v2916_v20  ;;  %v4828_v25 = vpop.f32.mrb[24].mxu0  ;;  %3751 = vmatprep.mubr.bf16.mxu1 %v5972_v9  ;;  %5418 = vmatprep.subr.bf16.mxu0 %v5976_v10  ;;  %v6008_v8 = vld [vmem:[%s7729_s1 + $0x520] sm:$0xff]  }
 0x127   :  { %v4892_v28 = vpop.f32.mrb[24].mxu1  ;;  %v4829_v29 = vpop.f32.mrb[25].mxu0  ;;  %5482 = vmatprep.subr.bf16.mxu1 %v5977_v16  ;;  %v6009_v9 = vld [vmem:[%s7729_s1 + $0x5a0] sm:$0xff]  }
 0x128   :  { %v4830_v33 = vadd.f32 %v4829_v29, %v4828_v25  ;;  %v4893_v35 = vpop.f32.mrb[25].mxu1  ;;  %v4831_v37 = vpop.f32.mrb[26].mxu0  ;;  %5419 = vmatpush3.bf16.msra.mxu0 %v5978_v18  ;;  %v6016_v18 = vld [vmem:[%s7729_s1 + $0x568] sm:$0xff]  }
 0x129   :  { %v4894_v41 = vadd.f32 %v4893_v35, %v4892_v28  ;;  %v4895_v42 = vpop.f32.mrb[26].mxu1  ;;  %v4832_v43 = vpop.f32.mrb[27].mxu0  ;;  %5483 = vmatpush3.bf16.msra.mxu1 %v5979_v21  ;;  %5420 = vmatprep.subr.bf16.mxu0 %v5986_v23  ;;  %v6017_v21 = vld [vmem:[%s7729_s1 + $0x5e8] sm:$0xff]  }
 0x12a   :  { %v2921_v44 = vadd.f32 %v4830_v33, %v6907_v4  ;;  %v4833_v45 = vadd.f32 %v4832_v43, %v4831_v37  ;;  %v4896_v46 = vpop.f32.mrb[27].mxu1  ;;  %5484 = vmatprep.subr.bf16.mxu1 %v5987_v27  ;;  %v6018_v25 = vld [vmem:[%s7729_s1 + $0x528] sm:$0xff]   ;;  %v6026_v33 = vld [vmem:[%s7729_s1 + $0x570] sm:$0xff]  }
 0x12b   :  { %v4897_v48 = vadd.f32 %v4896_v46, %v4895_v42  ;;  %3655 = vmatmul.mubr.bf16.gmra.mrb[132].mxu0 %v5974_v22  ;;  %v6019_v27 = vld [vmem:[%s7729_s1 + $0x5a8] sm:$0xff]  }
 0x12c   :  { %v7102_v50 = vadd.f32 %v4894_v41, %v2921_v44  ;;  %v2924_v51 = vadd.f32 %v4833_v45, %v6907_v4  ;;  %3752 = vmatmul.mubr.bf16.gmra.mrb[132].mxu1 %v5975_v26  ;;  %3662 = vmatprep.mubr.bf16.mxu0 %v5980_v31  ;;  %v5994_v26 = vld [vmem:[%s7730_s0 + $0x298] ss:$100 sps:$4 sm:$0xff]   ;;  %v6000_v31 = vld [vmem:[%s7730_s0 + $0x364] ss:$100 sps:$4 sm:$0xff]  }
 0x12d   :  { %3759 = vmatprep.mubr.bf16.mxu1 %v5982_v38  ;;  %5421 = vmatpush3.bf16.msra.mxu0 %v5988_v39  ;;  %v6002_v38 = vld [vmem:[%s7730_s0 + $0x36c] ss:$100 sps:$4 sm:$0xff]  }
 0x12e   :  { %v7111_v56 = vadd.f32 %v4897_v48, %v2924_v51  ;;  %v4834_v59 = vpop.f32.mrb[28].mxu0  ;;  %5485 = vmatpush3.bf16.msra.mxu1 %v5989_v40  ;;  %5422 = vmatprep.subr.bf16.mxu0 %v5996_v47  ;;  %v6027_v39 = vld [vmem:[%s7729_s1 + $0x5f0] sm:$0xff]  }
 0x12f   :  { %v4898_v0 = vpop.f32.mrb[28].mxu1  ;;  %v4835_v1 = vpop.f32.mrb[29].mxu0  ;;  %5486 = vmatprep.subr.bf16.mxu1 %v5997_v49  ;;  %v6028_v40 = vld [vmem:[%s7729_s1 + $0x530] sm:$0xff]  }
 0x130   :  { %v4836_v5 = vadd.f32 %v4835_v1, %v4834_v59  ;;  %v4899_v6 = vpop.f32.mrb[29].mxu1  ;;  %v4837_v7 = vpop.f32.mrb[30].mxu0  ;;  %v6029_v47 = vld [vmem:[%s7729_s1 + $0x5b0] sm:$0xff]   ;;  %v6037_v59 = vld [vmem:[%s7729_s1 + $0x5f8] sm:$0xff]  }
 0x131   :  { %v4900_v10 = vadd.f32 %v4899_v6, %v4898_v0  ;;  %v4901_v12 = vpop.f32.mrb[30].mxu1  ;;  %v4838_v13 = vpop.f32.mrb[31].mxu0  ;;  %5423 = vmatpush3.bf16.msra.mxu0 %v5998_v55  ;;  %v6010_v6 = vld [vmem:[%s7730_s0 + $0x42c] ss:$100 sps:$4 sm:$0xff]  }
 0x132   :  { %v2929_v15 = vadd.f32 %v4836_v5, %v6907_v4  ;;  %v4839_v16 = vadd.f32 %v4838_v13, %v4837_v7  ;;  %v4902_v17 = vpop.f32.mrb[31].mxu1  ;;  %5487 = vmatpush3.bf16.msra.mxu1 %v5999_v62  ;;  %5424 = vmatprep.subr.bf16.mxu0 %v6006_v63  ;;  %v6004_v62 = vld [vmem:[%s7730_s0 + $0x360] ss:$100 sps:$4 sm:$0xff]   ;;  %v6039_v63 = vld [vmem:[%s7729_s1 + $0x5b8] sm:$0xff]   ;;  %v6005_v5 = vld [vmem:[%s7730_s0 + $0x368] ss:$100 sps:$4 sm:$0xff]  }
 0x133   :  { %v4903_v20 = vadd.f32 %v4902_v17, %v4901_v12  ;;  %3663 = vmatmul.mubr.bf16.gmra.mrb[136].mxu0 %v5984_v52  ;;  %5488 = vmatprep.subr.bf16.mxu1 %v6007_v3  ;;  %v6036_v52 = vld [vmem:[%s7729_s1 + $0x578] sm:$0xff]  }
 0x134   :  { %v7144_v22 = vadd.f32 %v4900_v10, %v2929_v15  ;;  %v2932_v23 = vadd.f32 %v4839_v16, %v6907_v4  ;;  %3760 = vmatmul.mubr.bf16.gmra.mrb[136].mxu1 %v5985_v60  ;;  %3670 = vmatprep.mubr.bf16.mxu0 %v5990_v61  ;;  %v5995_v4 = vld [vmem:[%s7730_s0 + $0x2a0] ss:$100 sps:$4 sm:$0xff]   ;;  %v6012_v15 = vld [vmem:[%s7730_s0 + $0x434] ss:$100 sps:$4 sm:$0xff]  }
 0x135   :  { %3767 = vmatprep.mubr.bf16.mxu1 %v5992_v2  ;;  %5425 = vmatpush3.bf16.msra.mxu0 %v6008_v8 }
 0x136   :  { %v7156_v28 = vadd.f32 %v4903_v20, %v2932_v23  ;;  %v4920_v29 = vpop.f32.mrb[32].mxu0  ;;  %5489 = vmatpush3.bf16.msra.mxu1 %v6009_v9  ;;  %5426 = vmatprep.subr.bf16.mxu0 %v6016_v18 }
 0x137   :  { %v4984_v35 = vpop.f32.mrb[32].mxu1  ;;  %v4921_v37 = vpop.f32.mrb[33].mxu0  ;;  %5490 = vmatprep.subr.bf16.mxu1 %v6017_v21 }
 0x138   :  { %v4922_v41 = vadd.f32 %v4921_v37, %v4920_v29  ;;  %v4985_v42 = vpop.f32.mrb[33].mxu1  ;;  %v4923_v43 = vpop.f32.mrb[34].mxu0 }
 0x139   :  { %v4986_v44 = vadd.f32 %v4985_v42, %v4984_v35  ;;  %v4987_v45 = vpop.f32.mrb[34].mxu1  ;;  %v4924_v46 = vpop.f32.mrb[35].mxu0  ;;  %5427 = vmatpush3.bf16.msra.mxu0 %v6018_v25 }
 0x13a   :  { %v3067_v48 = vadd.f32 %v4922_v41, %v6946_v30  ;;  %v4925_v49 = vadd.f32 %v4924_v46, %v4923_v43  ;;  %v4988_v51 = vpop.f32.mrb[35].mxu1  ;;  %5491 = vmatpush3.bf16.msra.mxu1 %v6019_v27  ;;  %5428 = vmatprep.subr.bf16.mxu0 %v6026_v33  ;;  %v6038_v30 = vld [vmem:[%s7729_s1 + $0x538] sm:$0xff]  }
 0x13b   :  { %v4989_v55 = vadd.f32 %v4988_v51, %v4987_v45  ;;  %3671 = vmatmul.mubr.bf16.gmra.mrb[140].mxu0 %v5994_v26  ;;  %5492 = vmatprep.subr.bf16.mxu1 %v6027_v39 }
 0x13c   :  { %v7186_v60 = vadd.f32 %v4986_v44, %v3067_v48  ;;  %v3070_v61 = vadd.f32 %v4925_v49, %v6955_v34  ;;  %3768 = vmatmul.mubr.bf16.gmra.mrb[140].mxu1 %v5995_v4  ;;  %3678 = vmatprep.mubr.bf16.mxu0 %v6000_v31  ;;  %v7203_v34 = vld [vmem:[%s7729_s1 + $0x600] sm:$0xff]   ;;  %v6015_v4 = vld [vmem:[%s7730_s0 + $0x430] ss:$100 sps:$4 sm:$0xff]  }
 0x13d   :  { %3775 = vmatprep.mubr.bf16.mxu1 %v6002_v38  ;;  %5429 = vmatpush3.bf16.msra.mxu0 %v6028_v40  ;;  %v6022_v40 = vld [vmem:[%s7730_s0 + $0x4fc] ss:$100 sps:$4 sm:$0xff]  }
 0x13e   :  { %v7198_v0 = vadd.f32 %v4989_v55, %v3070_v61  ;;  %v4926_v1 = vpop.f32.mrb[36].mxu0  ;;  %5493 = vmatpush3.bf16.msra.mxu1 %v6029_v47  ;;  %5430 = vmatprep.subr.bf16.mxu0 %v6036_v52  ;;  %v6024_v47 = vld [vmem:[%s7730_s0 + $0x4f0] ss:$100 sps:$4 sm:$0xff]  }
 0x13f   :  { %v4990_v2 = vpop.f32.mrb[36].mxu1  ;;  %v4927_v3 = vpop.f32.mrb[37].mxu0  ;;  %5494 = vmatprep.subr.bf16.mxu1 %v6037_v59 }
 0x140   :  { %v4928_v7 = vadd.f32 %v4927_v3, %v4926_v1  ;;  %v4991_v8 = vpop.f32.mrb[37].mxu1  ;;  %v4929_v9 = vpop.f32.mrb[38].mxu0 }
 0x141   :  { %v4992_v10 = vadd.f32 %v4991_v8, %v4990_v2  ;;  %v4993_v12 = vpop.f32.mrb[38].mxu1  ;;  %v4930_v13 = vpop.f32.mrb[39].mxu0  ;;  %5431 = vmatpush3.bf16.msra.mxu0 %v6038_v30  ;;  %v6032_v30 = vld [vmem:[%s7730_s0 + $0x5c4] ss:$100 sps:$4 sm:$0xff]  }
 0x142   :  { %v3075_v16 = vadd.f32 %v4928_v7, %v6976_v54  ;;  %v4931_v17 = vadd.f32 %v4930_v13, %v4929_v9  ;;  %v4994_v18 = vpop.f32.mrb[39].mxu1  ;;  %5495 = vmatpush3.bf16.msra.mxu1 %v6039_v63  ;;  %5560 = vmatprep.subr.bf16.mxu0 %v7203_v34  ;;  %v6014_v54 = vld [vmem:[%s7730_s0 + $0x428] ss:$100 sps:$4 sm:$0xff]  }
 0x143   :  { %v4995_v20 = vadd.f32 %v4994_v18, %v4993_v12  ;;  %3679 = vmatmul.mubr.bf16.gmra.mrb[144].mxu0 %v6004_v62  ;;  %5592 = vmatprep.subr.bf16.mxu1 %v7203_v34  ;;  %v6035_v18 = vld [vmem:[%s7730_s0 + $0x5c0] ss:$100 sps:$4 sm:$0xff]  }
 0x144   :  { %v7217_v21 = vadd.f32 %v4992_v10, %v3075_v16  ;;  %v3078_v23 = vadd.f32 %v4931_v17, %v6982_v57  ;;  %3776 = vmatmul.mubr.bf16.gmra.mrb[144].mxu1 %v6005_v5  ;;  %3686 = vmatprep.mubr.bf16.mxu0 %v6010_v6  ;;  %v6020_v57 = vld [vmem:[%s7730_s0 + $0x4f4] ss:$100 sps:$4 sm:$0xff]  }
 0x145   :  { %3783 = vmatprep.mubr.bf16.mxu1 %v6012_v15 }
 0x146   :  { %v7220_v25 = vadd.f32 %v4995_v20, %v3078_v23  ;;  %v4932_v26 = vpop.f32.mrb[40].mxu0 }
 0x147   :  { %v4996_v27 = vpop.f32.mrb[40].mxu1  ;;  %v4933_v29 = vpop.f32.mrb[41].mxu0 }
 0x148   :  { %v4934_v31 = vadd.f32 %v4933_v29, %v4932_v26  ;;  %v4997_v33 = vpop.f32.mrb[41].mxu1  ;;  %v4935_v35 = vpop.f32.mrb[42].mxu0 }
 0x149   :  { %v4998_v37 = vadd.f32 %v4997_v33, %v4996_v27  ;;  %v4999_v38 = vpop.f32.mrb[42].mxu1  ;;  %v4936_v39 = vpop.f32.mrb[43].mxu0 }
 0x14a   :  { %v3083_v41 = vadd.f32 %v4934_v31, %v6994_v11  ;;  %v4937_v42 = vadd.f32 %v4936_v39, %v4935_v35  ;;  %v5000_v43 = vpop.f32.mrb[43].mxu1  ;;  %v6025_v11 = vld [vmem:[%s7730_s0 + $0x4f8] ss:$100 sps:$4 sm:$0xff]  }
 0x14b   :  { %v5001_v44 = vadd.f32 %v5000_v43, %v4999_v38  ;;  %3687 = vmatmul.mubr.bf16.gmra.mrb[148].mxu0 %v6014_v54  ;;  %v6045_v54 = vld [vmem:[%s7730_s0 + $0x5c] ss:$100 sps:$4 sm:$0xff]  }
 0x14c   :  { %v7235_v45 = vadd.f32 %v4998_v37, %v3083_v41  ;;  %v3086_v46 = vadd.f32 %v4937_v42, %v7000_v14  ;;  %3784 = vmatmul.mubr.bf16.gmra.mrb[148].mxu1 %v6015_v4  ;;  %3694 = vmatprep.mubr.bf16.mxu0 %v6020_v57  ;;  %v6030_v14 = vld [vmem:[%s7730_s0 + $0x5bc] ss:$100 sps:$4 sm:$0xff]  }
 0x14d   :  { %3791 = vmatprep.mubr.bf16.mxu1 %v6022_v40  ;;  %v6043_v43 = vld [vmem:[%s7730_s0 + $0x58] ss:$100 sps:$4 sm:$0xff]  }
 0x14e   :  { %v7241_v48 = vadd.f32 %v5001_v44, %v3086_v46  ;;  %v4938_v49 = vpop.f32.mrb[44].mxu0 }
 0x14f   :  { %v5002_v51 = vpop.f32.mrb[44].mxu1  ;;  %v4939_v52 = vpop.f32.mrb[45].mxu0 }
 0x150   :  { %v4940_v55 = vadd.f32 %v4939_v52, %v4938_v49  ;;  %v5003_v59 = vpop.f32.mrb[45].mxu1  ;;  %v4941_v61 = vpop.f32.mrb[46].mxu0  ;;  %v6049_v52 = vld [vmem:[%s7730_s0 + $0x124] ss:$100 sps:$4 sm:$0xff]  }
 0x151   :  { %v5004_v62 = vadd.f32 %v5003_v59, %v5002_v51  ;;  %v5005_v63 = vpop.f32.mrb[46].mxu1  ;;  %v4942_v1 = vpop.f32.mrb[47].mxu0 }
 0x152   :  { %v3091_v2 = vadd.f32 %v4940_v55, %v7012_v32  ;;  %v4943_v3 = vadd.f32 %v4942_v1, %v4941_v61  ;;  %v5006_v5 = vpop.f32.mrb[47].mxu1  ;;  %v6034_v32 = vld [vmem:[%s7730_s0 + $0x5b8] ss:$100 sps:$4 sm:$0xff]  }
 0x153   :  { %v5007_v6 = vadd.f32 %v5006_v5, %v5005_v63  ;;  %3695 = vmatmul.mubr.bf16.gmra.mrb[152].mxu0 %v6024_v47  ;;  %v6047_v47 = vld [vmem:[%s7730_s0 + $0x11c] ss:$100 sps:$4 sm:$0xff]  }
 0x154   :  { %v7253_v7 = vadd.f32 %v5004_v62, %v3091_v2  ;;  %v3094_v8 = vadd.f32 %v4943_v3, %v7018_v36  ;;  %3792 = vmatmul.mubr.bf16.gmra.mrb[152].mxu1 %v6025_v11  ;;  %3702 = vmatprep.mubr.bf16.mxu0 %v6030_v14  ;;  %v6042_v36 = vld [vmem:[%s7730_s0 + $0x54] ss:$100 sps:$4 sm:$0xff]   ;;  %v6053_v14 = vld [vmem:[%s7729_s1 + $0x608] sm:$0xff]   ;;  %v6052_v5 = vld [vmem:[%s7730_s0 + $0x120] ss:$100 sps:$4 sm:$0xff]  }
 0x155   :  { %3799 = vmatprep.mubr.bf16.mxu1 %v6032_v30 }
 0x156   :  { %v7256_v9 = vadd.f32 %v5007_v6, %v3094_v8  ;;  %v4944_v10 = vpop.f32.mrb[48].mxu0  ;;  %v6054_v6 = vld [vmem:[%s7730_s0 + $0x1e4] ss:$100 sps:$4 sm:$0xff]  }
 0x157   :  { %v5008_v12 = vpop.f32.mrb[48].mxu1  ;;  %v4945_v13 = vpop.f32.mrb[49].mxu0 }
 0x158   :  { %v4946_v15 = vadd.f32 %v4945_v13, %v4944_v10  ;;  %v5009_v16 = vpop.f32.mrb[49].mxu1  ;;  %v4947_v17 = vpop.f32.mrb[50].mxu0  ;;  %v6056_v13 = vld [vmem:[%s7730_s0 + $0x1ec] ss:$100 sps:$4 sm:$0xff]  }
 0x159   :  { %v5010_v20 = vadd.f32 %v5009_v16, %v5008_v12  ;;  %v5011_v23 = vpop.f32.mrb[50].mxu1  ;;  %v4948_v26 = vpop.f32.mrb[51].mxu0 }
 0x15a   :  { %v3099_v27 = vadd.f32 %v4946_v15, %v7030_v53  ;;  %v4949_v29 = vadd.f32 %v4948_v26, %v4947_v17  ;;  %v5012_v4 = vpop.f32.mrb[51].mxu1  ;;  %v6040_v53 = vld [vmem:[%s7730_s0 + $0x50] ss:$100 sps:$4 sm:$0xff]   ;;  %v6067_v17 = vld [vmem:[%s7729_s1 + $0x618] sm:$0xff]   ;;  %v6074_v26 = vld [vmem:[%s7729_s1 + $0x620] sm:$0xff]  }
 0x15b   :  { %v5013_v57 = vadd.f32 %v5012_v4, %v5011_v23  ;;  %3703 = vmatmul.mubr.bf16.gmra.mrb[156].mxu0 %v6034_v32 }
 0x15c   :  { %v7271_v31 = vadd.f32 %v5010_v20, %v3099_v27  ;;  %v3102_v33 = vadd.f32 %v4949_v29, %v7036_v58  ;;  %3800 = vmatmul.mubr.bf16.gmra.mrb[156].mxu1 %v6035_v18  ;;  %3840 = vmatprep.mubr.bf16.mxu0 %v6042_v36  ;;  %v6058_v29 = vld [vmem:[%s7730_s0 + $0x1e0] ss:$100 sps:$4 sm:$0xff]  }
 0x15d   :  { %3937 = vmatprep.mubr.bf16.mxu1 %v6045_v54 }
 0x15e   :  { %v7274_v35 = vadd.f32 %v5013_v57, %v3102_v33  ;;  %v4950_v37 = vpop.f32.mrb[52].mxu0  ;;  %v6059_v33 = vld [vmem:[%s7730_s0 + $0x1e8] ss:$100 sps:$4 sm:$0xff]  }
 0x15f   :  { %v5014_v38 = vpop.f32.mrb[52].mxu1  ;;  %v4951_v39 = vpop.f32.mrb[53].mxu0 }
 0x160   :  { %v4952_v40 = vadd.f32 %v4951_v39, %v4950_v37  ;;  %v5015_v41 = vpop.f32.mrb[53].mxu1  ;;  %v4953_v42 = vpop.f32.mrb[54].mxu0  ;;  %v6061_v37 = vld [vmem:[%s7730_s0 + $0x2ac] ss:$100 sps:$4 sm:$0xff]  }
 0x161   :  { %v5016_v58 = vadd.f32 %v5015_v41, %v5014_v38  ;;  %v5017_v44 = vpop.f32.mrb[54].mxu1  ;;  %v4954_v46 = vpop.f32.mrb[55].mxu0 }
 0x162   :  { %v3107_v49 = vadd.f32 %v4952_v40, %v7063_v19  ;;  %v4955_v11 = vadd.f32 %v4954_v46, %v4953_v42  ;;  %v5018_v51 = vpop.f32.mrb[55].mxu1  ;;  %v6060_v19 = vld [vmem:[%s7729_s1 + $0x610] sm:$0xff]  }
 0x163   :  { %v5019_v55 = vadd.f32 %v5018_v51, %v5017_v44  ;;  %3841 = vmatmul.mubr.bf16.vlgmr.msra.gmra.mrb[160].mxu0 %v6040_v53  ;;  %v6063_v40 = vld [vmem:[%s7730_s0 + $0x2b4] ss:$100 sps:$4 sm:$0xff]  }
 0x164   :  { %v7292_v59 = vadd.f32 %v5016_v58, %v3107_v49  ;;  %v3110_v61 = vadd.f32 %v4955_v11, %v7075_v24  ;;  %3938 = vmatmul.mubr.bf16.vlgmr.msra.gmra.mrb[160].mxu1 %v6043_v43  ;;  %5561 = vmatpush3.bf16.msra.mxu0 %v7203_v34  ;;  %v6051_v24 = vld [vmem:[%s7730_s0 + $0x118] ss:$100 sps:$4 sm:$0xff]   ;;  %v6081_v58 = vld [vmem:[%s7729_s1 + $0x628] sm:$0xff]   ;;  %v6088_v11 = vld [vmem:[%s7729_s1 + $0x630] sm:$0xff]  }
 0x165   :  { %5600 = vmatpush3.bf16.msra.mxu1 %v7203_v34  ;;  %3848 = vmatprep.mubr.bf16.mxu0 %v6047_v47 }
 0x166   :  { %v7300_v30 = vadd.f32 %v5019_v55, %v3110_v61  ;;  %v4956_v62 = vpop.f32.mrb[56].mxu0  ;;  %3945 = vmatprep.mubr.bf16.mxu1 %v6049_v52  ;;  %5562 = vmatprep.subr.bf16.mxu0 %v6053_v14 }
 0x167   :  { %v5020_v63 = vpop.f32.mrb[56].mxu1  ;;  %v4957_v1 = vpop.f32.mrb[57].mxu0  ;;  %5593 = vmatprep.subr.bf16.mxu1 %v6053_v14 }
 0x168   :  { %v4958_v2 = vadd.f32 %v4957_v1, %v4956_v62  ;;  %v5021_v3 = vpop.f32.mrb[57].mxu1  ;;  %v4959_v34 = vpop.f32.mrb[58].mxu0  ;;  %5563 = vmatpush3.bf16.msra.mxu0 %v6053_v14  ;;  %v6068_v62 = vld [vmem:[%s7730_s0 + $0x374] ss:$100 sps:$4 sm:$0xff]  }
 0x169   :  { %v5022_v8 = vadd.f32 %v5021_v3, %v5020_v63  ;;  %v5023_v10 = vpop.f32.mrb[58].mxu1  ;;  %v4960_v12 = vpop.f32.mrb[59].mxu0  ;;  %5601 = vmatpush3.bf16.msra.mxu1 %v6053_v14  ;;  %5564 = vmatprep.subr.bf16.mxu0 %v6060_v19  ;;  %v6065_v14 = vld [vmem:[%s7730_s0 + $0x2a8] ss:$100 sps:$4 sm:$0xff]  }
 0x16a   :  { %v3115_v32 = vadd.f32 %v4958_v2, %v7102_v50  ;;  %v4961_v15 = vadd.f32 %v4960_v12, %v4959_v34  ;;  %v5024_v16 = vpop.f32.mrb[59].mxu1  ;;  %5594 = vmatprep.subr.bf16.mxu1 %v6060_v19  ;;  %v6070_v2 = vld [vmem:[%s7730_s0 + $0x37c] ss:$100 sps:$4 sm:$0xff]  }
 0x16b   :  { %v5025_v18 = vadd.f32 %v5024_v16, %v5023_v10  ;;  %3849 = vmatmul.mubr.bf16.gmra.mrb[164].mxu0 %v6051_v24  ;;  %v6072_v16 = vld [vmem:[%s7730_s0 + $0x370] ss:$100 sps:$4 sm:$0xff]  }
 0x16c   :  { %v7318_v36 = vadd.f32 %v5022_v8, %v3115_v32  ;;  %v3118_v20 = vadd.f32 %v4961_v15, %v7111_v56  ;;  %3946 = vmatmul.mubr.bf16.gmra.mrb[164].mxu1 %v6052_v5  ;;  %3856 = vmatprep.mubr.bf16.mxu0 %v6054_v6  ;;  %v6095_v6 = vld [vmem:[%s7729_s1 + $0x638] sm:$0xff]  }
 0x16d   :  { %3953 = vmatprep.mubr.bf16.mxu1 %v6056_v13  ;;  %5565 = vmatpush3.bf16.msra.mxu0 %v6060_v19 }
 0x16e   :  { %v7321_v23 = vadd.f32 %v5025_v18, %v3118_v20  ;;  %v4962_v50 = vpop.f32.mrb[60].mxu0  ;;  %5602 = vmatpush3.bf16.msra.mxu1 %v6060_v19  ;;  %5566 = vmatprep.subr.bf16.mxu0 %v6067_v17  ;;  %v6066_v19 = vld [vmem:[%s7730_s0 + $0x2b0] ss:$100 sps:$4 sm:$0xff]  }
 0x16f   :  { %v5026_v54 = vpop.f32.mrb[60].mxu1  ;;  %v4963_v27 = vpop.f32.mrb[61].mxu0  ;;  %5595 = vmatprep.subr.bf16.mxu1 %v6067_v17 }
 0x170   :  { %v4964_v56 = vadd.f32 %v4963_v27, %v4962_v50  ;;  %v5027_v4 = vpop.f32.mrb[61].mxu1  ;;  %v4965_v57 = vpop.f32.mrb[62].mxu0  ;;  %v6075_v50 = vld [vmem:[%s7730_s0 + $0x43c] ss:$100 sps:$4 sm:$0xff]  }
 0x171   :  { %v5028_v38 = vadd.f32 %v5027_v4, %v5026_v54  ;;  %v5029_v39 = vpop.f32.mrb[62].mxu1  ;;  %v4966_v53 = vpop.f32.mrb[63].mxu0  ;;  %5567 = vmatpush3.bf16.msra.mxu0 %v6067_v17 }
 0x172   :  { %v3123_v41 = vadd.f32 %v4964_v56, %v7144_v22  ;;  %v4967_v42 = vadd.f32 %v4966_v53, %v4965_v57  ;;  %v5030_v43 = vpop.f32.mrb[63].mxu1  ;;  %5603 = vmatpush3.bf16.msra.mxu1 %v6067_v17  ;;  %5568 = vmatprep.subr.bf16.mxu0 %v6074_v26 }
 0x173   :  { %v5031_v44 = vadd.f32 %v5030_v43, %v5029_v39  ;;  %3857 = vmatmul.mubr.bf16.gmra.mrb[168].mxu0 %v6058_v29  ;;  %5596 = vmatprep.subr.bf16.mxu1 %v6074_v26  ;;  %v6077_v29 = vld [vmem:[%s7730_s0 + $0x444] ss:$100 sps:$4 sm:$0xff]  }
 0x174   :  { %v7342_v46 = vadd.f32 %v5028_v38, %v3123_v41  ;;  %v3126_v47 = vadd.f32 %v4967_v42, %v7156_v28  ;;  %3954 = vmatmul.mubr.bf16.gmra.mrb[168].mxu1 %v6059_v33  ;;  %3864 = vmatprep.mubr.bf16.mxu0 %v6061_v37 }
 0x175   :  { %3961 = vmatprep.mubr.bf16.mxu1 %v6063_v40  ;;  %5569 = vmatpush3.bf16.msra.mxu0 %v6074_v26 }
 0x176   :  { %v7345_v22 = vadd.f32 %v5031_v44, %v3126_v47  ;;  %v5048_v49 = vpop.f32.mrb[64].mxu0  ;;  %5604 = vmatpush3.bf16.msra.mxu1 %v6074_v26  ;;  %5570 = vmatprep.subr.bf16.mxu0 %v6081_v58  ;;  %v6080_v44 = vld [vmem:[%s7730_s0 + $0x440] ss:$100 sps:$4 sm:$0xff]  }
 0x177   :  { %v5112_v51 = vpop.f32.mrb[64].mxu1  ;;  %v5049_v52 = vpop.f32.mrb[65].mxu0  ;;  %5597 = vmatprep.subr.bf16.mxu1 %v6081_v58 }
 0x178   :  { %v5050_v28 = vadd.f32 %v5049_v52, %v5048_v49  ;;  %v5113_v55 = vpop.f32.mrb[65].mxu1  ;;  %v5051_v61 = vpop.f32.mrb[66].mxu0 }
 0x179   :  { %v5114_v63 = vadd.f32 %v5113_v55, %v5112_v51  ;;  %v5115_v1 = vpop.f32.mrb[66].mxu1  ;;  %v5052_v24 = vpop.f32.mrb[67].mxu0  ;;  %5571 = vmatpush3.bf16.msra.mxu0 %v6081_v58  ;;  %v6084_v51 = vld [vmem:[%s7730_s0 + $0x50c] ss:$100 sps:$4 sm:$0xff]  }
 0x17a   :  { %v3261_v3 = vadd.f32 %v5050_v28, %v7186_v60  ;;  %v5053_v34 = vadd.f32 %v5052_v24, %v5051_v61  ;;  %v5116_v5 = vpop.f32.mrb[67].mxu1  ;;  %5605 = vmatpush3.bf16.msra.mxu1 %v6081_v58  ;;  %5572 = vmatprep.subr.bf16.mxu0 %v6088_v11 }
 0x17b   :  { %v5117_v8 = vadd.f32 %v5116_v5, %v5115_v1  ;;  %3865 = vmatmul.mubr.bf16.gmra.mrb[172].mxu0 %v6065_v14  ;;  %5598 = vmatprep.subr.bf16.mxu1 %v6088_v11  ;;  %v6087_v5 = vld [vmem:[%s7730_s0 + $0x508] ss:$100 sps:$4 sm:$0xff]  }
 0x17c   :  { %v7366_v10 = vadd.f32 %v5114_v63, %v3261_v3  ;;  %v3264_v12 = vadd.f32 %v5053_v34, %v7198_v0  ;;  %3962 = vmatmul.mubr.bf16.gmra.mrb[172].mxu1 %v6066_v19  ;;  %3872 = vmatprep.mubr.bf16.mxu0 %v6068_v62  ;;  %v6073_v0 = vld [vmem:[%s7730_s0 + $0x378] ss:$100 sps:$4 sm:$0xff]  }
 0x17d   :  { %3969 = vmatprep.mubr.bf16.mxu1 %v6070_v2  ;;  %5573 = vmatpush3.bf16.msra.mxu0 %v6088_v11 }
 0x17e   :  { %v7369_v60 = vadd.f32 %v5117_v8, %v3264_v12  ;;  %v5054_v13 = vpop.f32.mrb[68].mxu0  ;;  %5606 = vmatpush3.bf16.msra.mxu1 %v6088_v11  ;;  %5574 = vmatprep.subr.bf16.mxu0 %v6095_v6 }
 0x17f   :  { %v5118_v32 = vpop.f32.mrb[68].mxu1  ;;  %v5055_v15 = vpop.f32.mrb[69].mxu0  ;;  %5599 = vmatprep.subr.bf16.mxu1 %v6095_v6 }
 0x180   :  { %v5056_v17 = vadd.f32 %v5055_v15, %v5054_v13  ;;  %v5119_v18 = vpop.f32.mrb[69].mxu1  ;;  %v5057_v20 = vpop.f32.mrb[70].mxu0  ;;  %v6091_v13 = vld [vmem:[%s7730_s0 + $0x5d4] ss:$100 sps:$4 sm:$0xff]  }
 0x181   :  { %v5120_v26 = vadd.f32 %v5119_v18, %v5118_v32  ;;  %v5121_v54 = vpop.f32.mrb[70].mxu1  ;;  %v5058_v27 = vpop.f32.mrb[71].mxu0  ;;  %5575 = vmatpush3.bf16.msra.mxu0 %v6095_v6 }
 0x182   :  { %v3269_v56 = vadd.f32 %v5056_v17, %v7217_v21  ;;  %v5059_v4 = vadd.f32 %v5058_v27, %v5057_v20  ;;  %v5122_v57 = vpop.f32.mrb[71].mxu1  ;;  %5607 = vmatpush3.bf16.msra.mxu1 %v6095_v6  ;;  %v6079_v21 = vld [vmem:[%s7730_s0 + $0x438] ss:$100 sps:$4 sm:$0xff]  }
 0x183   :  { %v5123_v33 = vadd.f32 %v5122_v57, %v5121_v54  ;;  %3873 = vmatmul.mubr.bf16.gmra.mrb[176].mxu0 %v6072_v16 }
 0x184   :  { %v7384_v37 = vadd.f32 %v5120_v26, %v3269_v56  ;;  %v3272_v38 = vadd.f32 %v5059_v4, %v7220_v25  ;;  %3970 = vmatmul.mubr.bf16.gmra.mrb[176].mxu1 %v6073_v0  ;;  %3880 = vmatprep.mubr.bf16.mxu0 %v6075_v50  ;;  %v6082_v25 = vld [vmem:[%s7730_s0 + $0x504] ss:$100 sps:$4 sm:$0xff]   ;;  %v6094_v4 = vld [vmem:[%s7730_s0 + $0x5d0] ss:$100 sps:$4 sm:$0xff]  }
 0x185   :  { %3977 = vmatprep.mubr.bf16.mxu1 %v6077_v29 }
 0x186   :  { %v7387_v39 = vadd.f32 %v5123_v33, %v3272_v38  ;;  %v5060_v53 = vpop.f32.mrb[72].mxu0 }
 0x187   :  { %v5124_v40 = vpop.f32.mrb[72].mxu1  ;;  %v5061_v41 = vpop.f32.mrb[73].mxu0 }
 0x188   :  { %v5062_v42 = vadd.f32 %v5061_v41, %v5060_v53  ;;  %v5125_v43 = vpop.f32.mrb[73].mxu1  ;;  %v5063_v58 = vpop.f32.mrb[74].mxu0  ;;  %v6097_v53 = vld [vmem:[%s7730_s0 + $0x380] ss:$100 sps:$4 sm:$0xff]  }
 0x189   :  { %v5126_v47 = vadd.f32 %v5125_v43, %v5124_v40  ;;  %v5127_v49 = vpop.f32.mrb[74].mxu1  ;;  %v5064_v11 = vpop.f32.mrb[75].mxu0 }
 0x18a   :  { %v3277_v52 = vadd.f32 %v5062_v42, %v7235_v45  ;;  %v5065_v14 = vadd.f32 %v5064_v11, %v5063_v58  ;;  %v5128_v28 = vpop.f32.mrb[75].mxu1  ;;  %v6086_v45 = vld [vmem:[%s7730_s0 + $0x500] ss:$100 sps:$4 sm:$0xff]  }
 0x18b   :  { %v5129_v55 = vadd.f32 %v5128_v28, %v5127_v49  ;;  %3881 = vmatmul.mubr.bf16.gmra.mrb[180].mxu0 %v6079_v21 }
 0x18c   :  { %v7402_v61 = vadd.f32 %v5126_v47, %v3277_v52  ;;  %v3280_v19 = vadd.f32 %v5065_v14, %v7241_v48  ;;  %3978 = vmatmul.mubr.bf16.gmra.mrb[180].mxu1 %v6080_v44  ;;  %3888 = vmatprep.mubr.bf16.mxu0 %v6082_v25  ;;  %v6089_v48 = vld [vmem:[%s7730_s0 + $0x5cc] ss:$100 sps:$4 sm:$0xff]  }
 0x18d   :  { %3985 = vmatprep.mubr.bf16.mxu1 %v6084_v51  ;;  %v6099_v14 = vld [vmem:[%s7730_s0 + $0x448] ss:$100 sps:$4 sm:$0xff]  }
 0x18e   :  { %v7405_v62 = vadd.f32 %v5129_v55, %v3280_v19  ;;  %v5066_v63 = vpop.f32.mrb[76].mxu0 }
 0x18f   :  { %v5130_v1 = vpop.f32.mrb[76].mxu1  ;;  %v5067_v24 = vpop.f32.mrb[77].mxu0 }
 0x190   :  { %v5068_v2 = vadd.f32 %v5067_v24, %v5066_v63  ;;  %v5131_v3 = vpop.f32.mrb[77].mxu1  ;;  %v5069_v34 = vpop.f32.mrb[78].mxu0  ;;  %v6101_v63 = vld [vmem:[%s7730_s0 + $0x510] ss:$100 sps:$4 sm:$0xff]  }
 0x191   :  { %v5132_v6 = vadd.f32 %v5131_v3, %v5130_v1  ;;  %v5133_v8 = vpop.f32.mrb[78].mxu1  ;;  %v5070_v12 = vpop.f32.mrb[79].mxu0 }
 0x192   :  { %v3285_v32 = vadd.f32 %v5068_v2, %v7253_v7  ;;  %v5071_v15 = vadd.f32 %v5070_v12, %v5069_v34  ;;  %v5134_v16 = vpop.f32.mrb[79].mxu1  ;;  %v6093_v7 = vld [vmem:[%s7730_s0 + $0x5c8] ss:$100 sps:$4 sm:$0xff]  }
 0x193   :  { %v5135_v17 = vadd.f32 %v5134_v16, %v5133_v8  ;;  %3889 = vmatmul.mubr.bf16.gmra.mrb[184].mxu0 %v6086_v45 }
 0x194   :  { %v7420_v18 = vadd.f32 %v5132_v6, %v3285_v32  ;;  %v3288_v20 = vadd.f32 %v5071_v15, %v7256_v9  ;;  %3986 = vmatmul.mubr.bf16.gmra.mrb[184].mxu1 %v6087_v5  ;;  %3896 = vmatprep.mubr.bf16.mxu0 %v6089_v48  ;;  %v6096_v9 = vld [vmem:[%s7730_s0 + $0x60] ss:$100 sps:$4 sm:$0xff]   ;;  %v6103_v15 = vld [vmem:[%s7730_s0 + $0x5d8] ss:$100 sps:$4 sm:$0xff]  }
 0x195   :  { %3993 = vmatprep.mubr.bf16.mxu1 %v6091_v13 }
 0x196   :  { %v7423_v0 = vadd.f32 %v5135_v17, %v3288_v20  ;;  %v5072_v50 = vpop.f32.mrb[80].mxu0 }
 0x197   :  { %v5136_v26 = vpop.f32.mrb[80].mxu1  ;;  %v5073_v54 = vpop.f32.mrb[81].mxu0 }
 0x198   :  { %v5074_v27 = vadd.f32 %v5073_v54, %v5072_v50  ;;  %v5137_v29 = vpop.f32.mrb[81].mxu1  ;;  %v5075_v56 = vpop.f32.mrb[82].mxu0 }
 0x199   :  { %v5138_v57 = vadd.f32 %v5137_v29, %v5136_v26  ;;  %v5139_v33 = vpop.f32.mrb[82].mxu1  ;;  %v5076_v38 = vpop.f32.mrb[83].mxu0 }
 0x19a   :  { %v3293_v40 = vadd.f32 %v5074_v27, %v7271_v31  ;;  %v5077_v41 = vadd.f32 %v5076_v38, %v5075_v56  ;;  %v5140_v21 = vpop.f32.mrb[83].mxu1  ;;  %v6098_v31 = vld [vmem:[%s7730_s0 + $0x128] ss:$100 sps:$4 sm:$0xff]  }
 0x19b   :  { %v5141_v42 = vadd.f32 %v5140_v21, %v5139_v33  ;;  %3897 = vmatmul.mubr.bf16.gmra.mrb[188].mxu0 %v6093_v7 }
 0x19c   :  { %v7438_v43 = vadd.f32 %v5138_v57, %v3293_v40  ;;  %v3296_v58 = vadd.f32 %v5077_v41, %v7274_v35  ;;  %3994 = vmatmul.mubr.bf16.gmra.mrb[188].mxu1 %v6094_v4  ;;  %5576 = vmatprep.mubr.bf16.mxu0 %v6096_v9  ;;  %v6100_v35 = vld [vmem:[%s7730_s0 + $0x1f0] ss:$100 sps:$4 sm:$0xff]  }
 0x19d   :  { %5584 = vmatprep.mubr.bf16.mxu1 %v6097_v53 }
 0x19e   :  { %v7441_v44 = vadd.f32 %v5141_v42, %v3296_v58  ;;  %v5078_v25 = vpop.f32.mrb[84].mxu0 }
 0x19f   :  { %v5142_v47 = vpop.f32.mrb[84].mxu1  ;;  %v5079_v49 = vpop.f32.mrb[85].mxu0 }
 0x1a0   :  { %v5080_v11 = vadd.f32 %v5079_v49, %v5078_v25  ;;  %v5143_v51 = vpop.f32.mrb[85].mxu1  ;;  %v5081_v52 = vpop.f32.mrb[86].mxu0 }
 0x1a1   :  { %v5144_v28 = vadd.f32 %v5143_v51, %v5142_v47  ;;  %v5145_v55 = vpop.f32.mrb[86].mxu1  ;;  %v5082_v19 = vpop.f32.mrb[87].mxu0 }
 0x1a2   :  { %v3301_v1 = vadd.f32 %v5080_v11, %v7292_v59  ;;  %v5083_v24 = vadd.f32 %v5082_v19, %v5081_v52  ;;  %v5146_v45 = vpop.f32.mrb[87].mxu1  ;;  %v6102_v59 = vld [vmem:[%s7730_s0 + $0x2b8] ss:$100 sps:$4 sm:$0xff]  }
 0x1a3   :  { %v5147_v2 = vadd.f32 %v5146_v45, %v5145_v55  ;;  %5577 = vmatmul.mubr.bf16.vlgmr.msra.gmra.mrb[192].mxu0 %v6098_v31 }
 0x1a4   :  { %v7456_v3 = vadd.f32 %v5144_v28, %v3301_v1  ;;  %v3304_v34 = vadd.f32 %v5083_v24, %v7300_v30  ;;  %5585 = vmatmul.mubr.bf16.vlgmr.msra.gmra.mrb[192].mxu1 %v6099_v14  ;;  %5580 = vmatprep.mubr.bf16.mxu0 %v6100_v35 }
 0x1a5   :  { %5588 = vmatprep.mubr.bf16.mxu1 %v6101_v63 }
 0x1a6   :  { %v7459_v5 = vadd.f32 %v5147_v2, %v3304_v34  ;;  %v5084_v48 = vpop.f32.mrb[88].mxu0 }
 0x1a7   :  { %v5148_v6 = vpop.f32.mrb[88].mxu1  ;;  %v5085_v8 = vpop.f32.mrb[89].mxu0 }
 0x1a8   :  { %v5086_v12 = vadd.f32 %v5085_v8, %v5084_v48  ;;  %v5149_v13 = vpop.f32.mrb[89].mxu1  ;;  %v5087_v32 = vpop.f32.mrb[90].mxu0 }
 0x1a9   :  { %v5150_v30 = vadd.f32 %v5149_v13, %v5148_v6  ;;  %v5151_v16 = vpop.f32.mrb[90].mxu1  ;;  %v5088_v17 = vpop.f32.mrb[91].mxu0 }
 0x1aa   :  { %v3309_v20 = vadd.f32 %v5086_v12, %v7318_v36  ;;  %v5089_v50 = vadd.f32 %v5088_v17, %v5087_v32  ;;  %v5152_v26 = vpop.f32.mrb[91].mxu1 }
 0x1ab   :  { %v5153_v54 = vadd.f32 %v5152_v26, %v5151_v16  ;;  %5581 = vmatmul.mubr.bf16.gmra.mrb[196].mxu0 %v6102_v59 }
 0x1ac   :  { %v7468_v7 = vadd.f32 %v5150_v30, %v3309_v20  ;;  %v3312_v27 = vadd.f32 %v5089_v50, %v7321_v23  ;;  %5589 = vmatmul.mubr.bf16.gmra.mrb[196].mxu1 %v6103_v15 }
 0x1ae   :  { %v7471_v29 = vadd.f32 %v5153_v54, %v3312_v27  ;;  %v5090_v56 = vpop.f32.mrb[92].mxu0 }
 0x1af   :  { %v5154_v4 = vpop.f32.mrb[92].mxu1  ;;  %v5091_v9 = vpop.f32.mrb[93].mxu0 }
 0x1b0   :  { %v5092_v57 = vadd.f32 %v5091_v9, %v5090_v56  ;;  %v5155_v33 = vpop.f32.mrb[93].mxu1  ;;  %v5093_v38 = vpop.f32.mrb[94].mxu0 }
 0x1b1   :  { %v5156_v53 = vadd.f32 %v5155_v33, %v5154_v4  ;;  %v5157_v40 = vpop.f32.mrb[94].mxu1  ;;  %v5094_v36 = vpop.f32.mrb[95].mxu0 }
 0x1b2   :  { %v3317_v41 = vadd.f32 %v5092_v57, %v7342_v46  ;;  %v5095_v21 = vadd.f32 %v5094_v36, %v5093_v38  ;;  %v5158_v42 = vpop.f32.mrb[95].mxu1 }
 0x1b3   :  { %v5159_v58 = vadd.f32 %v5158_v42, %v5157_v40 }
 0x1b4   :  { %v7474_v25 = vadd.f32 %v5156_v53, %v3317_v41  ;;  %v3320_v23 = vadd.f32 %v5095_v21, %v7345_v22 }
 0x1b6   :  { %v7477_v47 = vadd.f32 %v5159_v58, %v3320_v23  ;;  %v5176_v49 = vpop.f32.mrb[96].mxu0 }
 0x1b7   :  { %v5240_v31 = vpop.f32.mrb[96].mxu1  ;;  %v5177_v11 = vpop.f32.mrb[97].mxu0 }
 0x1b8   :  { %v5178_v51 = vadd.f32 %v5177_v11, %v5176_v49  ;;  %v5241_v52 = vpop.f32.mrb[97].mxu1  ;;  %v5179_v14 = vpop.f32.mrb[98].mxu0 }
 0x1b9   :  { %v5242_v35 = vadd.f32 %v5241_v52, %v5240_v31  ;;  %v5243_v28 = vpop.f32.mrb[98].mxu1  ;;  %v5180_v55 = vpop.f32.mrb[99].mxu0 }
 0x1ba   :  { %v3455_v46 = vadd.f32 %v5178_v51, %v7366_v10  ;;  %v5181_v19 = vadd.f32 %v5180_v55, %v5179_v14  ;;  %v5244_v63 = vpop.f32.mrb[99].mxu1 }
 0x1bb   :  { %v5245_v1 = vadd.f32 %v5244_v63, %v5243_v28 }
 0x1bc   :  { %v7480_v24 = vadd.f32 %v5242_v35, %v3455_v46  ;;  %v3458_v22 = vadd.f32 %v5181_v19, %v7369_v60 }
 0x1be   :  { %v7483_v45 = vadd.f32 %v5245_v1, %v3458_v22  ;;  %v5182_v2 = vpop.f32.mrb[100].mxu0 }
 0x1bf   :  { %v5246_v34 = vpop.f32.mrb[100].mxu1  ;;  %v5183_v48 = vpop.f32.mrb[101].mxu0 }
 0x1c0   :  { %v5184_v6 = vadd.f32 %v5183_v48, %v5182_v2  ;;  %v5247_v8 = vpop.f32.mrb[101].mxu1  ;;  %v5185_v59 = vpop.f32.mrb[102].mxu0 }
 0x1c1   :  { %v5248_v12 = vadd.f32 %v5247_v8, %v5246_v34  ;;  %v5249_v13 = vpop.f32.mrb[102].mxu1  ;;  %v5186_v32 = vpop.f32.mrb[103].mxu0 }
 0x1c2   :  { %v3463_v10 = vadd.f32 %v5184_v6, %v7384_v37  ;;  %v5187_v15 = vadd.f32 %v5186_v32, %v5185_v59  ;;  %v5250_v30 = vpop.f32.mrb[103].mxu1 }
 0x1c3   :  { %v5251_v16 = vadd.f32 %v5250_v30, %v5249_v13 }
 0x1c4   :  { %v7486_v17 = vadd.f32 %v5248_v12, %v3463_v10  ;;  %v3466_v60 = vadd.f32 %v5187_v15, %v7387_v39 }
 0x1c6   :  { %v7489_v20 = vadd.f32 %v5251_v16, %v3466_v60  ;;  %v5188_v50 = vpop.f32.mrb[104].mxu0 }
 0x1c7   :  { %v5252_v26 = vpop.f32.mrb[104].mxu1  ;;  %v5189_v54 = vpop.f32.mrb[105].mxu0 }
 0x1c8   :  { %v5190_v27 = vadd.f32 %v5189_v54, %v5188_v50  ;;  %v5253_v56 = vpop.f32.mrb[105].mxu1  ;;  %v5191_v4 = vpop.f32.mrb[106].mxu0 }
 0x1c9   :  { %v5254_v9 = vadd.f32 %v5253_v56, %v5252_v26  ;;  %v5255_v57 = vpop.f32.mrb[106].mxu1  ;;  %v5192_v33 = vpop.f32.mrb[107].mxu0 }
 0x1ca   :  { %v3471_v37 = vadd.f32 %v5190_v27, %v7402_v61  ;;  %v5193_v38 = vadd.f32 %v5192_v33, %v5191_v4  ;;  %v5256_v53 = vpop.f32.mrb[107].mxu1 }
 0x1cb   :  { %v5257_v40 = vadd.f32 %v5256_v53, %v5255_v57 }
 0x1cc   :  { %v7492_v36 = vadd.f32 %v5254_v9, %v3471_v37  ;;  %v3474_v39 = vadd.f32 %v5193_v38, %v7405_v62 }
 0x1ce   :  { %v7495_v41 = vadd.f32 %v5257_v40, %v3474_v39  ;;  %v5194_v21 = vpop.f32.mrb[108].mxu0 }
 0x1cf   :  { %v5258_v42 = vpop.f32.mrb[108].mxu1  ;;  %v5195_v58 = vpop.f32.mrb[109].mxu0 }
 0x1d0   :  { %v5196_v23 = vadd.f32 %v5195_v58, %v5194_v21  ;;  %v5259_v49 = vpop.f32.mrb[109].mxu1  ;;  %v5197_v31 = vpop.f32.mrb[110].mxu0 }
 0x1d1   :  { %v5260_v11 = vadd.f32 %v5259_v49, %v5258_v42  ;;  %v5261_v51 = vpop.f32.mrb[110].mxu1  ;;  %v5198_v52 = vpop.f32.mrb[111].mxu0 }
 0x1d2   :  { %v3479_v61 = vadd.f32 %v5196_v23, %v7420_v18  ;;  %v5199_v14 = vadd.f32 %v5198_v52, %v5197_v31  ;;  %v5262_v35 = vpop.f32.mrb[111].mxu1 }
 0x1d3   :  { %v5263_v28 = vadd.f32 %v5262_v35, %v5261_v51 }
 0x1d4   :  { %v7498_v55 = vadd.f32 %v5260_v11, %v3479_v61  ;;  %v3482_v62 = vadd.f32 %v5199_v14, %v7423_v0 }
 0x1d6   :  { %v7501_v46 = vadd.f32 %v5263_v28, %v3482_v62  ;;  %v5200_v19 = vpop.f32.mrb[112].mxu0 }
 0x1d7   :  { %v5264_v63 = vpop.f32.mrb[112].mxu1  ;;  %v5201_v1 = vpop.f32.mrb[113].mxu0 }
 0x1d8   :  { %v5202_v22 = vadd.f32 %v5201_v1, %v5200_v19  ;;  %v5265_v2 = vpop.f32.mrb[113].mxu1  ;;  %v5203_v34 = vpop.f32.mrb[114].mxu0 }
 0x1d9   :  { %v5266_v48 = vadd.f32 %v5265_v2, %v5264_v63  ;;  %v5267_v6 = vpop.f32.mrb[114].mxu1  ;;  %v5204_v8 = vpop.f32.mrb[115].mxu0 }
 0x1da   :  { %v3487_v18 = vadd.f32 %v5202_v22, %v7438_v43  ;;  %v5205_v59 = vadd.f32 %v5204_v8, %v5203_v34  ;;  %v5268_v12 = vpop.f32.mrb[115].mxu1 }
 0x1db   :  { %v5269_v13 = vadd.f32 %v5268_v12, %v5267_v6 }
 0x1dc   :  { %v7504_v32 = vadd.f32 %v5266_v48, %v3487_v18  ;;  %v3490_v0 = vadd.f32 %v5205_v59, %v7441_v44 }
 0x1de   :  { %v7507_v10 = vadd.f32 %v5269_v13, %v3490_v0  ;;  %v5206_v15 = vpop.f32.mrb[116].mxu0 }
 0x1df   :  { %v5270_v30 = vpop.f32.mrb[116].mxu1  ;;  %v5207_v16 = vpop.f32.mrb[117].mxu0 }
 0x1e0   :  { %v5208_v60 = vadd.f32 %v5207_v16, %v5206_v15  ;;  %v5271_v50 = vpop.f32.mrb[117].mxu1  ;;  %v5209_v26 = vpop.f32.mrb[118].mxu0 }
 0x1e1   :  { %v5272_v54 = vadd.f32 %v5271_v50, %v5270_v30  ;;  %v5273_v27 = vpop.f32.mrb[118].mxu1  ;;  %v5210_v56 = vpop.f32.mrb[119].mxu0 }
 0x1e2   :  { %v3495_v43 = vadd.f32 %v5208_v60, %v7456_v3  ;;  %v5211_v4 = vadd.f32 %v5210_v56, %v5209_v26  ;;  %v5274_v9 = vpop.f32.mrb[119].mxu1 }
 0x1e3   :  { %v5275_v57 = vadd.f32 %v5274_v9, %v5273_v27 }
 0x1e4   :  { %v7510_v33 = vadd.f32 %v5272_v54, %v3495_v43  ;;  %v3498_v44 = vadd.f32 %v5211_v4, %v7459_v5 }
 0x1e6   :  { %v7513_v37 = vadd.f32 %v5275_v57, %v3498_v44  ;;  %v5212_v38 = vpop.f32.mrb[120].mxu0 }
 0x1e7   :  { %v5276_v53 = vpop.f32.mrb[120].mxu1  ;;  %v5213_v40 = vpop.f32.mrb[121].mxu0 }
 0x1e8   :  { %v5214_v39 = vadd.f32 %v5213_v40, %v5212_v38  ;;  %v5277_v21 = vpop.f32.mrb[121].mxu1  ;;  %v5215_v42 = vpop.f32.mrb[122].mxu0 }
 0x1e9   :  { %v5278_v58 = vadd.f32 %v5277_v21, %v5276_v53  ;;  %v5279_v23 = vpop.f32.mrb[122].mxu1  ;;  %v5216_v49 = vpop.f32.mrb[123].mxu0 }
 0x1ea   :  { %v3503_v3 = vadd.f32 %v5214_v39, %v7468_v7  ;;  %v5217_v31 = vadd.f32 %v5216_v49, %v5215_v42  ;;  %v5280_v11 = vpop.f32.mrb[123].mxu1 }
 0x1eb   :  { %v5281_v51 = vadd.f32 %v5280_v11, %v5279_v23 }
 0x1ec   :  { %v7516_v52 = vadd.f32 %v5278_v58, %v3503_v3  ;;  %v3506_v5 = vadd.f32 %v5217_v31, %v7471_v29 }
 0x1ee   :  { %v7519_v61 = vadd.f32 %v5281_v51, %v3506_v5  ;;  %v5218_v14 = vpop.f32.mrb[124].mxu0 }
 0x1ef   :  { %v5282_v35 = vpop.f32.mrb[124].mxu1  ;;  %v5219_v28 = vpop.f32.mrb[125].mxu0 }
 0x1f0   :  { %v5220_v62 = vadd.f32 %v5219_v28, %v5218_v14  ;;  %v5283_v19 = vpop.f32.mrb[125].mxu1  ;;  %v5221_v63 = vpop.f32.mrb[126].mxu0 }
 0x1f1   :  { %v5284_v1 = vadd.f32 %v5283_v19, %v5282_v35  ;;  %v5285_v22 = vpop.f32.mrb[126].mxu1  ;;  %v5222_v2 = vpop.f32.mrb[127].mxu0 }
 0x1f2   :  { %v3511_v7 = vadd.f32 %v5220_v62, %v7474_v25  ;;  %v5223_v34 = vadd.f32 %v5222_v2, %v5221_v63  ;;  %v5286_v48 = vpop.f32.mrb[127].mxu1 }
 0x1f3   :  { %v5287_v6 = vadd.f32 %v5286_v48, %v5285_v22 }
 0x1f4   :  { %v7522_v8 = vadd.f32 %v5284_v1, %v3511_v7  ;;  %v3514_v29 = vadd.f32 %v5223_v34, %v7477_v47 }
 0x1f6   :  { %v7525_v18 = vadd.f32 %v5287_v6, %v3514_v29  ;;  %v5304_v59 = vpop.f32.mrb[128].mxu0 }
 0x1f7   :  { %v5368_v12 = vpop.f32.mrb[128].mxu1  ;;  %v5305_v13 = vpop.f32.mrb[129].mxu0 }
 0x1f8   :  { %v5306_v0 = vadd.f32 %v5305_v13, %v5304_v59  ;;  %v5369_v15 = vpop.f32.mrb[129].mxu1  ;;  %v5307_v30 = vpop.f32.mrb[130].mxu0 }
 0x1f9   :  { %v5370_v16 = vadd.f32 %v5369_v15, %v5368_v12  ;;  %v5371_v60 = vpop.f32.mrb[130].mxu1  ;;  %v5308_v50 = vpop.f32.mrb[131].mxu0 }
 0x1fa   :  { %v3649_v25 = vadd.f32 %v5306_v0, %v7480_v24  ;;  %v5309_v26 = vadd.f32 %v5308_v50, %v5307_v30  ;;  %v5372_v54 = vpop.f32.mrb[131].mxu1 }
 0x1fb   :  { %v5373_v27 = vadd.f32 %v5372_v54, %v5371_v60 }
 0x1fc   :  { %v7528_v56 = vadd.f32 %v5370_v16, %v3649_v25  ;;  %v3652_v47 = vadd.f32 %v5309_v26, %v7483_v45 }
 0x1fe   :  { %v7531_v43 = vadd.f32 %v5373_v27, %v3652_v47  ;;  %v5310_v4 = vpop.f32.mrb[132].mxu0 }
 0x1ff   :  { %v5374_v9 = vpop.f32.mrb[132].mxu1  ;;  %v5311_v57 = vpop.f32.mrb[133].mxu0 }
 0x200   :  { %v5312_v44 = vadd.f32 %v5311_v57, %v5310_v4  ;;  %v5375_v38 = vpop.f32.mrb[133].mxu1  ;;  %v5313_v53 = vpop.f32.mrb[134].mxu0 }
 0x201   :  { %v5376_v40 = vadd.f32 %v5375_v38, %v5374_v9  ;;  %v5377_v39 = vpop.f32.mrb[134].mxu1  ;;  %v5314_v21 = vpop.f32.mrb[135].mxu0 }
 0x202   :  { %v3657_v24 = vadd.f32 %v5312_v44, %v7486_v17  ;;  %v5315_v42 = vadd.f32 %v5314_v21, %v5313_v53  ;;  %v5378_v58 = vpop.f32.mrb[135].mxu1 }
 0x203   :  { %v5379_v23 = vadd.f32 %v5378_v58, %v5377_v39 }
 0x204   :  { %v7534_v49 = vadd.f32 %v5376_v40, %v3657_v24  ;;  %v3660_v45 = vadd.f32 %v5315_v42, %v7489_v20 }
 0x206   :  { %v7537_v3 = vadd.f32 %v5379_v23, %v3660_v45  ;;  %v5316_v31 = vpop.f32.mrb[136].mxu0 }
 0x207   :  { %v5380_v11 = vpop.f32.mrb[136].mxu1  ;;  %v5317_v51 = vpop.f32.mrb[137].mxu0 }
 0x208   :  { %v5318_v5 = vadd.f32 %v5317_v51, %v5316_v31  ;;  %v5381_v14 = vpop.f32.mrb[137].mxu1  ;;  %v5319_v35 = vpop.f32.mrb[138].mxu0 }
 0x209   :  { %v5382_v28 = vadd.f32 %v5381_v14, %v5380_v11  ;;  %v5383_v62 = vpop.f32.mrb[138].mxu1  ;;  %v5320_v19 = vpop.f32.mrb[139].mxu0 }
 0x20a   :  { %v3665_v17 = vadd.f32 %v5318_v5, %v7492_v36  ;;  %v5321_v63 = vadd.f32 %v5320_v19, %v5319_v35  ;;  %v5384_v1 = vpop.f32.mrb[139].mxu1 }
 0x20b   :  { %v5385_v22 = vadd.f32 %v5384_v1, %v5383_v62 }
 0x20c   :  { %v7540_v2 = vadd.f32 %v5382_v28, %v3665_v17  ;;  %v3668_v20 = vadd.f32 %v5321_v63, %v7495_v41 }
 0x20e   :  { %v7543_v7 = vadd.f32 %v5385_v22, %v3668_v20  ;;  %v5322_v34 = vpop.f32.mrb[140].mxu0 }
 0x20f   :  { %v5386_v48 = vpop.f32.mrb[140].mxu1  ;;  %v5323_v6 = vpop.f32.mrb[141].mxu0 }
 0x210   :  { %v5324_v29 = vadd.f32 %v5323_v6, %v5322_v34  ;;  %v5387_v59 = vpop.f32.mrb[141].mxu1  ;;  %v5325_v12 = vpop.f32.mrb[142].mxu0 }
 0x211   :  { %v5388_v13 = vadd.f32 %v5387_v59, %v5386_v48  ;;  %v5389_v0 = vpop.f32.mrb[142].mxu1  ;;  %v5326_v15 = vpop.f32.mrb[143].mxu0 }
 0x212   :  { %v3673_v36 = vadd.f32 %v5324_v29, %v7498_v55  ;;  %v5327_v30 = vadd.f32 %v5326_v15, %v5325_v12  ;;  %v5390_v16 = vpop.f32.mrb[143].mxu1 }
 0x213   :  { %v5391_v60 = vadd.f32 %v5390_v16, %v5389_v0 }
 0x214   :  { %v7546_v50 = vadd.f32 %v5388_v13, %v3673_v36  ;;  %v3676_v41 = vadd.f32 %v5327_v30, %v7501_v46 }
 0x216   :  { %v7549_v25 = vadd.f32 %v5391_v60, %v3676_v41  ;;  %v5328_v26 = vpop.f32.mrb[144].mxu0 }
 0x217   :  { %v5392_v54 = vpop.f32.mrb[144].mxu1  ;;  %v5329_v27 = vpop.f32.mrb[145].mxu0 }
 0x218   :  { %v5330_v47 = vadd.f32 %v5329_v27, %v5328_v26  ;;  %v5393_v4 = vpop.f32.mrb[145].mxu1  ;;  %v5331_v9 = vpop.f32.mrb[146].mxu0 }
 0x219   :  { %v5394_v57 = vadd.f32 %v5393_v4, %v5392_v54  ;;  %v5395_v44 = vpop.f32.mrb[146].mxu1  ;;  %v5332_v38 = vpop.f32.mrb[147].mxu0 }
 0x21a   :  { %v3681_v55 = vadd.f32 %v5330_v47, %v7504_v32  ;;  %v5333_v53 = vadd.f32 %v5332_v38, %v5331_v9  ;;  %v5396_v40 = vpop.f32.mrb[147].mxu1 }
 0x21b   :  { %v5397_v39 = vadd.f32 %v5396_v40, %v5395_v44 }
 0x21c   :  { %v7552_v21 = vadd.f32 %v5394_v57, %v3681_v55  ;;  %v3684_v46 = vadd.f32 %v5333_v53, %v7507_v10 }
 0x21e   :  { %v7555_v24 = vadd.f32 %v5397_v39, %v3684_v46  ;;  %v5334_v42 = vpop.f32.mrb[148].mxu0 }
 0x21f   :  { %v5398_v58 = vpop.f32.mrb[148].mxu1  ;;  %v5335_v23 = vpop.f32.mrb[149].mxu0 }
 0x220   :  { %v5336_v45 = vadd.f32 %v5335_v23, %v5334_v42  ;;  %v5399_v31 = vpop.f32.mrb[149].mxu1  ;;  %v5337_v11 = vpop.f32.mrb[150].mxu0 }
 0x221   :  { %v5400_v51 = vadd.f32 %v5399_v31, %v5398_v58  ;;  %v5401_v5 = vpop.f32.mrb[150].mxu1  ;;  %v5338_v14 = vpop.f32.mrb[151].mxu0 }
 0x222   :  { %v3689_v32 = vadd.f32 %v5336_v45, %v7510_v33  ;;  %v5339_v35 = vadd.f32 %v5338_v14, %v5337_v11  ;;  %v5402_v28 = vpop.f32.mrb[151].mxu1 }
 0x223   :  { %v5403_v62 = vadd.f32 %v5402_v28, %v5401_v5 }
 0x224   :  { %v7558_v19 = vadd.f32 %v5400_v51, %v3689_v32  ;;  %v3692_v10 = vadd.f32 %v5339_v35, %v7513_v37 }
 0x226   :  { %v7561_v17 = vadd.f32 %v5403_v62, %v3692_v10  ;;  %v5340_v63 = vpop.f32.mrb[152].mxu0 }
 0x227   :  { %v5404_v1 = vpop.f32.mrb[152].mxu1  ;;  %v5341_v22 = vpop.f32.mrb[153].mxu0 }
 0x228   :  { %v5342_v20 = vadd.f32 %v5341_v22, %v5340_v63  ;;  %v5405_v34 = vpop.f32.mrb[153].mxu1  ;;  %v5343_v48 = vpop.f32.mrb[154].mxu0 }
 0x229   :  { %v5406_v6 = vadd.f32 %v5405_v34, %v5404_v1  ;;  %v5407_v29 = vpop.f32.mrb[154].mxu1  ;;  %v5344_v59 = vpop.f32.mrb[155].mxu0 }
 0x22a   :  { %v3697_v33 = vadd.f32 %v5342_v20, %v7516_v52  ;;  %v5345_v12 = vadd.f32 %v5344_v59, %v5343_v48  ;;  %v5408_v13 = vpop.f32.mrb[155].mxu1 }
 0x22b   :  { %v5409_v0 = vadd.f32 %v5408_v13, %v5407_v29 }
 0x22c   :  { %v7564_v15 = vadd.f32 %v5406_v6, %v3697_v33  ;;  %v3700_v37 = vadd.f32 %v5345_v12, %v7519_v61 }
 0x22e   :  { %v7567_v36 = vadd.f32 %v5409_v0, %v3700_v37  ;;  %v5346_v30 = vpop.f32.mrb[156].mxu0 }
 0x22f   :  { %v5410_v16 = vpop.f32.mrb[156].mxu1  ;;  %v5347_v60 = vpop.f32.mrb[157].mxu0 }
 0x230   :  { %v5348_v41 = vadd.f32 %v5347_v60, %v5346_v30  ;;  %v5411_v26 = vpop.f32.mrb[157].mxu1  ;;  %v5349_v54 = vpop.f32.mrb[158].mxu0 }
 0x231   :  { %v5412_v27 = vadd.f32 %v5411_v26, %v5410_v16  ;;  %v5413_v47 = vpop.f32.mrb[158].mxu1  ;;  %v5350_v4 = vpop.f32.mrb[159].mxu0 }
 0x232   :  { %v3705_v52 = vadd.f32 %v5348_v41, %v7522_v8  ;;  %v5351_v9 = vadd.f32 %v5350_v4, %v5349_v54  ;;  %v5414_v57 = vpop.f32.mrb[159].mxu1 }
 0x233   :  { %v5415_v44 = vadd.f32 %v5414_v57, %v5413_v47 }
 0x234   :  { %v7570_v38 = vadd.f32 %v5412_v27, %v3705_v52  ;;  %v3708_v61 = vadd.f32 %v5351_v9, %v7525_v18 }
 0x236   :  { %v7573_v55 = vadd.f32 %v5415_v44, %v3708_v61  ;;  %v5432_v53 = vpop.f32.mrb[160].mxu0 }
 0x237   :  { %v5496_v40 = vpop.f32.mrb[160].mxu1  ;;  %v5433_v39 = vpop.f32.mrb[161].mxu0 }
 0x238   :  { %v5434_v46 = vadd.f32 %v5433_v39, %v5432_v53  ;;  %v5497_v42 = vpop.f32.mrb[161].mxu1  ;;  %v5435_v58 = vpop.f32.mrb[162].mxu0 }
 0x239   :  { %v5498_v23 = vadd.f32 %v5497_v42, %v5496_v40  ;;  %v5499_v45 = vpop.f32.mrb[162].mxu1  ;;  %v5436_v31 = vpop.f32.mrb[163].mxu0 }
 0x23a   :  { %v3843_v8 = vadd.f32 %v5434_v46, %v7528_v56  ;;  %v5437_v11 = vadd.f32 %v5436_v31, %v5435_v58  ;;  %v5500_v51 = vpop.f32.mrb[163].mxu1 }
 0x23b   :  { %v5501_v5 = vadd.f32 %v5500_v51, %v5499_v45 }
 0x23c   :  { %v3846_v14 = vadd.f32 %v5437_v11, %v7531_v43  ;;  %v7577_v32 = vadd.f32 %v5498_v23, %v3843_v8 }
 0x23e   :  { %v5438_v18 = vpop.f32.mrb[164].mxu0  ;;  %v7579_v35 = vadd.f32 %v5501_v5, %v3846_v14 }
 0x23f   :  { %v5502_v28 = vpop.f32.mrb[164].mxu1  ;;  %v5439_v62 = vpop.f32.mrb[165].mxu0 }
 0x240   :  { %v5440_v10 = vadd.f32 %v5439_v62, %v5438_v18  ;;  %v5503_v63 = vpop.f32.mrb[165].mxu1  ;;  %v5441_v1 = vpop.f32.mrb[166].mxu0 }
 0x241   :  { %v5504_v22 = vadd.f32 %v5503_v63, %v5502_v28  ;;  %v5505_v20 = vpop.f32.mrb[166].mxu1  ;;  %v5442_v34 = vpop.f32.mrb[167].mxu0 }
 0x242   :  { %v3851_v56 = vadd.f32 %v5440_v10, %v7534_v49  ;;  %v5443_v48 = vadd.f32 %v5442_v34, %v5441_v1  ;;  %v5506_v6 = vpop.f32.mrb[167].mxu1 }
 0x243   :  { %v5507_v29 = vadd.f32 %v5506_v6, %v5505_v20 }
 0x244   :  { %v3854_v43 = vadd.f32 %v5443_v48, %v7537_v3  ;;  %v7583_v59 = vadd.f32 %v5504_v22, %v3851_v56 }
 0x246   :  { %v5444_v33 = vpop.f32.mrb[168].mxu0  ;;  %v7585_v12 = vadd.f32 %v5507_v29, %v3854_v43 }
 0x247   :  { %v5508_v13 = vpop.f32.mrb[168].mxu1  ;;  %v5445_v0 = vpop.f32.mrb[169].mxu0 }
 0x248   :  { %v5446_v37 = vadd.f32 %v5445_v0, %v5444_v33  ;;  %v5509_v30 = vpop.f32.mrb[169].mxu1  ;;  %v5447_v16 = vpop.f32.mrb[170].mxu0 }
 0x249   :  { %v5510_v60 = vadd.f32 %v5509_v30, %v5508_v13  ;;  %v5511_v41 = vpop.f32.mrb[170].mxu1  ;;  %v5448_v26 = vpop.f32.mrb[171].mxu0 }
 0x24a   :  { %v3859_v49 = vadd.f32 %v5446_v37, %v7540_v2  ;;  %v5449_v54 = vadd.f32 %v5448_v26, %v5447_v16  ;;  %v5512_v27 = vpop.f32.mrb[171].mxu1 }
 0x24b   :  { %v5513_v47 = vadd.f32 %v5512_v27, %v5511_v41 }
 0x24c   :  { %v3862_v3 = vadd.f32 %v5449_v54, %v7543_v7  ;;  %v7589_v4 = vadd.f32 %v5510_v60, %v3859_v49 }
 0x24e   :  { %v5450_v52 = vpop.f32.mrb[172].mxu0  ;;  %v7591_v9 = vadd.f32 %v5513_v47, %v3862_v3 }
 0x24f   :  { %v5514_v57 = vpop.f32.mrb[172].mxu1  ;;  %v5451_v44 = vpop.f32.mrb[173].mxu0 }
 0x250   :  { %v5452_v61 = vadd.f32 %v5451_v44, %v5450_v52  ;;  %v5515_v53 = vpop.f32.mrb[173].mxu1  ;;  %v5453_v40 = vpop.f32.mrb[174].mxu0 }
 0x251   :  { %v5516_v39 = vadd.f32 %v5515_v53, %v5514_v57  ;;  %v5517_v46 = vpop.f32.mrb[174].mxu1  ;;  %v5454_v42 = vpop.f32.mrb[175].mxu0 }
 0x252   :  { %v3867_v2 = vadd.f32 %v5452_v61, %v7546_v50  ;;  %v5455_v58 = vadd.f32 %v5454_v42, %v5453_v40  ;;  %v5518_v23 = vpop.f32.mrb[175].mxu1 }
 0x253   :  { %v5519_v45 = vadd.f32 %v5518_v23, %v5517_v46 }
 0x254   :  { %v3870_v7 = vadd.f32 %v5455_v58, %v7549_v25  ;;  %v7595_v31 = vadd.f32 %v5516_v39, %v3867_v2 }
 0x256   :  { %v5456_v8 = vpop.f32.mrb[176].mxu0  ;;  %v7597_v11 = vadd.f32 %v5519_v45, %v3870_v7 }
 0x257   :  { %v5520_v51 = vpop.f32.mrb[176].mxu1  ;;  %v5457_v5 = vpop.f32.mrb[177].mxu0 }
 0x258   :  { %v5458_v14 = vadd.f32 %v5457_v5, %v5456_v8  ;;  %v5521_v18 = vpop.f32.mrb[177].mxu1  ;;  %v5459_v28 = vpop.f32.mrb[178].mxu0 }
 0x259   :  { %v5522_v62 = vadd.f32 %v5521_v18, %v5520_v51  ;;  %v5523_v10 = vpop.f32.mrb[178].mxu1  ;;  %v5460_v63 = vpop.f32.mrb[179].mxu0 }
 0x25a   :  { %v3875_v50 = vadd.f32 %v5458_v14, %v7552_v21  ;;  %v5461_v1 = vadd.f32 %v5460_v63, %v5459_v28  ;;  %v5524_v22 = vpop.f32.mrb[179].mxu1 }
 0x25b   :  { %v5525_v20 = vadd.f32 %v5524_v22, %v5523_v10 }
 0x25c   :  { %v3878_v25 = vadd.f32 %v5461_v1, %v7555_v24  ;;  %v3972_v34 = vadd.f32 %v5522_v62, %v3875_v50 }
 0x25e   :  { %v5462_v56 = vpop.f32.mrb[180].mxu0  ;;  %v7601_v48 = vadd.f32 %v5525_v20, %v3878_v25 }
 0x25f   :  { %v5526_v6 = vpop.f32.mrb[180].mxu1  ;;  %v5463_v29 = vpop.f32.mrb[181].mxu0 }
 0x260   :  { %v5464_v43 = vadd.f32 %v5463_v29, %v5462_v56  ;;  %v5527_v33 = vpop.f32.mrb[181].mxu1  ;;  %v5465_v13 = vpop.f32.mrb[182].mxu0 }
 0x261   :  { %v5528_v0 = vadd.f32 %v5527_v33, %v5526_v6  ;;  %v5529_v37 = vpop.f32.mrb[182].mxu1  ;;  %v5466_v30 = vpop.f32.mrb[183].mxu0 }
 0x262   :  { %v3883_v16 = vadd.f32 %v5464_v43, %v7558_v19  ;;  %v5467_v21 = vadd.f32 %v5466_v30, %v5465_v13  ;;  %v5530_v60 = vpop.f32.mrb[183].mxu1 }
 0x263   :  { %v5531_v41 = vadd.f32 %v5530_v60, %v5529_v37 }
 0x264   :  { %v3886_v26 = vadd.f32 %v5467_v21, %v7561_v17  ;;  %v3980_v24 = vadd.f32 %v5528_v0, %v3883_v16 }
 0x266   :  { %v5468_v49 = vpop.f32.mrb[184].mxu0  ;;  %v7605_v54 = vadd.f32 %v5531_v41, %v3886_v26 }
 0x267   :  { %v5532_v27 = vpop.f32.mrb[184].mxu1  ;;  %v5469_v47 = vpop.f32.mrb[185].mxu0 }
 0x268   :  { %v5470_v3 = vadd.f32 %v5469_v47, %v5468_v49  ;;  %v5533_v52 = vpop.f32.mrb[185].mxu1  ;;  %v5471_v57 = vpop.f32.mrb[186].mxu0 }
 0x269   :  { %v5534_v44 = vadd.f32 %v5533_v52, %v5532_v27  ;;  %v5535_v61 = vpop.f32.mrb[186].mxu1  ;;  %v5472_v53 = vpop.f32.mrb[187].mxu0 }
 0x26a   :  { %v3891_v40 = vadd.f32 %v5470_v3, %v7564_v15  ;;  %v5473_v19 = vadd.f32 %v5472_v53, %v5471_v57  ;;  %v5536_v39 = vpop.f32.mrb[187].mxu1 }
 0x26b   :  { %v5537_v46 = vadd.f32 %v5536_v39, %v5535_v61 }
 0x26c   :  { %v3894_v42 = vadd.f32 %v5473_v19, %v7567_v36  ;;  %v7609_v17 = vadd.f32 %v5534_v44, %v3891_v40 }
 0x26e   :  { %v5474_v2 = vpop.f32.mrb[188].mxu0  ;;  %v7611_v58 = vadd.f32 %v5537_v46, %v3894_v42 }
 0x26f   :  { %v5538_v23 = vpop.f32.mrb[188].mxu1  ;;  %v5475_v45 = vpop.f32.mrb[189].mxu0 }
 0x270   :  { %v5476_v7 = vadd.f32 %v5475_v45, %v5474_v2  ;;  %v5539_v8 = vpop.f32.mrb[189].mxu1  ;;  %v5477_v51 = vpop.f32.mrb[190].mxu0 }
 0x271   :  { %v5540_v5 = vadd.f32 %v5539_v8, %v5538_v23  ;;  %v5541_v14 = vpop.f32.mrb[190].mxu1  ;;  %v5478_v18 = vpop.f32.mrb[191].mxu0 }
 0x272   :  { %v3899_v15 = vadd.f32 %v5476_v7, %v7570_v38  ;;  %v5479_v28 = vadd.f32 %v5478_v18, %v5477_v51  ;;  %v5542_v62 = vpop.f32.mrb[191].mxu1 }
 0x273   :  { %v5543_v10 = vadd.f32 %v5542_v62, %v5541_v14 }
 0x274   :  { %v3902_v36 = vadd.f32 %v5479_v28, %v7573_v55  ;;  %v7615_v63 = vadd.f32 %v5540_v5, %v3899_v15 }
 0x276   :  { %v5578_v50 = vpop.f32.mrb[192].mxu0  ;;  %v7617_v1 = vadd.f32 %v5543_v10, %v3902_v36 }
 0x277   :  { %v4045_v22 = vadd.f32 %v5578_v50, %v7583_v59  ;;  %v5586_v20 = vpop.f32.mrb[192].mxu1  ;;  %v4036_v25 = vpop.f32.mrb[193].mxu0 }
 0x278   :  { %v4077_v56 = vadd.f32 %v5586_v20, %v3980_v24  ;;  %v4037_v6 = vadd.f32 %v4036_v25, %v7577_v32  ;;  %v4068_v29 = vpop.f32.mrb[193].mxu1  ;;  %v5579_v43 = vpop.f32.mrb[194].mxu0 }
 0x279   :  { %v4101_v38 = vmax.f32 %v4045_v22, 0.0  ;;  %v4197_v33 = vsub.f32 0.0, %v4045_v22  ;;  %v4069_v13 = vadd.f32 %v4068_v29, %v3972_v34  ;;  %v4048_v0 = vadd.f32 %v5579_v43, %v7585_v12  ;;  %v5587_v55 = vpop.f32.mrb[194].mxu1  ;;  %v4039_v37 = vpop.f32.mrb[195].mxu0 }
 0x27a   :  { %v4109_v30 = vmax.f32 %v4077_v56, 0.0  ;;  %v4205_v16 = vsub.f32 0.0, %v4077_v56  ;;  %v4099_v21 = vmax.f32 %v4037_v6, 0.0  ;;  %v4195_v60 = vsub.f32 0.0, %v4037_v6  ;;  %v4071_v41 = vpop.f32.mrb[195].mxu1 }
 0x27b   :  { %v4746_v59 = vpack.c.bf16 %v4101_v38, %v4101_v38  ;;  %v4213_v26 = vmax.f32 %v4197_v33, 0.0  ;;  %v4107_v49 = vmax.f32 %v4069_v13, 0.0  ;;  %v4203_v24 = vsub.f32 0.0, %v4069_v13 }
 0x27c   :  { %v4754_v27 = vpack.c.bf16 %v4109_v30, %v4109_v30  ;;  %v4221_v32 = vmax.f32 %v4205_v16, 0.0  ;;  %v4744_v47 = vpack.c.bf16 %v4099_v21, %v4099_v21  ;;  %v4211_v3 = vmax.f32 %v4195_v60, 0.0 }
 0x27d   :  { %4181 = vst [vmem:[%s7732_s3 + $0x10] sm:$0xf] %v4746_v59  ;;  %v4762_v12 = vpack.c.bf16 %v4213_v26, %v4213_v26  ;;  %v4752_v34 = vpack.c.bf16 %v4107_v49, %v4107_v49  ;;  %v4219_v52 = vmax.f32 %v4203_v24, 0.0  ;;  %v4102_v57 = vmax.f32 %v4048_v0, 0.0 }
 0x27e   :  { %4189 = vst [vmem:[%s7732_s3 + $0x50] sm:$0xf] %v4754_v27  ;;  %v4770_v44 = vpack.c.bf16 %v4221_v32, %v4221_v32  ;;  %4179 = vst [vmem:[%s7732_s3] sm:$0xf] %v4744_v47  ;;  %v4760_v61 = vpack.c.bf16 %v4211_v3, %v4211_v3  ;;  %v4198_v53 = vsub.f32 0.0, %v4048_v0  ;;  %v4080_v40 = vadd.f32 %v5587_v55, %v7605_v54  ;;  %v5582_v19 = vpop.f32.mrb[196].mxu0 }
 0x27f   :  { %4293 = vst [vmem:[%s7732_s3 + $0x14] sm:$0xf] %v4762_v12  ;;  %4187 = vst [vmem:[%s7732_s3 + $0x40] sm:$0xf] %v4752_v34  ;;  %v4768_v39 = vpack.c.bf16 %v4219_v52, %v4219_v52  ;;  %v4747_v46 = vpack.c.bf16 %v4102_v57, %v4102_v57  ;;  %v4040_v42 = vadd.f32 %v4039_v37, %v7579_v35  ;;  %v5590_v23 = vpop.f32.mrb[196].mxu1  ;;  %v4052_v45 = vpop.f32.mrb[197].mxu0 }
 0x280   :  { %v4072_v2 = vadd.f32 %v4071_v41, %v7601_v48  ;;  %4301 = vst [vmem:[%s7732_s3 + $0x54] sm:$0xf] %v4770_v44  ;;  %4291 = vst [vmem:[%s7732_s3 + $0x4] sm:$0xf] %v4760_v61  ;;  %v4214_v54 = vmax.f32 %v4198_v53, 0.0  ;;  %v4110_v7 = vmax.f32 %v4080_v40, 0.0  ;;  %v4061_v51 = vadd.f32 %v5582_v19, %v7595_v31 }
 0x281   :  { %v4206_v8 = vsub.f32 0.0, %v4080_v40  ;;  %v4084_v5 = vpop.f32.mrb[197].mxu1  ;;  %v5583_v14 = vpop.f32.mrb[198].mxu0  ;;  %4299 = vst [vmem:[%s7732_s3 + $0x44] sm:$0xf] %v4768_v39  ;;  %v4100_v35 = vmax.f32 %v4040_v42, 0.0  ;;  %v4093_v33 = vadd.f32 %v5590_v23, %v7615_v63  ;;  %v4053_v55 = vadd.f32 %v4052_v45, %v7589_v4 }
 0x282   :  { %4182 = vst [vmem:[%s7732_s3 + $0x18] sm:$0xf] %v4747_v46  ;;  %v4196_v48 = vsub.f32 0.0, %v4040_v42  ;;  %v4108_v18 = vmax.f32 %v4072_v2, 0.0  ;;  %v4204_v15 = vsub.f32 0.0, %v4072_v2  ;;  %v5591_v28 = vpop.f32.mrb[198].mxu1  ;;  %v4763_v10 = vpack.c.bf16 %v4214_v54, %v4214_v54 }
 0x283   :  { %v4055_v62 = vpop.f32.mrb[199].mxu0  ;;  %v4755_v36 = vpack.c.bf16 %v4110_v7, %v4110_v7  ;;  %v4222_v50 = vmax.f32 %v4206_v8, 0.0  ;;  %v4105_v31 = vmax.f32 %v4061_v51, 0.0  ;;  %v4087_v22 = vpop.f32.mrb[199].mxu1  ;;  %v4745_v20 = vpack.c.bf16 %v4100_v35, %v4100_v35 }
 0x284   :  { %v4212_v25 = vmax.f32 %v4196_v48, 0.0  ;;  %v4753_v56 = vpack.c.bf16 %v4108_v18, %v4108_v18  ;;  %v4220_v6 = vmax.f32 %v4204_v15, 0.0  ;;  %4294 = vst [vmem:[%s7732_s3 + $0x1c] sm:$0xf] %v4763_v10  ;;  %v4201_v38 = vsub.f32 0.0, %v4061_v51 }
 0x285   :  { %4190 = vst [vmem:[%s7732_s3 + $0x58] sm:$0xf] %v4755_v36  ;;  %v4771_v29 = vpack.c.bf16 %v4222_v50, %v4222_v50  ;;  %v4750_v43 = vpack.c.bf16 %v4105_v31, %v4105_v31  ;;  %4180 = vst [vmem:[%s7732_s3 + $0x8] sm:$0xf] %v4745_v20  ;;  %v4085_v37 = vadd.f32 %v4084_v5, %v7609_v17  ;;  %v4113_v30 = vmax.f32 %v4093_v33, 0.0 }
 0x286   :  { %v4761_v13 = vpack.c.bf16 %v4212_v25, %v4212_v25  ;;  %4188 = vst [vmem:[%s7732_s3 + $0x48] sm:$0xf] %v4753_v56  ;;  %v4769_v0 = vpack.c.bf16 %v4220_v6, %v4220_v6  ;;  %v4217_v63 = vmax.f32 %v4201_v38, 0.0  ;;  %v4209_v16 = vsub.f32 0.0, %v4093_v33 }
 0x287   :  { %4302 = vst [vmem:[%s7732_s3 + $0x5c] sm:$0xf] %v4771_v29  ;;  %4185 = vst [vmem:[%s7732_s3 + $0x30] sm:$0xf] %v4750_v43  ;;  %v4064_v21 = vadd.f32 %v5583_v14, %v7597_v11  ;;  %v4103_v4 = vmax.f32 %v4053_v55, 0.0  ;;  %v4199_v17 = vsub.f32 0.0, %v4053_v55  ;;  %v4758_v26 = vpack.c.bf16 %v4113_v30, %v4113_v30 }
 0x288   :  { %4292 = vst [vmem:[%s7732_s3 + $0xc] sm:$0xf] %v4761_v13  ;;  %4300 = vst [vmem:[%s7732_s3 + $0x4c] sm:$0xf] %v4769_v0  ;;  %v4111_v60 = vmax.f32 %v4085_v37, 0.0  ;;  %v4207_v41 = vsub.f32 0.0, %v4085_v37  ;;  %v4766_v59 = vpack.c.bf16 %v4217_v63, %v4217_v63  ;;  %v4096_v52 = vadd.f32 %v5591_v28, %v7617_v1 }
 0x289   :  { %v4225_v49 = vmax.f32 %v4209_v16, 0.0  ;;  %v4106_v24 = vmax.f32 %v4064_v21, 0.0  ;;  %v4748_v27 = vpack.c.bf16 %v4103_v4, %v4103_v4  ;;  %v4215_v32 = vmax.f32 %v4199_v17, 0.0  ;;  %4193 = vst [vmem:[%s7732_s3 + $0x70] sm:$0xf] %v4758_v26 }
 0x28a   :  { %v4756_v47 = vpack.c.bf16 %v4111_v60, %v4111_v60  ;;  %v4223_v11 = vmax.f32 %v4207_v41, 0.0  ;;  %4297 = vst [vmem:[%s7732_s3 + $0x34] sm:$0xf] %v4766_v59  ;;  %v4202_v34 = vsub.f32 0.0, %v4064_v21  ;;  %v4056_v61 = vadd.f32 %v4055_v62, %v7591_v9 }
 0x28b   :  { %v4774_v3 = vpack.c.bf16 %v4225_v49, %v4225_v49  ;;  %v4751_v12 = vpack.c.bf16 %v4106_v24, %v4106_v24  ;;  %4183 = vst [vmem:[%s7732_s3 + $0x20] sm:$0xf] %v4748_v27  ;;  %v4764_v57 = vpack.c.bf16 %v4215_v32, %v4215_v32  ;;  %v4088_v53 = vadd.f32 %v4087_v22, %v7611_v58 }
 0x28c   :  { %4191 = vst [vmem:[%s7732_s3 + $0x60] sm:$0xf] %v4756_v47  ;;  %v4772_v44 = vpack.c.bf16 %v4223_v11, %v4223_v11  ;;  %v4218_v1 = vmax.f32 %v4202_v34, 0.0  ;;  %v4114_v40 = vmax.f32 %v4096_v52, 0.0  ;;  %v4210_v19 = vsub.f32 0.0, %v4096_v52 }
 0x28d   :  { %4305 = vst [vmem:[%s7732_s3 + $0x74] sm:$0xf] %v4774_v3  ;;  %4186 = vst [vmem:[%s7732_s3 + $0x38] sm:$0xf] %v4751_v12  ;;  %v4104_v9 = vmax.f32 %v4056_v61, 0.0  ;;  %v4200_v58 = vsub.f32 0.0, %v4056_v61 }
 0x28e   :  { %4295 = vst [vmem:[%s7732_s3 + $0x24] sm:$0xf] %v4764_v57  ;;  %4303 = vst [vmem:[%s7732_s3 + $0x64] sm:$0xf] %v4772_v44  ;;  %v4112_v39 = vmax.f32 %v4088_v53, 0.0  ;;  %v4208_v46 = vsub.f32 0.0, %v4088_v53  ;;  %v4767_v42 = vpack.c.bf16 %v4218_v1, %v4218_v1  ;;  %v4759_v2 = vpack.c.bf16 %v4114_v40, %v4114_v40 }
 0x28f   :  { %v4226_v23 = vmax.f32 %v4210_v19, 0.0  ;;  %v4749_v45 = vpack.c.bf16 %v4104_v9, %v4104_v9  ;;  %v4216_v54 = vmax.f32 %v4200_v58, 0.0 }
 0x290   :  { %v4757_v7 = vpack.c.bf16 %v4112_v39, %v4112_v39  ;;  %v4224_v8 = vmax.f32 %v4208_v46, 0.0  ;;  %4298 = vst [vmem:[%s7732_s3 + $0x3c] sm:$0xf] %v4767_v42  ;;  %4194 = vst [vmem:[%s7732_s3 + $0x78] sm:$0xf] %v4759_v2 }
 0x291   :  { %v4775_v51 = vpack.c.bf16 %v4226_v23, %v4226_v23  ;;  %4184 = vst [vmem:[%s7732_s3 + $0x28] sm:$0xf] %v4749_v45  ;;  %v4765_v5 = vpack.c.bf16 %v4216_v54, %v4216_v54 }
 0x292   :  { %4192 = vst [vmem:[%s7732_s3 + $0x68] sm:$0xf] %v4757_v7  ;;  %v4773_v14 = vpack.c.bf16 %v4224_v8, %v4224_v8 }
 0x293   :  { %4306 = vst [vmem:[%s7732_s3 + $0x7c] sm:$0xf] %v4775_v51  ;;  %4296 = vst [vmem:[%s7732_s3 + $0x2c] sm:$0xf] %v4765_v5 }
 0x294   :  { %4304 = vst [vmem:[%s7732_s3 + $0x6c] sm:$0xf] %v4773_v14 }

// kernel: _lambda_.7
= control target key start
LH: loop header
LB: loop body
LE: loop exit
PB: predicated region body
PF: predicated region fallthrough
CT: control target
= control target key end

     0   :  { %v581_v1 = vmov 1983009808   ;;  %v68_v3 = vlaneseq  ;;  %vm400_vm0 = vcmask 1041408   ;;  %s982_s0 = inlined_call_operand.vmem [shape: bf16[2,8192], index: 0, kind: input, shape index: {}]   ;;  %s983_s1 = inlined_call_operand.vmem [shape: f32[2,8192], index: 1, kind: output, shape index: {}]  }
   0x1   :  { %v8_v0 = vld [vmem:[%s982_s0] sm:$0xff]  ;;  %v66_v2 = vunpack.c.l.s4 %v581_v1  ;;  %v9_v4 = vld [vmem:[%s982_s0 + $0x8] sm:$0xff]  ;;  %v602_v5 = vld [vmem:[%s982_s0 + $0x10] sm:$0xff] }
   0x2   :  { %v12_v6 = vld [vmem:[%s982_s0 + $0x20] sm:$0xff]  ;;  %v607_v7 = vunpack.c.l.bf16 %v8_v0  ;;  %v609_v8 = vunpack.c.h.bf16 %v8_v0  ;;  %v13_v9 = vld [vmem:[%s982_s0 + $0x28] sm:$0xff]  ;;  %v614_v10 = vunpack.c.l.bf16 %v9_v4  ;;  %v616_v12 = vshrl.u32 %v68_v3, 7  ;;  %v14_v13 = vld [vmem:[%s982_s0 + $0x30] sm:$0xff] }
   0x3   :  { %v67_v11 = vunpack.c.0.s8 %v66_v2  ;;  %v15_v14 = vld [vmem:[%s982_s0 + $0x38] sm:$0xff]  ;;  %v624_v15 = vunpack.c.h.bf16 %v9_v4  ;;  %v627_v16 = vunpack.c.l.bf16 %v602_v5  ;;  %v629_v17 = vunpack.c.l.bf16 %v12_v6 }
   0x4   :  { %v631_v18 = vunpack.c.h.bf16 %v12_v6  ;;  %v633_v19 = vunpack.c.l.bf16 %v13_v9  ;;  %v635_v20 = vunpack.c.h.bf16 %v13_v9  ;;  %v32_v21 = vmul.f32 %v607_v7, %v607_v7 }
   0x5   :  { %v33_v22 = vmul.f32 %v609_v8, %v609_v8  ;;  %v641_v23 = vunpack.c.l.bf16 %v14_v13  ;;  %v643_v24 = vunpack.c.h.bf16 %v14_v13  ;;  %v34_v25 = vmul.f32 %v614_v10, %v614_v10 }
   0x6   :  { %991 = vst [vmem:[#allocation2_spill] sm:$0xff] %v631_v18  ;;  %992 = vst [vmem:[#allocation3_spill] sm:$0xff] %v633_v19  ;;  %v648_v26 = vsub.s32 %v67_v11, %v616_v12  ;;  %v650_v27 = vunpack.c.l.bf16 %v15_v14  ;;  %v64_v28 = vcombine.high %v32_v21, %v32_v21  ;;  %v652_v30 = vunpack.c.h.bf16 %v15_v14 }
   0x7   :  { %993 = vst [vmem:[#allocation4_spill] sm:$0xff] %v635_v20  ;;  %994 = vst [vmem:[#allocation5_spill] sm:$0xff] %v641_v23  ;;  %v81_v29 = vcombine.high %v33_v22, %v33_v22  ;;  %v35_v31 = vmul.f32 %v624_v15, %v624_v15  ;;  %v658_v32 = vmul.f32 %v627_v16, %v627_v16 }
   0x8   :  { %995 = vst [vmem:[#allocation6_spill] sm:$0xff] %v643_v24  ;;  %996 = vst [vmem:[#allocation7_spill] sm:$0xff] %v650_v27  ;;  %v98_v33 = vcombine.high %v34_v25, %v34_v25  ;;  %v40_v34 = vmul.f32 %v629_v17, %v629_v17  ;;  %v41_v35 = vmul.f32 %v631_v18, %v631_v18 }
   0x9   :  { %997 = vst [vmem:[#allocation8_spill] sm:$0xff] %v652_v30  ;;  %v42_v36 = vmul.f32 %v633_v19, %v633_v19  ;;  %v43_v37 = vmul.f32 %v635_v20, %v635_v20  ;;  %v44_v38 = vmul.f32 %v641_v23, %v641_v23  ;;  %v45_v39 = vmul.f32 %v643_v24, %v643_v24 }
   0xa   :  { %v71_v40 = vrot.slane %v32_v21, %v648_v26  ;;  %v115_v41 = vcombine.high %v35_v31, %v35_v31  ;;  %v78_v42 = vrot.slane %v64_v28, %v648_v26  ;;  %v88_v43 = vrot.slane %v33_v22, %v648_v26 }
   0xb   :  { %v676_v44 = vrot.slane %v81_v29, %v648_v26  ;;  %v679_v45 = vrot.slane %v34_v25, %v648_v26  ;;  %v46_v46 = vmul.f32 %v650_v27, %v650_v27  ;;  %v684_v47 = vrot.slane %v98_v33, %v648_v26 }
   0xc   :  { %v200_v48 = vcombine.high %v40_v34, %v40_v34  ;;  %v217_v49 = vcombine.high %v41_v35, %v41_v35  ;;  %v47_v50 = vmul.f32 %v652_v30, %v652_v30  ;;  %v689_v51 = vrot.slane %v35_v31, %v648_v26 }
   0xd   :  { %v234_v52 = vcombine.high %v42_v36, %v42_v36  ;;  %v251_v53 = vcombine.high %v43_v37, %v43_v37  ;;  %v79_v54 = vcombine.high %v71_v40, %v71_v40  ;;  %v692_v55 = vrot.slane %v115_v41, %v648_v26 }
   0xe   :  { %v695_v56 = vrot.slane %v40_v34, %v648_v26  ;;  %v268_v57 = vcombine.high %v44_v38, %v44_v38  ;;  %v80_v58 = vcombine.high %v78_v42, %v78_v42  ;;  %v96_v59 = vcombine.high %v88_v43, %v88_v43 }
   0xf   :  { %v97_v60 = vcombine.high %v676_v44, %v676_v44  ;;  %v113_v61 = vcombine.high %v679_v45, %v679_v45  ;;  %v114_v62 = vcombine.high %v684_v47, %v684_v47  ;;  %v214_v63 = vrot.slane %v200_v48, %v648_v26 }
  0x10   :  { %v224_v0 = vrot.slane %v41_v35, %v648_v26  ;;  %v231_v1 = vrot.slane %v217_v49, %v648_v26  ;;  %v241_v3 = vrot.slane %v42_v36, %v648_v26  ;;  %v248_v4 = vrot.slane %v234_v52, %v648_v26 }
  0x11   :  { %v258_v6 = vrot.slane %v43_v37, %v648_v26  ;;  %v215_v9 = vcombine.high %v695_v56, %v695_v56  ;;  %v265_v11 = vrot.slane %v251_v53, %v648_v26  ;;  %v285_v13 = vcombine.high %v45_v39, %v45_v39 }
  0x12   :  { %v302_v14 = vcombine.high %v46_v46, %v46_v46  ;;  %v319_v21 = vcombine.high %v47_v50, %v47_v50  ;;  %v401_v22 = vsel %vm400_vm0, %v71_v40, 0.0  ;;  %v402_v25 = vsel %vm400_vm0, %v79_v54, 0.0 }
  0x13   :  { %v404_v28 = vsel %vm400_vm0, %v78_v42, 0.0  ;;  %v216_v29 = vcombine.high %v214_v63, %v214_v63  ;;  %v232_v31 = vcombine.high %v224_v0, %v224_v0  ;;  %v233_v33 = vcombine.high %v231_v1, %v231_v1 }
  0x14   :  { %v403_v34 = vadd.f32 %v402_v25, %v401_v22  ;;  %v275_v35 = vrot.slane %v44_v38, %v648_v26  ;;  %v282_v36 = vrot.slane %v268_v57, %v648_v26  ;;  %v292_v37 = vrot.slane %v45_v39, %v648_v26 }
  0x15   :  { %v406_v41 = vsel %vm400_vm0, %v80_v58, 0.0  ;;  %v299_v48 = vrot.slane %v285_v13, %v648_v26  ;;  %v309_v40 = vrot.slane %v46_v46, %v648_v26  ;;  %v326_v49 = vrot.slane %v47_v50, %v648_v26 }
  0x16   :  { %v405_v52 = vadd.f32 %v404_v28, %v403_v34  ;;  %v249_v42 = vcombine.high %v241_v3, %v241_v3  ;;  %v316_v53 = vrot.slane %v302_v14, %v648_v26  ;;  %v333_v54 = vrot.slane %v319_v21, %v648_v26 }
  0x17   :  { %v408_v38 = vsel %vm400_vm0, %v88_v43, 0.0  ;;  %v250_v22 = vcombine.high %v248_v4, %v248_v4  ;;  %v266_v57 = vcombine.high %v258_v6, %v258_v6  ;;  %v267_v25 = vcombine.high %v265_v11, %v265_v11 }
  0x18   :  { %v407_v39 = vadd.f32 %v406_v41, %v405_v52  ;;  %v283_v2 = vcombine.high %v275_v35, %v275_v35  ;;  %v284_v58 = vcombine.high %v282_v36, %v282_v36  ;;  %v300_v30 = vcombine.high %v292_v37, %v292_v37 }
  0x19   :  { %v410_v13 = vsel %vm400_vm0, %v96_v59, 0.0  ;;  %v301_v46 = vcombine.high %v299_v48, %v299_v48  ;;  %v317_v27 = vcombine.high %v309_v40, %v309_v40  ;;  %v334_v50 = vcombine.high %v326_v49, %v326_v49 }
  0x1a   :  { %v409_v28 = vadd.f32 %v408_v38, %v407_v39  ;;  %v318_v34 = vcombine.high %v316_v53, %v316_v53  ;;  %v335_v24 = vcombine.high %v333_v54, %v333_v54  ;;  %v412_v14 = vsel %vm400_vm0, %v676_v44, 0.0 }
  0x1b   :  { %v414_v43 = vsel %vm400_vm0, %v97_v60, 0.0  ;;  %v416_v41 = vsel %vm400_vm0, %v679_v45, 0.0  ;;  %v418_v52 = vsel %vm400_vm0, %v113_v61, 0.0  ;;  %v420_v59 = vsel %vm400_vm0, %v684_v47, 0.0 }
  0x1c   :  { %v411_v21 = vadd.f32 %v410_v13, %v409_v28  ;;  %v422_v23 = vsel %vm400_vm0, %v114_v62, 0.0  ;;  %v738_v38 = vsel %vm400_vm0, %v215_v9, 0.0  ;;  %v741_v39 = vsel %vm400_vm0, %v214_v63, 0.0 }
  0x1d   :  { %v744_v44 = vsel %vm400_vm0, %v216_v29, 0.0  ;;  %v747_v13 = vsel %vm400_vm0, %v224_v0, 0.0  ;;  %v750_v45 = vsel %vm400_vm0, %v232_v31, 0.0  ;;  %v753_v47 = vsel %vm400_vm0, %v231_v1, 0.0 }
  0x1e   :  { %v413_v60 = vadd.f32 %v412_v14, %v411_v21  ;;  %v756_v61 = vsel %vm400_vm0, %v233_v33, 0.0  ;;  %v759_v62 = vsel %vm400_vm0, %v241_v3, 0.0  ;;  %v762_v63 = vsel %vm400_vm0, %v249_v42, 0.0 }
  0x1f   :  { %v765_v9 = vsel %vm400_vm0, %v248_v4, 0.0  ;;  %v768_v29 = vsel %vm400_vm0, %v250_v22, 0.0  ;;  %v771_v31 = vsel %vm400_vm0, %v258_v6, 0.0  ;;  %v774_v1 = vsel %vm400_vm0, %v266_v57, 0.0 }
  0x20   :  { %v415_v0 = vadd.f32 %v414_v43, %v413_v60  ;;  %v777_v33 = vsel %vm400_vm0, %v265_v11, 0.0  ;;  %v780_v3 = vsel %vm400_vm0, %v267_v25, 0.0  ;;  %v783_v42 = vsel %vm400_vm0, %v275_v35, 0.0 }
  0x21   :  { %v786_v4 = vsel %vm400_vm0, %v283_v2, 0.0  ;;  %v789_v28 = vsel %vm400_vm0, %v282_v36, 0.0  ;;  %v792_v6 = vsel %vm400_vm0, %v284_v58, 0.0  ;;  %v795_v57 = vsel %vm400_vm0, %v292_v37, 0.0 }
  0x22   :  { %v417_v22 = vadd.f32 %v416_v41, %v415_v0  ;;  %v798_v11 = vsel %vm400_vm0, %v300_v30, 0.0  ;;  %v801_v25 = vsel %vm400_vm0, %v299_v48, 0.0  ;;  %v804_v35 = vsel %vm400_vm0, %v301_v46, 0.0 }
  0x23   :  { %v807_v2 = vsel %vm400_vm0, %v309_v40, 0.0  ;;  %v810_v14 = vsel %vm400_vm0, %v317_v27, 0.0  ;;  %v813_v58 = vsel %vm400_vm0, %v316_v53, 0.0  ;;  %v816_v37 = vsel %vm400_vm0, %v318_v34, 0.0 }
  0x24   :  { %v419_v36 = vadd.f32 %v418_v52, %v417_v22  ;;  %v819_v30 = vsel %vm400_vm0, %v326_v49, 0.0  ;;  %v822_v48 = vsel %vm400_vm0, %v334_v50, 0.0  ;;  %v825_v46 = vsel %vm400_vm0, %v333_v54, 0.0 }
  0x25   :  { %v828_v40 = vsel %vm400_vm0, %v335_v24, 0.0  ;;  %v424_v53 = vsel %vm400_vm0, %v689_v51, 0.0  ;;  %v833_v43 = vunpack.c.h.bf16 %v602_v5  ;;  %v131_v49 = vcombine.high %v692_v55, %v692_v55 }
  0x26   :  { %v421_v27 = vadd.f32 %v420_v59, %v419_v36  ;;  %v132_v50 = vcombine.high %v658_v32, %v658_v32  ;;  %v139_v54 = vrot.slane %v658_v32, %v648_v26  ;;  %v998_v24 = vcombine.high %v689_v51, %v689_v51 }
  0x27   :  { %v428_v5 = vsel %vm400_vm0, %v692_v55, 0.0  ;;  %v37_v59 = vmul.f32 %v833_v43, %v833_v43  ;;  %v430_v0 = vsel %vm400_vm0, %v131_v49, 0.0 }
  0x28   :  { %v423_v34 = vadd.f32 %v422_v23, %v421_v27  ;;  %v426_v21 = vsel %vm400_vm0, %v998_v24, 0.0  ;;  %v11_v23 = vld [vmem:[%s982_s0 + $0x18] sm:$0xff]  ;;  %v146_v60 = vrot.slane %v132_v50, %v648_v26  ;;  %v147_v32 = vcombine.high %v139_v54, %v139_v54 }
  0x29   :  { %v432_v22 = vsel %vm400_vm0, %v139_v54, 0.0  ;;  %v855_v36 = vunpack.c.l.bf16 %v11_v23 }
  0x2a   :  { %v425_v41 = vadd.f32 %v424_v53, %v423_v34  ;;  %v148_v55 = vcombine.high %v146_v60, %v146_v60  ;;  %v149_v53 = vcombine.high %v37_v59, %v37_v59  ;;  %v156_v34 = vrot.slane %v37_v59, %v648_v26 }
  0x2b   :  { %v434_v24 = vsel %vm400_vm0, %v147_v32, 0.0  ;;  %v38_v50 = vmul.f32 %v855_v36, %v855_v36 }
  0x2c   :  { %v427_v52 = vadd.f32 %v426_v21, %v425_v41  ;;  %v436_v41 = vsel %vm400_vm0, %v146_v60, 0.0  ;;  %v163_v49 = vrot.slane %v149_v53, %v648_v26  ;;  %v438_v54 = vsel %vm400_vm0, %v148_v55, 0.0 }
  0x2d   :  { %v166_v32 = vcombine.high %v38_v50, %v38_v50 }
  0x2e   :  { %v429_v51 = vadd.f32 %v428_v5, %v427_v52  ;;  %v164_v5 = vcombine.high %v156_v34, %v156_v34  ;;  %v165_v19 = vcombine.high %v163_v49, %v163_v49 }
  0x30   :  { %v431_v27 = vadd.f32 %v430_v0, %v429_v51  ;;  %v440_v0 = vsel %vm400_vm0, %v156_v34, 0.0  ;;  %v865_v51 = vunpack.c.h.bf16 %v11_v23  ;;  %v442_v60 = vsel %vm400_vm0, %v164_v5, 0.0 }
  0x31   :  { %v446_v23 = vsel %vm400_vm0, %v165_v19, 0.0 }
  0x32   :  { %v433_v21 = vadd.f32 %v432_v22, %v431_v27  ;;  %v173_v22 = vrot.slane %v38_v50, %v648_v26  ;;  %v39_v53 = vmul.f32 %v865_v51, %v865_v51 }
  0x34   :  { %v435_v20 = vadd.f32 %v434_v24, %v433_v21  ;;  %v444_v24 = vsel %vm400_vm0, %v163_v49, 0.0  ;;  %v181_v55 = vcombine.high %v173_v22, %v173_v22  ;;  %v183_v50 = vcombine.high %v39_v53, %v39_v53 }
  0x35   :  { %v190_v5 = vrot.slane %v39_v53, %v648_v26 }
  0x36   :  { %v437_v52 = vadd.f32 %v436_v41, %v435_v20  ;;  %v180_v20 = vrot.slane %v166_v32, %v648_v26  ;;  %v448_v41 = vsel %vm400_vm0, %v173_v22, 0.0 }
  0x37   :  { %v198_v32 = vcombine.high %v190_v5, %v190_v5 }
  0x38   :  { %v439_v59 = vadd.f32 %v438_v54, %v437_v52  ;;  %v182_v52 = vcombine.high %v180_v20, %v180_v20 }
  0x3a   :  { %v441_v27 = vadd.f32 %v440_v0, %v439_v59  ;;  %v450_v0 = vsel %vm400_vm0, %v181_v55, 0.0  ;;  %v452_v59 = vsel %vm400_vm0, %v180_v20, 0.0  ;;  %v454_v18 = vsel %vm400_vm0, %v182_v52, 0.0 }
  0x3c   :  { %v443_v21 = vadd.f32 %v442_v60, %v441_v27  ;;  %v197_v27 = vrot.slane %v183_v50, %v648_v26  ;;  %v464_v26 = vsel %vm400_vm0, %v695_v56, 0.0 }
  0x3e   :  { %v445_v34 = vadd.f32 %v444_v24, %v443_v21  ;;  %v456_v24 = vsel %vm400_vm0, %v190_v5, 0.0  ;;  %v199_v21 = vcombine.high %v197_v27, %v197_v27  ;;  %v460_v53 = vsel %vm400_vm0, %v197_v27, 0.0 }
  0x40   :  { %v447_v54 = vadd.f32 %v446_v23, %v445_v34  ;;  %v458_v23 = vsel %vm400_vm0, %v198_v32, 0.0 }
  0x42   :  { %v449_v49 = vadd.f32 %v448_v41, %v447_v54  ;;  %v462_v41 = vsel %vm400_vm0, %v199_v21, 0.0 }
  0x44   :  { %v451_v60 = vadd.f32 %v450_v0, %v449_v49 }
  0x46   :  { %v453_v19 = vadd.f32 %v452_v59, %v451_v60 }
  0x48   :  { %v455_v22 = vadd.f32 %v454_v18, %v453_v19 }
  0x4a   :  { %v457_v34 = vadd.f32 %v456_v24, %v455_v22 }
  0x4c   :  { %v459_v55 = vadd.f32 %v458_v23, %v457_v34 }
  0x4e   :  { %v461_v20 = vadd.f32 %v460_v53, %v459_v55  ;;  %v999_v53 = vld [vmem:[#allocation2_spill] sm:$0xff] }
  0x50   :  { %v463_v54 = vadd.f32 %v462_v41, %v461_v20  ;;  %v1000_v41 = vld [vmem:[#allocation3_spill] sm:$0xff]  ;;  %v1001_v20 = vld [vmem:[#allocation4_spill] sm:$0xff] }
  0x52   :  { %v465_v50 = vadd.f32 %v464_v26, %v463_v54 }
  0x54   :  { %v467_v52 = vadd.f32 %v738_v38, %v465_v50 }
  0x56   :  { %v469_v5 = vadd.f32 %v741_v39, %v467_v52 }
  0x58   :  { %v471_v18 = vadd.f32 %v744_v44, %v469_v5 }
  0x5a   :  { %v473_v0 = vadd.f32 %v747_v13, %v471_v18 }
  0x5c   :  { %v475_v49 = vadd.f32 %v750_v45, %v473_v0 }
  0x5e   :  { %v477_v59 = vadd.f32 %v753_v47, %v475_v49 }
  0x60   :  { %v479_v60 = vadd.f32 %v756_v61, %v477_v59 }
  0x62   :  { %v481_v27 = vadd.f32 %v759_v62, %v479_v60 }
  0x64   :  { %v483_v56 = vadd.f32 %v762_v63, %v481_v27 }
  0x66   :  { %v485_v32 = vadd.f32 %v765_v9, %v483_v56 }
  0x68   :  { %v487_v38 = vadd.f32 %v768_v29, %v485_v32 }
  0x6a   :  { %v489_v39 = vadd.f32 %v771_v31, %v487_v38 }
  0x6c   :  { %v491_v44 = vadd.f32 %v774_v1, %v489_v39 }
  0x6e   :  { %v493_v13 = vadd.f32 %v777_v33, %v491_v44 }
  0x70   :  { %v495_v45 = vadd.f32 %v780_v3, %v493_v13 }
  0x72   :  { %v497_v47 = vadd.f32 %v783_v42, %v495_v45 }
  0x74   :  { %v499_v61 = vadd.f32 %v786_v4, %v497_v47 }
  0x76   :  { %v501_v62 = vadd.f32 %v789_v28, %v499_v61 }
  0x78   :  { %v503_v63 = vadd.f32 %v792_v6, %v501_v62 }
  0x7a   :  { %v505_v9 = vadd.f32 %v795_v57, %v503_v63 }
  0x7c   :  { %v507_v29 = vadd.f32 %v798_v11, %v505_v9 }
  0x7e   :  { %v509_v31 = vadd.f32 %v801_v25, %v507_v29 }
  0x80   :  { %v511_v1 = vadd.f32 %v804_v35, %v509_v31  ;;  %v582_v35 = vmov 269488144  }
  0x81   :  { %v534_v24 = vunpack.c.l.s4 %v582_v35 }
  0x82   :  { %v513_v33 = vadd.f32 %v807_v2, %v511_v1 }
  0x83   :  { %v535_v2 = vunpack.c.0.s8 %v534_v24 }
  0x84   :  { %v515_v3 = vadd.f32 %v810_v14, %v513_v33 }
  0x85   :  { %v538_v14 = vsub.s32 %v535_v2, %v616_v12 }
  0x86   :  { %v517_v42 = vadd.f32 %v813_v58, %v515_v3 }
  0x88   :  { %v519_v4 = vadd.f32 %v816_v37, %v517_v42 }
  0x8a   :  { %v521_v28 = vadd.f32 %v819_v30, %v519_v4 }
  0x8c   :  { %v523_v6 = vadd.f32 %v822_v48, %v521_v28 }
  0x8e   :  { %v525_v57 = vadd.f32 %v825_v46, %v523_v6 }
  0x90   :  { %v527_v11 = vadd.f32 %v828_v40, %v525_v57 }
  0x92   :  { %528 = vadd.xlane.f32.xlu0 %v527_v11 }
 0x11f   :  { %v529_v25 = vpop.xlane.xlu0 %528 }
 0x120   :  { %v530_v19 = vmax.f32 %v529_v25, 1e-24 }
 0x122   :  { %579 = vrsqrt.f32 %v530_v19 }
 0x12c   :  { %v580_v58 = vpop.eup %579 }
 0x12d   :  { %v539_v22 = vrot.slane %v580_v58, %v538_v14 }
 0x12f   :  { %v541_v37 = vmul.f32 %v539_v22, %v607_v7  ;;  %v542_v30 = vmul.f32 %v539_v22, %v609_v8  ;;  %v543_v48 = vmul.f32 %v539_v22, %v614_v10  ;;  %v544_v46 = vmul.f32 %v539_v22, %v624_v15  ;;  %v1002_v10 = vld [vmem:[#allocation5_spill] sm:$0xff] }
 0x130   :  { %v545_v40 = vmul.f32 %v539_v22, %v627_v16  ;;  %v546_v21 = vmul.f32 %v539_v22, %v833_v43  ;;  %v547_v23 = vmul.f32 %v539_v22, %v855_v36  ;;  %v548_v34 = vmul.f32 %v539_v22, %v865_v51  ;;  %v1003_v16 = vld [vmem:[#allocation6_spill] sm:$0xff]  ;;  %v1004_v43 = vld [vmem:[#allocation7_spill] sm:$0xff]  ;;  %v1005_v51 = vld [vmem:[#allocation8_spill] sm:$0xff] }
 0x131   :  { %v549_v12 = vmul.f32 %v539_v22, %v629_v17  ;;  %v550_v55 = vmul.f32 %v539_v22, %v999_v53  ;;  %v551_v7 = vmul.f32 %v539_v22, %v1000_v41  ;;  %v552_v8 = vmul.f32 %v539_v22, %v1001_v20  ;;  %557 = vst [vmem:[%s983_s1] sm:$0xff] %v541_v37 }
 0x132   :  { %558 = vst [vmem:[%s983_s1 + $0x8] sm:$0xff] %v542_v30  ;;  %559 = vst [vmem:[%s983_s1 + $0x10] sm:$0xff] %v543_v48  ;;  %v553_v15 = vmul.f32 %v539_v22, %v1002_v10  ;;  %v554_v17 = vmul.f32 %v539_v22, %v1003_v16  ;;  %v555_v36 = vmul.f32 %v539_v22, %v1004_v43 }
 0x133   :  { %560 = vst [vmem:[%s983_s1 + $0x18] sm:$0xff] %v544_v46  ;;  %v556_v26 = vmul.f32 %v539_v22, %v1005_v51  ;;  %561 = vst [vmem:[%s983_s1 + $0x20] sm:$0xff] %v545_v40 }
 0x134   :  { %562 = vst [vmem:[%s983_s1 + $0x28] sm:$0xff] %v546_v21  ;;  %563 = vst [vmem:[%s983_s1 + $0x30] sm:$0xff] %v547_v23 }
 0x135   :  { %564 = vst [vmem:[%s983_s1 + $0x38] sm:$0xff] %v548_v34  ;;  %565 = vst [vmem:[%s983_s1 + $0x40] sm:$0xff] %v549_v12 }
 0x136   :  { %566 = vst [vmem:[%s983_s1 + $0x48] sm:$0xff] %v550_v55  ;;  %567 = vst [vmem:[%s983_s1 + $0x50] sm:$0xff] %v551_v7 }
 0x137   :  { %568 = vst [vmem:[%s983_s1 + $0x58] sm:$0xff] %v552_v8  ;;  %569 = vst [vmem:[%s983_s1 + $0x60] sm:$0xff] %v553_v15 }
 0x138   :  { %570 = vst [vmem:[%s983_s1 + $0x68] sm:$0xff] %v554_v17  ;;  %571 = vst [vmem:[%s983_s1 + $0x70] sm:$0xff] %v555_v36 }
 0x139   :  { %572 = vst [vmem:[%s983_s1 + $0x78] sm:$0xff] %v556_v26 }

// kernel: _lambda_.6
= control target key start
LH: loop header
LB: loop body
LE: loop exit
PB: predicated region body
PF: predicated region fallthrough
CT: control target
= control target key end

     0   :  { %s12080_s1 = inlined_call_operand.vmem [shape: bf16[6400,256], index: 1, kind: input, shape index: {}]   ;;  %s12081_s0 = inlined_call_operand.vmem [shape: bf16[32,6400], index: 0, kind: input, shape index: {}]   ;;  %s12082_s2 = inlined_call_operand.vmem [shape: f32[1,256], index: 2, kind: input, shape index: {}]   ;;  %s12083_s3 = inlined_call_operand.vmem [shape: bf16[32,512], index: 3, kind: output, shape index: {}]  }
   0x1   :  { %v7983_v0 = vld [vmem:[%s12080_s1 + $0x4] ss:$8 sps:$4 sm:$0xff]   ;;  %v7987_v2 = vld [vmem:[%s12080_s1] ss:$8 sps:$4 sm:$0xff]   ;;  %v7989_v4 = vld [vmem:[%s12080_s1 + $0x14] ss:$8 sps:$4 sm:$0xff]  }
   0x2   :  { %v7985_v1 = vld [vmem:[%s12080_s1 + $0xc04] ss:$8 sps:$4 sm:$0xff]   ;;  %5426 = vmatprep.subr.bf16.mxu1 %v7983_v0  ;;  %v7988_v3 = vld [vmem:[%s12080_s1 + $0xc00] ss:$8 sps:$4 sm:$0xff]   ;;  %v7991_v5 = vld [vmem:[%s12080_s1 + $0xc14] ss:$8 sps:$4 sm:$0xff]  }
   0x3   :  { %6062 = vmatprep.subr.bf16.mxu0 %v7985_v1  ;;  %5427 = vmatpush1.bf16.msra.mxu1 %v7987_v2  ;;  %v7993_v6 = vld [vmem:[%s12080_s1 + $0x10] ss:$8 sps:$4 sm:$0xff]   ;;  %v7995_v8 = vld [vmem:[%s12080_s1 + $0x24] ss:$8 sps:$4 sm:$0xff]   ;;  %v7999_v10 = vld [vmem:[%s12080_s1 + $0x20] ss:$8 sps:$4 sm:$0xff]  }
   0x4   :  { %6063 = vmatpush1.bf16.msra.mxu0 %v7988_v3  ;;  %5428 = vmatprep.subr.bf16.mxu1 %v7989_v4  ;;  %v7994_v7 = vld [vmem:[%s12080_s1 + $0xc10] ss:$8 sps:$4 sm:$0xff]   ;;  %v7997_v9 = vld [vmem:[%s12080_s1 + $0xc24] ss:$8 sps:$4 sm:$0xff]   ;;  %v8000_v11 = vld [vmem:[%s12080_s1 + $0xc20] ss:$8 sps:$4 sm:$0xff]  }
   0x5   :  { %6064 = vmatprep.subr.bf16.mxu0 %v7991_v5  ;;  %v8001_v12 = vld [vmem:[%s12080_s1 + $0x34] ss:$8 sps:$4 sm:$0xff]   ;;  %v8005_v14 = vld [vmem:[%s12080_s1 + $0x30] ss:$8 sps:$4 sm:$0xff]   ;;  %v8007_v16 = vld [vmem:[%s12080_s1 + $0x44] ss:$8 sps:$4 sm:$0xff]  }
   0x6   :  { %v8003_v13 = vld [vmem:[%s12080_s1 + $0xc34] ss:$8 sps:$4 sm:$0xff]   ;;  %v8006_v15 = vld [vmem:[%s12080_s1 + $0xc30] ss:$8 sps:$4 sm:$0xff]   ;;  %v8009_v17 = vld [vmem:[%s12080_s1 + $0xc44] ss:$8 sps:$4 sm:$0xff]  }
   0x7   :  { %5429 = vmatpush1.bf16.msra.mxu1 %v7993_v6  ;;  %v8011_v18 = vld [vmem:[%s12080_s1 + $0x40] ss:$8 sps:$4 sm:$0xff]   ;;  %v8013_v20 = vld [vmem:[%s12080_s1 + $0x54] ss:$8 sps:$4 sm:$0xff]   ;;  %v8017_v22 = vld [vmem:[%s12080_s1 + $0x50] ss:$8 sps:$4 sm:$0xff]  }
   0x8   :  { %6065 = vmatpush1.bf16.msra.mxu0 %v7994_v7  ;;  %5430 = vmatprep.subr.bf16.mxu1 %v7995_v8  ;;  %v8012_v19 = vld [vmem:[%s12080_s1 + $0xc40] ss:$8 sps:$4 sm:$0xff]   ;;  %v8015_v21 = vld [vmem:[%s12080_s1 + $0xc54] ss:$8 sps:$4 sm:$0xff]   ;;  %v8018_v23 = vld [vmem:[%s12080_s1 + $0xc50] ss:$8 sps:$4 sm:$0xff]  }
   0x9   :  { %6066 = vmatprep.subr.bf16.mxu0 %v7997_v9  ;;  %v8019_v24 = vld [vmem:[%s12080_s1 + $0x64] ss:$8 sps:$4 sm:$0xff]   ;;  %v8023_v26 = vld [vmem:[%s12080_s1 + $0x60] ss:$8 sps:$4 sm:$0xff]   ;;  %v8025_v28 = vld [vmem:[%s12080_s1 + $0x74] ss:$8 sps:$4 sm:$0xff]  }
   0xa   :  { %v8021_v25 = vld [vmem:[%s12080_s1 + $0xc64] ss:$8 sps:$4 sm:$0xff]   ;;  %v8024_v27 = vld [vmem:[%s12080_s1 + $0xc60] ss:$8 sps:$4 sm:$0xff]   ;;  %v8027_v29 = vld [vmem:[%s12080_s1 + $0xc74] ss:$8 sps:$4 sm:$0xff]  }
   0xb   :  { %5431 = vmatpush1.bf16.msra.mxu1 %v7999_v10  ;;  %v8029_v30 = vld [vmem:[%s12080_s1 + $0x70] ss:$8 sps:$4 sm:$0xff]   ;;  %v8031_v32 = vld [vmem:[%s12080_s1 + $0x84] ss:$8 sps:$4 sm:$0xff]   ;;  %v8035_v34 = vld [vmem:[%s12080_s1 + $0x80] ss:$8 sps:$4 sm:$0xff]  }
   0xc   :  { %6067 = vmatpush1.bf16.msra.mxu0 %v8000_v11  ;;  %5432 = vmatprep.subr.bf16.mxu1 %v8001_v12  ;;  %v8030_v31 = vld [vmem:[%s12080_s1 + $0xc70] ss:$8 sps:$4 sm:$0xff]   ;;  %v8033_v33 = vld [vmem:[%s12080_s1 + $0xc84] ss:$8 sps:$4 sm:$0xff]   ;;  %v8036_v35 = vld [vmem:[%s12080_s1 + $0xc80] ss:$8 sps:$4 sm:$0xff]  }
   0xd   :  { %6068 = vmatprep.subr.bf16.mxu0 %v8003_v13  ;;  %v8037_v36 = vld [vmem:[%s12080_s1 + $0x94] ss:$8 sps:$4 sm:$0xff]   ;;  %v8041_v38 = vld [vmem:[%s12080_s1 + $0x90] ss:$8 sps:$4 sm:$0xff]   ;;  %v8043_v40 = vld [vmem:[%s12080_s1 + $0xa4] ss:$8 sps:$4 sm:$0xff]  }
   0xe   :  { %v8039_v37 = vld [vmem:[%s12080_s1 + $0xc94] ss:$8 sps:$4 sm:$0xff]   ;;  %v8042_v39 = vld [vmem:[%s12080_s1 + $0xc90] ss:$8 sps:$4 sm:$0xff]   ;;  %v8045_v41 = vld [vmem:[%s12080_s1 + $0xca4] ss:$8 sps:$4 sm:$0xff]  }
   0xf   :  { %5433 = vmatpush1.bf16.msra.mxu1 %v8005_v14  ;;  %v8047_v42 = vld [vmem:[%s12080_s1 + $0xa0] ss:$8 sps:$4 sm:$0xff]   ;;  %v8049_v44 = vld [vmem:[%s12080_s1 + $0xb4] ss:$8 sps:$4 sm:$0xff]   ;;  %v8053_v46 = vld [vmem:[%s12080_s1 + $0xb0] ss:$8 sps:$4 sm:$0xff]  }
  0x10   :  { %6069 = vmatpush1.bf16.msra.mxu0 %v8006_v15  ;;  %5434 = vmatprep.subr.bf16.mxu1 %v8007_v16  ;;  %v8048_v43 = vld [vmem:[%s12080_s1 + $0xca0] ss:$8 sps:$4 sm:$0xff]   ;;  %v8051_v45 = vld [vmem:[%s12080_s1 + $0xcb4] ss:$8 sps:$4 sm:$0xff]   ;;  %v8054_v47 = vld [vmem:[%s12080_s1 + $0xcb0] ss:$8 sps:$4 sm:$0xff]  }
  0x11   :  { %6070 = vmatprep.subr.bf16.mxu0 %v8009_v17  ;;  %v8081_v48 = vld [vmem:[%s12081_s0 + $0x4] ss:$200 sps:$4 sm:$0xff]   ;;  %v8059_v52 = vld [vmem:[%s12080_s1 + $0xc0] ss:$8 sps:$4 sm:$0xff]   ;;  %v8061_v54 = vld [vmem:[%s12080_s1 + $0xd4] ss:$8 sps:$4 sm:$0xff]  }
  0x12   :  { %v8055_v49 = vld [vmem:[%s12080_s1 + $0xc4] ss:$8 sps:$4 sm:$0xff]   ;;  %5458 = vmatprep.mubr.bf16.mxu1 %v8081_v48  ;;  %v8060_v53 = vld [vmem:[%s12080_s1 + $0xcc0] ss:$8 sps:$4 sm:$0xff]   ;;  %v8063_v55 = vld [vmem:[%s12080_s1 + $0xcd4] ss:$8 sps:$4 sm:$0xff]  }
  0x13   :  { %5435 = vmatpush1.bf16.msra.mxu1 %v8011_v18  ;;  %v8057_v50 = vld [vmem:[%s12080_s1 + $0xcc4] ss:$8 sps:$4 sm:$0xff]   ;;  %v8065_v56 = vld [vmem:[%s12080_s1 + $0xd0] ss:$8 sps:$4 sm:$0xff]   ;;  %v8071_v60 = vld [vmem:[%s12080_s1 + $0xe0] ss:$8 sps:$4 sm:$0xff]  }
  0x14   :  { %6071 = vmatpush1.bf16.msra.mxu0 %v8012_v19  ;;  %5436 = vmatprep.subr.bf16.mxu1 %v8013_v20  ;;  %v8087_v51 = vld [vmem:[%s12081_s0 + $0x64] ss:$200 sps:$4 sm:$0xff]   ;;  %v8066_v57 = vld [vmem:[%s12080_s1 + $0xcd0] ss:$8 sps:$4 sm:$0xff]   ;;  %v8072_v61 = vld [vmem:[%s12080_s1 + $0xce0] ss:$8 sps:$4 sm:$0xff]  }
  0x15   :  { %6072 = vmatprep.subr.bf16.mxu0 %v8015_v21  ;;  %6094 = vmatprep.mubr.bf16.mxu0 %v8087_v51  ;;  %v8067_v58 = vld [vmem:[%s12080_s1 + $0xe4] ss:$8 sps:$4 sm:$0xff]   ;;  %v8073_v62 = vld [vmem:[%s12080_s1 + $0xf4] ss:$8 sps:$4 sm:$0xff]   ;;  %v8077_v0 = vld [vmem:[%s12080_s1 + $0xf0] ss:$8 sps:$4 sm:$0xff]  }
  0x16   :  { %v8069_v59 = vld [vmem:[%s12080_s1 + $0xce4] ss:$8 sps:$4 sm:$0xff]   ;;  %v8075_v63 = vld [vmem:[%s12080_s1 + $0xcf4] ss:$8 sps:$4 sm:$0xff]   ;;  %v8078_v1 = vld [vmem:[%s12080_s1 + $0xcf0] ss:$8 sps:$4 sm:$0xff]  }
  0x17   :  { %5437 = vmatpush1.bf16.msra.mxu1 %v8017_v22  ;;  %v8084_v2 = vld [vmem:[%s12080_s1 + $0x104] ss:$8 sps:$4 sm:$0xff]   ;;  %v8079_v4 = vld [vmem:[%s12081_s0] ss:$200 sps:$4 sm:$0xff]   ;;  %v8093_v8 = vld [vmem:[%s12080_s1 + $0x114] ss:$8 sps:$4 sm:$0xff]  }
  0x18   :  { %6073 = vmatpush1.bf16.msra.mxu0 %v8018_v23  ;;  %5438 = vmatprep.subr.bf16.mxu1 %v8019_v24  ;;  %v8090_v3 = vld [vmem:[%s12080_s1 + $0xd04] ss:$8 sps:$4 sm:$0xff]   ;;  %v8082_v5 = vld [vmem:[%s12080_s1 + $0x100] ss:$8 sps:$4 sm:$0xff]   ;;  %v8096_v9 = vld [vmem:[%s12080_s1 + $0xd14] ss:$8 sps:$4 sm:$0xff]  }
  0x19   :  { %6074 = vmatprep.subr.bf16.mxu0 %v8021_v25  ;;  %v8085_v6 = vld [vmem:[%s12081_s0 + $0x60] ss:$200 sps:$4 sm:$0xff]   ;;  %v8091_v10 = vld [vmem:[%s12080_s1 + $0x110] ss:$8 sps:$4 sm:$0xff]   ;;  %v8099_v12 = vld [vmem:[%s12080_s1 + $0x124] ss:$8 sps:$4 sm:$0xff]  }
  0x1a   :  { %v8088_v7 = vld [vmem:[%s12080_s1 + $0xd00] ss:$8 sps:$4 sm:$0xff]   ;;  %v8094_v11 = vld [vmem:[%s12080_s1 + $0xd10] ss:$8 sps:$4 sm:$0xff]   ;;  %v8102_v13 = vld [vmem:[%s12080_s1 + $0xd24] ss:$8 sps:$4 sm:$0xff]  }
  0x1b   :  { %5439 = vmatpush1.bf16.msra.mxu1 %v8023_v26  ;;  %v8097_v14 = vld [vmem:[%s12080_s1 + $0x120] ss:$8 sps:$4 sm:$0xff]   ;;  %v8105_v16 = vld [vmem:[%s12080_s1 + $0x134] ss:$8 sps:$4 sm:$0xff]   ;;  %v8103_v18 = vld [vmem:[%s12080_s1 + $0x130] ss:$8 sps:$4 sm:$0xff]  }
  0x1c   :  { %6075 = vmatpush1.bf16.msra.mxu0 %v8024_v27  ;;  %5440 = vmatprep.subr.bf16.mxu1 %v8025_v28  ;;  %v8100_v15 = vld [vmem:[%s12080_s1 + $0xd20] ss:$8 sps:$4 sm:$0xff]   ;;  %v8108_v17 = vld [vmem:[%s12080_s1 + $0xd34] ss:$8 sps:$4 sm:$0xff]   ;;  %v8106_v19 = vld [vmem:[%s12080_s1 + $0xd30] ss:$8 sps:$4 sm:$0xff]  }
  0x1d   :  { %6076 = vmatprep.subr.bf16.mxu0 %v8027_v29  ;;  %v8111_v20 = vld [vmem:[%s12080_s1 + $0x144] ss:$8 sps:$4 sm:$0xff]   ;;  %v8109_v22 = vld [vmem:[%s12080_s1 + $0x140] ss:$8 sps:$4 sm:$0xff]   ;;  %v8117_v24 = vld [vmem:[%s12080_s1 + $0x154] ss:$8 sps:$4 sm:$0xff]  }
  0x1e   :  { %v8114_v21 = vld [vmem:[%s12080_s1 + $0xd44] ss:$8 sps:$4 sm:$0xff]   ;;  %v8112_v23 = vld [vmem:[%s12080_s1 + $0xd40] ss:$8 sps:$4 sm:$0xff]   ;;  %v8120_v25 = vld [vmem:[%s12080_s1 + $0xd54] ss:$8 sps:$4 sm:$0xff]  }
  0x1f   :  { %5441 = vmatpush1.bf16.msra.mxu1 %v8029_v30  ;;  %v8115_v26 = vld [vmem:[%s12080_s1 + $0x150] ss:$8 sps:$4 sm:$0xff]   ;;  %v8169_v28 = vld [vmem:[%s12081_s0 + $0x194] ss:$200 sps:$4 sm:$0xff]   ;;  %v8123_v29 = vld [vmem:[%s12080_s1 + $0x164] ss:$8 sps:$4 sm:$0xff]  }
  0x20   :  { %6077 = vmatpush1.bf16.msra.mxu0 %v8030_v31  ;;  %5442 = vmatprep.subr.bf16.mxu1 %v8031_v32  ;;  %v8118_v27 = vld [vmem:[%s12080_s1 + $0xd50] ss:$8 sps:$4 sm:$0xff]   ;;  %v8126_v30 = vld [vmem:[%s12080_s1 + $0xd64] ss:$8 sps:$4 sm:$0xff]   ;;  %v8174_v31 = vld [vmem:[%s12081_s0 + $0x1f4] ss:$200 sps:$4 sm:$0xff]  }
  0x21   :  { %6078 = vmatprep.subr.bf16.mxu0 %v8033_v33  ;;  %v8121_v32 = vld [vmem:[%s12080_s1 + $0x160] ss:$8 sps:$4 sm:$0xff]   ;;  %v8139_v48 = vld [vmem:[%s12080_s1 + $0x190] ss:$8 sps:$4 sm:$0xff]   ;;  %v8150_v51 = vld [vmem:[%s12080_s1 + $0xda4] ss:$8 sps:$4 sm:$0xff]  }
  0x22   :  { %v8124_v33 = vld [vmem:[%s12080_s1 + $0xd60] ss:$8 sps:$4 sm:$0xff]  }
  0x23   :  { %5443 = vmatpush1.bf16.msra.mxu1 %v8035_v34  ;;  %v8179_v34 = vld [vmem:[%s12081_s0 + $0x190] ss:$200 sps:$4 sm:$0xff]  }
  0x24   :  { %6079 = vmatpush1.bf16.msra.mxu0 %v8036_v35  ;;  %5444 = vmatprep.subr.bf16.mxu1 %v8037_v36  ;;  %v8180_v35 = vld [vmem:[%s12081_s0 + $0x1f0] ss:$200 sps:$4 sm:$0xff]   ;;  %v8129_v36 = vld [vmem:[%s12080_s1 + $0x174] ss:$8 sps:$4 sm:$0xff]  }
  0x25   :  { %6080 = vmatprep.subr.bf16.mxu0 %v8039_v37  ;;  %v8132_v37 = vld [vmem:[%s12080_s1 + $0xd74] ss:$8 sps:$4 sm:$0xff]  }
  0x27   :  { %5445 = vmatpush1.bf16.msra.mxu1 %v8041_v38  ;;  %v8127_v38 = vld [vmem:[%s12080_s1 + $0x170] ss:$8 sps:$4 sm:$0xff]  }
  0x28   :  { %6081 = vmatpush1.bf16.msra.mxu0 %v8042_v39  ;;  %5446 = vmatprep.subr.bf16.mxu1 %v8043_v40  ;;  %v8130_v39 = vld [vmem:[%s12080_s1 + $0xd70] ss:$8 sps:$4 sm:$0xff]   ;;  %v8189_v40 = vld [vmem:[%s12081_s0 + $0xc] ss:$200 sps:$4 sm:$0xff]  }
  0x29   :  { %6082 = vmatprep.subr.bf16.mxu0 %v8045_v41  ;;  %v8135_v41 = vld [vmem:[%s12080_s1 + $0x184] ss:$8 sps:$4 sm:$0xff]  }
  0x2b   :  { %5447 = vmatpush1.bf16.msra.mxu1 %v8047_v42  ;;  %v8138_v42 = vld [vmem:[%s12080_s1 + $0xd84] ss:$8 sps:$4 sm:$0xff]  }
  0x2c   :  { %6083 = vmatpush1.bf16.msra.mxu0 %v8048_v43  ;;  %5448 = vmatprep.subr.bf16.mxu1 %v8049_v44  ;;  %v8195_v43 = vld [vmem:[%s12081_s0 + $0x6c] ss:$200 sps:$4 sm:$0xff]   ;;  %v8133_v44 = vld [vmem:[%s12080_s1 + $0x180] ss:$8 sps:$4 sm:$0xff]  }
  0x2d   :  { %6084 = vmatprep.subr.bf16.mxu0 %v8051_v45  ;;  %v8136_v45 = vld [vmem:[%s12080_s1 + $0xd80] ss:$8 sps:$4 sm:$0xff]  }
  0x2f   :  { %5449 = vmatpush1.bf16.msra.mxu1 %v8053_v46  ;;  %v8141_v46 = vld [vmem:[%s12080_s1 + $0x194] ss:$8 sps:$4 sm:$0xff]  }
  0x30   :  { %6085 = vmatpush1.bf16.msra.mxu0 %v8054_v47  ;;  %5450 = vmatprep.subr.bf16.mxu1 %v8055_v49  ;;  %v8144_v47 = vld [vmem:[%s12080_s1 + $0xd94] ss:$8 sps:$4 sm:$0xff]   ;;  %v8142_v49 = vld [vmem:[%s12080_s1 + $0xd90] ss:$8 sps:$4 sm:$0xff]  }
  0x31   :  { %6086 = vmatprep.subr.bf16.mxu0 %v8057_v50  ;;  %v8147_v50 = vld [vmem:[%s12080_s1 + $0x1a4] ss:$8 sps:$4 sm:$0xff]  }
  0x33   :  { %5451 = vmatpush1.bf16.msra.mxu1 %v8059_v52  ;;  %v8145_v52 = vld [vmem:[%s12080_s1 + $0x1a0] ss:$8 sps:$4 sm:$0xff]  }
  0x34   :  { %6087 = vmatpush1.bf16.msra.mxu0 %v8060_v53  ;;  %5452 = vmatprep.subr.bf16.mxu1 %v8061_v54  ;;  %v8148_v53 = vld [vmem:[%s12080_s1 + $0xda0] ss:$8 sps:$4 sm:$0xff]   ;;  %v8153_v54 = vld [vmem:[%s12080_s1 + $0x1b4] ss:$8 sps:$4 sm:$0xff]  }
  0x35   :  { %6088 = vmatprep.subr.bf16.mxu0 %v8063_v55  ;;  %v8156_v55 = vld [vmem:[%s12080_s1 + $0xdb4] ss:$8 sps:$4 sm:$0xff]  }
  0x37   :  { %5453 = vmatpush1.bf16.msra.mxu1 %v8065_v56  ;;  %v8151_v56 = vld [vmem:[%s12080_s1 + $0x1b0] ss:$8 sps:$4 sm:$0xff]  }
  0x38   :  { %6089 = vmatpush1.bf16.msra.mxu0 %v8066_v57  ;;  %5454 = vmatprep.subr.bf16.mxu1 %v8067_v58  ;;  %v8154_v57 = vld [vmem:[%s12080_s1 + $0xdb0] ss:$8 sps:$4 sm:$0xff]   ;;  %v8159_v58 = vld [vmem:[%s12080_s1 + $0x1c4] ss:$8 sps:$4 sm:$0xff]  }
  0x39   :  { %6090 = vmatprep.subr.bf16.mxu0 %v8069_v59  ;;  %v8162_v59 = vld [vmem:[%s12080_s1 + $0xdc4] ss:$8 sps:$4 sm:$0xff]  }
  0x3b   :  { %5455 = vmatpush1.bf16.msra.mxu1 %v8071_v60  ;;  %v8157_v60 = vld [vmem:[%s12080_s1 + $0x1c0] ss:$8 sps:$4 sm:$0xff]  }
  0x3c   :  { %6091 = vmatpush1.bf16.msra.mxu0 %v8072_v61  ;;  %5456 = vmatprep.subr.bf16.mxu1 %v8073_v62  ;;  %v8160_v61 = vld [vmem:[%s12080_s1 + $0xdc0] ss:$8 sps:$4 sm:$0xff]   ;;  %v8165_v62 = vld [vmem:[%s12080_s1 + $0x1d4] ss:$8 sps:$4 sm:$0xff]  }
  0x3d   :  { %6092 = vmatprep.subr.bf16.mxu0 %v8075_v63  ;;  %v8168_v63 = vld [vmem:[%s12080_s1 + $0xdd4] ss:$8 sps:$4 sm:$0xff]  }
  0x3f   :  { %5457 = vmatpush1.bf16.msra.mxu1 %v8077_v0  ;;  %v8163_v0 = vld [vmem:[%s12080_s1 + $0x1d0] ss:$8 sps:$4 sm:$0xff]  }
  0x40   :  { %6093 = vmatpush1.bf16.msra.mxu0 %v8078_v1  ;;  %5479 = vmatprep.subr.bf16.mxu1 %v8084_v2  ;;  %v8166_v1 = vld [vmem:[%s12080_s1 + $0xdd0] ss:$8 sps:$4 sm:$0xff]   ;;  %v8173_v2 = vld [vmem:[%s12080_s1 + $0x1e4] ss:$8 sps:$4 sm:$0xff]  }
  0x41   :  { %6115 = vmatprep.subr.bf16.mxu0 %v8090_v3  ;;  %v8178_v3 = vld [vmem:[%s12080_s1 + $0xde4] ss:$8 sps:$4 sm:$0xff]  }
  0x42   :  { %5459 = vmatmul.mubr.bf16.vlgmr.msra.gmra.mrb[0].mxu1 %v8079_v4  ;;  %v8171_v4 = vld [vmem:[%s12080_s1 + $0x1e0] ss:$8 sps:$4 sm:$0xff]  }
  0x43   :  { %6095 = vmatmul.mubr.bf16.vlgmr.msra.gmra.mrb[0].mxu0 %v8085_v6  ;;  %5480 = vmatpush1.bf16.msra.mxu1 %v8082_v5  ;;  %v8176_v5 = vld [vmem:[%s12080_s1 + $0xde0] ss:$8 sps:$4 sm:$0xff]   ;;  %v8183_v6 = vld [vmem:[%s12080_s1 + $0x1f4] ss:$8 sps:$4 sm:$0xff]  }
  0x44   :  { %6116 = vmatpush1.bf16.msra.mxu0 %v8088_v7  ;;  %5481 = vmatprep.subr.bf16.mxu1 %v8093_v8  ;;  %v8186_v7 = vld [vmem:[%s12080_s1 + $0xdf4] ss:$8 sps:$4 sm:$0xff]   ;;  %v8181_v8 = vld [vmem:[%s12080_s1 + $0x1f0] ss:$8 sps:$4 sm:$0xff]  }
  0x45   :  { %6117 = vmatprep.subr.bf16.mxu0 %v8096_v9  ;;  %5468 = vmatprep.mubr.bf16.mxu1 %v8169_v28  ;;  %v8184_v9 = vld [vmem:[%s12080_s1 + $0xdf0] ss:$8 sps:$4 sm:$0xff]   ;;  %v8213_v28 = vld [vmem:[%s12080_s1 + $0x234] ss:$8 sps:$4 sm:$0xff]  }
  0x46   :  { %6104 = vmatprep.mubr.bf16.mxu0 %v8174_v31  ;;  %v8214_v31 = vld [vmem:[%s12080_s1 + $0xe30] ss:$8 sps:$4 sm:$0xff]  }
  0x47   :  { %5482 = vmatpush1.bf16.msra.mxu1 %v8091_v10  ;;  %v8192_v10 = vld [vmem:[%s12080_s1 + $0x204] ss:$8 sps:$4 sm:$0xff]  }
  0x48   :  { %6118 = vmatpush1.bf16.msra.mxu0 %v8094_v11  ;;  %5483 = vmatprep.subr.bf16.mxu1 %v8099_v12  ;;  %v8198_v11 = vld [vmem:[%s12080_s1 + $0xe04] ss:$8 sps:$4 sm:$0xff]   ;;  %v8187_v12 = vld [vmem:[%s12081_s0 + $0x8] ss:$200 sps:$4 sm:$0xff]  }
  0x49   :  { %6119 = vmatprep.subr.bf16.mxu0 %v8102_v13  ;;  %v8190_v13 = vld [vmem:[%s12080_s1 + $0x200] ss:$8 sps:$4 sm:$0xff]  }
  0x4a   :  { %5469 = vmatmul.mubr.bf16.gmra.mrb[4].mxu1 %v8179_v34  ;;  %v8222_v34 = vld [vmem:[%s12080_s1 + $0xe44] ss:$8 sps:$4 sm:$0xff]  }
  0x4b   :  { %5484 = vmatpush1.bf16.msra.mxu1 %v8097_v14  ;;  %6105 = vmatmul.mubr.bf16.gmra.mrb[4].mxu0 %v8180_v35  ;;  %v8193_v14 = vld [vmem:[%s12081_s0 + $0x68] ss:$200 sps:$4 sm:$0xff]   ;;  %v8303_v35 = vld [vmem:[%s12081_s0 + $0x74] ss:$200 sps:$4 sm:$0xff]  }
  0x4c   :  { %6120 = vmatpush1.bf16.msra.mxu0 %v8100_v15  ;;  %5485 = vmatprep.subr.bf16.mxu1 %v8105_v16  ;;  %v8196_v15 = vld [vmem:[%s12080_s1 + $0xe00] ss:$8 sps:$4 sm:$0xff]   ;;  %v8201_v16 = vld [vmem:[%s12080_s1 + $0x214] ss:$8 sps:$4 sm:$0xff]  }
  0x4d   :  { %6121 = vmatprep.subr.bf16.mxu0 %v8108_v17  ;;  %5511 = vmatprep.mubr.bf16.mxu1 %v8189_v40  ;;  %v8204_v17 = vld [vmem:[%s12080_s1 + $0xe14] ss:$8 sps:$4 sm:$0xff]   ;;  %v8223_v40 = vld [vmem:[%s12080_s1 + $0x250] ss:$8 sps:$4 sm:$0xff]  }
  0x4e   :  { %6147 = vmatprep.mubr.bf16.mxu0 %v8195_v43  ;;  %v8234_v43 = vld [vmem:[%s12080_s1 + $0xe64] ss:$8 sps:$4 sm:$0xff]  }
  0x4f   :  { %5486 = vmatpush1.bf16.msra.mxu1 %v8103_v18  ;;  %v8199_v18 = vld [vmem:[%s12080_s1 + $0x210] ss:$8 sps:$4 sm:$0xff]  }
  0x50   :  { %6122 = vmatpush1.bf16.msra.mxu0 %v8106_v19  ;;  %5487 = vmatprep.subr.bf16.mxu1 %v8111_v20  ;;  %v8202_v19 = vld [vmem:[%s12080_s1 + $0xe10] ss:$8 sps:$4 sm:$0xff]   ;;  %v8277_v20 = vld [vmem:[%s12081_s0 + $0x19c] ss:$200 sps:$4 sm:$0xff]  }
  0x51   :  { %6123 = vmatprep.subr.bf16.mxu0 %v8114_v21  ;;  %v8207_v21 = vld [vmem:[%s12080_s1 + $0x224] ss:$8 sps:$4 sm:$0xff]  }
  0x53   :  { %5488 = vmatpush1.bf16.msra.mxu1 %v8109_v22  ;;  %v8210_v22 = vld [vmem:[%s12080_s1 + $0xe24] ss:$8 sps:$4 sm:$0xff]  }
  0x54   :  { %6124 = vmatpush1.bf16.msra.mxu0 %v8112_v23  ;;  %5489 = vmatprep.subr.bf16.mxu1 %v8117_v24  ;;  %v8282_v23 = vld [vmem:[%s12081_s0 + $0x1fc] ss:$200 sps:$4 sm:$0xff]   ;;  %v8205_v24 = vld [vmem:[%s12080_s1 + $0x220] ss:$8 sps:$4 sm:$0xff]  }
  0x55   :  { %6125 = vmatprep.subr.bf16.mxu0 %v8120_v25  ;;  %v8208_v25 = vld [vmem:[%s12080_s1 + $0xe20] ss:$8 sps:$4 sm:$0xff]  }
  0x57   :  { %5490 = vmatpush1.bf16.msra.mxu1 %v8115_v26  ;;  %v8287_v26 = vld [vmem:[%s12081_s0 + $0x198] ss:$200 sps:$4 sm:$0xff]  }
  0x58   :  { %6126 = vmatpush1.bf16.msra.mxu0 %v8118_v27  ;;  %5491 = vmatprep.subr.bf16.mxu1 %v8123_v29  ;;  %v8288_v27 = vld [vmem:[%s12081_s0 + $0x1f8] ss:$200 sps:$4 sm:$0xff]   ;;  %v8216_v29 = vld [vmem:[%s12080_s1 + $0xe34] ss:$8 sps:$4 sm:$0xff]  }
  0x59   :  { %6127 = vmatprep.subr.bf16.mxu0 %v8126_v30  ;;  %v8211_v30 = vld [vmem:[%s12080_s1 + $0x230] ss:$8 sps:$4 sm:$0xff]  }
  0x5b   :  { %5492 = vmatpush1.bf16.msra.mxu1 %v8121_v32  ;;  %v8297_v32 = vld [vmem:[%s12081_s0 + $0x14] ss:$200 sps:$4 sm:$0xff]  }
  0x5c   :  { %6128 = vmatpush1.bf16.msra.mxu0 %v8124_v33  ;;  %5493 = vmatprep.subr.bf16.mxu1 %v8129_v36  ;;  %v8219_v33 = vld [vmem:[%s12080_s1 + $0x244] ss:$8 sps:$4 sm:$0xff]   ;;  %v8217_v36 = vld [vmem:[%s12080_s1 + $0x240] ss:$8 sps:$4 sm:$0xff]  }
  0x5d   :  { %6129 = vmatprep.subr.bf16.mxu0 %v8132_v37  ;;  %v8220_v37 = vld [vmem:[%s12080_s1 + $0xe40] ss:$8 sps:$4 sm:$0xff]  }
  0x5f   :  { %5494 = vmatpush1.bf16.msra.mxu1 %v8127_v38  ;;  %v8225_v38 = vld [vmem:[%s12080_s1 + $0x254] ss:$8 sps:$4 sm:$0xff]  }
  0x60   :  { %6130 = vmatpush1.bf16.msra.mxu0 %v8130_v39  ;;  %5495 = vmatprep.subr.bf16.mxu1 %v8135_v41  ;;  %v8228_v39 = vld [vmem:[%s12080_s1 + $0xe54] ss:$8 sps:$4 sm:$0xff]   ;;  %v8226_v41 = vld [vmem:[%s12080_s1 + $0xe50] ss:$8 sps:$4 sm:$0xff]  }
  0x61   :  { %6131 = vmatprep.subr.bf16.mxu0 %v8138_v42  ;;  %v8231_v42 = vld [vmem:[%s12080_s1 + $0x264] ss:$8 sps:$4 sm:$0xff]  }
  0x63   :  { %5496 = vmatpush1.bf16.msra.mxu1 %v8133_v44  ;;  %v8229_v44 = vld [vmem:[%s12080_s1 + $0x260] ss:$8 sps:$4 sm:$0xff]  }
  0x64   :  { %6132 = vmatpush1.bf16.msra.mxu0 %v8136_v45  ;;  %5497 = vmatprep.subr.bf16.mxu1 %v8141_v46  ;;  %v8232_v45 = vld [vmem:[%s12080_s1 + $0xe60] ss:$8 sps:$4 sm:$0xff]   ;;  %v8237_v46 = vld [vmem:[%s12080_s1 + $0x274] ss:$8 sps:$4 sm:$0xff]  }
  0x65   :  { %6133 = vmatprep.subr.bf16.mxu0 %v8144_v47  ;;  %v8240_v47 = vld [vmem:[%s12080_s1 + $0xe74] ss:$8 sps:$4 sm:$0xff]  }
  0x67   :  { %5498 = vmatpush1.bf16.msra.mxu1 %v8139_v48  ;;  %v8235_v48 = vld [vmem:[%s12080_s1 + $0x270] ss:$8 sps:$4 sm:$0xff]  }
  0x68   :  { %6134 = vmatpush1.bf16.msra.mxu0 %v8142_v49  ;;  %5499 = vmatprep.subr.bf16.mxu1 %v8147_v50  ;;  %v8238_v49 = vld [vmem:[%s12080_s1 + $0xe70] ss:$8 sps:$4 sm:$0xff]   ;;  %v8243_v50 = vld [vmem:[%s12080_s1 + $0x284] ss:$8 sps:$4 sm:$0xff]  }
  0x69   :  { %6135 = vmatprep.subr.bf16.mxu0 %v8150_v51  ;;  %v8246_v51 = vld [vmem:[%s12080_s1 + $0xe84] ss:$8 sps:$4 sm:$0xff]  }
  0x6b   :  { %5500 = vmatpush1.bf16.msra.mxu1 %v8145_v52  ;;  %v8241_v52 = vld [vmem:[%s12080_s1 + $0x280] ss:$8 sps:$4 sm:$0xff]  }
  0x6c   :  { %6136 = vmatpush1.bf16.msra.mxu0 %v8148_v53  ;;  %5501 = vmatprep.subr.bf16.mxu1 %v8153_v54  ;;  %v8244_v53 = vld [vmem:[%s12080_s1 + $0xe80] ss:$8 sps:$4 sm:$0xff]   ;;  %v8249_v54 = vld [vmem:[%s12080_s1 + $0x294] ss:$8 sps:$4 sm:$0xff]  }
  0x6d   :  { %6137 = vmatprep.subr.bf16.mxu0 %v8156_v55  ;;  %v8252_v55 = vld [vmem:[%s12080_s1 + $0xe94] ss:$8 sps:$4 sm:$0xff]  }
  0x6f   :  { %5502 = vmatpush1.bf16.msra.mxu1 %v8151_v56  ;;  %v8247_v56 = vld [vmem:[%s12080_s1 + $0x290] ss:$8 sps:$4 sm:$0xff]  }
  0x70   :  { %6138 = vmatpush1.bf16.msra.mxu0 %v8154_v57  ;;  %5503 = vmatprep.subr.bf16.mxu1 %v8159_v58  ;;  %v8250_v57 = vld [vmem:[%s12080_s1 + $0xe90] ss:$8 sps:$4 sm:$0xff]   ;;  %v8255_v58 = vld [vmem:[%s12080_s1 + $0x2a4] ss:$8 sps:$4 sm:$0xff]  }
  0x71   :  { %6139 = vmatprep.subr.bf16.mxu0 %v8162_v59  ;;  %v8258_v59 = vld [vmem:[%s12080_s1 + $0xea4] ss:$8 sps:$4 sm:$0xff]  }
  0x73   :  { %5504 = vmatpush1.bf16.msra.mxu1 %v8157_v60  ;;  %v8253_v60 = vld [vmem:[%s12080_s1 + $0x2a0] ss:$8 sps:$4 sm:$0xff]  }
  0x74   :  { %6140 = vmatpush1.bf16.msra.mxu0 %v8160_v61  ;;  %5505 = vmatprep.subr.bf16.mxu1 %v8165_v62  ;;  %v8256_v61 = vld [vmem:[%s12080_s1 + $0xea0] ss:$8 sps:$4 sm:$0xff]   ;;  %v8261_v62 = vld [vmem:[%s12080_s1 + $0x2b4] ss:$8 sps:$4 sm:$0xff]  }
  0x75   :  { %6141 = vmatprep.subr.bf16.mxu0 %v8168_v63  ;;  %v8264_v63 = vld [vmem:[%s12080_s1 + $0xeb4] ss:$8 sps:$4 sm:$0xff]  }
  0x77   :  { %5506 = vmatpush1.bf16.msra.mxu1 %v8163_v0  ;;  %v8259_v0 = vld [vmem:[%s12080_s1 + $0x2b0] ss:$8 sps:$4 sm:$0xff]  }
  0x78   :  { %6142 = vmatpush1.bf16.msra.mxu0 %v8166_v1  ;;  %5507 = vmatprep.subr.bf16.mxu1 %v8173_v2  ;;  %v8262_v1 = vld [vmem:[%s12080_s1 + $0xeb0] ss:$8 sps:$4 sm:$0xff]   ;;  %v8267_v2 = vld [vmem:[%s12080_s1 + $0x2c4] ss:$8 sps:$4 sm:$0xff]  }
  0x79   :  { %6143 = vmatprep.subr.bf16.mxu0 %v8178_v3  ;;  %v8270_v3 = vld [vmem:[%s12080_s1 + $0xec4] ss:$8 sps:$4 sm:$0xff]  }
  0x7b   :  { %5508 = vmatpush1.bf16.msra.mxu1 %v8171_v4  ;;  %v8265_v4 = vld [vmem:[%s12080_s1 + $0x2c0] ss:$8 sps:$4 sm:$0xff]  }
  0x7c   :  { %6144 = vmatpush1.bf16.msra.mxu0 %v8176_v5  ;;  %5509 = vmatprep.subr.bf16.mxu1 %v8183_v6  ;;  %v8268_v5 = vld [vmem:[%s12080_s1 + $0xec0] ss:$8 sps:$4 sm:$0xff]   ;;  %v8273_v6 = vld [vmem:[%s12080_s1 + $0x2d4] ss:$8 sps:$4 sm:$0xff]  }
  0x7d   :  { %6145 = vmatprep.subr.bf16.mxu0 %v8186_v7  ;;  %v8276_v7 = vld [vmem:[%s12080_s1 + $0xed4] ss:$8 sps:$4 sm:$0xff]  }
  0x7f   :  { %5510 = vmatpush1.bf16.msra.mxu1 %v8181_v8  ;;  %v8271_v8 = vld [vmem:[%s12080_s1 + $0x2d0] ss:$8 sps:$4 sm:$0xff]  }
  0x80   :  { %6146 = vmatpush1.bf16.msra.mxu0 %v8184_v9  ;;  %5532 = vmatprep.subr.bf16.mxu1 %v8192_v10  ;;  %v8274_v9 = vld [vmem:[%s12080_s1 + $0xed0] ss:$8 sps:$4 sm:$0xff]   ;;  %v8281_v10 = vld [vmem:[%s12080_s1 + $0x2e4] ss:$8 sps:$4 sm:$0xff]  }
  0x81   :  { %6168 = vmatprep.subr.bf16.mxu0 %v8198_v11  ;;  %v8286_v11 = vld [vmem:[%s12080_s1 + $0xee4] ss:$8 sps:$4 sm:$0xff]  }
  0x82   :  { %5512 = vmatmul.mubr.bf16.vlgmr.msra.gmra.mrb[0].mxu1 %v8187_v12  ;;  %v8279_v12 = vld [vmem:[%s12080_s1 + $0x2e0] ss:$8 sps:$4 sm:$0xff]  }
  0x83   :  { %6148 = vmatmul.mubr.bf16.vlgmr.msra.gmra.mrb[0].mxu0 %v8193_v14  ;;  %5533 = vmatpush1.bf16.msra.mxu1 %v8190_v13  ;;  %v8284_v13 = vld [vmem:[%s12080_s1 + $0xee0] ss:$8 sps:$4 sm:$0xff]   ;;  %v8291_v14 = vld [vmem:[%s12080_s1 + $0x2f4] ss:$8 sps:$4 sm:$0xff]  }
  0x84   :  { %6169 = vmatpush1.bf16.msra.mxu0 %v8196_v15  ;;  %5534 = vmatprep.subr.bf16.mxu1 %v8201_v16  ;;  %v8294_v15 = vld [vmem:[%s12080_s1 + $0xef4] ss:$8 sps:$4 sm:$0xff]   ;;  %v8289_v16 = vld [vmem:[%s12080_s1 + $0x2f0] ss:$8 sps:$4 sm:$0xff]  }
  0x85   :  { %6170 = vmatprep.subr.bf16.mxu0 %v8204_v17  ;;  %5521 = vmatprep.mubr.bf16.mxu1 %v8277_v20  ;;  %v8292_v17 = vld [vmem:[%s12080_s1 + $0xef0] ss:$8 sps:$4 sm:$0xff]  }
  0x86   :  { %6157 = vmatprep.mubr.bf16.mxu0 %v8282_v23  ;;  %v8295_v20 = vld [vmem:[%s12081_s0 + $0x10] ss:$200 sps:$4 sm:$0xff]   ;;  %v8304_v23 = vld [vmem:[%s12080_s1 + $0xf00] ss:$8 sps:$4 sm:$0xff]  }
  0x87   :  { %5535 = vmatpush1.bf16.msra.mxu1 %v8199_v18  ;;  %v8300_v18 = vld [vmem:[%s12080_s1 + $0x304] ss:$8 sps:$4 sm:$0xff]  }
  0x88   :  { %6171 = vmatpush1.bf16.msra.mxu0 %v8202_v19  ;;  %5536 = vmatprep.subr.bf16.mxu1 %v8207_v21  ;;  %v8306_v19 = vld [vmem:[%s12080_s1 + $0xf04] ss:$8 sps:$4 sm:$0xff]   ;;  %v8298_v21 = vld [vmem:[%s12080_s1 + $0x300] ss:$8 sps:$4 sm:$0xff]  }
  0x89   :  { %6172 = vmatprep.subr.bf16.mxu0 %v8210_v22  ;;  %v8301_v22 = vld [vmem:[%s12081_s0 + $0x70] ss:$200 sps:$4 sm:$0xff]  }
  0x8a   :  { %5522 = vmatmul.mubr.bf16.gmra.mrb[4].mxu1 %v8287_v26  ;;  %v8385_v26 = vld [vmem:[%s12081_s0 + $0x1a4] ss:$200 sps:$4 sm:$0xff]  }
  0x8b   :  { %6158 = vmatmul.mubr.bf16.gmra.mrb[4].mxu0 %v8288_v27  ;;  %5537 = vmatpush1.bf16.msra.mxu1 %v8205_v24  ;;  %v8309_v24 = vld [vmem:[%s12080_s1 + $0x314] ss:$8 sps:$4 sm:$0xff]   ;;  %v8390_v27 = vld [vmem:[%s12081_s0 + $0x204] ss:$200 sps:$4 sm:$0xff]  }
  0x8c   :  { %6173 = vmatpush1.bf16.msra.mxu0 %v8208_v25  ;;  %5538 = vmatprep.subr.bf16.mxu1 %v8213_v28  ;;  %v8312_v25 = vld [vmem:[%s12080_s1 + $0xf14] ss:$8 sps:$4 sm:$0xff]   ;;  %v8307_v28 = vld [vmem:[%s12080_s1 + $0x310] ss:$8 sps:$4 sm:$0xff]  }
  0x8d   :  { %6174 = vmatprep.subr.bf16.mxu0 %v8216_v29  ;;  %5564 = vmatprep.mubr.bf16.mxu1 %v8297_v32  ;;  %v8310_v29 = vld [vmem:[%s12080_s1 + $0xf10] ss:$8 sps:$4 sm:$0xff]   ;;  %v8313_v32 = vld [vmem:[%s12080_s1 + $0x320] ss:$8 sps:$4 sm:$0xff]  }
  0x8e   :  { %6200 = vmatprep.mubr.bf16.mxu0 %v8303_v35  ;;  %v8396_v35 = vld [vmem:[%s12081_s0 + $0x200] ss:$200 sps:$4 sm:$0xff]  }
  0x8f   :  { %5539 = vmatpush1.bf16.msra.mxu1 %v8211_v30  ;;  %v8315_v30 = vld [vmem:[%s12080_s1 + $0x324] ss:$8 sps:$4 sm:$0xff]  }
  0x90   :  { %6175 = vmatpush1.bf16.msra.mxu0 %v8214_v31  ;;  %5540 = vmatprep.subr.bf16.mxu1 %v8219_v33  ;;  %v8318_v31 = vld [vmem:[%s12080_s1 + $0xf24] ss:$8 sps:$4 sm:$0xff]   ;;  %v8316_v33 = vld [vmem:[%s12080_s1 + $0xf20] ss:$8 sps:$4 sm:$0xff]  }
  0x91   :  { %6176 = vmatprep.subr.bf16.mxu0 %v8222_v34  ;;  %v8395_v34 = vld [vmem:[%s12081_s0 + $0x1a0] ss:$200 sps:$4 sm:$0xff]  }
  0x93   :  { %5541 = vmatpush1.bf16.msra.mxu1 %v8217_v36  ;;  %v8321_v36 = vld [vmem:[%s12080_s1 + $0x334] ss:$8 sps:$4 sm:$0xff]  }
  0x94   :  { %6177 = vmatpush1.bf16.msra.mxu0 %v8220_v37  ;;  %5542 = vmatprep.subr.bf16.mxu1 %v8225_v38  ;;  %v8324_v37 = vld [vmem:[%s12080_s1 + $0xf34] ss:$8 sps:$4 sm:$0xff]  }
  0x95   :  { %6178 = vmatprep.subr.bf16.mxu0 %v8228_v39  ;;  %v8405_v38 = vld [vmem:[%s12081_s0 + $0x1c] ss:$200 sps:$4 sm:$0xff]  }
  0x96   :  { %v8411_v39 = vld [vmem:[%s12081_s0 + $0x7c] ss:$200 sps:$4 sm:$0xff]  }
  0x97   :  { %5543 = vmatpush1.bf16.msra.mxu1 %v8223_v40  ;;  %v8319_v40 = vld [vmem:[%s12080_s1 + $0x330] ss:$8 sps:$4 sm:$0xff]  }
  0x98   :  { %6179 = vmatpush1.bf16.msra.mxu0 %v8226_v41  ;;  %5544 = vmatprep.subr.bf16.mxu1 %v8231_v42  ;;  %v8322_v41 = vld [vmem:[%s12080_s1 + $0xf30] ss:$8 sps:$4 sm:$0xff]   ;;  %v8327_v42 = vld [vmem:[%s12080_s1 + $0x344] ss:$8 sps:$4 sm:$0xff]  }
  0x99   :  { %6180 = vmatprep.subr.bf16.mxu0 %v8234_v43  ;;  %v8330_v43 = vld [vmem:[%s12080_s1 + $0xf44] ss:$8 sps:$4 sm:$0xff]  }
  0x9b   :  { %5545 = vmatpush1.bf16.msra.mxu1 %v8229_v44  ;;  %v8325_v44 = vld [vmem:[%s12080_s1 + $0x340] ss:$8 sps:$4 sm:$0xff]  }
  0x9c   :  { %6181 = vmatpush1.bf16.msra.mxu0 %v8232_v45  ;;  %5546 = vmatprep.subr.bf16.mxu1 %v8237_v46  ;;  %v8328_v45 = vld [vmem:[%s12080_s1 + $0xf40] ss:$8 sps:$4 sm:$0xff]   ;;  %v8333_v46 = vld [vmem:[%s12080_s1 + $0x354] ss:$8 sps:$4 sm:$0xff]  }
  0x9d   :  { %6182 = vmatprep.subr.bf16.mxu0 %v8240_v47  ;;  %v8336_v47 = vld [vmem:[%s12080_s1 + $0xf54] ss:$8 sps:$4 sm:$0xff]  }
  0x9f   :  { %5547 = vmatpush1.bf16.msra.mxu1 %v8235_v48  ;;  %v8331_v48 = vld [vmem:[%s12080_s1 + $0x350] ss:$8 sps:$4 sm:$0xff]  }
  0xa0   :  { %6183 = vmatpush1.bf16.msra.mxu0 %v8238_v49  ;;  %5548 = vmatprep.subr.bf16.mxu1 %v8243_v50  ;;  %v8334_v49 = vld [vmem:[%s12080_s1 + $0xf50] ss:$8 sps:$4 sm:$0xff]   ;;  %v8339_v50 = vld [vmem:[%s12080_s1 + $0x364] ss:$8 sps:$4 sm:$0xff]  }
  0xa1   :  { %6184 = vmatprep.subr.bf16.mxu0 %v8246_v51  ;;  %v8342_v51 = vld [vmem:[%s12080_s1 + $0xf64] ss:$8 sps:$4 sm:$0xff]  }
  0xa3   :  { %5549 = vmatpush1.bf16.msra.mxu1 %v8241_v52  ;;  %v8337_v52 = vld [vmem:[%s12080_s1 + $0x360] ss:$8 sps:$4 sm:$0xff]  }
  0xa4   :  { %6185 = vmatpush1.bf16.msra.mxu0 %v8244_v53  ;;  %5550 = vmatprep.subr.bf16.mxu1 %v8249_v54  ;;  %v8340_v53 = vld [vmem:[%s12080_s1 + $0xf60] ss:$8 sps:$4 sm:$0xff]   ;;  %v8345_v54 = vld [vmem:[%s12080_s1 + $0x374] ss:$8 sps:$4 sm:$0xff]  }
  0xa5   :  { %6186 = vmatprep.subr.bf16.mxu0 %v8252_v55  ;;  %v8348_v55 = vld [vmem:[%s12080_s1 + $0xf74] ss:$8 sps:$4 sm:$0xff]  }
  0xa7   :  { %5551 = vmatpush1.bf16.msra.mxu1 %v8247_v56  ;;  %v8343_v56 = vld [vmem:[%s12080_s1 + $0x370] ss:$8 sps:$4 sm:$0xff]  }
  0xa8   :  { %6187 = vmatpush1.bf16.msra.mxu0 %v8250_v57  ;;  %5552 = vmatprep.subr.bf16.mxu1 %v8255_v58  ;;  %v8346_v57 = vld [vmem:[%s12080_s1 + $0xf70] ss:$8 sps:$4 sm:$0xff]   ;;  %v8351_v58 = vld [vmem:[%s12080_s1 + $0x384] ss:$8 sps:$4 sm:$0xff]  }
  0xa9   :  { %6188 = vmatprep.subr.bf16.mxu0 %v8258_v59  ;;  %v8354_v59 = vld [vmem:[%s12080_s1 + $0xf84] ss:$8 sps:$4 sm:$0xff]  }
  0xab   :  { %5553 = vmatpush1.bf16.msra.mxu1 %v8253_v60  ;;  %v8349_v60 = vld [vmem:[%s12080_s1 + $0x380] ss:$8 sps:$4 sm:$0xff]  }
  0xac   :  { %6189 = vmatpush1.bf16.msra.mxu0 %v8256_v61  ;;  %5554 = vmatprep.subr.bf16.mxu1 %v8261_v62  ;;  %v8352_v61 = vld [vmem:[%s12080_s1 + $0xf80] ss:$8 sps:$4 sm:$0xff]   ;;  %v8357_v62 = vld [vmem:[%s12080_s1 + $0x394] ss:$8 sps:$4 sm:$0xff]  }
  0xad   :  { %6190 = vmatprep.subr.bf16.mxu0 %v8264_v63  ;;  %v8360_v63 = vld [vmem:[%s12080_s1 + $0xf94] ss:$8 sps:$4 sm:$0xff]  }
  0xaf   :  { %5555 = vmatpush1.bf16.msra.mxu1 %v8259_v0  ;;  %v8355_v0 = vld [vmem:[%s12080_s1 + $0x390] ss:$8 sps:$4 sm:$0xff]  }
  0xb0   :  { %6191 = vmatpush1.bf16.msra.mxu0 %v8262_v1  ;;  %5556 = vmatprep.subr.bf16.mxu1 %v8267_v2  ;;  %v8358_v1 = vld [vmem:[%s12080_s1 + $0xf90] ss:$8 sps:$4 sm:$0xff]   ;;  %v8363_v2 = vld [vmem:[%s12080_s1 + $0x3a4] ss:$8 sps:$4 sm:$0xff]  }
  0xb1   :  { %6192 = vmatprep.subr.bf16.mxu0 %v8270_v3  ;;  %v8366_v3 = vld [vmem:[%s12080_s1 + $0xfa4] ss:$8 sps:$4 sm:$0xff]  }
  0xb3   :  { %5557 = vmatpush1.bf16.msra.mxu1 %v8265_v4  ;;  %v8361_v4 = vld [vmem:[%s12080_s1 + $0x3a0] ss:$8 sps:$4 sm:$0xff]  }
  0xb4   :  { %6193 = vmatpush1.bf16.msra.mxu0 %v8268_v5  ;;  %5558 = vmatprep.subr.bf16.mxu1 %v8273_v6  ;;  %v8364_v5 = vld [vmem:[%s12080_s1 + $0xfa0] ss:$8 sps:$4 sm:$0xff]   ;;  %v8369_v6 = vld [vmem:[%s12080_s1 + $0x3b4] ss:$8 sps:$4 sm:$0xff]  }
  0xb5   :  { %6194 = vmatprep.subr.bf16.mxu0 %v8276_v7  ;;  %v8372_v7 = vld [vmem:[%s12080_s1 + $0xfb4] ss:$8 sps:$4 sm:$0xff]  }
  0xb7   :  { %5559 = vmatpush1.bf16.msra.mxu1 %v8271_v8  ;;  %v8367_v8 = vld [vmem:[%s12080_s1 + $0x3b0] ss:$8 sps:$4 sm:$0xff]  }
  0xb8   :  { %6195 = vmatpush1.bf16.msra.mxu0 %v8274_v9  ;;  %5560 = vmatprep.subr.bf16.mxu1 %v8281_v10  ;;  %v8370_v9 = vld [vmem:[%s12080_s1 + $0xfb0] ss:$8 sps:$4 sm:$0xff]   ;;  %v8375_v10 = vld [vmem:[%s12080_s1 + $0x3c4] ss:$8 sps:$4 sm:$0xff]  }
  0xb9   :  { %6196 = vmatprep.subr.bf16.mxu0 %v8286_v11  ;;  %v8378_v11 = vld [vmem:[%s12080_s1 + $0xfc4] ss:$8 sps:$4 sm:$0xff]  }
  0xbb   :  { %5561 = vmatpush1.bf16.msra.mxu1 %v8279_v12  ;;  %v8373_v12 = vld [vmem:[%s12080_s1 + $0x3c0] ss:$8 sps:$4 sm:$0xff]  }
  0xbc   :  { %6197 = vmatpush1.bf16.msra.mxu0 %v8284_v13  ;;  %5562 = vmatprep.subr.bf16.mxu1 %v8291_v14  ;;  %v8376_v13 = vld [vmem:[%s12080_s1 + $0xfc0] ss:$8 sps:$4 sm:$0xff]   ;;  %v8381_v14 = vld [vmem:[%s12080_s1 + $0x3d4] ss:$8 sps:$4 sm:$0xff]  }
  0xbd   :  { %6198 = vmatprep.subr.bf16.mxu0 %v8294_v15  ;;  %v8384_v15 = vld [vmem:[%s12080_s1 + $0xfd4] ss:$8 sps:$4 sm:$0xff]  }
  0xbf   :  { %5563 = vmatpush1.bf16.msra.mxu1 %v8289_v16  ;;  %v8379_v16 = vld [vmem:[%s12080_s1 + $0x3d0] ss:$8 sps:$4 sm:$0xff]  }
  0xc0   :  { %6199 = vmatpush1.bf16.msra.mxu0 %v8292_v17  ;;  %5585 = vmatprep.subr.bf16.mxu1 %v8300_v18  ;;  %v8382_v17 = vld [vmem:[%s12080_s1 + $0xfd0] ss:$8 sps:$4 sm:$0xff]   ;;  %v8389_v18 = vld [vmem:[%s12080_s1 + $0x3e4] ss:$8 sps:$4 sm:$0xff]  }
  0xc1   :  { %6221 = vmatprep.subr.bf16.mxu0 %v8306_v19  ;;  %v8394_v19 = vld [vmem:[%s12080_s1 + $0xfe4] ss:$8 sps:$4 sm:$0xff]  }
  0xc2   :  { %5565 = vmatmul.mubr.bf16.vlgmr.msra.gmra.mrb[0].mxu1 %v8295_v20  ;;  %v8387_v20 = vld [vmem:[%s12080_s1 + $0x3e0] ss:$8 sps:$4 sm:$0xff]  }
  0xc3   :  { %6201 = vmatmul.mubr.bf16.vlgmr.msra.gmra.mrb[0].mxu0 %v8301_v22  ;;  %5586 = vmatpush1.bf16.msra.mxu1 %v8298_v21  ;;  %v8392_v21 = vld [vmem:[%s12080_s1 + $0xfe0] ss:$8 sps:$4 sm:$0xff]   ;;  %v8399_v22 = vld [vmem:[%s12080_s1 + $0x3f4] ss:$8 sps:$4 sm:$0xff]  }
  0xc4   :  { %6222 = vmatpush1.bf16.msra.mxu0 %v8304_v23  ;;  %5587 = vmatprep.subr.bf16.mxu1 %v8309_v24  ;;  %v8402_v23 = vld [vmem:[%s12080_s1 + $0xff4] ss:$8 sps:$4 sm:$0xff]   ;;  %v8397_v24 = vld [vmem:[%s12080_s1 + $0x3f0] ss:$8 sps:$4 sm:$0xff]  }
  0xc5   :  { %6223 = vmatprep.subr.bf16.mxu0 %v8312_v25  ;;  %5574 = vmatprep.mubr.bf16.mxu1 %v8385_v26  ;;  %v8400_v25 = vld [vmem:[%s12080_s1 + $0xff0] ss:$8 sps:$4 sm:$0xff]   ;;  %v8408_v26 = vld [vmem:[%s12080_s1 + $0x404] ss:$8 sps:$4 sm:$0xff]  }
  0xc6   :  { %6210 = vmatprep.mubr.bf16.mxu0 %v8390_v27  ;;  %v8414_v27 = vld [vmem:[%s12080_s1 + $0x1004] ss:$8 sps:$4 sm:$0xff]  }
  0xc7   :  { %5588 = vmatpush1.bf16.msra.mxu1 %v8307_v28  ;;  %v8403_v28 = vld [vmem:[%s12081_s0 + $0x18] ss:$200 sps:$4 sm:$0xff]  }
  0xc8   :  { %6224 = vmatpush1.bf16.msra.mxu0 %v8310_v29  ;;  %5589 = vmatprep.subr.bf16.mxu1 %v8315_v30  ;;  %v8406_v29 = vld [vmem:[%s12080_s1 + $0x400] ss:$8 sps:$4 sm:$0xff]  }
  0xc9   :  { %6225 = vmatprep.subr.bf16.mxu0 %v8318_v31  ;;  %v8409_v30 = vld [vmem:[%s12081_s0 + $0x78] ss:$200 sps:$4 sm:$0xff]  }
  0xca   :  { %5575 = vmatmul.mubr.bf16.gmra.mrb[4].mxu1 %v8395_v34  ;;  %v8412_v31 = vld [vmem:[%s12080_s1 + $0x1000] ss:$8 sps:$4 sm:$0xff]   ;;  %v8493_v34 = vld [vmem:[%s12081_s0 + $0x1ac] ss:$200 sps:$4 sm:$0xff]  }
  0xcb   :  { %6211 = vmatmul.mubr.bf16.gmra.mrb[4].mxu0 %v8396_v35  ;;  %5590 = vmatpush1.bf16.msra.mxu1 %v8313_v32  ;;  %v8417_v32 = vld [vmem:[%s12080_s1 + $0x414] ss:$8 sps:$4 sm:$0xff]  }
  0xcc   :  { %6226 = vmatpush1.bf16.msra.mxu0 %v8316_v33  ;;  %5591 = vmatprep.subr.bf16.mxu1 %v8321_v36  ;;  %v8420_v33 = vld [vmem:[%s12080_s1 + $0x1014] ss:$8 sps:$4 sm:$0xff]   ;;  %v8415_v36 = vld [vmem:[%s12080_s1 + $0x410] ss:$8 sps:$4 sm:$0xff]  }
  0xcd   :  { %6227 = vmatprep.subr.bf16.mxu0 %v8324_v37  ;;  %5617 = vmatprep.mubr.bf16.mxu1 %v8405_v38  ;;  %v8498_v35 = vld [vmem:[%s12081_s0 + $0x20c] ss:$200 sps:$4 sm:$0xff]   ;;  %v8418_v37 = vld [vmem:[%s12080_s1 + $0x1010] ss:$8 sps:$4 sm:$0xff]  }
  0xce   :  { %6253 = vmatprep.mubr.bf16.mxu0 %v8411_v39  ;;  %v8423_v38 = vld [vmem:[%s12080_s1 + $0x424] ss:$8 sps:$4 sm:$0xff]  }
  0xcf   :  { %5592 = vmatpush1.bf16.msra.mxu1 %v8319_v40  ;;  %v8426_v39 = vld [vmem:[%s12080_s1 + $0x1024] ss:$8 sps:$4 sm:$0xff]   ;;  %v8421_v40 = vld [vmem:[%s12080_s1 + $0x420] ss:$8 sps:$4 sm:$0xff]  }
  0xd0   :  { %6228 = vmatpush1.bf16.msra.mxu0 %v8322_v41  ;;  %5593 = vmatprep.subr.bf16.mxu1 %v8327_v42  ;;  %v8424_v41 = vld [vmem:[%s12080_s1 + $0x1020] ss:$8 sps:$4 sm:$0xff]  }
  0xd1   :  { %6229 = vmatprep.subr.bf16.mxu0 %v8330_v43  ;;  %v8503_v42 = vld [vmem:[%s12081_s0 + $0x1a8] ss:$200 sps:$4 sm:$0xff]  }
  0xd2   :  { %v8504_v43 = vld [vmem:[%s12081_s0 + $0x208] ss:$200 sps:$4 sm:$0xff]  }
  0xd3   :  { %5594 = vmatpush1.bf16.msra.mxu1 %v8325_v44  ;;  %v8429_v44 = vld [vmem:[%s12080_s1 + $0x434] ss:$8 sps:$4 sm:$0xff]  }
  0xd4   :  { %6230 = vmatpush1.bf16.msra.mxu0 %v8328_v45  ;;  %5595 = vmatprep.subr.bf16.mxu1 %v8333_v46  ;;  %v8432_v45 = vld [vmem:[%s12080_s1 + $0x1034] ss:$8 sps:$4 sm:$0xff]   ;;  %v8513_v46 = vld [vmem:[%s12081_s0 + $0x24] ss:$200 sps:$4 sm:$0xff]  }
  0xd5   :  { %6231 = vmatprep.subr.bf16.mxu0 %v8336_v47  ;;  %v8519_v47 = vld [vmem:[%s12081_s0 + $0x84] ss:$200 sps:$4 sm:$0xff]  }
  0xd7   :  { %5596 = vmatpush1.bf16.msra.mxu1 %v8331_v48  ;;  %v8427_v48 = vld [vmem:[%s12080_s1 + $0x430] ss:$8 sps:$4 sm:$0xff]  }
  0xd8   :  { %6232 = vmatpush1.bf16.msra.mxu0 %v8334_v49  ;;  %5597 = vmatprep.subr.bf16.mxu1 %v8339_v50  ;;  %v8430_v49 = vld [vmem:[%s12080_s1 + $0x1030] ss:$8 sps:$4 sm:$0xff]   ;;  %v8435_v50 = vld [vmem:[%s12080_s1 + $0x444] ss:$8 sps:$4 sm:$0xff]  }
  0xd9   :  { %6233 = vmatprep.subr.bf16.mxu0 %v8342_v51  ;;  %v8438_v51 = vld [vmem:[%s12080_s1 + $0x1044] ss:$8 sps:$4 sm:$0xff]  }
  0xdb   :  { %5598 = vmatpush1.bf16.msra.mxu1 %v8337_v52  ;;  %v8433_v52 = vld [vmem:[%s12080_s1 + $0x440] ss:$8 sps:$4 sm:$0xff]  }
  0xdc   :  { %6234 = vmatpush1.bf16.msra.mxu0 %v8340_v53  ;;  %5599 = vmatprep.subr.bf16.mxu1 %v8345_v54  ;;  %v8436_v53 = vld [vmem:[%s12080_s1 + $0x1040] ss:$8 sps:$4 sm:$0xff]   ;;  %v8441_v54 = vld [vmem:[%s12080_s1 + $0x454] ss:$8 sps:$4 sm:$0xff]  }
  0xdd   :  { %6235 = vmatprep.subr.bf16.mxu0 %v8348_v55  ;;  %v8444_v55 = vld [vmem:[%s12080_s1 + $0x1054] ss:$8 sps:$4 sm:$0xff]  }
  0xdf   :  { %5600 = vmatpush1.bf16.msra.mxu1 %v8343_v56  ;;  %v8439_v56 = vld [vmem:[%s12080_s1 + $0x450] ss:$8 sps:$4 sm:$0xff]  }
  0xe0   :  { %6236 = vmatpush1.bf16.msra.mxu0 %v8346_v57  ;;  %5601 = vmatprep.subr.bf16.mxu1 %v8351_v58  ;;  %v8442_v57 = vld [vmem:[%s12080_s1 + $0x1050] ss:$8 sps:$4 sm:$0xff]   ;;  %v8447_v58 = vld [vmem:[%s12080_s1 + $0x464] ss:$8 sps:$4 sm:$0xff]  }
  0xe1   :  { %6237 = vmatprep.subr.bf16.mxu0 %v8354_v59  ;;  %v8450_v59 = vld [vmem:[%s12080_s1 + $0x1064] ss:$8 sps:$4 sm:$0xff]  }
  0xe3   :  { %5602 = vmatpush1.bf16.msra.mxu1 %v8349_v60  ;;  %v8445_v60 = vld [vmem:[%s12080_s1 + $0x460] ss:$8 sps:$4 sm:$0xff]  }
  0xe4   :  { %6238 = vmatpush1.bf16.msra.mxu0 %v8352_v61  ;;  %5603 = vmatprep.subr.bf16.mxu1 %v8357_v62  ;;  %v8448_v61 = vld [vmem:[%s12080_s1 + $0x1060] ss:$8 sps:$4 sm:$0xff]   ;;  %v8453_v62 = vld [vmem:[%s12080_s1 + $0x474] ss:$8 sps:$4 sm:$0xff]  }
  0xe5   :  { %6239 = vmatprep.subr.bf16.mxu0 %v8360_v63  ;;  %v8456_v63 = vld [vmem:[%s12080_s1 + $0x1074] ss:$8 sps:$4 sm:$0xff]  }
  0xe7   :  { %5604 = vmatpush1.bf16.msra.mxu1 %v8355_v0  ;;  %v8451_v0 = vld [vmem:[%s12080_s1 + $0x470] ss:$8 sps:$4 sm:$0xff]  }
  0xe8   :  { %6240 = vmatpush1.bf16.msra.mxu0 %v8358_v1  ;;  %5605 = vmatprep.subr.bf16.mxu1 %v8363_v2  ;;  %v8454_v1 = vld [vmem:[%s12080_s1 + $0x1070] ss:$8 sps:$4 sm:$0xff]   ;;  %v8459_v2 = vld [vmem:[%s12080_s1 + $0x484] ss:$8 sps:$4 sm:$0xff]  }
  0xe9   :  { %6241 = vmatprep.subr.bf16.mxu0 %v8366_v3  ;;  %v8462_v3 = vld [vmem:[%s12080_s1 + $0x1084] ss:$8 sps:$4 sm:$0xff]  }
  0xeb   :  { %5606 = vmatpush1.bf16.msra.mxu1 %v8361_v4  ;;  %v8457_v4 = vld [vmem:[%s12080_s1 + $0x480] ss:$8 sps:$4 sm:$0xff]  }
  0xec   :  { %6242 = vmatpush1.bf16.msra.mxu0 %v8364_v5  ;;  %5607 = vmatprep.subr.bf16.mxu1 %v8369_v6  ;;  %v8460_v5 = vld [vmem:[%s12080_s1 + $0x1080] ss:$8 sps:$4 sm:$0xff]   ;;  %v8465_v6 = vld [vmem:[%s12080_s1 + $0x494] ss:$8 sps:$4 sm:$0xff]  }
  0xed   :  { %6243 = vmatprep.subr.bf16.mxu0 %v8372_v7  ;;  %v8468_v7 = vld [vmem:[%s12080_s1 + $0x1094] ss:$8 sps:$4 sm:$0xff]  }
  0xef   :  { %5608 = vmatpush1.bf16.msra.mxu1 %v8367_v8  ;;  %v8463_v8 = vld [vmem:[%s12080_s1 + $0x490] ss:$8 sps:$4 sm:$0xff]  }
  0xf0   :  { %6244 = vmatpush1.bf16.msra.mxu0 %v8370_v9  ;;  %5609 = vmatprep.subr.bf16.mxu1 %v8375_v10  ;;  %v8466_v9 = vld [vmem:[%s12080_s1 + $0x1090] ss:$8 sps:$4 sm:$0xff]   ;;  %v8471_v10 = vld [vmem:[%s12080_s1 + $0x4a4] ss:$8 sps:$4 sm:$0xff]  }
  0xf1   :  { %6245 = vmatprep.subr.bf16.mxu0 %v8378_v11  ;;  %v8474_v11 = vld [vmem:[%s12080_s1 + $0x10a4] ss:$8 sps:$4 sm:$0xff]  }
  0xf3   :  { %5610 = vmatpush1.bf16.msra.mxu1 %v8373_v12  ;;  %v8469_v12 = vld [vmem:[%s12080_s1 + $0x4a0] ss:$8 sps:$4 sm:$0xff]  }
  0xf4   :  { %6246 = vmatpush1.bf16.msra.mxu0 %v8376_v13  ;;  %5611 = vmatprep.subr.bf16.mxu1 %v8381_v14  ;;  %v8472_v13 = vld [vmem:[%s12080_s1 + $0x10a0] ss:$8 sps:$4 sm:$0xff]   ;;  %v8477_v14 = vld [vmem:[%s12080_s1 + $0x4b4] ss:$8 sps:$4 sm:$0xff]  }
  0xf5   :  { %6247 = vmatprep.subr.bf16.mxu0 %v8384_v15  ;;  %v8480_v15 = vld [vmem:[%s12080_s1 + $0x10b4] ss:$8 sps:$4 sm:$0xff]  }
  0xf7   :  { %5612 = vmatpush1.bf16.msra.mxu1 %v8379_v16  ;;  %v8475_v16 = vld [vmem:[%s12080_s1 + $0x4b0] ss:$8 sps:$4 sm:$0xff]  }
  0xf8   :  { %6248 = vmatpush1.bf16.msra.mxu0 %v8382_v17  ;;  %5613 = vmatprep.subr.bf16.mxu1 %v8389_v18  ;;  %v8478_v17 = vld [vmem:[%s12080_s1 + $0x10b0] ss:$8 sps:$4 sm:$0xff]   ;;  %v8483_v18 = vld [vmem:[%s12080_s1 + $0x4c4] ss:$8 sps:$4 sm:$0xff]  }
  0xf9   :  { %6249 = vmatprep.subr.bf16.mxu0 %v8394_v19  ;;  %v8486_v19 = vld [vmem:[%s12080_s1 + $0x10c4] ss:$8 sps:$4 sm:$0xff]  }
  0xfb   :  { %5614 = vmatpush1.bf16.msra.mxu1 %v8387_v20  ;;  %v8481_v20 = vld [vmem:[%s12080_s1 + $0x4c0] ss:$8 sps:$4 sm:$0xff]  }
  0xfc   :  { %6250 = vmatpush1.bf16.msra.mxu0 %v8392_v21  ;;  %5615 = vmatprep.subr.bf16.mxu1 %v8399_v22  ;;  %v8484_v21 = vld [vmem:[%s12080_s1 + $0x10c0] ss:$8 sps:$4 sm:$0xff]   ;;  %v8489_v22 = vld [vmem:[%s12080_s1 + $0x4d4] ss:$8 sps:$4 sm:$0xff]  }
  0xfd   :  { %6251 = vmatprep.subr.bf16.mxu0 %v8402_v23  ;;  %v8492_v23 = vld [vmem:[%s12080_s1 + $0x10d4] ss:$8 sps:$4 sm:$0xff]  }
  0xff   :  { %5616 = vmatpush1.bf16.msra.mxu1 %v8397_v24  ;;  %v8487_v24 = vld [vmem:[%s12080_s1 + $0x4d0] ss:$8 sps:$4 sm:$0xff]  }
 0x100   :  { %6252 = vmatpush1.bf16.msra.mxu0 %v8400_v25  ;;  %5638 = vmatprep.subr.bf16.mxu1 %v8408_v26  ;;  %v8490_v25 = vld [vmem:[%s12080_s1 + $0x10d0] ss:$8 sps:$4 sm:$0xff]   ;;  %v8497_v26 = vld [vmem:[%s12080_s1 + $0x4e4] ss:$8 sps:$4 sm:$0xff]  }
 0x101   :  { %6274 = vmatprep.subr.bf16.mxu0 %v8414_v27  ;;  %v8502_v27 = vld [vmem:[%s12080_s1 + $0x10e4] ss:$8 sps:$4 sm:$0xff]  }
 0x102   :  { %5618 = vmatmul.mubr.bf16.vlgmr.msra.gmra.mrb[0].mxu1 %v8403_v28  ;;  %v8495_v28 = vld [vmem:[%s12080_s1 + $0x4e0] ss:$8 sps:$4 sm:$0xff]  }
 0x103   :  { %6254 = vmatmul.mubr.bf16.vlgmr.msra.gmra.mrb[0].mxu0 %v8409_v30  ;;  %5639 = vmatpush1.bf16.msra.mxu1 %v8406_v29  ;;  %v8500_v29 = vld [vmem:[%s12080_s1 + $0x10e0] ss:$8 sps:$4 sm:$0xff]   ;;  %v8507_v30 = vld [vmem:[%s12080_s1 + $0x4f4] ss:$8 sps:$4 sm:$0xff]  }
 0x104   :  { %6275 = vmatpush1.bf16.msra.mxu0 %v8412_v31  ;;  %5640 = vmatprep.subr.bf16.mxu1 %v8417_v32  ;;  %v8510_v31 = vld [vmem:[%s12080_s1 + $0x10f4] ss:$8 sps:$4 sm:$0xff]   ;;  %v8505_v32 = vld [vmem:[%s12080_s1 + $0x4f0] ss:$8 sps:$4 sm:$0xff]  }
 0x105   :  { %6276 = vmatprep.subr.bf16.mxu0 %v8420_v33  ;;  %5627 = vmatprep.mubr.bf16.mxu1 %v8493_v34  ;;  %v8508_v33 = vld [vmem:[%s12080_s1 + $0x10f0] ss:$8 sps:$4 sm:$0xff]   ;;  %v8516_v34 = vld [vmem:[%s12080_s1 + $0x504] ss:$8 sps:$4 sm:$0xff]  }
 0x106   :  { %6263 = vmatprep.mubr.bf16.mxu0 %v8498_v35  ;;  %v8522_v35 = vld [vmem:[%s12080_s1 + $0x1104] ss:$8 sps:$4 sm:$0xff]  }
 0x107   :  { %5641 = vmatpush1.bf16.msra.mxu1 %v8415_v36  ;;  %v8511_v36 = vld [vmem:[%s12081_s0 + $0x20] ss:$200 sps:$4 sm:$0xff]  }
 0x108   :  { %6277 = vmatpush1.bf16.msra.mxu0 %v8418_v37  ;;  %5642 = vmatprep.subr.bf16.mxu1 %v8423_v38  ;;  %v8514_v37 = vld [vmem:[%s12080_s1 + $0x500] ss:$8 sps:$4 sm:$0xff]  }
 0x109   :  { %6278 = vmatprep.subr.bf16.mxu0 %v8426_v39  ;;  %v8517_v38 = vld [vmem:[%s12081_s0 + $0x80] ss:$200 sps:$4 sm:$0xff]  }
 0x10a   :  { %5628 = vmatmul.mubr.bf16.gmra.mrb[4].mxu1 %v8503_v42  ;;  %v8520_v39 = vld [vmem:[%s12080_s1 + $0x1100] ss:$8 sps:$4 sm:$0xff]   ;;  %v8601_v42 = vld [vmem:[%s12081_s0 + $0x1b4] ss:$200 sps:$4 sm:$0xff]  }
 0x10b   :  { %6264 = vmatmul.mubr.bf16.gmra.mrb[4].mxu0 %v8504_v43  ;;  %5643 = vmatpush1.bf16.msra.mxu1 %v8421_v40  ;;  %v8525_v40 = vld [vmem:[%s12080_s1 + $0x514] ss:$8 sps:$4 sm:$0xff]  }
 0x10c   :  { %6279 = vmatpush1.bf16.msra.mxu0 %v8424_v41  ;;  %5644 = vmatprep.subr.bf16.mxu1 %v8429_v44  ;;  %v8528_v41 = vld [vmem:[%s12080_s1 + $0x1114] ss:$8 sps:$4 sm:$0xff]   ;;  %v8523_v44 = vld [vmem:[%s12080_s1 + $0x510] ss:$8 sps:$4 sm:$0xff]  }
 0x10d   :  { %6280 = vmatprep.subr.bf16.mxu0 %v8432_v45  ;;  %5670 = vmatprep.mubr.bf16.mxu1 %v8513_v46  ;;  %v8606_v43 = vld [vmem:[%s12081_s0 + $0x214] ss:$200 sps:$4 sm:$0xff]   ;;  %v8526_v45 = vld [vmem:[%s12080_s1 + $0x1110] ss:$8 sps:$4 sm:$0xff]   ;;  %v8531_v46 = vld [vmem:[%s12080_s1 + $0x524] ss:$8 sps:$4 sm:$0xff]  }
 0x10e   :  { %6306 = vmatprep.mubr.bf16.mxu0 %v8519_v47  ;;  %v8534_v47 = vld [vmem:[%s12080_s1 + $0x1124] ss:$8 sps:$4 sm:$0xff]  }
 0x10f   :  { %5645 = vmatpush1.bf16.msra.mxu1 %v8427_v48  ;;  %v8529_v48 = vld [vmem:[%s12080_s1 + $0x520] ss:$8 sps:$4 sm:$0xff]  }
 0x110   :  { %6281 = vmatpush1.bf16.msra.mxu0 %v8430_v49  ;;  %5646 = vmatprep.subr.bf16.mxu1 %v8435_v50  ;;  %v8532_v49 = vld [vmem:[%s12080_s1 + $0x1120] ss:$8 sps:$4 sm:$0xff]   ;;  %v8611_v50 = vld [vmem:[%s12081_s0 + $0x1b0] ss:$200 sps:$4 sm:$0xff]  }
 0x111   :  { %6282 = vmatprep.subr.bf16.mxu0 %v8438_v51  ;;  %v8612_v51 = vld [vmem:[%s12081_s0 + $0x210] ss:$200 sps:$4 sm:$0xff]  }
 0x113   :  { %5647 = vmatpush1.bf16.msra.mxu1 %v8433_v52  ;;  %v8537_v52 = vld [vmem:[%s12080_s1 + $0x534] ss:$8 sps:$4 sm:$0xff]  }
 0x114   :  { %6283 = vmatpush1.bf16.msra.mxu0 %v8436_v53  ;;  %5648 = vmatprep.subr.bf16.mxu1 %v8441_v54  ;;  %v8540_v53 = vld [vmem:[%s12080_s1 + $0x1134] ss:$8 sps:$4 sm:$0xff]  }
 0x115   :  { %6284 = vmatprep.subr.bf16.mxu0 %v8444_v55  ;;  %v8621_v54 = vld [vmem:[%s12081_s0 + $0x2c] ss:$200 sps:$4 sm:$0xff]  }
 0x116   :  { %v8627_v55 = vld [vmem:[%s12081_s0 + $0x8c] ss:$200 sps:$4 sm:$0xff]  }
 0x117   :  { %5649 = vmatpush1.bf16.msra.mxu1 %v8439_v56  ;;  %v8535_v56 = vld [vmem:[%s12080_s1 + $0x530] ss:$8 sps:$4 sm:$0xff]  }
 0x118   :  { %6285 = vmatpush1.bf16.msra.mxu0 %v8442_v57  ;;  %5650 = vmatprep.subr.bf16.mxu1 %v8447_v58  ;;  %v8538_v57 = vld [vmem:[%s12080_s1 + $0x1130] ss:$8 sps:$4 sm:$0xff]   ;;  %v8543_v58 = vld [vmem:[%s12080_s1 + $0x544] ss:$8 sps:$4 sm:$0xff]  }
 0x119   :  { %6286 = vmatprep.subr.bf16.mxu0 %v8450_v59  ;;  %v8546_v59 = vld [vmem:[%s12080_s1 + $0x1144] ss:$8 sps:$4 sm:$0xff]  }
 0x11b   :  { %5651 = vmatpush1.bf16.msra.mxu1 %v8445_v60  ;;  %v8541_v60 = vld [vmem:[%s12080_s1 + $0x540] ss:$8 sps:$4 sm:$0xff]  }
 0x11c   :  { %6287 = vmatpush1.bf16.msra.mxu0 %v8448_v61  ;;  %5652 = vmatprep.subr.bf16.mxu1 %v8453_v62  ;;  %v8544_v61 = vld [vmem:[%s12080_s1 + $0x1140] ss:$8 sps:$4 sm:$0xff]   ;;  %v8549_v62 = vld [vmem:[%s12080_s1 + $0x554] ss:$8 sps:$4 sm:$0xff]  }
 0x11d   :  { %6288 = vmatprep.subr.bf16.mxu0 %v8456_v63  ;;  %v8552_v63 = vld [vmem:[%s12080_s1 + $0x1154] ss:$8 sps:$4 sm:$0xff]  }
 0x11f   :  { %5653 = vmatpush1.bf16.msra.mxu1 %v8451_v0  ;;  %v8547_v0 = vld [vmem:[%s12080_s1 + $0x550] ss:$8 sps:$4 sm:$0xff]  }
 0x120   :  { %6289 = vmatpush1.bf16.msra.mxu0 %v8454_v1  ;;  %5654 = vmatprep.subr.bf16.mxu1 %v8459_v2  ;;  %v8550_v1 = vld [vmem:[%s12080_s1 + $0x1150] ss:$8 sps:$4 sm:$0xff]   ;;  %v8555_v2 = vld [vmem:[%s12080_s1 + $0x564] ss:$8 sps:$4 sm:$0xff]  }
 0x121   :  { %6290 = vmatprep.subr.bf16.mxu0 %v8462_v3  ;;  %v8558_v3 = vld [vmem:[%s12080_s1 + $0x1164] ss:$8 sps:$4 sm:$0xff]  }
 0x123   :  { %5655 = vmatpush1.bf16.msra.mxu1 %v8457_v4  ;;  %v8553_v4 = vld [vmem:[%s12080_s1 + $0x560] ss:$8 sps:$4 sm:$0xff]  }
 0x124   :  { %6291 = vmatpush1.bf16.msra.mxu0 %v8460_v5  ;;  %5656 = vmatprep.subr.bf16.mxu1 %v8465_v6  ;;  %v8556_v5 = vld [vmem:[%s12080_s1 + $0x1160] ss:$8 sps:$4 sm:$0xff]   ;;  %v8561_v6 = vld [vmem:[%s12080_s1 + $0x574] ss:$8 sps:$4 sm:$0xff]  }
 0x125   :  { %6292 = vmatprep.subr.bf16.mxu0 %v8468_v7  ;;  %v8564_v7 = vld [vmem:[%s12080_s1 + $0x1174] ss:$8 sps:$4 sm:$0xff]  }
 0x127   :  { %5657 = vmatpush1.bf16.msra.mxu1 %v8463_v8  ;;  %v8559_v8 = vld [vmem:[%s12080_s1 + $0x570] ss:$8 sps:$4 sm:$0xff]  }
 0x128   :  { %6293 = vmatpush1.bf16.msra.mxu0 %v8466_v9  ;;  %5658 = vmatprep.subr.bf16.mxu1 %v8471_v10  ;;  %v8562_v9 = vld [vmem:[%s12080_s1 + $0x1170] ss:$8 sps:$4 sm:$0xff]   ;;  %v8567_v10 = vld [vmem:[%s12080_s1 + $0x584] ss:$8 sps:$4 sm:$0xff]  }
 0x129   :  { %6294 = vmatprep.subr.bf16.mxu0 %v8474_v11  ;;  %v8570_v11 = vld [vmem:[%s12080_s1 + $0x1184] ss:$8 sps:$4 sm:$0xff]  }
 0x12b   :  { %5659 = vmatpush1.bf16.msra.mxu1 %v8469_v12  ;;  %v8565_v12 = vld [vmem:[%s12080_s1 + $0x580] ss:$8 sps:$4 sm:$0xff]  }
 0x12c   :  { %6295 = vmatpush1.bf16.msra.mxu0 %v8472_v13  ;;  %5660 = vmatprep.subr.bf16.mxu1 %v8477_v14  ;;  %v8568_v13 = vld [vmem:[%s12080_s1 + $0x1180] ss:$8 sps:$4 sm:$0xff]   ;;  %v8573_v14 = vld [vmem:[%s12080_s1 + $0x594] ss:$8 sps:$4 sm:$0xff]  }
 0x12d   :  { %6296 = vmatprep.subr.bf16.mxu0 %v8480_v15  ;;  %v8576_v15 = vld [vmem:[%s12080_s1 + $0x1194] ss:$8 sps:$4 sm:$0xff]  }
 0x12f   :  { %5661 = vmatpush1.bf16.msra.mxu1 %v8475_v16  ;;  %v8571_v16 = vld [vmem:[%s12080_s1 + $0x590] ss:$8 sps:$4 sm:$0xff]  }
 0x130   :  { %6297 = vmatpush1.bf16.msra.mxu0 %v8478_v17  ;;  %5662 = vmatprep.subr.bf16.mxu1 %v8483_v18  ;;  %v8574_v17 = vld [vmem:[%s12080_s1 + $0x1190] ss:$8 sps:$4 sm:$0xff]   ;;  %v8579_v18 = vld [vmem:[%s12080_s1 + $0x5a4] ss:$8 sps:$4 sm:$0xff]  }
 0x131   :  { %6298 = vmatprep.subr.bf16.mxu0 %v8486_v19  ;;  %v8582_v19 = vld [vmem:[%s12080_s1 + $0x11a4] ss:$8 sps:$4 sm:$0xff]  }
 0x133   :  { %5663 = vmatpush1.bf16.msra.mxu1 %v8481_v20  ;;  %v8577_v20 = vld [vmem:[%s12080_s1 + $0x5a0] ss:$8 sps:$4 sm:$0xff]  }
 0x134   :  { %6299 = vmatpush1.bf16.msra.mxu0 %v8484_v21  ;;  %5664 = vmatprep.subr.bf16.mxu1 %v8489_v22  ;;  %v8580_v21 = vld [vmem:[%s12080_s1 + $0x11a0] ss:$8 sps:$4 sm:$0xff]   ;;  %v8585_v22 = vld [vmem:[%s12080_s1 + $0x5b4] ss:$8 sps:$4 sm:$0xff]  }
 0x135   :  { %6300 = vmatprep.subr.bf16.mxu0 %v8492_v23  ;;  %v8588_v23 = vld [vmem:[%s12080_s1 + $0x11b4] ss:$8 sps:$4 sm:$0xff]  }
 0x137   :  { %5665 = vmatpush1.bf16.msra.mxu1 %v8487_v24  ;;  %v8583_v24 = vld [vmem:[%s12080_s1 + $0x5b0] ss:$8 sps:$4 sm:$0xff]  }
 0x138   :  { %6301 = vmatpush1.bf16.msra.mxu0 %v8490_v25  ;;  %5666 = vmatprep.subr.bf16.mxu1 %v8497_v26  ;;  %v8586_v25 = vld [vmem:[%s12080_s1 + $0x11b0] ss:$8 sps:$4 sm:$0xff]   ;;  %v8591_v26 = vld [vmem:[%s12080_s1 + $0x5c4] ss:$8 sps:$4 sm:$0xff]  }
 0x139   :  { %6302 = vmatprep.subr.bf16.mxu0 %v8502_v27  ;;  %v8594_v27 = vld [vmem:[%s12080_s1 + $0x11c4] ss:$8 sps:$4 sm:$0xff]  }
 0x13b   :  { %5667 = vmatpush1.bf16.msra.mxu1 %v8495_v28  ;;  %v8589_v28 = vld [vmem:[%s12080_s1 + $0x5c0] ss:$8 sps:$4 sm:$0xff]  }
 0x13c   :  { %6303 = vmatpush1.bf16.msra.mxu0 %v8500_v29  ;;  %5668 = vmatprep.subr.bf16.mxu1 %v8507_v30  ;;  %v8592_v29 = vld [vmem:[%s12080_s1 + $0x11c0] ss:$8 sps:$4 sm:$0xff]   ;;  %v8597_v30 = vld [vmem:[%s12080_s1 + $0x5d4] ss:$8 sps:$4 sm:$0xff]  }
 0x13d   :  { %6304 = vmatprep.subr.bf16.mxu0 %v8510_v31  ;;  %v8600_v31 = vld [vmem:[%s12080_s1 + $0x11d4] ss:$8 sps:$4 sm:$0xff]  }
 0x13f   :  { %5669 = vmatpush1.bf16.msra.mxu1 %v8505_v32  ;;  %v8595_v32 = vld [vmem:[%s12080_s1 + $0x5d0] ss:$8 sps:$4 sm:$0xff]  }
 0x140   :  { %6305 = vmatpush1.bf16.msra.mxu0 %v8508_v33  ;;  %5691 = vmatprep.subr.bf16.mxu1 %v8516_v34  ;;  %v8598_v33 = vld [vmem:[%s12080_s1 + $0x11d0] ss:$8 sps:$4 sm:$0xff]   ;;  %v8605_v34 = vld [vmem:[%s12080_s1 + $0x5e4] ss:$8 sps:$4 sm:$0xff]  }
 0x141   :  { %6327 = vmatprep.subr.bf16.mxu0 %v8522_v35  ;;  %v8610_v35 = vld [vmem:[%s12080_s1 + $0x11e4] ss:$8 sps:$4 sm:$0xff]  }
 0x142   :  { %5671 = vmatmul.mubr.bf16.vlgmr.msra.gmra.mrb[0].mxu1 %v8511_v36  ;;  %v8603_v36 = vld [vmem:[%s12080_s1 + $0x5e0] ss:$8 sps:$4 sm:$0xff]  }
 0x143   :  { %6307 = vmatmul.mubr.bf16.vlgmr.msra.gmra.mrb[0].mxu0 %v8517_v38  ;;  %5692 = vmatpush1.bf16.msra.mxu1 %v8514_v37  ;;  %v8608_v37 = vld [vmem:[%s12080_s1 + $0x11e0] ss:$8 sps:$4 sm:$0xff]   ;;  %v8615_v38 = vld [vmem:[%s12080_s1 + $0x5f4] ss:$8 sps:$4 sm:$0xff]  }
 0x144   :  { %6328 = vmatpush1.bf16.msra.mxu0 %v8520_v39  ;;  %5693 = vmatprep.subr.bf16.mxu1 %v8525_v40  ;;  %v8618_v39 = vld [vmem:[%s12080_s1 + $0x11f4] ss:$8 sps:$4 sm:$0xff]   ;;  %v8613_v40 = vld [vmem:[%s12080_s1 + $0x5f0] ss:$8 sps:$4 sm:$0xff]  }
 0x145   :  { %6329 = vmatprep.subr.bf16.mxu0 %v8528_v41  ;;  %5680 = vmatprep.mubr.bf16.mxu1 %v8601_v42  ;;  %v8616_v41 = vld [vmem:[%s12080_s1 + $0x11f0] ss:$8 sps:$4 sm:$0xff]   ;;  %v8624_v42 = vld [vmem:[%s12080_s1 + $0x604] ss:$8 sps:$4 sm:$0xff]  }
 0x146   :  { %6316 = vmatprep.mubr.bf16.mxu0 %v8606_v43  ;;  %v8619_v43 = vld [vmem:[%s12081_s0 + $0x28] ss:$200 sps:$4 sm:$0xff]  }
 0x147   :  { %5694 = vmatpush1.bf16.msra.mxu1 %v8523_v44  ;;  %v8625_v44 = vld [vmem:[%s12081_s0 + $0x88] ss:$200 sps:$4 sm:$0xff]  }
 0x148   :  { %6330 = vmatpush1.bf16.msra.mxu0 %v8526_v45  ;;  %5695 = vmatprep.subr.bf16.mxu1 %v8531_v46  ;;  %v8630_v45 = vld [vmem:[%s12080_s1 + $0x1204] ss:$8 sps:$4 sm:$0xff]   ;;  %v8622_v46 = vld [vmem:[%s12080_s1 + $0x600] ss:$8 sps:$4 sm:$0xff]  }
 0x149   :  { %6331 = vmatprep.subr.bf16.mxu0 %v8534_v47  ;;  %v8628_v47 = vld [vmem:[%s12080_s1 + $0x1200] ss:$8 sps:$4 sm:$0xff]  }
 0x14a   :  { %5681 = vmatmul.mubr.bf16.gmra.mrb[4].mxu1 %v8611_v50  ;;  %v8631_v50 = vld [vmem:[%s12080_s1 + $0x610] ss:$8 sps:$4 sm:$0xff]  }
 0x14b   :  { %6317 = vmatmul.mubr.bf16.gmra.mrb[4].mxu0 %v8612_v51  ;;  %5696 = vmatpush1.bf16.msra.mxu1 %v8529_v48  ;;  %v8633_v48 = vld [vmem:[%s12080_s1 + $0x614] ss:$8 sps:$4 sm:$0xff]   ;;  %v8634_v51 = vld [vmem:[%s12080_s1 + $0x1210] ss:$8 sps:$4 sm:$0xff]  }
 0x14c   :  { %6332 = vmatpush1.bf16.msra.mxu0 %v8532_v49  ;;  %5697 = vmatprep.subr.bf16.mxu1 %v8537_v52  ;;  %v8636_v49 = vld [vmem:[%s12080_s1 + $0x1214] ss:$8 sps:$4 sm:$0xff]  }
 0x14d   :  { %6333 = vmatprep.subr.bf16.mxu0 %v8540_v53  ;;  %5723 = vmatprep.mubr.bf16.mxu1 %v8621_v54  ;;  %v8709_v52 = vld [vmem:[%s12081_s0 + $0x1bc] ss:$200 sps:$4 sm:$0xff]  }
 0x14e   :  { %6359 = vmatprep.mubr.bf16.mxu0 %v8627_v55  ;;  %v8714_v53 = vld [vmem:[%s12081_s0 + $0x21c] ss:$200 sps:$4 sm:$0xff]  }
 0x14f   :  { %5698 = vmatpush1.bf16.msra.mxu1 %v8535_v56  ;;  %v8639_v54 = vld [vmem:[%s12080_s1 + $0x624] ss:$8 sps:$4 sm:$0xff]   ;;  %v8719_v56 = vld [vmem:[%s12081_s0 + $0x1b8] ss:$200 sps:$4 sm:$0xff]  }
 0x150   :  { %6334 = vmatpush1.bf16.msra.mxu0 %v8538_v57  ;;  %5699 = vmatprep.subr.bf16.mxu1 %v8543_v58  ;;  %v8642_v55 = vld [vmem:[%s12080_s1 + $0x1224] ss:$8 sps:$4 sm:$0xff]   ;;  %v8720_v57 = vld [vmem:[%s12081_s0 + $0x218] ss:$200 sps:$4 sm:$0xff]  }
 0x151   :  { %6335 = vmatprep.subr.bf16.mxu0 %v8546_v59  ;;  %v8637_v58 = vld [vmem:[%s12080_s1 + $0x620] ss:$8 sps:$4 sm:$0xff]  }
 0x152   :  { %v8640_v59 = vld [vmem:[%s12080_s1 + $0x1220] ss:$8 sps:$4 sm:$0xff]  }
 0x153   :  { %5700 = vmatpush1.bf16.msra.mxu1 %v8541_v60  ;;  %v8645_v60 = vld [vmem:[%s12080_s1 + $0x634] ss:$8 sps:$4 sm:$0xff]  }
 0x154   :  { %6336 = vmatpush1.bf16.msra.mxu0 %v8544_v61  ;;  %5701 = vmatprep.subr.bf16.mxu1 %v8549_v62  ;;  %v8648_v61 = vld [vmem:[%s12080_s1 + $0x1234] ss:$8 sps:$4 sm:$0xff]  }
 0x155   :  { %6337 = vmatprep.subr.bf16.mxu0 %v8552_v63  ;;  %v8729_v62 = vld [vmem:[%s12081_s0 + $0x34] ss:$200 sps:$4 sm:$0xff]  }
 0x156   :  { %v8735_v63 = vld [vmem:[%s12081_s0 + $0x94] ss:$200 sps:$4 sm:$0xff]  }
 0x157   :  { %5702 = vmatpush1.bf16.msra.mxu1 %v8547_v0  ;;  %v8643_v0 = vld [vmem:[%s12080_s1 + $0x630] ss:$8 sps:$4 sm:$0xff]  }
 0x158   :  { %6338 = vmatpush1.bf16.msra.mxu0 %v8550_v1  ;;  %5703 = vmatprep.subr.bf16.mxu1 %v8555_v2  ;;  %v8646_v1 = vld [vmem:[%s12080_s1 + $0x1230] ss:$8 sps:$4 sm:$0xff]   ;;  %v8651_v2 = vld [vmem:[%s12080_s1 + $0x644] ss:$8 sps:$4 sm:$0xff]  }
 0x159   :  { %6339 = vmatprep.subr.bf16.mxu0 %v8558_v3  ;;  %v8654_v3 = vld [vmem:[%s12080_s1 + $0x1244] ss:$8 sps:$4 sm:$0xff]  }
 0x15b   :  { %5704 = vmatpush1.bf16.msra.mxu1 %v8553_v4  ;;  %v8649_v4 = vld [vmem:[%s12080_s1 + $0x640] ss:$8 sps:$4 sm:$0xff]  }
 0x15c   :  { %6340 = vmatpush1.bf16.msra.mxu0 %v8556_v5  ;;  %5705 = vmatprep.subr.bf16.mxu1 %v8561_v6  ;;  %v8652_v5 = vld [vmem:[%s12080_s1 + $0x1240] ss:$8 sps:$4 sm:$0xff]   ;;  %v8657_v6 = vld [vmem:[%s12080_s1 + $0x654] ss:$8 sps:$4 sm:$0xff]  }
 0x15d   :  { %6341 = vmatprep.subr.bf16.mxu0 %v8564_v7  ;;  %v8660_v7 = vld [vmem:[%s12080_s1 + $0x1254] ss:$8 sps:$4 sm:$0xff]  }
 0x15f   :  { %5706 = vmatpush1.bf16.msra.mxu1 %v8559_v8  ;;  %v8655_v8 = vld [vmem:[%s12080_s1 + $0x650] ss:$8 sps:$4 sm:$0xff]  }
 0x160   :  { %6342 = vmatpush1.bf16.msra.mxu0 %v8562_v9  ;;  %5707 = vmatprep.subr.bf16.mxu1 %v8567_v10  ;;  %v8658_v9 = vld [vmem:[%s12080_s1 + $0x1250] ss:$8 sps:$4 sm:$0xff]   ;;  %v8663_v10 = vld [vmem:[%s12080_s1 + $0x664] ss:$8 sps:$4 sm:$0xff]  }
 0x161   :  { %6343 = vmatprep.subr.bf16.mxu0 %v8570_v11  ;;  %v8666_v11 = vld [vmem:[%s12080_s1 + $0x1264] ss:$8 sps:$4 sm:$0xff]  }
 0x163   :  { %5708 = vmatpush1.bf16.msra.mxu1 %v8565_v12  ;;  %v8661_v12 = vld [vmem:[%s12080_s1 + $0x660] ss:$8 sps:$4 sm:$0xff]  }
 0x164   :  { %6344 = vmatpush1.bf16.msra.mxu0 %v8568_v13  ;;  %5709 = vmatprep.subr.bf16.mxu1 %v8573_v14  ;;  %v8664_v13 = vld [vmem:[%s12080_s1 + $0x1260] ss:$8 sps:$4 sm:$0xff]   ;;  %v8669_v14 = vld [vmem:[%s12080_s1 + $0x674] ss:$8 sps:$4 sm:$0xff]  }
 0x165   :  { %6345 = vmatprep.subr.bf16.mxu0 %v8576_v15  ;;  %v8672_v15 = vld [vmem:[%s12080_s1 + $0x1274] ss:$8 sps:$4 sm:$0xff]  }
 0x167   :  { %5710 = vmatpush1.bf16.msra.mxu1 %v8571_v16  ;;  %v8667_v16 = vld [vmem:[%s12080_s1 + $0x670] ss:$8 sps:$4 sm:$0xff]  }
 0x168   :  { %6346 = vmatpush1.bf16.msra.mxu0 %v8574_v17  ;;  %5711 = vmatprep.subr.bf16.mxu1 %v8579_v18  ;;  %v8670_v17 = vld [vmem:[%s12080_s1 + $0x1270] ss:$8 sps:$4 sm:$0xff]   ;;  %v8675_v18 = vld [vmem:[%s12080_s1 + $0x684] ss:$8 sps:$4 sm:$0xff]  }
 0x169   :  { %6347 = vmatprep.subr.bf16.mxu0 %v8582_v19  ;;  %v8678_v19 = vld [vmem:[%s12080_s1 + $0x1284] ss:$8 sps:$4 sm:$0xff]  }
 0x16b   :  { %5712 = vmatpush1.bf16.msra.mxu1 %v8577_v20  ;;  %v8673_v20 = vld [vmem:[%s12080_s1 + $0x680] ss:$8 sps:$4 sm:$0xff]  }
 0x16c   :  { %6348 = vmatpush1.bf16.msra.mxu0 %v8580_v21  ;;  %5713 = vmatprep.subr.bf16.mxu1 %v8585_v22  ;;  %v8676_v21 = vld [vmem:[%s12080_s1 + $0x1280] ss:$8 sps:$4 sm:$0xff]   ;;  %v8681_v22 = vld [vmem:[%s12080_s1 + $0x694] ss:$8 sps:$4 sm:$0xff]  }
 0x16d   :  { %6349 = vmatprep.subr.bf16.mxu0 %v8588_v23  ;;  %v8684_v23 = vld [vmem:[%s12080_s1 + $0x1294] ss:$8 sps:$4 sm:$0xff]  }
 0x16f   :  { %5714 = vmatpush1.bf16.msra.mxu1 %v8583_v24  ;;  %v8679_v24 = vld [vmem:[%s12080_s1 + $0x690] ss:$8 sps:$4 sm:$0xff]  }
 0x170   :  { %6350 = vmatpush1.bf16.msra.mxu0 %v8586_v25  ;;  %5715 = vmatprep.subr.bf16.mxu1 %v8591_v26  ;;  %v8682_v25 = vld [vmem:[%s12080_s1 + $0x1290] ss:$8 sps:$4 sm:$0xff]   ;;  %v8687_v26 = vld [vmem:[%s12080_s1 + $0x6a4] ss:$8 sps:$4 sm:$0xff]  }
 0x171   :  { %6351 = vmatprep.subr.bf16.mxu0 %v8594_v27  ;;  %v8690_v27 = vld [vmem:[%s12080_s1 + $0x12a4] ss:$8 sps:$4 sm:$0xff]  }
 0x173   :  { %5716 = vmatpush1.bf16.msra.mxu1 %v8589_v28  ;;  %v8685_v28 = vld [vmem:[%s12080_s1 + $0x6a0] ss:$8 sps:$4 sm:$0xff]  }
 0x174   :  { %6352 = vmatpush1.bf16.msra.mxu0 %v8592_v29  ;;  %5717 = vmatprep.subr.bf16.mxu1 %v8597_v30  ;;  %v8688_v29 = vld [vmem:[%s12080_s1 + $0x12a0] ss:$8 sps:$4 sm:$0xff]   ;;  %v8693_v30 = vld [vmem:[%s12080_s1 + $0x6b4] ss:$8 sps:$4 sm:$0xff]  }
 0x175   :  { %6353 = vmatprep.subr.bf16.mxu0 %v8600_v31  ;;  %v8696_v31 = vld [vmem:[%s12080_s1 + $0x12b4] ss:$8 sps:$4 sm:$0xff]  }
 0x177   :  { %5718 = vmatpush1.bf16.msra.mxu1 %v8595_v32  ;;  %v8691_v32 = vld [vmem:[%s12080_s1 + $0x6b0] ss:$8 sps:$4 sm:$0xff]  }
 0x178   :  { %6354 = vmatpush1.bf16.msra.mxu0 %v8598_v33  ;;  %5719 = vmatprep.subr.bf16.mxu1 %v8605_v34  ;;  %v8694_v33 = vld [vmem:[%s12080_s1 + $0x12b0] ss:$8 sps:$4 sm:$0xff]   ;;  %v8699_v34 = vld [vmem:[%s12080_s1 + $0x6c4] ss:$8 sps:$4 sm:$0xff]  }
 0x179   :  { %6355 = vmatprep.subr.bf16.mxu0 %v8610_v35  ;;  %v8702_v35 = vld [vmem:[%s12080_s1 + $0x12c4] ss:$8 sps:$4 sm:$0xff]  }
 0x17b   :  { %5720 = vmatpush1.bf16.msra.mxu1 %v8603_v36  ;;  %v8697_v36 = vld [vmem:[%s12080_s1 + $0x6c0] ss:$8 sps:$4 sm:$0xff]  }
 0x17c   :  { %6356 = vmatpush1.bf16.msra.mxu0 %v8608_v37  ;;  %5721 = vmatprep.subr.bf16.mxu1 %v8615_v38  ;;  %v8700_v37 = vld [vmem:[%s12080_s1 + $0x12c0] ss:$8 sps:$4 sm:$0xff]   ;;  %v8705_v38 = vld [vmem:[%s12080_s1 + $0x6d4] ss:$8 sps:$4 sm:$0xff]  }
 0x17d   :  { %6357 = vmatprep.subr.bf16.mxu0 %v8618_v39  ;;  %v8708_v39 = vld [vmem:[%s12080_s1 + $0x12d4] ss:$8 sps:$4 sm:$0xff]  }
 0x17f   :  { %5722 = vmatpush1.bf16.msra.mxu1 %v8613_v40  ;;  %v8703_v40 = vld [vmem:[%s12080_s1 + $0x6d0] ss:$8 sps:$4 sm:$0xff]  }
 0x180   :  { %6358 = vmatpush1.bf16.msra.mxu0 %v8616_v41  ;;  %5744 = vmatprep.subr.bf16.mxu1 %v8624_v42  ;;  %v8706_v41 = vld [vmem:[%s12080_s1 + $0x12d0] ss:$8 sps:$4 sm:$0xff]   ;;  %v8713_v42 = vld [vmem:[%s12080_s1 + $0x6e4] ss:$8 sps:$4 sm:$0xff]  }
 0x181   :  { %6380 = vmatprep.subr.bf16.mxu0 %v8630_v45  ;;  %v8716_v45 = vld [vmem:[%s12080_s1 + $0x12e0] ss:$8 sps:$4 sm:$0xff]  }
 0x182   :  { %5724 = vmatmul.mubr.bf16.vlgmr.msra.gmra.mrb[0].mxu1 %v8619_v43  ;;  %v8718_v43 = vld [vmem:[%s12080_s1 + $0x12e4] ss:$8 sps:$4 sm:$0xff]  }
 0x183   :  { %6360 = vmatmul.mubr.bf16.vlgmr.msra.gmra.mrb[0].mxu0 %v8625_v44  ;;  %5745 = vmatpush1.bf16.msra.mxu1 %v8622_v46  ;;  %v8711_v44 = vld [vmem:[%s12080_s1 + $0x6e0] ss:$8 sps:$4 sm:$0xff]   ;;  %v8723_v46 = vld [vmem:[%s12080_s1 + $0x6f4] ss:$8 sps:$4 sm:$0xff]  }
 0x184   :  { %6381 = vmatpush1.bf16.msra.mxu0 %v8628_v47  ;;  %5746 = vmatprep.subr.bf16.mxu1 %v8633_v48  ;;  %v8726_v47 = vld [vmem:[%s12080_s1 + $0x12f4] ss:$8 sps:$4 sm:$0xff]   ;;  %v8721_v48 = vld [vmem:[%s12080_s1 + $0x6f0] ss:$8 sps:$4 sm:$0xff]  }
 0x185   :  { %6382 = vmatprep.subr.bf16.mxu0 %v8636_v49  ;;  %5733 = vmatprep.mubr.bf16.mxu1 %v8709_v52  ;;  %v8724_v49 = vld [vmem:[%s12080_s1 + $0x12f0] ss:$8 sps:$4 sm:$0xff]  }
 0x186   :  { %6369 = vmatprep.mubr.bf16.mxu0 %v8714_v53  ;;  %v8733_v52 = vld [vmem:[%s12081_s0 + $0x90] ss:$200 sps:$4 sm:$0xff]   ;;  %v8738_v53 = vld [vmem:[%s12080_s1 + $0x1304] ss:$8 sps:$4 sm:$0xff]  }
 0x187   :  { %5747 = vmatpush1.bf16.msra.mxu1 %v8631_v50  ;;  %v8732_v50 = vld [vmem:[%s12080_s1 + $0x704] ss:$8 sps:$4 sm:$0xff]  }
 0x188   :  { %6383 = vmatpush1.bf16.msra.mxu0 %v8634_v51  ;;  %5748 = vmatprep.subr.bf16.mxu1 %v8639_v54  ;;  %v8727_v51 = vld [vmem:[%s12081_s0 + $0x30] ss:$200 sps:$4 sm:$0xff]   ;;  %v8730_v54 = vld [vmem:[%s12080_s1 + $0x700] ss:$8 sps:$4 sm:$0xff]  }
 0x189   :  { %6384 = vmatprep.subr.bf16.mxu0 %v8642_v55  ;;  %v8736_v55 = vld [vmem:[%s12080_s1 + $0x1300] ss:$8 sps:$4 sm:$0xff]  }
 0x18a   :  { %5734 = vmatmul.mubr.bf16.gmra.mrb[4].mxu1 %v8719_v56  ;;  %v8741_v56 = vld [vmem:[%s12080_s1 + $0x714] ss:$8 sps:$4 sm:$0xff]  }
 0x18b   :  { %6370 = vmatmul.mubr.bf16.gmra.mrb[4].mxu0 %v8720_v57  ;;  %5749 = vmatpush1.bf16.msra.mxu1 %v8637_v58  ;;  %v8744_v57 = vld [vmem:[%s12080_s1 + $0x1314] ss:$8 sps:$4 sm:$0xff]   ;;  %v8739_v58 = vld [vmem:[%s12080_s1 + $0x710] ss:$8 sps:$4 sm:$0xff]  }
 0x18c   :  { %6385 = vmatpush1.bf16.msra.mxu0 %v8640_v59  ;;  %5750 = vmatprep.subr.bf16.mxu1 %v8645_v60  ;;  %v8742_v59 = vld [vmem:[%s12080_s1 + $0x1310] ss:$8 sps:$4 sm:$0xff]   ;;  %v8817_v60 = vld [vmem:[%s12081_s0 + $0x1c4] ss:$200 sps:$4 sm:$0xff]  }
 0x18d   :  { %6386 = vmatprep.subr.bf16.mxu0 %v8648_v61  ;;  %5776 = vmatprep.mubr.bf16.mxu1 %v8729_v62  ;;  %v8822_v61 = vld [vmem:[%s12081_s0 + $0x224] ss:$200 sps:$4 sm:$0xff]  }
 0x18e   :  { %6412 = vmatprep.mubr.bf16.mxu0 %v8735_v63  ;;  %v8747_v62 = vld [vmem:[%s12080_s1 + $0x724] ss:$8 sps:$4 sm:$0xff]  }
 0x18f   :  { %5751 = vmatpush1.bf16.msra.mxu1 %v8643_v0  ;;  %v8750_v63 = vld [vmem:[%s12080_s1 + $0x1324] ss:$8 sps:$4 sm:$0xff]   ;;  %v8827_v0 = vld [vmem:[%s12081_s0 + $0x1c0] ss:$200 sps:$4 sm:$0xff]  }
 0x190   :  { %6387 = vmatpush1.bf16.msra.mxu0 %v8646_v1  ;;  %5752 = vmatprep.subr.bf16.mxu1 %v8651_v2  ;;  %v8828_v1 = vld [vmem:[%s12081_s0 + $0x220] ss:$200 sps:$4 sm:$0xff]  }
 0x191   :  { %6388 = vmatprep.subr.bf16.mxu0 %v8654_v3  ;;  %v8745_v2 = vld [vmem:[%s12080_s1 + $0x720] ss:$8 sps:$4 sm:$0xff]  }
 0x192   :  { %v8748_v3 = vld [vmem:[%s12080_s1 + $0x1320] ss:$8 sps:$4 sm:$0xff]  }
 0x193   :  { %5753 = vmatpush1.bf16.msra.mxu1 %v8649_v4  ;;  %v8753_v4 = vld [vmem:[%s12080_s1 + $0x734] ss:$8 sps:$4 sm:$0xff]  }
 0x194   :  { %6389 = vmatpush1.bf16.msra.mxu0 %v8652_v5  ;;  %5754 = vmatprep.subr.bf16.mxu1 %v8657_v6  ;;  %v8756_v5 = vld [vmem:[%s12080_s1 + $0x1334] ss:$8 sps:$4 sm:$0xff]  }
 0x195   :  { %6390 = vmatprep.subr.bf16.mxu0 %v8660_v7  ;;  %v8837_v6 = vld [vmem:[%s12081_s0 + $0x3c] ss:$200 sps:$4 sm:$0xff]  }
 0x196   :  { %v8843_v7 = vld [vmem:[%s12081_s0 + $0x9c] ss:$200 sps:$4 sm:$0xff]  }
 0x197   :  { %5755 = vmatpush1.bf16.msra.mxu1 %v8655_v8  ;;  %v8751_v8 = vld [vmem:[%s12080_s1 + $0x730] ss:$8 sps:$4 sm:$0xff]  }
 0x198   :  { %6391 = vmatpush1.bf16.msra.mxu0 %v8658_v9  ;;  %5756 = vmatprep.subr.bf16.mxu1 %v8663_v10  ;;  %v8754_v9 = vld [vmem:[%s12080_s1 + $0x1330] ss:$8 sps:$4 sm:$0xff]   ;;  %v8759_v10 = vld [vmem:[%s12080_s1 + $0x744] ss:$8 sps:$4 sm:$0xff]  }
 0x199   :  { %6392 = vmatprep.subr.bf16.mxu0 %v8666_v11  ;;  %v8762_v11 = vld [vmem:[%s12080_s1 + $0x1344] ss:$8 sps:$4 sm:$0xff]  }
 0x19b   :  { %5757 = vmatpush1.bf16.msra.mxu1 %v8661_v12  ;;  %v8757_v12 = vld [vmem:[%s12080_s1 + $0x740] ss:$8 sps:$4 sm:$0xff]  }
 0x19c   :  { %6393 = vmatpush1.bf16.msra.mxu0 %v8664_v13  ;;  %5758 = vmatprep.subr.bf16.mxu1 %v8669_v14  ;;  %v8760_v13 = vld [vmem:[%s12080_s1 + $0x1340] ss:$8 sps:$4 sm:$0xff]   ;;  %v8765_v14 = vld [vmem:[%s12080_s1 + $0x754] ss:$8 sps:$4 sm:$0xff]  }
 0x19d   :  { %6394 = vmatprep.subr.bf16.mxu0 %v8672_v15  ;;  %v8768_v15 = vld [vmem:[%s12080_s1 + $0x1354] ss:$8 sps:$4 sm:$0xff]  }
 0x19f   :  { %5759 = vmatpush1.bf16.msra.mxu1 %v8667_v16  ;;  %v8763_v16 = vld [vmem:[%s12080_s1 + $0x750] ss:$8 sps:$4 sm:$0xff]  }
 0x1a0   :  { %6395 = vmatpush1.bf16.msra.mxu0 %v8670_v17  ;;  %5760 = vmatprep.subr.bf16.mxu1 %v8675_v18  ;;  %v8766_v17 = vld [vmem:[%s12080_s1 + $0x1350] ss:$8 sps:$4 sm:$0xff]   ;;  %v8771_v18 = vld [vmem:[%s12080_s1 + $0x764] ss:$8 sps:$4 sm:$0xff]  }
 0x1a1   :  { %6396 = vmatprep.subr.bf16.mxu0 %v8678_v19  ;;  %v8774_v19 = vld [vmem:[%s12080_s1 + $0x1364] ss:$8 sps:$4 sm:$0xff]  }
 0x1a3   :  { %5761 = vmatpush1.bf16.msra.mxu1 %v8673_v20  ;;  %v8769_v20 = vld [vmem:[%s12080_s1 + $0x760] ss:$8 sps:$4 sm:$0xff]  }
 0x1a4   :  { %6397 = vmatpush1.bf16.msra.mxu0 %v8676_v21  ;;  %5762 = vmatprep.subr.bf16.mxu1 %v8681_v22  ;;  %v8772_v21 = vld [vmem:[%s12080_s1 + $0x1360] ss:$8 sps:$4 sm:$0xff]   ;;  %v8777_v22 = vld [vmem:[%s12080_s1 + $0x774] ss:$8 sps:$4 sm:$0xff]  }
 0x1a5   :  { %6398 = vmatprep.subr.bf16.mxu0 %v8684_v23  ;;  %v8780_v23 = vld [vmem:[%s12080_s1 + $0x1374] ss:$8 sps:$4 sm:$0xff]  }
 0x1a7   :  { %5763 = vmatpush1.bf16.msra.mxu1 %v8679_v24  ;;  %v8775_v24 = vld [vmem:[%s12080_s1 + $0x770] ss:$8 sps:$4 sm:$0xff]  }
 0x1a8   :  { %6399 = vmatpush1.bf16.msra.mxu0 %v8682_v25  ;;  %5764 = vmatprep.subr.bf16.mxu1 %v8687_v26  ;;  %v8778_v25 = vld [vmem:[%s12080_s1 + $0x1370] ss:$8 sps:$4 sm:$0xff]   ;;  %v8783_v26 = vld [vmem:[%s12080_s1 + $0x784] ss:$8 sps:$4 sm:$0xff]  }
 0x1a9   :  { %6400 = vmatprep.subr.bf16.mxu0 %v8690_v27  ;;  %v8786_v27 = vld [vmem:[%s12080_s1 + $0x1384] ss:$8 sps:$4 sm:$0xff]  }
 0x1ab   :  { %5765 = vmatpush1.bf16.msra.mxu1 %v8685_v28  ;;  %v8781_v28 = vld [vmem:[%s12080_s1 + $0x780] ss:$8 sps:$4 sm:$0xff]  }
 0x1ac   :  { %6401 = vmatpush1.bf16.msra.mxu0 %v8688_v29  ;;  %5766 = vmatprep.subr.bf16.mxu1 %v8693_v30  ;;  %v8784_v29 = vld [vmem:[%s12080_s1 + $0x1380] ss:$8 sps:$4 sm:$0xff]   ;;  %v8789_v30 = vld [vmem:[%s12080_s1 + $0x794] ss:$8 sps:$4 sm:$0xff]  }
 0x1ad   :  { %6402 = vmatprep.subr.bf16.mxu0 %v8696_v31  ;;  %v8792_v31 = vld [vmem:[%s12080_s1 + $0x1394] ss:$8 sps:$4 sm:$0xff]  }
 0x1af   :  { %5767 = vmatpush1.bf16.msra.mxu1 %v8691_v32  ;;  %v8787_v32 = vld [vmem:[%s12080_s1 + $0x790] ss:$8 sps:$4 sm:$0xff]  }
 0x1b0   :  { %6403 = vmatpush1.bf16.msra.mxu0 %v8694_v33  ;;  %5768 = vmatprep.subr.bf16.mxu1 %v8699_v34  ;;  %v8790_v33 = vld [vmem:[%s12080_s1 + $0x1390] ss:$8 sps:$4 sm:$0xff]   ;;  %v8795_v34 = vld [vmem:[%s12080_s1 + $0x7a4] ss:$8 sps:$4 sm:$0xff]  }
 0x1b1   :  { %6404 = vmatprep.subr.bf16.mxu0 %v8702_v35  ;;  %v8798_v35 = vld [vmem:[%s12080_s1 + $0x13a4] ss:$8 sps:$4 sm:$0xff]  }
 0x1b3   :  { %5769 = vmatpush1.bf16.msra.mxu1 %v8697_v36  ;;  %v8793_v36 = vld [vmem:[%s12080_s1 + $0x7a0] ss:$8 sps:$4 sm:$0xff]  }
 0x1b4   :  { %6405 = vmatpush1.bf16.msra.mxu0 %v8700_v37  ;;  %5770 = vmatprep.subr.bf16.mxu1 %v8705_v38  ;;  %v8796_v37 = vld [vmem:[%s12080_s1 + $0x13a0] ss:$8 sps:$4 sm:$0xff]   ;;  %v8801_v38 = vld [vmem:[%s12080_s1 + $0x7b4] ss:$8 sps:$4 sm:$0xff]  }
 0x1b5   :  { %6406 = vmatprep.subr.bf16.mxu0 %v8708_v39  ;;  %v8804_v39 = vld [vmem:[%s12080_s1 + $0x13b4] ss:$8 sps:$4 sm:$0xff]  }
 0x1b7   :  { %5771 = vmatpush1.bf16.msra.mxu1 %v8703_v40  ;;  %v8799_v40 = vld [vmem:[%s12080_s1 + $0x7b0] ss:$8 sps:$4 sm:$0xff]  }
 0x1b8   :  { %6407 = vmatpush1.bf16.msra.mxu0 %v8706_v41  ;;  %5772 = vmatprep.subr.bf16.mxu1 %v8713_v42  ;;  %v8802_v41 = vld [vmem:[%s12080_s1 + $0x13b0] ss:$8 sps:$4 sm:$0xff]   ;;  %v8807_v42 = vld [vmem:[%s12080_s1 + $0x7c4] ss:$8 sps:$4 sm:$0xff]  }
 0x1b9   :  { %6408 = vmatprep.subr.bf16.mxu0 %v8718_v43  ;;  %v8810_v43 = vld [vmem:[%s12080_s1 + $0x13c4] ss:$8 sps:$4 sm:$0xff]  }
 0x1bb   :  { %5773 = vmatpush1.bf16.msra.mxu1 %v8711_v44  ;;  %v8805_v44 = vld [vmem:[%s12080_s1 + $0x7c0] ss:$8 sps:$4 sm:$0xff]  }
 0x1bc   :  { %6409 = vmatpush1.bf16.msra.mxu0 %v8716_v45  ;;  %5774 = vmatprep.subr.bf16.mxu1 %v8723_v46  ;;  %v8808_v45 = vld [vmem:[%s12080_s1 + $0x13c0] ss:$8 sps:$4 sm:$0xff]   ;;  %v8813_v46 = vld [vmem:[%s12080_s1 + $0x7d4] ss:$8 sps:$4 sm:$0xff]  }
 0x1bd   :  { %6410 = vmatprep.subr.bf16.mxu0 %v8726_v47  ;;  %v8816_v47 = vld [vmem:[%s12080_s1 + $0x13d4] ss:$8 sps:$4 sm:$0xff]  }
 0x1bf   :  { %5775 = vmatpush1.bf16.msra.mxu1 %v8721_v48  ;;  %v8811_v48 = vld [vmem:[%s12080_s1 + $0x7d0] ss:$8 sps:$4 sm:$0xff]  }
 0x1c0   :  { %6411 = vmatpush1.bf16.msra.mxu0 %v8724_v49  ;;  %5797 = vmatprep.subr.bf16.mxu1 %v8732_v50  ;;  %v8814_v49 = vld [vmem:[%s12080_s1 + $0x13d0] ss:$8 sps:$4 sm:$0xff]   ;;  %v8821_v50 = vld [vmem:[%s12080_s1 + $0x7e4] ss:$8 sps:$4 sm:$0xff]  }
 0x1c1   :  { %6433 = vmatprep.subr.bf16.mxu0 %v8738_v53  ;;  %v8824_v53 = vld [vmem:[%s12080_s1 + $0x13e0] ss:$8 sps:$4 sm:$0xff]  }
 0x1c2   :  { %5777 = vmatmul.mubr.bf16.vlgmr.msra.gmra.mrb[0].mxu1 %v8727_v51  ;;  %v8826_v51 = vld [vmem:[%s12080_s1 + $0x13e4] ss:$8 sps:$4 sm:$0xff]  }
 0x1c3   :  { %6413 = vmatmul.mubr.bf16.vlgmr.msra.gmra.mrb[0].mxu0 %v8733_v52  ;;  %5798 = vmatpush1.bf16.msra.mxu1 %v8730_v54  ;;  %v8819_v52 = vld [vmem:[%s12080_s1 + $0x7e0] ss:$8 sps:$4 sm:$0xff]   ;;  %v8831_v54 = vld [vmem:[%s12080_s1 + $0x7f4] ss:$8 sps:$4 sm:$0xff]  }
 0x1c4   :  { %6434 = vmatpush1.bf16.msra.mxu0 %v8736_v55  ;;  %5799 = vmatprep.subr.bf16.mxu1 %v8741_v56  ;;  %v8834_v55 = vld [vmem:[%s12080_s1 + $0x13f4] ss:$8 sps:$4 sm:$0xff]   ;;  %v8829_v56 = vld [vmem:[%s12080_s1 + $0x7f0] ss:$8 sps:$4 sm:$0xff]  }
 0x1c5   :  { %6435 = vmatprep.subr.bf16.mxu0 %v8744_v57  ;;  %5786 = vmatprep.mubr.bf16.mxu1 %v8817_v60  ;;  %v8832_v57 = vld [vmem:[%s12080_s1 + $0x13f0] ss:$8 sps:$4 sm:$0xff]  }
 0x1c6   :  { %6422 = vmatprep.mubr.bf16.mxu0 %v8822_v61  ;;  %v8841_v60 = vld [vmem:[%s12081_s0 + $0x98] ss:$200 sps:$4 sm:$0xff]   ;;  %v8846_v61 = vld [vmem:[%s12080_s1 + $0x1404] ss:$8 sps:$4 sm:$0xff]  }
 0x1c7   :  { %5800 = vmatpush1.bf16.msra.mxu1 %v8739_v58  ;;  %v8840_v58 = vld [vmem:[%s12080_s1 + $0x804] ss:$8 sps:$4 sm:$0xff]  }
 0x1c8   :  { %6436 = vmatpush1.bf16.msra.mxu0 %v8742_v59  ;;  %5801 = vmatprep.subr.bf16.mxu1 %v8747_v62  ;;  %v8835_v59 = vld [vmem:[%s12081_s0 + $0x38] ss:$200 sps:$4 sm:$0xff]  }
 0x1c9   :  { %6437 = vmatprep.subr.bf16.mxu0 %v8750_v63  ;;  %v8838_v62 = vld [vmem:[%s12080_s1 + $0x800] ss:$8 sps:$4 sm:$0xff]  }
 0x1ca   :  { %5787 = vmatmul.mubr.bf16.gmra.mrb[4].mxu1 %v8827_v0  ;;  %v8844_v63 = vld [vmem:[%s12080_s1 + $0x1400] ss:$8 sps:$4 sm:$0xff]   ;;  %v8849_v0 = vld [vmem:[%s12080_s1 + $0x814] ss:$8 sps:$4 sm:$0xff]  }
 0x1cb   :  { %6423 = vmatmul.mubr.bf16.gmra.mrb[4].mxu0 %v8828_v1  ;;  %5802 = vmatpush1.bf16.msra.mxu1 %v8745_v2  ;;  %v8852_v1 = vld [vmem:[%s12080_s1 + $0x1414] ss:$8 sps:$4 sm:$0xff]   ;;  %v8847_v2 = vld [vmem:[%s12080_s1 + $0x810] ss:$8 sps:$4 sm:$0xff]  }
 0x1cc   :  { %6438 = vmatpush1.bf16.msra.mxu0 %v8748_v3  ;;  %5803 = vmatprep.subr.bf16.mxu1 %v8753_v4  ;;  %v8850_v3 = vld [vmem:[%s12080_s1 + $0x1410] ss:$8 sps:$4 sm:$0xff]   ;;  %v8925_v4 = vld [vmem:[%s12081_s0 + $0x1cc] ss:$200 sps:$4 sm:$0xff]  }
 0x1cd   :  { %6439 = vmatprep.subr.bf16.mxu0 %v8756_v5  ;;  %5829 = vmatprep.mubr.bf16.mxu1 %v8837_v6  ;;  %v8930_v5 = vld [vmem:[%s12081_s0 + $0x22c] ss:$200 sps:$4 sm:$0xff]  }
 0x1ce   :  { %6465 = vmatprep.mubr.bf16.mxu0 %v8843_v7  ;;  %v8855_v6 = vld [vmem:[%s12080_s1 + $0x824] ss:$8 sps:$4 sm:$0xff]  }
 0x1cf   :  { %5804 = vmatpush1.bf16.msra.mxu1 %v8751_v8  ;;  %v8858_v7 = vld [vmem:[%s12080_s1 + $0x1424] ss:$8 sps:$4 sm:$0xff]   ;;  %v8935_v8 = vld [vmem:[%s12081_s0 + $0x1c8] ss:$200 sps:$4 sm:$0xff]  }
 0x1d0   :  { %6440 = vmatpush1.bf16.msra.mxu0 %v8754_v9  ;;  %5805 = vmatprep.subr.bf16.mxu1 %v8759_v10  ;;  %v8936_v9 = vld [vmem:[%s12081_s0 + $0x228] ss:$200 sps:$4 sm:$0xff]  }
 0x1d1   :  { %6441 = vmatprep.subr.bf16.mxu0 %v8762_v11  ;;  %v8853_v10 = vld [vmem:[%s12080_s1 + $0x820] ss:$8 sps:$4 sm:$0xff]  }
 0x1d2   :  { %v8856_v11 = vld [vmem:[%s12080_s1 + $0x1420] ss:$8 sps:$4 sm:$0xff]  }
 0x1d3   :  { %5806 = vmatpush1.bf16.msra.mxu1 %v8757_v12  ;;  %v8861_v12 = vld [vmem:[%s12080_s1 + $0x834] ss:$8 sps:$4 sm:$0xff]  }
 0x1d4   :  { %6442 = vmatpush1.bf16.msra.mxu0 %v8760_v13  ;;  %5807 = vmatprep.subr.bf16.mxu1 %v8765_v14  ;;  %v8864_v13 = vld [vmem:[%s12080_s1 + $0x1434] ss:$8 sps:$4 sm:$0xff]   ;;  %v8945_v14 = vld [vmem:[%s12081_s0 + $0x44] ss:$200 sps:$4 sm:$0xff]  }
 0x1d5   :  { %6443 = vmatprep.subr.bf16.mxu0 %v8768_v15  ;;  %v8951_v15 = vld [vmem:[%s12081_s0 + $0xa4] ss:$200 sps:$4 sm:$0xff]  }
 0x1d7   :  { %5808 = vmatpush1.bf16.msra.mxu1 %v8763_v16  ;;  %v8859_v16 = vld [vmem:[%s12080_s1 + $0x830] ss:$8 sps:$4 sm:$0xff]  }
 0x1d8   :  { %6444 = vmatpush1.bf16.msra.mxu0 %v8766_v17  ;;  %5809 = vmatprep.subr.bf16.mxu1 %v8771_v18  ;;  %v8862_v17 = vld [vmem:[%s12080_s1 + $0x1430] ss:$8 sps:$4 sm:$0xff]   ;;  %v8867_v18 = vld [vmem:[%s12080_s1 + $0x844] ss:$8 sps:$4 sm:$0xff]  }
 0x1d9   :  { %6445 = vmatprep.subr.bf16.mxu0 %v8774_v19  ;;  %v8870_v19 = vld [vmem:[%s12080_s1 + $0x1444] ss:$8 sps:$4 sm:$0xff]  }
 0x1db   :  { %5810 = vmatpush1.bf16.msra.mxu1 %v8769_v20  ;;  %v8865_v20 = vld [vmem:[%s12080_s1 + $0x840] ss:$8 sps:$4 sm:$0xff]  }
 0x1dc   :  { %6446 = vmatpush1.bf16.msra.mxu0 %v8772_v21  ;;  %5811 = vmatprep.subr.bf16.mxu1 %v8777_v22  ;;  %v8868_v21 = vld [vmem:[%s12080_s1 + $0x1440] ss:$8 sps:$4 sm:$0xff]   ;;  %v8873_v22 = vld [vmem:[%s12080_s1 + $0x854] ss:$8 sps:$4 sm:$0xff]  }
 0x1dd   :  { %6447 = vmatprep.subr.bf16.mxu0 %v8780_v23  ;;  %v8876_v23 = vld [vmem:[%s12080_s1 + $0x1454] ss:$8 sps:$4 sm:$0xff]  }
 0x1df   :  { %5812 = vmatpush1.bf16.msra.mxu1 %v8775_v24  ;;  %v8871_v24 = vld [vmem:[%s12080_s1 + $0x850] ss:$8 sps:$4 sm:$0xff]  }
 0x1e0   :  { %6448 = vmatpush1.bf16.msra.mxu0 %v8778_v25  ;;  %5813 = vmatprep.subr.bf16.mxu1 %v8783_v26  ;;  %v8874_v25 = vld [vmem:[%s12080_s1 + $0x1450] ss:$8 sps:$4 sm:$0xff]   ;;  %v8879_v26 = vld [vmem:[%s12080_s1 + $0x864] ss:$8 sps:$4 sm:$0xff]  }
 0x1e1   :  { %6449 = vmatprep.subr.bf16.mxu0 %v8786_v27  ;;  %v8882_v27 = vld [vmem:[%s12080_s1 + $0x1464] ss:$8 sps:$4 sm:$0xff]  }
 0x1e3   :  { %5814 = vmatpush1.bf16.msra.mxu1 %v8781_v28  ;;  %v8877_v28 = vld [vmem:[%s12080_s1 + $0x860] ss:$8 sps:$4 sm:$0xff]  }
 0x1e4   :  { %6450 = vmatpush1.bf16.msra.mxu0 %v8784_v29  ;;  %5815 = vmatprep.subr.bf16.mxu1 %v8789_v30  ;;  %v8880_v29 = vld [vmem:[%s12080_s1 + $0x1460] ss:$8 sps:$4 sm:$0xff]   ;;  %v8885_v30 = vld [vmem:[%s12080_s1 + $0x874] ss:$8 sps:$4 sm:$0xff]  }
 0x1e5   :  { %6451 = vmatprep.subr.bf16.mxu0 %v8792_v31  ;;  %v8888_v31 = vld [vmem:[%s12080_s1 + $0x1474] ss:$8 sps:$4 sm:$0xff]  }
 0x1e7   :  { %5816 = vmatpush1.bf16.msra.mxu1 %v8787_v32  ;;  %v8883_v32 = vld [vmem:[%s12080_s1 + $0x870] ss:$8 sps:$4 sm:$0xff]  }
 0x1e8   :  { %6452 = vmatpush1.bf16.msra.mxu0 %v8790_v33  ;;  %5817 = vmatprep.subr.bf16.mxu1 %v8795_v34  ;;  %v8886_v33 = vld [vmem:[%s12080_s1 + $0x1470] ss:$8 sps:$4 sm:$0xff]   ;;  %v8891_v34 = vld [vmem:[%s12080_s1 + $0x884] ss:$8 sps:$4 sm:$0xff]  }
 0x1e9   :  { %6453 = vmatprep.subr.bf16.mxu0 %v8798_v35  ;;  %v8894_v35 = vld [vmem:[%s12080_s1 + $0x1484] ss:$8 sps:$4 sm:$0xff]  }
 0x1eb   :  { %5818 = vmatpush1.bf16.msra.mxu1 %v8793_v36  ;;  %v8889_v36 = vld [vmem:[%s12080_s1 + $0x880] ss:$8 sps:$4 sm:$0xff]  }
 0x1ec   :  { %6454 = vmatpush1.bf16.msra.mxu0 %v8796_v37  ;;  %5819 = vmatprep.subr.bf16.mxu1 %v8801_v38  ;;  %v8892_v37 = vld [vmem:[%s12080_s1 + $0x1480] ss:$8 sps:$4 sm:$0xff]   ;;  %v8897_v38 = vld [vmem:[%s12080_s1 + $0x894] ss:$8 sps:$4 sm:$0xff]  }
 0x1ed   :  { %6455 = vmatprep.subr.bf16.mxu0 %v8804_v39  ;;  %v8900_v39 = vld [vmem:[%s12080_s1 + $0x1494] ss:$8 sps:$4 sm:$0xff]  }
 0x1ef   :  { %5820 = vmatpush1.bf16.msra.mxu1 %v8799_v40  ;;  %v8895_v40 = vld [vmem:[%s12080_s1 + $0x890] ss:$8 sps:$4 sm:$0xff]  }
 0x1f0   :  { %6456 = vmatpush1.bf16.msra.mxu0 %v8802_v41  ;;  %5821 = vmatprep.subr.bf16.mxu1 %v8807_v42  ;;  %v8898_v41 = vld [vmem:[%s12080_s1 + $0x1490] ss:$8 sps:$4 sm:$0xff]   ;;  %v8903_v42 = vld [vmem:[%s12080_s1 + $0x8a4] ss:$8 sps:$4 sm:$0xff]  }
 0x1f1   :  { %6457 = vmatprep.subr.bf16.mxu0 %v8810_v43  ;;  %v8906_v43 = vld [vmem:[%s12080_s1 + $0x14a4] ss:$8 sps:$4 sm:$0xff]  }
 0x1f3   :  { %5822 = vmatpush1.bf16.msra.mxu1 %v8805_v44  ;;  %v8901_v44 = vld [vmem:[%s12080_s1 + $0x8a0] ss:$8 sps:$4 sm:$0xff]  }
 0x1f4   :  { %6458 = vmatpush1.bf16.msra.mxu0 %v8808_v45  ;;  %5823 = vmatprep.subr.bf16.mxu1 %v8813_v46  ;;  %v8904_v45 = vld [vmem:[%s12080_s1 + $0x14a0] ss:$8 sps:$4 sm:$0xff]   ;;  %v8909_v46 = vld [vmem:[%s12080_s1 + $0x8b4] ss:$8 sps:$4 sm:$0xff]  }
 0x1f5   :  { %6459 = vmatprep.subr.bf16.mxu0 %v8816_v47  ;;  %v8912_v47 = vld [vmem:[%s12080_s1 + $0x14b4] ss:$8 sps:$4 sm:$0xff]  }
 0x1f7   :  { %5824 = vmatpush1.bf16.msra.mxu1 %v8811_v48  ;;  %v8907_v48 = vld [vmem:[%s12080_s1 + $0x8b0] ss:$8 sps:$4 sm:$0xff]  }
 0x1f8   :  { %6460 = vmatpush1.bf16.msra.mxu0 %v8814_v49  ;;  %5825 = vmatprep.subr.bf16.mxu1 %v8821_v50  ;;  %v8910_v49 = vld [vmem:[%s12080_s1 + $0x14b0] ss:$8 sps:$4 sm:$0xff]   ;;  %v8915_v50 = vld [vmem:[%s12080_s1 + $0x8c4] ss:$8 sps:$4 sm:$0xff]  }
 0x1f9   :  { %6461 = vmatprep.subr.bf16.mxu0 %v8826_v51  ;;  %v8918_v51 = vld [vmem:[%s12080_s1 + $0x14c4] ss:$8 sps:$4 sm:$0xff]  }
 0x1fb   :  { %5826 = vmatpush1.bf16.msra.mxu1 %v8819_v52  ;;  %v8913_v52 = vld [vmem:[%s12080_s1 + $0x8c0] ss:$8 sps:$4 sm:$0xff]  }
 0x1fc   :  { %6462 = vmatpush1.bf16.msra.mxu0 %v8824_v53  ;;  %5827 = vmatprep.subr.bf16.mxu1 %v8831_v54  ;;  %v8916_v53 = vld [vmem:[%s12080_s1 + $0x14c0] ss:$8 sps:$4 sm:$0xff]   ;;  %v8921_v54 = vld [vmem:[%s12080_s1 + $0x8d4] ss:$8 sps:$4 sm:$0xff]  }
 0x1fd   :  { %6463 = vmatprep.subr.bf16.mxu0 %v8834_v55  ;;  %v8924_v55 = vld [vmem:[%s12080_s1 + $0x14d4] ss:$8 sps:$4 sm:$0xff]  }
 0x1ff   :  { %5828 = vmatpush1.bf16.msra.mxu1 %v8829_v56  ;;  %v8919_v56 = vld [vmem:[%s12080_s1 + $0x8d0] ss:$8 sps:$4 sm:$0xff]  }
 0x200   :  { %6464 = vmatpush1.bf16.msra.mxu0 %v8832_v57  ;;  %5850 = vmatprep.subr.bf16.mxu1 %v8840_v58  ;;  %v8922_v57 = vld [vmem:[%s12080_s1 + $0x14d0] ss:$8 sps:$4 sm:$0xff]   ;;  %v8929_v58 = vld [vmem:[%s12080_s1 + $0x8e4] ss:$8 sps:$4 sm:$0xff]  }
 0x201   :  { %6486 = vmatprep.subr.bf16.mxu0 %v8846_v61  ;;  %v8932_v61 = vld [vmem:[%s12080_s1 + $0x14e0] ss:$8 sps:$4 sm:$0xff]  }
 0x202   :  { %5830 = vmatmul.mubr.bf16.vlgmr.msra.gmra.mrb[0].mxu1 %v8835_v59  ;;  %v8934_v59 = vld [vmem:[%s12080_s1 + $0x14e4] ss:$8 sps:$4 sm:$0xff]  }
 0x203   :  { %6466 = vmatmul.mubr.bf16.vlgmr.msra.gmra.mrb[0].mxu0 %v8841_v60  ;;  %5851 = vmatpush1.bf16.msra.mxu1 %v8838_v62  ;;  %v8927_v60 = vld [vmem:[%s12080_s1 + $0x8e0] ss:$8 sps:$4 sm:$0xff]   ;;  %v8939_v62 = vld [vmem:[%s12080_s1 + $0x8f4] ss:$8 sps:$4 sm:$0xff]  }
 0x204   :  { %6487 = vmatpush1.bf16.msra.mxu0 %v8844_v63  ;;  %5852 = vmatprep.subr.bf16.mxu1 %v8849_v0  ;;  %v8942_v63 = vld [vmem:[%s12080_s1 + $0x14f4] ss:$8 sps:$4 sm:$0xff]   ;;  %v8937_v0 = vld [vmem:[%s12080_s1 + $0x8f0] ss:$8 sps:$4 sm:$0xff]  }
 0x205   :  { %6488 = vmatprep.subr.bf16.mxu0 %v8852_v1  ;;  %5839 = vmatprep.mubr.bf16.mxu1 %v8925_v4  ;;  %v8940_v1 = vld [vmem:[%s12080_s1 + $0x14f0] ss:$8 sps:$4 sm:$0xff]   ;;  %v8943_v4 = vld [vmem:[%s12081_s0 + $0x40] ss:$200 sps:$4 sm:$0xff]  }
 0x206   :  { %6475 = vmatprep.mubr.bf16.mxu0 %v8930_v5  ;;  %v8949_v5 = vld [vmem:[%s12081_s0 + $0xa0] ss:$200 sps:$4 sm:$0xff]  }
 0x207   :  { %5853 = vmatpush1.bf16.msra.mxu1 %v8847_v2  ;;  %v8948_v2 = vld [vmem:[%s12080_s1 + $0x904] ss:$8 sps:$4 sm:$0xff]  }
 0x208   :  { %6489 = vmatpush1.bf16.msra.mxu0 %v8850_v3  ;;  %5854 = vmatprep.subr.bf16.mxu1 %v8855_v6  ;;  %v8954_v3 = vld [vmem:[%s12080_s1 + $0x1504] ss:$8 sps:$4 sm:$0xff]   ;;  %v8946_v6 = vld [vmem:[%s12080_s1 + $0x900] ss:$8 sps:$4 sm:$0xff]  }
 0x209   :  { %6490 = vmatprep.subr.bf16.mxu0 %v8858_v7  ;;  %v8952_v7 = vld [vmem:[%s12080_s1 + $0x1500] ss:$8 sps:$4 sm:$0xff]  }
 0x20a   :  { %5840 = vmatmul.mubr.bf16.gmra.mrb[4].mxu1 %v8935_v8  ;;  %v8957_v8 = vld [vmem:[%s12080_s1 + $0x914] ss:$8 sps:$4 sm:$0xff]  }
 0x20b   :  { %6476 = vmatmul.mubr.bf16.gmra.mrb[4].mxu0 %v8936_v9  ;;  %5855 = vmatpush1.bf16.msra.mxu1 %v8853_v10  ;;  %v8960_v9 = vld [vmem:[%s12080_s1 + $0x1514] ss:$8 sps:$4 sm:$0xff]  }
 0x20c   :  { %6491 = vmatpush1.bf16.msra.mxu0 %v8856_v11  ;;  %5856 = vmatprep.subr.bf16.mxu1 %v8861_v12  ;;  %v9033_v10 = vld [vmem:[%s12081_s0 + $0x1d4] ss:$200 sps:$4 sm:$0xff]   ;;  %v8955_v12 = vld [vmem:[%s12080_s1 + $0x910] ss:$8 sps:$4 sm:$0xff]  }
 0x20d   :  { %6492 = vmatprep.subr.bf16.mxu0 %v8864_v13  ;;  %5882 = vmatprep.mubr.bf16.mxu1 %v8945_v14  ;;  %v9038_v11 = vld [vmem:[%s12081_s0 + $0x234] ss:$200 sps:$4 sm:$0xff]   ;;  %v8958_v13 = vld [vmem:[%s12080_s1 + $0x1510] ss:$8 sps:$4 sm:$0xff]   ;;  %v8963_v14 = vld [vmem:[%s12080_s1 + $0x924] ss:$8 sps:$4 sm:$0xff]  }
 0x20e   :  { %6518 = vmatprep.mubr.bf16.mxu0 %v8951_v15  ;;  %v8966_v15 = vld [vmem:[%s12080_s1 + $0x1524] ss:$8 sps:$4 sm:$0xff]  }
 0x20f   :  { %5857 = vmatpush1.bf16.msra.mxu1 %v8859_v16  ;;  %v9043_v16 = vld [vmem:[%s12081_s0 + $0x1d0] ss:$200 sps:$4 sm:$0xff]  }
 0x210   :  { %6493 = vmatpush1.bf16.msra.mxu0 %v8862_v17  ;;  %5858 = vmatprep.subr.bf16.mxu1 %v8867_v18  ;;  %v9044_v17 = vld [vmem:[%s12081_s0 + $0x230] ss:$200 sps:$4 sm:$0xff]   ;;  %v8961_v18 = vld [vmem:[%s12080_s1 + $0x920] ss:$8 sps:$4 sm:$0xff]  }
 0x211   :  { %6494 = vmatprep.subr.bf16.mxu0 %v8870_v19  ;;  %v8964_v19 = vld [vmem:[%s12080_s1 + $0x1520] ss:$8 sps:$4 sm:$0xff]  }
 0x213   :  { %5859 = vmatpush1.bf16.msra.mxu1 %v8865_v20  ;;  %v8969_v20 = vld [vmem:[%s12080_s1 + $0x934] ss:$8 sps:$4 sm:$0xff]  }
 0x214   :  { %6495 = vmatpush1.bf16.msra.mxu0 %v8868_v21  ;;  %5860 = vmatprep.subr.bf16.mxu1 %v8873_v22  ;;  %v8972_v21 = vld [vmem:[%s12080_s1 + $0x1534] ss:$8 sps:$4 sm:$0xff]  }
 0x215   :  { %6496 = vmatprep.subr.bf16.mxu0 %v8876_v23  ;;  %v9053_v22 = vld [vmem:[%s12081_s0 + $0x4c] ss:$200 sps:$4 sm:$0xff]  }
 0x216   :  { %v9059_v23 = vld [vmem:[%s12081_s0 + $0xac] ss:$200 sps:$4 sm:$0xff]  }
 0x217   :  { %5861 = vmatpush1.bf16.msra.mxu1 %v8871_v24  ;;  %v8967_v24 = vld [vmem:[%s12080_s1 + $0x930] ss:$8 sps:$4 sm:$0xff]  }
 0x218   :  { %6497 = vmatpush1.bf16.msra.mxu0 %v8874_v25  ;;  %5862 = vmatprep.subr.bf16.mxu1 %v8879_v26  ;;  %v8970_v25 = vld [vmem:[%s12080_s1 + $0x1530] ss:$8 sps:$4 sm:$0xff]   ;;  %v8975_v26 = vld [vmem:[%s12080_s1 + $0x944] ss:$8 sps:$4 sm:$0xff]  }
 0x219   :  { %6498 = vmatprep.subr.bf16.mxu0 %v8882_v27  ;;  %v8978_v27 = vld [vmem:[%s12080_s1 + $0x1544] ss:$8 sps:$4 sm:$0xff]  }
 0x21b   :  { %5863 = vmatpush1.bf16.msra.mxu1 %v8877_v28  ;;  %v8973_v28 = vld [vmem:[%s12080_s1 + $0x940] ss:$8 sps:$4 sm:$0xff]  }
 0x21c   :  { %6499 = vmatpush1.bf16.msra.mxu0 %v8880_v29  ;;  %5864 = vmatprep.subr.bf16.mxu1 %v8885_v30  ;;  %v8976_v29 = vld [vmem:[%s12080_s1 + $0x1540] ss:$8 sps:$4 sm:$0xff]   ;;  %v8981_v30 = vld [vmem:[%s12080_s1 + $0x954] ss:$8 sps:$4 sm:$0xff]  }
 0x21d   :  { %6500 = vmatprep.subr.bf16.mxu0 %v8888_v31  ;;  %v8984_v31 = vld [vmem:[%s12080_s1 + $0x1554] ss:$8 sps:$4 sm:$0xff]  }
 0x21f   :  { %5865 = vmatpush1.bf16.msra.mxu1 %v8883_v32  ;;  %v8979_v32 = vld [vmem:[%s12080_s1 + $0x950] ss:$8 sps:$4 sm:$0xff]  }
 0x220   :  { %6501 = vmatpush1.bf16.msra.mxu0 %v8886_v33  ;;  %5866 = vmatprep.subr.bf16.mxu1 %v8891_v34  ;;  %v8982_v33 = vld [vmem:[%s12080_s1 + $0x1550] ss:$8 sps:$4 sm:$0xff]   ;;  %v8987_v34 = vld [vmem:[%s12080_s1 + $0x964] ss:$8 sps:$4 sm:$0xff]  }
 0x221   :  { %6502 = vmatprep.subr.bf16.mxu0 %v8894_v35  ;;  %v8990_v35 = vld [vmem:[%s12080_s1 + $0x1564] ss:$8 sps:$4 sm:$0xff]  }
 0x223   :  { %5867 = vmatpush1.bf16.msra.mxu1 %v8889_v36  ;;  %v8985_v36 = vld [vmem:[%s12080_s1 + $0x960] ss:$8 sps:$4 sm:$0xff]  }
 0x224   :  { %6503 = vmatpush1.bf16.msra.mxu0 %v8892_v37  ;;  %5868 = vmatprep.subr.bf16.mxu1 %v8897_v38  ;;  %v8988_v37 = vld [vmem:[%s12080_s1 + $0x1560] ss:$8 sps:$4 sm:$0xff]   ;;  %v8993_v38 = vld [vmem:[%s12080_s1 + $0x974] ss:$8 sps:$4 sm:$0xff]  }
 0x225   :  { %6504 = vmatprep.subr.bf16.mxu0 %v8900_v39  ;;  %v8996_v39 = vld [vmem:[%s12080_s1 + $0x1574] ss:$8 sps:$4 sm:$0xff]  }
 0x227   :  { %5869 = vmatpush1.bf16.msra.mxu1 %v8895_v40  ;;  %v8991_v40 = vld [vmem:[%s12080_s1 + $0x970] ss:$8 sps:$4 sm:$0xff]  }
 0x228   :  { %6505 = vmatpush1.bf16.msra.mxu0 %v8898_v41  ;;  %5870 = vmatprep.subr.bf16.mxu1 %v8903_v42  ;;  %v8994_v41 = vld [vmem:[%s12080_s1 + $0x1570] ss:$8 sps:$4 sm:$0xff]   ;;  %v8999_v42 = vld [vmem:[%s12080_s1 + $0x984] ss:$8 sps:$4 sm:$0xff]  }
 0x229   :  { %6506 = vmatprep.subr.bf16.mxu0 %v8906_v43  ;;  %v9002_v43 = vld [vmem:[%s12080_s1 + $0x1584] ss:$8 sps:$4 sm:$0xff]  }
 0x22b   :  { %5871 = vmatpush1.bf16.msra.mxu1 %v8901_v44  ;;  %v8997_v44 = vld [vmem:[%s12080_s1 + $0x980] ss:$8 sps:$4 sm:$0xff]  }
 0x22c   :  { %6507 = vmatpush1.bf16.msra.mxu0 %v8904_v45  ;;  %5872 = vmatprep.subr.bf16.mxu1 %v8909_v46  ;;  %v9000_v45 = vld [vmem:[%s12080_s1 + $0x1580] ss:$8 sps:$4 sm:$0xff]   ;;  %v9005_v46 = vld [vmem:[%s12080_s1 + $0x994] ss:$8 sps:$4 sm:$0xff]  }
 0x22d   :  { %6508 = vmatprep.subr.bf16.mxu0 %v8912_v47  ;;  %v9008_v47 = vld [vmem:[%s12080_s1 + $0x1594] ss:$8 sps:$4 sm:$0xff]  }
 0x22f   :  { %5873 = vmatpush1.bf16.msra.mxu1 %v8907_v48  ;;  %v9003_v48 = vld [vmem:[%s12080_s1 + $0x990] ss:$8 sps:$4 sm:$0xff]  }
 0x230   :  { %6509 = vmatpush1.bf16.msra.mxu0 %v8910_v49  ;;  %5874 = vmatprep.subr.bf16.mxu1 %v8915_v50  ;;  %v9006_v49 = vld [vmem:[%s12080_s1 + $0x1590] ss:$8 sps:$4 sm:$0xff]   ;;  %v9011_v50 = vld [vmem:[%s12080_s1 + $0x9a4] ss:$8 sps:$4 sm:$0xff]  }
 0x231   :  { %6510 = vmatprep.subr.bf16.mxu0 %v8918_v51  ;;  %v9014_v51 = vld [vmem:[%s12080_s1 + $0x15a4] ss:$8 sps:$4 sm:$0xff]  }
 0x233   :  { %5875 = vmatpush1.bf16.msra.mxu1 %v8913_v52  ;;  %v9009_v52 = vld [vmem:[%s12080_s1 + $0x9a0] ss:$8 sps:$4 sm:$0xff]  }
 0x234   :  { %6511 = vmatpush1.bf16.msra.mxu0 %v8916_v53  ;;  %5876 = vmatprep.subr.bf16.mxu1 %v8921_v54  ;;  %v9012_v53 = vld [vmem:[%s12080_s1 + $0x15a0] ss:$8 sps:$4 sm:$0xff]   ;;  %v9017_v54 = vld [vmem:[%s12080_s1 + $0x9b4] ss:$8 sps:$4 sm:$0xff]  }
 0x235   :  { %6512 = vmatprep.subr.bf16.mxu0 %v8924_v55  ;;  %v9020_v55 = vld [vmem:[%s12080_s1 + $0x15b4] ss:$8 sps:$4 sm:$0xff]  }
 0x237   :  { %5877 = vmatpush1.bf16.msra.mxu1 %v8919_v56  ;;  %v9015_v56 = vld [vmem:[%s12080_s1 + $0x9b0] ss:$8 sps:$4 sm:$0xff]  }
 0x238   :  { %6513 = vmatpush1.bf16.msra.mxu0 %v8922_v57  ;;  %5878 = vmatprep.subr.bf16.mxu1 %v8929_v58  ;;  %v9018_v57 = vld [vmem:[%s12080_s1 + $0x15b0] ss:$8 sps:$4 sm:$0xff]   ;;  %v9023_v58 = vld [vmem:[%s12080_s1 + $0x9c4] ss:$8 sps:$4 sm:$0xff]  }
 0x239   :  { %6514 = vmatprep.subr.bf16.mxu0 %v8934_v59  ;;  %v9026_v59 = vld [vmem:[%s12080_s1 + $0x15c4] ss:$8 sps:$4 sm:$0xff]  }
 0x23b   :  { %5879 = vmatpush1.bf16.msra.mxu1 %v8927_v60  ;;  %v9021_v60 = vld [vmem:[%s12080_s1 + $0x9c0] ss:$8 sps:$4 sm:$0xff]  }
 0x23c   :  { %6515 = vmatpush1.bf16.msra.mxu0 %v8932_v61  ;;  %5880 = vmatprep.subr.bf16.mxu1 %v8939_v62  ;;  %v9024_v61 = vld [vmem:[%s12080_s1 + $0x15c0] ss:$8 sps:$4 sm:$0xff]   ;;  %v9029_v62 = vld [vmem:[%s12080_s1 + $0x9d4] ss:$8 sps:$4 sm:$0xff]  }
 0x23d   :  { %6516 = vmatprep.subr.bf16.mxu0 %v8942_v63  ;;  %v9032_v63 = vld [vmem:[%s12080_s1 + $0x15d4] ss:$8 sps:$4 sm:$0xff]  }
 0x23f   :  { %5881 = vmatpush1.bf16.msra.mxu1 %v8937_v0  ;;  %v9027_v0 = vld [vmem:[%s12080_s1 + $0x9d0] ss:$8 sps:$4 sm:$0xff]  }
 0x240   :  { %6517 = vmatpush1.bf16.msra.mxu0 %v8940_v1  ;;  %5903 = vmatprep.subr.bf16.mxu1 %v8948_v2  ;;  %v9030_v1 = vld [vmem:[%s12080_s1 + $0x15d0] ss:$8 sps:$4 sm:$0xff]   ;;  %v9037_v2 = vld [vmem:[%s12080_s1 + $0x9e4] ss:$8 sps:$4 sm:$0xff]  }
 0x241   :  { %6539 = vmatprep.subr.bf16.mxu0 %v8954_v3  ;;  %v9042_v3 = vld [vmem:[%s12080_s1 + $0x15e4] ss:$8 sps:$4 sm:$0xff]  }
 0x242   :  { %5883 = vmatmul.mubr.bf16.vlgmr.msra.gmra.mrb[0].mxu1 %v8943_v4  ;;  %v9035_v4 = vld [vmem:[%s12080_s1 + $0x9e0] ss:$8 sps:$4 sm:$0xff]  }
 0x243   :  { %6519 = vmatmul.mubr.bf16.vlgmr.msra.gmra.mrb[0].mxu0 %v8949_v5  ;;  %5904 = vmatpush1.bf16.msra.mxu1 %v8946_v6  ;;  %v9040_v5 = vld [vmem:[%s12080_s1 + $0x15e0] ss:$8 sps:$4 sm:$0xff]   ;;  %v9047_v6 = vld [vmem:[%s12080_s1 + $0x9f4] ss:$8 sps:$4 sm:$0xff]  }
 0x244   :  { %6540 = vmatpush1.bf16.msra.mxu0 %v8952_v7  ;;  %5905 = vmatprep.subr.bf16.mxu1 %v8957_v8  ;;  %v9050_v7 = vld [vmem:[%s12080_s1 + $0x15f4] ss:$8 sps:$4 sm:$0xff]   ;;  %v9045_v8 = vld [vmem:[%s12080_s1 + $0x9f0] ss:$8 sps:$4 sm:$0xff]  }
 0x245   :  { %6541 = vmatprep.subr.bf16.mxu0 %v8960_v9  ;;  %5892 = vmatprep.mubr.bf16.mxu1 %v9033_v10  ;;  %v9048_v9 = vld [vmem:[%s12080_s1 + $0x15f0] ss:$8 sps:$4 sm:$0xff]   ;;  %v9056_v10 = vld [vmem:[%s12080_s1 + $0xa04] ss:$8 sps:$4 sm:$0xff]  }
 0x246   :  { %6528 = vmatprep.mubr.bf16.mxu0 %v9038_v11  ;;  %v9062_v11 = vld [vmem:[%s12080_s1 + $0x1604] ss:$8 sps:$4 sm:$0xff]  }
 0x247   :  { %5906 = vmatpush1.bf16.msra.mxu1 %v8955_v12  ;;  %v9051_v12 = vld [vmem:[%s12081_s0 + $0x48] ss:$200 sps:$4 sm:$0xff]  }
 0x248   :  { %6542 = vmatpush1.bf16.msra.mxu0 %v8958_v13  ;;  %5907 = vmatprep.subr.bf16.mxu1 %v8963_v14  ;;  %v9057_v13 = vld [vmem:[%s12081_s0 + $0xa8] ss:$200 sps:$4 sm:$0xff]  }
 0x249   :  { %6543 = vmatprep.subr.bf16.mxu0 %v8966_v15  ;;  %v9054_v14 = vld [vmem:[%s12080_s1 + $0xa00] ss:$8 sps:$4 sm:$0xff]  }
 0x24a   :  { %5893 = vmatmul.mubr.bf16.gmra.mrb[4].mxu1 %v9043_v16  ;;  %v9060_v15 = vld [vmem:[%s12080_s1 + $0x1600] ss:$8 sps:$4 sm:$0xff]   ;;  %v9065_v16 = vld [vmem:[%s12080_s1 + $0xa14] ss:$8 sps:$4 sm:$0xff]  }
 0x24b   :  { %6529 = vmatmul.mubr.bf16.gmra.mrb[4].mxu0 %v9044_v17  ;;  %5908 = vmatpush1.bf16.msra.mxu1 %v8961_v18  ;;  %v9068_v17 = vld [vmem:[%s12080_s1 + $0x1614] ss:$8 sps:$4 sm:$0xff]  }
 0x24c   :  { %6544 = vmatpush1.bf16.msra.mxu0 %v8964_v19  ;;  %5909 = vmatprep.subr.bf16.mxu1 %v8969_v20  ;;  %v9141_v18 = vld [vmem:[%s12081_s0 + $0x1dc] ss:$200 sps:$4 sm:$0xff]   ;;  %v9063_v20 = vld [vmem:[%s12080_s1 + $0xa10] ss:$8 sps:$4 sm:$0xff]  }
 0x24d   :  { %6545 = vmatprep.subr.bf16.mxu0 %v8972_v21  ;;  %5935 = vmatprep.mubr.bf16.mxu1 %v9053_v22  ;;  %v9146_v19 = vld [vmem:[%s12081_s0 + $0x23c] ss:$200 sps:$4 sm:$0xff]   ;;  %v9066_v21 = vld [vmem:[%s12080_s1 + $0x1610] ss:$8 sps:$4 sm:$0xff]  }
 0x24e   :  { %6571 = vmatprep.mubr.bf16.mxu0 %v9059_v23  ;;  %v9071_v22 = vld [vmem:[%s12080_s1 + $0xa24] ss:$8 sps:$4 sm:$0xff]  }
 0x24f   :  { %5910 = vmatpush1.bf16.msra.mxu1 %v8967_v24  ;;  %v9074_v23 = vld [vmem:[%s12080_s1 + $0x1624] ss:$8 sps:$4 sm:$0xff]   ;;  %v9151_v24 = vld [vmem:[%s12081_s0 + $0x1d8] ss:$200 sps:$4 sm:$0xff]  }
 0x250   :  { %6546 = vmatpush1.bf16.msra.mxu0 %v8970_v25  ;;  %5911 = vmatprep.subr.bf16.mxu1 %v8975_v26  ;;  %v9152_v25 = vld [vmem:[%s12081_s0 + $0x238] ss:$200 sps:$4 sm:$0xff]  }
 0x251   :  { %6547 = vmatprep.subr.bf16.mxu0 %v8978_v27  ;;  %v9069_v26 = vld [vmem:[%s12080_s1 + $0xa20] ss:$8 sps:$4 sm:$0xff]  }
 0x252   :  { %v9072_v27 = vld [vmem:[%s12080_s1 + $0x1620] ss:$8 sps:$4 sm:$0xff]  }
 0x253   :  { %5912 = vmatpush1.bf16.msra.mxu1 %v8973_v28  ;;  %v9077_v28 = vld [vmem:[%s12080_s1 + $0xa34] ss:$8 sps:$4 sm:$0xff]  }
 0x254   :  { %6548 = vmatpush1.bf16.msra.mxu0 %v8976_v29  ;;  %5913 = vmatprep.subr.bf16.mxu1 %v8981_v30  ;;  %v9080_v29 = vld [vmem:[%s12080_s1 + $0x1634] ss:$8 sps:$4 sm:$0xff]  }
 0x255   :  { %6549 = vmatprep.subr.bf16.mxu0 %v8984_v31  ;;  %v9161_v30 = vld [vmem:[%s12081_s0 + $0x54] ss:$200 sps:$4 sm:$0xff]  }
 0x256   :  { %v9167_v31 = vld [vmem:[%s12081_s0 + $0xb4] ss:$200 sps:$4 sm:$0xff]  }
 0x257   :  { %5914 = vmatpush1.bf16.msra.mxu1 %v8979_v32  ;;  %v9075_v32 = vld [vmem:[%s12080_s1 + $0xa30] ss:$8 sps:$4 sm:$0xff]  }
 0x258   :  { %6550 = vmatpush1.bf16.msra.mxu0 %v8982_v33  ;;  %5915 = vmatprep.subr.bf16.mxu1 %v8987_v34  ;;  %v9078_v33 = vld [vmem:[%s12080_s1 + $0x1630] ss:$8 sps:$4 sm:$0xff]   ;;  %v9083_v34 = vld [vmem:[%s12080_s1 + $0xa44] ss:$8 sps:$4 sm:$0xff]  }
 0x259   :  { %6551 = vmatprep.subr.bf16.mxu0 %v8990_v35  ;;  %v9086_v35 = vld [vmem:[%s12080_s1 + $0x1644] ss:$8 sps:$4 sm:$0xff]  }
 0x25b   :  { %5916 = vmatpush1.bf16.msra.mxu1 %v8985_v36  ;;  %v9081_v36 = vld [vmem:[%s12080_s1 + $0xa40] ss:$8 sps:$4 sm:$0xff]  }
 0x25c   :  { %6552 = vmatpush1.bf16.msra.mxu0 %v8988_v37  ;;  %5917 = vmatprep.subr.bf16.mxu1 %v8993_v38  ;;  %v9084_v37 = vld [vmem:[%s12080_s1 + $0x1640] ss:$8 sps:$4 sm:$0xff]   ;;  %v9089_v38 = vld [vmem:[%s12080_s1 + $0xa54] ss:$8 sps:$4 sm:$0xff]  }
 0x25d   :  { %6553 = vmatprep.subr.bf16.mxu0 %v8996_v39  ;;  %v9092_v39 = vld [vmem:[%s12080_s1 + $0x1654] ss:$8 sps:$4 sm:$0xff]  }
 0x25f   :  { %5918 = vmatpush1.bf16.msra.mxu1 %v8991_v40  ;;  %v9087_v40 = vld [vmem:[%s12080_s1 + $0xa50] ss:$8 sps:$4 sm:$0xff]  }
 0x260   :  { %6554 = vmatpush1.bf16.msra.mxu0 %v8994_v41  ;;  %5919 = vmatprep.subr.bf16.mxu1 %v8999_v42  ;;  %v9090_v41 = vld [vmem:[%s12080_s1 + $0x1650] ss:$8 sps:$4 sm:$0xff]   ;;  %v9095_v42 = vld [vmem:[%s12080_s1 + $0xa64] ss:$8 sps:$4 sm:$0xff]  }
 0x261   :  { %6555 = vmatprep.subr.bf16.mxu0 %v9002_v43  ;;  %v9098_v43 = vld [vmem:[%s12080_s1 + $0x1664] ss:$8 sps:$4 sm:$0xff]  }
 0x263   :  { %5920 = vmatpush1.bf16.msra.mxu1 %v8997_v44  ;;  %v9093_v44 = vld [vmem:[%s12080_s1 + $0xa60] ss:$8 sps:$4 sm:$0xff]  }
 0x264   :  { %6556 = vmatpush1.bf16.msra.mxu0 %v9000_v45  ;;  %5921 = vmatprep.subr.bf16.mxu1 %v9005_v46  ;;  %v9096_v45 = vld [vmem:[%s12080_s1 + $0x1660] ss:$8 sps:$4 sm:$0xff]   ;;  %v9101_v46 = vld [vmem:[%s12080_s1 + $0xa74] ss:$8 sps:$4 sm:$0xff]  }
 0x265   :  { %6557 = vmatprep.subr.bf16.mxu0 %v9008_v47  ;;  %v9104_v47 = vld [vmem:[%s12080_s1 + $0x1674] ss:$8 sps:$4 sm:$0xff]  }
 0x267   :  { %5922 = vmatpush1.bf16.msra.mxu1 %v9003_v48  ;;  %v9099_v48 = vld [vmem:[%s12080_s1 + $0xa70] ss:$8 sps:$4 sm:$0xff]  }
 0x268   :  { %6558 = vmatpush1.bf16.msra.mxu0 %v9006_v49  ;;  %5923 = vmatprep.subr.bf16.mxu1 %v9011_v50  ;;  %v9102_v49 = vld [vmem:[%s12080_s1 + $0x1670] ss:$8 sps:$4 sm:$0xff]   ;;  %v9107_v50 = vld [vmem:[%s12080_s1 + $0xa84] ss:$8 sps:$4 sm:$0xff]  }
 0x269   :  { %6559 = vmatprep.subr.bf16.mxu0 %v9014_v51  ;;  %v9110_v51 = vld [vmem:[%s12080_s1 + $0x1684] ss:$8 sps:$4 sm:$0xff]  }
 0x26b   :  { %5924 = vmatpush1.bf16.msra.mxu1 %v9009_v52  ;;  %v9105_v52 = vld [vmem:[%s12080_s1 + $0xa80] ss:$8 sps:$4 sm:$0xff]  }
 0x26c   :  { %6560 = vmatpush1.bf16.msra.mxu0 %v9012_v53  ;;  %5925 = vmatprep.subr.bf16.mxu1 %v9017_v54  ;;  %v9108_v53 = vld [vmem:[%s12080_s1 + $0x1680] ss:$8 sps:$4 sm:$0xff]   ;;  %v9113_v54 = vld [vmem:[%s12080_s1 + $0xa94] ss:$8 sps:$4 sm:$0xff]  }
 0x26d   :  { %6561 = vmatprep.subr.bf16.mxu0 %v9020_v55  ;;  %v9116_v55 = vld [vmem:[%s12080_s1 + $0x1694] ss:$8 sps:$4 sm:$0xff]  }
 0x26f   :  { %5926 = vmatpush1.bf16.msra.mxu1 %v9015_v56  ;;  %v9111_v56 = vld [vmem:[%s12080_s1 + $0xa90] ss:$8 sps:$4 sm:$0xff]  }
 0x270   :  { %6562 = vmatpush1.bf16.msra.mxu0 %v9018_v57  ;;  %5927 = vmatprep.subr.bf16.mxu1 %v9023_v58  ;;  %v9114_v57 = vld [vmem:[%s12080_s1 + $0x1690] ss:$8 sps:$4 sm:$0xff]   ;;  %v9119_v58 = vld [vmem:[%s12080_s1 + $0xaa4] ss:$8 sps:$4 sm:$0xff]  }
 0x271   :  { %6563 = vmatprep.subr.bf16.mxu0 %v9026_v59  ;;  %v9122_v59 = vld [vmem:[%s12080_s1 + $0x16a4] ss:$8 sps:$4 sm:$0xff]  }
 0x273   :  { %5928 = vmatpush1.bf16.msra.mxu1 %v9021_v60  ;;  %v9117_v60 = vld [vmem:[%s12080_s1 + $0xaa0] ss:$8 sps:$4 sm:$0xff]  }
 0x274   :  { %6564 = vmatpush1.bf16.msra.mxu0 %v9024_v61  ;;  %5929 = vmatprep.subr.bf16.mxu1 %v9029_v62  ;;  %v9120_v61 = vld [vmem:[%s12080_s1 + $0x16a0] ss:$8 sps:$4 sm:$0xff]   ;;  %v9125_v62 = vld [vmem:[%s12080_s1 + $0xab4] ss:$8 sps:$4 sm:$0xff]  }
 0x275   :  { %6565 = vmatprep.subr.bf16.mxu0 %v9032_v63  ;;  %v9128_v63 = vld [vmem:[%s12080_s1 + $0x16b4] ss:$8 sps:$4 sm:$0xff]  }
 0x277   :  { %5930 = vmatpush1.bf16.msra.mxu1 %v9027_v0  ;;  %v9123_v0 = vld [vmem:[%s12080_s1 + $0xab0] ss:$8 sps:$4 sm:$0xff]  }
 0x278   :  { %6566 = vmatpush1.bf16.msra.mxu0 %v9030_v1  ;;  %5931 = vmatprep.subr.bf16.mxu1 %v9037_v2  ;;  %v9126_v1 = vld [vmem:[%s12080_s1 + $0x16b0] ss:$8 sps:$4 sm:$0xff]   ;;  %v9131_v2 = vld [vmem:[%s12080_s1 + $0xac4] ss:$8 sps:$4 sm:$0xff]  }
 0x279   :  { %6567 = vmatprep.subr.bf16.mxu0 %v9042_v3  ;;  %v9134_v3 = vld [vmem:[%s12080_s1 + $0x16c4] ss:$8 sps:$4 sm:$0xff]  }
 0x27b   :  { %5932 = vmatpush1.bf16.msra.mxu1 %v9035_v4  ;;  %v9129_v4 = vld [vmem:[%s12080_s1 + $0xac0] ss:$8 sps:$4 sm:$0xff]  }
 0x27c   :  { %6568 = vmatpush1.bf16.msra.mxu0 %v9040_v5  ;;  %5933 = vmatprep.subr.bf16.mxu1 %v9047_v6  ;;  %v9132_v5 = vld [vmem:[%s12080_s1 + $0x16c0] ss:$8 sps:$4 sm:$0xff]   ;;  %v9137_v6 = vld [vmem:[%s12080_s1 + $0xad4] ss:$8 sps:$4 sm:$0xff]  }
 0x27d   :  { %6569 = vmatprep.subr.bf16.mxu0 %v9050_v7  ;;  %v9140_v7 = vld [vmem:[%s12080_s1 + $0x16d4] ss:$8 sps:$4 sm:$0xff]  }
 0x27f   :  { %5934 = vmatpush1.bf16.msra.mxu1 %v9045_v8  ;;  %v9135_v8 = vld [vmem:[%s12080_s1 + $0xad0] ss:$8 sps:$4 sm:$0xff]  }
 0x280   :  { %6570 = vmatpush1.bf16.msra.mxu0 %v9048_v9  ;;  %5956 = vmatprep.subr.bf16.mxu1 %v9056_v10  ;;  %v9138_v9 = vld [vmem:[%s12080_s1 + $0x16d0] ss:$8 sps:$4 sm:$0xff]   ;;  %v9145_v10 = vld [vmem:[%s12080_s1 + $0xae4] ss:$8 sps:$4 sm:$0xff]  }
 0x281   :  { %6592 = vmatprep.subr.bf16.mxu0 %v9062_v11  ;;  %v9150_v11 = vld [vmem:[%s12080_s1 + $0x16e4] ss:$8 sps:$4 sm:$0xff]  }
 0x282   :  { %5936 = vmatmul.mubr.bf16.vlgmr.msra.gmra.mrb[0].mxu1 %v9051_v12  ;;  %v9143_v12 = vld [vmem:[%s12080_s1 + $0xae0] ss:$8 sps:$4 sm:$0xff]  }
 0x283   :  { %6572 = vmatmul.mubr.bf16.vlgmr.msra.gmra.mrb[0].mxu0 %v9057_v13  ;;  %5957 = vmatpush1.bf16.msra.mxu1 %v9054_v14  ;;  %v9148_v13 = vld [vmem:[%s12080_s1 + $0x16e0] ss:$8 sps:$4 sm:$0xff]   ;;  %v9155_v14 = vld [vmem:[%s12080_s1 + $0xaf4] ss:$8 sps:$4 sm:$0xff]  }
 0x284   :  { %6593 = vmatpush1.bf16.msra.mxu0 %v9060_v15  ;;  %5958 = vmatprep.subr.bf16.mxu1 %v9065_v16  ;;  %v9158_v15 = vld [vmem:[%s12080_s1 + $0x16f4] ss:$8 sps:$4 sm:$0xff]   ;;  %v9153_v16 = vld [vmem:[%s12080_s1 + $0xaf0] ss:$8 sps:$4 sm:$0xff]  }
 0x285   :  { %6594 = vmatprep.subr.bf16.mxu0 %v9068_v17  ;;  %5945 = vmatprep.mubr.bf16.mxu1 %v9141_v18  ;;  %v9156_v17 = vld [vmem:[%s12080_s1 + $0x16f0] ss:$8 sps:$4 sm:$0xff]   ;;  %v9164_v18 = vld [vmem:[%s12080_s1 + $0xb04] ss:$8 sps:$4 sm:$0xff]  }
 0x286   :  { %6581 = vmatprep.mubr.bf16.mxu0 %v9146_v19  ;;  %v9170_v19 = vld [vmem:[%s12080_s1 + $0x1704] ss:$8 sps:$4 sm:$0xff]  }
 0x287   :  { %5959 = vmatpush1.bf16.msra.mxu1 %v9063_v20  ;;  %v9159_v20 = vld [vmem:[%s12081_s0 + $0x50] ss:$200 sps:$4 sm:$0xff]  }
 0x288   :  { %6595 = vmatpush1.bf16.msra.mxu0 %v9066_v21  ;;  %5960 = vmatprep.subr.bf16.mxu1 %v9071_v22  ;;  %v9165_v21 = vld [vmem:[%s12081_s0 + $0xb0] ss:$200 sps:$4 sm:$0xff]   ;;  %v9162_v22 = vld [vmem:[%s12080_s1 + $0xb00] ss:$8 sps:$4 sm:$0xff]  }
 0x289   :  { %6596 = vmatprep.subr.bf16.mxu0 %v9074_v23  ;;  %v9168_v23 = vld [vmem:[%s12080_s1 + $0x1700] ss:$8 sps:$4 sm:$0xff]  }
 0x28a   :  { %5946 = vmatmul.mubr.bf16.gmra.mrb[4].mxu1 %v9151_v24  ;;  %v9173_v24 = vld [vmem:[%s12080_s1 + $0xb14] ss:$8 sps:$4 sm:$0xff]  }
 0x28b   :  { %6582 = vmatmul.mubr.bf16.gmra.mrb[4].mxu0 %v9152_v25  ;;  %5961 = vmatpush1.bf16.msra.mxu1 %v9069_v26  ;;  %v9176_v25 = vld [vmem:[%s12080_s1 + $0x1714] ss:$8 sps:$4 sm:$0xff]   ;;  %v9249_v26 = vld [vmem:[%s12081_s0 + $0x1e4] ss:$200 sps:$4 sm:$0xff]  }
 0x28c   :  { %6597 = vmatpush1.bf16.msra.mxu0 %v9072_v27  ;;  %5962 = vmatprep.subr.bf16.mxu1 %v9077_v28  ;;  %v9251_v27 = vld [vmem:[%s12081_s0 + $0x244] ss:$200 sps:$4 sm:$0xff]   ;;  %v9171_v28 = vld [vmem:[%s12080_s1 + $0xb10] ss:$8 sps:$4 sm:$0xff]  }
 0x28d   :  { %6598 = vmatprep.subr.bf16.mxu0 %v9080_v29  ;;  %5988 = vmatprep.mubr.bf16.mxu1 %v9161_v30  ;;  %v9174_v29 = vld [vmem:[%s12080_s1 + $0x1710] ss:$8 sps:$4 sm:$0xff]   ;;  %v9179_v30 = vld [vmem:[%s12080_s1 + $0xb24] ss:$8 sps:$4 sm:$0xff]  }
 0x28e   :  { %6624 = vmatprep.mubr.bf16.mxu0 %v9167_v31  ;;  %v9182_v31 = vld [vmem:[%s12080_s1 + $0x1724] ss:$8 sps:$4 sm:$0xff]  }
 0x28f   :  { %5963 = vmatpush1.bf16.msra.mxu1 %v9075_v32  ;;  %v9253_v32 = vld [vmem:[%s12081_s0 + $0x1e0] ss:$200 sps:$4 sm:$0xff]  }
 0x290   :  { %6599 = vmatpush1.bf16.msra.mxu0 %v9078_v33  ;;  %5964 = vmatprep.subr.bf16.mxu1 %v9083_v34  ;;  %v9257_v33 = vld [vmem:[%s12081_s0 + $0x240] ss:$200 sps:$4 sm:$0xff]  }
 0x291   :  { %6600 = vmatprep.subr.bf16.mxu0 %v9086_v35  ;;  %v9177_v34 = vld [vmem:[%s12080_s1 + $0xb20] ss:$8 sps:$4 sm:$0xff]  }
 0x292   :  { %v9180_v35 = vld [vmem:[%s12080_s1 + $0x1720] ss:$8 sps:$4 sm:$0xff]  }
 0x293   :  { %5965 = vmatpush1.bf16.msra.mxu1 %v9081_v36  ;;  %v9185_v36 = vld [vmem:[%s12080_s1 + $0xb34] ss:$8 sps:$4 sm:$0xff]  }
 0x294   :  { %6601 = vmatpush1.bf16.msra.mxu0 %v9084_v37  ;;  %5966 = vmatprep.subr.bf16.mxu1 %v9089_v38  ;;  %v9188_v37 = vld [vmem:[%s12080_s1 + $0x1734] ss:$8 sps:$4 sm:$0xff]  }
 0x295   :  { %6602 = vmatprep.subr.bf16.mxu0 %v9092_v39  ;;  %v9269_v38 = vld [vmem:[%s12081_s0 + $0x5c] ss:$200 sps:$4 sm:$0xff]  }
 0x296   :  { %v9272_v39 = vld [vmem:[%s12081_s0 + $0xbc] ss:$200 sps:$4 sm:$0xff]  }
 0x297   :  { %5967 = vmatpush1.bf16.msra.mxu1 %v9087_v40  ;;  %v9183_v40 = vld [vmem:[%s12080_s1 + $0xb30] ss:$8 sps:$4 sm:$0xff]  }
 0x298   :  { %6603 = vmatpush1.bf16.msra.mxu0 %v9090_v41  ;;  %5968 = vmatprep.subr.bf16.mxu1 %v9095_v42  ;;  %v9186_v41 = vld [vmem:[%s12080_s1 + $0x1730] ss:$8 sps:$4 sm:$0xff]   ;;  %v9191_v42 = vld [vmem:[%s12080_s1 + $0xb44] ss:$8 sps:$4 sm:$0xff]  }
 0x299   :  { %6604 = vmatprep.subr.bf16.mxu0 %v9098_v43  ;;  %v9194_v43 = vld [vmem:[%s12080_s1 + $0x1744] ss:$8 sps:$4 sm:$0xff]  }
 0x29b   :  { %5969 = vmatpush1.bf16.msra.mxu1 %v9093_v44  ;;  %v9189_v44 = vld [vmem:[%s12080_s1 + $0xb40] ss:$8 sps:$4 sm:$0xff]  }
 0x29c   :  { %6605 = vmatpush1.bf16.msra.mxu0 %v9096_v45  ;;  %5970 = vmatprep.subr.bf16.mxu1 %v9101_v46  ;;  %v9192_v45 = vld [vmem:[%s12080_s1 + $0x1740] ss:$8 sps:$4 sm:$0xff]   ;;  %v9197_v46 = vld [vmem:[%s12080_s1 + $0xb54] ss:$8 sps:$4 sm:$0xff]  }
 0x29d   :  { %6606 = vmatprep.subr.bf16.mxu0 %v9104_v47  ;;  %v9200_v47 = vld [vmem:[%s12080_s1 + $0x1754] ss:$8 sps:$4 sm:$0xff]  }
 0x29f   :  { %5971 = vmatpush1.bf16.msra.mxu1 %v9099_v48  ;;  %v9195_v48 = vld [vmem:[%s12080_s1 + $0xb50] ss:$8 sps:$4 sm:$0xff]  }
 0x2a0   :  { %6607 = vmatpush1.bf16.msra.mxu0 %v9102_v49  ;;  %5972 = vmatprep.subr.bf16.mxu1 %v9107_v50  ;;  %v9198_v49 = vld [vmem:[%s12080_s1 + $0x1750] ss:$8 sps:$4 sm:$0xff]   ;;  %v9203_v50 = vld [vmem:[%s12080_s1 + $0xb64] ss:$8 sps:$4 sm:$0xff]  }
 0x2a1   :  { %6608 = vmatprep.subr.bf16.mxu0 %v9110_v51  ;;  %v9206_v51 = vld [vmem:[%s12080_s1 + $0x1764] ss:$8 sps:$4 sm:$0xff]  }
 0x2a3   :  { %5973 = vmatpush1.bf16.msra.mxu1 %v9105_v52  ;;  %v9201_v52 = vld [vmem:[%s12080_s1 + $0xb60] ss:$8 sps:$4 sm:$0xff]  }
 0x2a4   :  { %6609 = vmatpush1.bf16.msra.mxu0 %v9108_v53  ;;  %5974 = vmatprep.subr.bf16.mxu1 %v9113_v54  ;;  %v9204_v53 = vld [vmem:[%s12080_s1 + $0x1760] ss:$8 sps:$4 sm:$0xff]   ;;  %v9209_v54 = vld [vmem:[%s12080_s1 + $0xb74] ss:$8 sps:$4 sm:$0xff]  }
 0x2a5   :  { %6610 = vmatprep.subr.bf16.mxu0 %v9116_v55  ;;  %v9212_v55 = vld [vmem:[%s12080_s1 + $0x1774] ss:$8 sps:$4 sm:$0xff]  }
 0x2a7   :  { %5975 = vmatpush1.bf16.msra.mxu1 %v9111_v56  ;;  %v9207_v56 = vld [vmem:[%s12080_s1 + $0xb70] ss:$8 sps:$4 sm:$0xff]  }
 0x2a8   :  { %6611 = vmatpush1.bf16.msra.mxu0 %v9114_v57  ;;  %5976 = vmatprep.subr.bf16.mxu1 %v9119_v58  ;;  %v9210_v57 = vld [vmem:[%s12080_s1 + $0x1770] ss:$8 sps:$4 sm:$0xff]   ;;  %v9215_v58 = vld [vmem:[%s12080_s1 + $0xb84] ss:$8 sps:$4 sm:$0xff]  }
 0x2a9   :  { %6612 = vmatprep.subr.bf16.mxu0 %v9122_v59  ;;  %v9218_v59 = vld [vmem:[%s12080_s1 + $0x1784] ss:$8 sps:$4 sm:$0xff]  }
 0x2ab   :  { %5977 = vmatpush1.bf16.msra.mxu1 %v9117_v60  ;;  %v9213_v60 = vld [vmem:[%s12080_s1 + $0xb80] ss:$8 sps:$4 sm:$0xff]  }
 0x2ac   :  { %6613 = vmatpush1.bf16.msra.mxu0 %v9120_v61  ;;  %5978 = vmatprep.subr.bf16.mxu1 %v9125_v62  ;;  %v9216_v61 = vld [vmem:[%s12080_s1 + $0x1780] ss:$8 sps:$4 sm:$0xff]   ;;  %v9221_v62 = vld [vmem:[%s12080_s1 + $0xb94] ss:$8 sps:$4 sm:$0xff]  }
 0x2ad   :  { %6614 = vmatprep.subr.bf16.mxu0 %v9128_v63  ;;  %v9224_v63 = vld [vmem:[%s12080_s1 + $0x1794] ss:$8 sps:$4 sm:$0xff]  }
 0x2af   :  { %5979 = vmatpush1.bf16.msra.mxu1 %v9123_v0  ;;  %v9219_v0 = vld [vmem:[%s12080_s1 + $0xb90] ss:$8 sps:$4 sm:$0xff]  }
 0x2b0   :  { %6615 = vmatpush1.bf16.msra.mxu0 %v9126_v1  ;;  %5980 = vmatprep.subr.bf16.mxu1 %v9131_v2  ;;  %v9222_v1 = vld [vmem:[%s12080_s1 + $0x1790] ss:$8 sps:$4 sm:$0xff]   ;;  %v9227_v2 = vld [vmem:[%s12080_s1 + $0xba4] ss:$8 sps:$4 sm:$0xff]  }
 0x2b1   :  { %6616 = vmatprep.subr.bf16.mxu0 %v9134_v3  ;;  %v9230_v3 = vld [vmem:[%s12080_s1 + $0x17a4] ss:$8 sps:$4 sm:$0xff]  }
 0x2b3   :  { %5981 = vmatpush1.bf16.msra.mxu1 %v9129_v4  ;;  %v9225_v4 = vld [vmem:[%s12080_s1 + $0xba0] ss:$8 sps:$4 sm:$0xff]  }
 0x2b4   :  { %6617 = vmatpush1.bf16.msra.mxu0 %v9132_v5  ;;  %5982 = vmatprep.subr.bf16.mxu1 %v9137_v6  ;;  %v9228_v5 = vld [vmem:[%s12080_s1 + $0x17a0] ss:$8 sps:$4 sm:$0xff]   ;;  %v9233_v6 = vld [vmem:[%s12080_s1 + $0xbb4] ss:$8 sps:$4 sm:$0xff]  }
 0x2b5   :  { %6618 = vmatprep.subr.bf16.mxu0 %v9140_v7  ;;  %v9236_v7 = vld [vmem:[%s12080_s1 + $0x17b4] ss:$8 sps:$4 sm:$0xff]  }
 0x2b7   :  { %5983 = vmatpush1.bf16.msra.mxu1 %v9135_v8  ;;  %v9231_v8 = vld [vmem:[%s12080_s1 + $0xbb0] ss:$8 sps:$4 sm:$0xff]  }
 0x2b8   :  { %6619 = vmatpush1.bf16.msra.mxu0 %v9138_v9  ;;  %5984 = vmatprep.subr.bf16.mxu1 %v9145_v10  ;;  %v9234_v9 = vld [vmem:[%s12080_s1 + $0x17b0] ss:$8 sps:$4 sm:$0xff]   ;;  %v9239_v10 = vld [vmem:[%s12080_s1 + $0xbc4] ss:$8 sps:$4 sm:$0xff]  }
 0x2b9   :  { %6620 = vmatprep.subr.bf16.mxu0 %v9150_v11  ;;  %v9242_v11 = vld [vmem:[%s12080_s1 + $0x17c4] ss:$8 sps:$4 sm:$0xff]  }
 0x2bb   :  { %5985 = vmatpush1.bf16.msra.mxu1 %v9143_v12  ;;  %v9237_v12 = vld [vmem:[%s12080_s1 + $0xbc0] ss:$8 sps:$4 sm:$0xff]  }
 0x2bc   :  { %6621 = vmatpush1.bf16.msra.mxu0 %v9148_v13  ;;  %5986 = vmatprep.subr.bf16.mxu1 %v9155_v14  ;;  %v9240_v13 = vld [vmem:[%s12080_s1 + $0x17c0] ss:$8 sps:$4 sm:$0xff]   ;;  %v9245_v14 = vld [vmem:[%s12080_s1 + $0xbd4] ss:$8 sps:$4 sm:$0xff]  }
 0x2bd   :  { %6622 = vmatprep.subr.bf16.mxu0 %v9158_v15  ;;  %v9248_v15 = vld [vmem:[%s12080_s1 + $0x17d4] ss:$8 sps:$4 sm:$0xff]  }
 0x2bf   :  { %5987 = vmatpush1.bf16.msra.mxu1 %v9153_v16  ;;  %v9243_v16 = vld [vmem:[%s12080_s1 + $0xbd0] ss:$8 sps:$4 sm:$0xff]  }
 0x2c0   :  { %6623 = vmatpush1.bf16.msra.mxu0 %v9156_v17  ;;  %6009 = vmatprep.subr.bf16.mxu1 %v9164_v18  ;;  %v9246_v17 = vld [vmem:[%s12080_s1 + $0x17d0] ss:$8 sps:$4 sm:$0xff]   ;;  %v9256_v18 = vld [vmem:[%s12080_s1 + $0xbe4] ss:$8 sps:$4 sm:$0xff]  }
 0x2c1   :  { %6645 = vmatprep.subr.bf16.mxu0 %v9170_v19  ;;  %v9260_v19 = vld [vmem:[%s12080_s1 + $0x17e4] ss:$8 sps:$4 sm:$0xff]  }
 0x2c2   :  { %5989 = vmatmul.mubr.bf16.vlgmr.msra.gmra.mrb[0].mxu1 %v9159_v20  ;;  %v9254_v20 = vld [vmem:[%s12080_s1 + $0xbe0] ss:$8 sps:$4 sm:$0xff]  }
 0x2c3   :  { %6625 = vmatmul.mubr.bf16.vlgmr.msra.gmra.mrb[0].mxu0 %v9165_v21  ;;  %6010 = vmatpush1.bf16.msra.mxu1 %v9162_v22  ;;  %v9258_v21 = vld [vmem:[%s12080_s1 + $0x17e0] ss:$8 sps:$4 sm:$0xff]   ;;  %v9263_v22 = vld [vmem:[%s12080_s1 + $0xbf4] ss:$8 sps:$4 sm:$0xff]  }
 0x2c4   :  { %6646 = vmatpush1.bf16.msra.mxu0 %v9168_v23  ;;  %6011 = vmatprep.subr.bf16.mxu1 %v9173_v24  ;;  %v9266_v23 = vld [vmem:[%s12080_s1 + $0x17f4] ss:$8 sps:$4 sm:$0xff]   ;;  %v9261_v24 = vld [vmem:[%s12080_s1 + $0xbf0] ss:$8 sps:$4 sm:$0xff]  }
 0x2c5   :  { %6647 = vmatprep.subr.bf16.mxu0 %v9176_v25  ;;  %5998 = vmatprep.mubr.bf16.mxu1 %v9249_v26  ;;  %v9264_v25 = vld [vmem:[%s12080_s1 + $0x17f0] ss:$8 sps:$4 sm:$0xff]   ;;  %v9275_v26 = vld [vmem:[%s12080_s1 + $0x1804] ss:$8 sps:$4 sm:$0xff]  }
 0x2c6   :  { %6634 = vmatprep.mubr.bf16.mxu0 %v9251_v27  ;;  %v9267_v27 = vld [vmem:[%s12081_s0 + $0x58] ss:$200 sps:$4 sm:$0xff]  }
 0x2c7   :  { %6012 = vmatpush1.bf16.msra.mxu1 %v9171_v28  ;;  %v9270_v28 = vld [vmem:[%s12081_s0 + $0xb8] ss:$200 sps:$4 sm:$0xff]  }
 0x2c8   :  { %6648 = vmatpush1.bf16.msra.mxu0 %v9174_v29  ;;  %6013 = vmatprep.subr.bf16.mxu1 %v9179_v30  ;;  %v9273_v29 = vld [vmem:[%s12080_s1 + $0x1800] ss:$8 sps:$4 sm:$0xff]   ;;  %v9278_v30 = vld [vmem:[%s12080_s1 + $0x1814] ss:$8 sps:$4 sm:$0xff]  }
 0x2c9   :  { %6649 = vmatprep.subr.bf16.mxu0 %v9182_v31  ;;  %v9279_v31 = vld [vmem:[%s12081_s0 + $0x1ec] ss:$200 sps:$4 sm:$0xff]  }
 0x2ca   :  { %5999 = vmatmul.mubr.bf16.gmra.mrb[4].mxu1 %v9253_v32  ;;  %v9281_v32 = vld [vmem:[%s12081_s0 + $0x24c] ss:$200 sps:$4 sm:$0xff]  }
 0x2cb   :  { %6635 = vmatmul.mubr.bf16.gmra.mrb[4].mxu0 %v9257_v33  ;;  %6014 = vmatpush1.bf16.msra.mxu1 %v9177_v34  ;;  %v9276_v33 = vld [vmem:[%s12080_s1 + $0x1810] ss:$8 sps:$4 sm:$0xff]   ;;  %v9287_v34 = vld [vmem:[%s12080_s1 + $0x1824] ss:$8 sps:$4 sm:$0xff]  }
 0x2cc   :  { %6650 = vmatpush1.bf16.msra.mxu0 %v9180_v35  ;;  %6015 = vmatprep.subr.bf16.mxu1 %v9185_v36  ;;  %v9283_v35 = vld [vmem:[%s12081_s0 + $0x1e8] ss:$200 sps:$4 sm:$0xff]  }
 0x2cd   :  { %6651 = vmatprep.subr.bf16.mxu0 %v9188_v37  ;;  %6041 = vmatprep.mubr.bf16.mxu1 %v9269_v38  ;;  %v9284_v36 = vld [vmem:[%s12081_s0 + $0x248] ss:$200 sps:$4 sm:$0xff]   ;;  %v9290_v38 = vld [vmem:[%s12080_s1 + $0x1834] ss:$8 sps:$4 sm:$0xff]  }
 0x2ce   :  { %6677 = vmatprep.mubr.bf16.mxu0 %v9272_v39  ;;  %v9285_v37 = vld [vmem:[%s12080_s1 + $0x1820] ss:$8 sps:$4 sm:$0xff]   ;;  %v9329_v39 = vld [vmem:[%s12081_s0 + $0xc4] ss:$200 sps:$4 sm:$0xff]  }
 0x2cf   :  { %6016 = vmatpush1.bf16.msra.mxu1 %v9183_v40  ;;  %v9332_v40 = vld [vmem:[%s12081_s0 + $0x254] ss:$200 sps:$4 sm:$0xff]  }
 0x2d0   :  { %6652 = vmatpush1.bf16.msra.mxu0 %v9186_v41  ;;  %6017 = vmatprep.subr.bf16.mxu1 %v9191_v42  ;;  %v9288_v41 = vld [vmem:[%s12080_s1 + $0x1830] ss:$8 sps:$4 sm:$0xff]   ;;  %v9293_v42 = vld [vmem:[%s12080_s1 + $0x1844] ss:$8 sps:$4 sm:$0xff]  }
 0x2d1   :  { %6653 = vmatprep.subr.bf16.mxu0 %v9194_v43  ;;  %v9291_v43 = vld [vmem:[%s12080_s1 + $0x1840] ss:$8 sps:$4 sm:$0xff]  }
 0x2d3   :  { %6018 = vmatpush1.bf16.msra.mxu1 %v9189_v44  ;;  %v9296_v44 = vld [vmem:[%s12080_s1 + $0x1854] ss:$8 sps:$4 sm:$0xff]  }
 0x2d4   :  { %6654 = vmatpush1.bf16.msra.mxu0 %v9192_v45  ;;  %6019 = vmatprep.subr.bf16.mxu1 %v9197_v46  ;;  %v9294_v45 = vld [vmem:[%s12080_s1 + $0x1850] ss:$8 sps:$4 sm:$0xff]   ;;  %v9299_v46 = vld [vmem:[%s12080_s1 + $0x1864] ss:$8 sps:$4 sm:$0xff]  }
 0x2d5   :  { %6655 = vmatprep.subr.bf16.mxu0 %v9200_v47  ;;  %v9297_v47 = vld [vmem:[%s12080_s1 + $0x1860] ss:$8 sps:$4 sm:$0xff]  }
 0x2d7   :  { %6020 = vmatpush1.bf16.msra.mxu1 %v9195_v48  ;;  %v9302_v48 = vld [vmem:[%s12080_s1 + $0x1874] ss:$8 sps:$4 sm:$0xff]  }
 0x2d8   :  { %6656 = vmatpush1.bf16.msra.mxu0 %v9198_v49  ;;  %6021 = vmatprep.subr.bf16.mxu1 %v9203_v50  ;;  %v9300_v49 = vld [vmem:[%s12080_s1 + $0x1870] ss:$8 sps:$4 sm:$0xff]   ;;  %v9305_v50 = vld [vmem:[%s12080_s1 + $0x1884] ss:$8 sps:$4 sm:$0xff]  }
 0x2d9   :  { %6657 = vmatprep.subr.bf16.mxu0 %v9206_v51  ;;  %v9303_v51 = vld [vmem:[%s12080_s1 + $0x1880] ss:$8 sps:$4 sm:$0xff]  }
 0x2db   :  { %6022 = vmatpush1.bf16.msra.mxu1 %v9201_v52  ;;  %v9308_v52 = vld [vmem:[%s12080_s1 + $0x1894] ss:$8 sps:$4 sm:$0xff]  }
 0x2dc   :  { %6658 = vmatpush1.bf16.msra.mxu0 %v9204_v53  ;;  %6023 = vmatprep.subr.bf16.mxu1 %v9209_v54  ;;  %v9306_v53 = vld [vmem:[%s12080_s1 + $0x1890] ss:$8 sps:$4 sm:$0xff]   ;;  %v9311_v54 = vld [vmem:[%s12080_s1 + $0x18a4] ss:$8 sps:$4 sm:$0xff]  }
 0x2dd   :  { %6659 = vmatprep.subr.bf16.mxu0 %v9212_v55  ;;  %v9309_v55 = vld [vmem:[%s12080_s1 + $0x18a0] ss:$8 sps:$4 sm:$0xff]  }
 0x2df   :  { %6024 = vmatpush1.bf16.msra.mxu1 %v9207_v56  ;;  %v9314_v56 = vld [vmem:[%s12080_s1 + $0x18b4] ss:$8 sps:$4 sm:$0xff]  }
 0x2e0   :  { %6660 = vmatpush1.bf16.msra.mxu0 %v9210_v57  ;;  %6025 = vmatprep.subr.bf16.mxu1 %v9215_v58  ;;  %v9312_v57 = vld [vmem:[%s12080_s1 + $0x18b0] ss:$8 sps:$4 sm:$0xff]   ;;  %v9317_v58 = vld [vmem:[%s12080_s1 + $0x18c4] ss:$8 sps:$4 sm:$0xff]  }
 0x2e1   :  { %6661 = vmatprep.subr.bf16.mxu0 %v9218_v59  ;;  %v9315_v59 = vld [vmem:[%s12080_s1 + $0x18c0] ss:$8 sps:$4 sm:$0xff]  }
 0x2e3   :  { %6026 = vmatpush1.bf16.msra.mxu1 %v9213_v60  ;;  %v9320_v60 = vld [vmem:[%s12080_s1 + $0x18d4] ss:$8 sps:$4 sm:$0xff]  }
 0x2e4   :  { %6662 = vmatpush1.bf16.msra.mxu0 %v9216_v61  ;;  %6027 = vmatprep.subr.bf16.mxu1 %v9221_v62  ;;  %v9318_v61 = vld [vmem:[%s12080_s1 + $0x18d0] ss:$8 sps:$4 sm:$0xff]   ;;  %v9323_v62 = vld [vmem:[%s12080_s1 + $0x18e4] ss:$8 sps:$4 sm:$0xff]  }
 0x2e5   :  { %6663 = vmatprep.subr.bf16.mxu0 %v9224_v63  ;;  %v9321_v63 = vld [vmem:[%s12080_s1 + $0x18e0] ss:$8 sps:$4 sm:$0xff]  }
 0x2e7   :  { %6028 = vmatpush1.bf16.msra.mxu1 %v9219_v0  ;;  %v9326_v0 = vld [vmem:[%s12080_s1 + $0x18f4] ss:$8 sps:$4 sm:$0xff]  }
 0x2e8   :  { %6664 = vmatpush1.bf16.msra.mxu0 %v9222_v1  ;;  %6029 = vmatprep.subr.bf16.mxu1 %v9227_v2  ;;  %v9324_v1 = vld [vmem:[%s12080_s1 + $0x18f0] ss:$8 sps:$4 sm:$0xff]   ;;  %v9327_v2 = vld [vmem:[%s12081_s0 + $0xc0] ss:$200 sps:$4 sm:$0xff]  }
 0x2e9   :  { %6665 = vmatprep.subr.bf16.mxu0 %v9230_v3  ;;  %v9330_v3 = vld [vmem:[%s12081_s0 + $0x250] ss:$200 sps:$4 sm:$0xff]  }
 0x2eb   :  { %6030 = vmatpush1.bf16.msra.mxu1 %v9225_v4  ;;  %v916_v4 = vlaneseq }
 0x2ec   :  { %6666 = vmatpush1.bf16.msra.mxu0 %v9228_v5  ;;  %6031 = vmatprep.subr.bf16.mxu1 %v9233_v6 }
 0x2ed   :  { %6667 = vmatprep.subr.bf16.mxu0 %v9236_v7  ;;  %v917_v5 = vshrl.u32 %v916_v4, 7 }
 0x2ef   :  { %6032 = vmatpush1.bf16.msra.mxu1 %v9231_v8 }
 0x2f0   :  { %6668 = vmatpush1.bf16.msra.mxu0 %v9234_v9  ;;  %6033 = vmatprep.subr.bf16.mxu1 %v9239_v10  ;;  %v918_v9 = vsub.s32 0, %v917_v5 }
 0x2f1   :  { %6669 = vmatprep.subr.bf16.mxu0 %v9242_v11  ;;  %v914_v11 = vld [vmem:[%s12082_s2] sm:$0x3] }
 0x2f3   :  { %6034 = vmatpush1.bf16.msra.mxu1 %v9237_v12  ;;  %v922_v12 = vsub.s32 1, %v917_v5 }
 0x2f4   :  { %6670 = vmatpush1.bf16.msra.mxu0 %v9240_v13  ;;  %6035 = vmatprep.subr.bf16.mxu1 %v9245_v14  ;;  %v919_v13 = vrot.slane %v914_v11, %v918_v9 }
 0x2f5   :  { %6671 = vmatprep.subr.bf16.mxu0 %v9248_v15  ;;  %v923_v14 = vrot.slane %v914_v11, %v922_v12 }
 0x2f7   :  { %6036 = vmatpush1.bf16.msra.mxu1 %v9243_v16 }
 0x2f8   :  { %6672 = vmatpush1.bf16.msra.mxu0 %v9246_v17  ;;  %6037 = vmatprep.subr.bf16.mxu1 %v9256_v18 }
 0x2f9   :  { %6673 = vmatprep.subr.bf16.mxu0 %v9260_v19 }
 0x2fb   :  { %6038 = vmatpush1.bf16.msra.mxu1 %v9254_v20 }
 0x2fc   :  { %6674 = vmatpush1.bf16.msra.mxu0 %v9258_v21  ;;  %6039 = vmatprep.subr.bf16.mxu1 %v9263_v22 }
 0x2fd   :  { %6675 = vmatprep.subr.bf16.mxu0 %v9266_v23 }
 0x2ff   :  { %6040 = vmatpush1.bf16.msra.mxu1 %v9261_v24 }
 0x300   :  { %6676 = vmatpush1.bf16.msra.mxu0 %v9264_v25  ;;  %7751 = vmatprep.subr.bf16.mxu1 %v9275_v26 }
 0x301   :  { %6698 = vmatprep.subr.bf16.mxu0 %v9275_v26 }
 0x302   :  { %6042 = vmatmul.mubr.bf16.vlgmr.msra.gmra.mrb[0].mxu1 %v9267_v27 }
 0x303   :  { %6678 = vmatmul.mubr.bf16.vlgmr.msra.gmra.mrb[0].mxu0 %v9270_v28  ;;  %7767 = vmatpush1.bf16.msra.mxu1 %v9273_v29 }
 0x304   :  { %6699 = vmatpush1.bf16.msra.mxu0 %v9273_v29  ;;  %7752 = vmatprep.subr.bf16.mxu1 %v9278_v30 }
 0x305   :  { %6700 = vmatprep.subr.bf16.mxu0 %v9278_v30  ;;  %6051 = vmatprep.mubr.bf16.mxu1 %v9279_v31 }
 0x306   :  { %6687 = vmatprep.mubr.bf16.mxu0 %v9281_v32 }
 0x307   :  { %7768 = vmatpush1.bf16.msra.mxu1 %v9276_v33 }
 0x308   :  { %6701 = vmatpush1.bf16.msra.mxu0 %v9276_v33  ;;  %7753 = vmatprep.subr.bf16.mxu1 %v9287_v34 }
 0x309   :  { %6702 = vmatprep.subr.bf16.mxu0 %v9287_v34 }
 0x30a   :  { %6052 = vmatmul.mubr.bf16.gmra.mrb[4].mxu1 %v9283_v35 }
 0x30b   :  { %6688 = vmatmul.mubr.bf16.gmra.mrb[4].mxu0 %v9284_v36  ;;  %7769 = vmatpush1.bf16.msra.mxu1 %v9285_v37 }
 0x30c   :  { %6703 = vmatpush1.bf16.msra.mxu0 %v9285_v37  ;;  %7754 = vmatprep.subr.bf16.mxu1 %v9290_v38 }
 0x30d   :  { %6704 = vmatprep.subr.bf16.mxu0 %v9290_v38  ;;  %6730 = vmatprep.mubr.bf16.mxu0 %v9329_v39 }
 0x30e   :  { %6740 = vmatprep.mubr.bf16.mxu1 %v9332_v40 }
 0x30f   :  { %7770 = vmatpush1.bf16.msra.mxu1 %v9288_v41 }
 0x310   :  { %6705 = vmatpush1.bf16.msra.mxu0 %v9288_v41  ;;  %7755 = vmatprep.subr.bf16.mxu1 %v9293_v42 }
 0x311   :  { %6706 = vmatprep.subr.bf16.mxu0 %v9293_v42 }
 0x313   :  { %7771 = vmatpush1.bf16.msra.mxu1 %v9291_v43 }
 0x314   :  { %6707 = vmatpush1.bf16.msra.mxu0 %v9291_v43  ;;  %7756 = vmatprep.subr.bf16.mxu1 %v9296_v44 }
 0x315   :  { %6708 = vmatprep.subr.bf16.mxu0 %v9296_v44 }
 0x317   :  { %7772 = vmatpush1.bf16.msra.mxu1 %v9294_v45 }
 0x318   :  { %6709 = vmatpush1.bf16.msra.mxu0 %v9294_v45  ;;  %7757 = vmatprep.subr.bf16.mxu1 %v9299_v46 }
 0x319   :  { %6710 = vmatprep.subr.bf16.mxu0 %v9299_v46 }
 0x31b   :  { %7773 = vmatpush1.bf16.msra.mxu1 %v9297_v47 }
 0x31c   :  { %6711 = vmatpush1.bf16.msra.mxu0 %v9297_v47  ;;  %7758 = vmatprep.subr.bf16.mxu1 %v9302_v48 }
 0x31d   :  { %6712 = vmatprep.subr.bf16.mxu0 %v9302_v48 }
 0x31f   :  { %7774 = vmatpush1.bf16.msra.mxu1 %v9300_v49 }
 0x320   :  { %6713 = vmatpush1.bf16.msra.mxu0 %v9300_v49  ;;  %7759 = vmatprep.subr.bf16.mxu1 %v9305_v50 }
 0x321   :  { %6714 = vmatprep.subr.bf16.mxu0 %v9305_v50 }
 0x323   :  { %7775 = vmatpush1.bf16.msra.mxu1 %v9303_v51 }
 0x324   :  { %6715 = vmatpush1.bf16.msra.mxu0 %v9303_v51  ;;  %7760 = vmatprep.subr.bf16.mxu1 %v9308_v52 }
 0x325   :  { %6716 = vmatprep.subr.bf16.mxu0 %v9308_v52 }
 0x327   :  { %7776 = vmatpush1.bf16.msra.mxu1 %v9306_v53 }
 0x328   :  { %6717 = vmatpush1.bf16.msra.mxu0 %v9306_v53  ;;  %7761 = vmatprep.subr.bf16.mxu1 %v9311_v54 }
 0x329   :  { %6718 = vmatprep.subr.bf16.mxu0 %v9311_v54 }
 0x32b   :  { %7777 = vmatpush1.bf16.msra.mxu1 %v9309_v55 }
 0x32c   :  { %6719 = vmatpush1.bf16.msra.mxu0 %v9309_v55  ;;  %7762 = vmatprep.subr.bf16.mxu1 %v9314_v56 }
 0x32d   :  { %6720 = vmatprep.subr.bf16.mxu0 %v9314_v56 }
 0x32f   :  { %7778 = vmatpush1.bf16.msra.mxu1 %v9312_v57 }
 0x330   :  { %6721 = vmatpush1.bf16.msra.mxu0 %v9312_v57  ;;  %7763 = vmatprep.subr.bf16.mxu1 %v9317_v58 }
 0x331   :  { %6722 = vmatprep.subr.bf16.mxu0 %v9317_v58 }
 0x333   :  { %7779 = vmatpush1.bf16.msra.mxu1 %v9315_v59 }
 0x334   :  { %6723 = vmatpush1.bf16.msra.mxu0 %v9315_v59  ;;  %7764 = vmatprep.subr.bf16.mxu1 %v9320_v60 }
 0x335   :  { %6724 = vmatprep.subr.bf16.mxu0 %v9320_v60 }
 0x337   :  { %7780 = vmatpush1.bf16.msra.mxu1 %v9318_v61 }
 0x338   :  { %6725 = vmatpush1.bf16.msra.mxu0 %v9318_v61  ;;  %7765 = vmatprep.subr.bf16.mxu1 %v9323_v62 }
 0x339   :  { %6726 = vmatprep.subr.bf16.mxu0 %v9323_v62 }
 0x33b   :  { %7781 = vmatpush1.bf16.msra.mxu1 %v9321_v63 }
 0x33c   :  { %6727 = vmatpush1.bf16.msra.mxu0 %v9321_v63  ;;  %7766 = vmatprep.subr.bf16.mxu1 %v9326_v0 }
 0x33d   :  { %6728 = vmatprep.subr.bf16.mxu0 %v9326_v0 }
 0x33f   :  { %7782 = vmatpush1.bf16.msra.mxu1 %v9324_v1 }
 0x340   :  { %6729 = vmatpush1.bf16.msra.mxu0 %v9324_v1 }
 0x342   :  { %6741 = vmatmul.mubr.bf16.vlgmr.msra.gmra.mrb[8].mxu1 %v9330_v3 }
 0x343   :  { %6731 = vmatmul.mubr.bf16.vlgmr.msra.gmra.mrb[0].mxu0 %v9327_v2 }
 0x3d5   :  { %v6043_v6 = vpop.f32.mrb[0].mxu1 }
 0x3d6   :  { %v6045_v7 = vpop.f32.mrb[1].mxu1  ;;  %v7783_v31 = vadd.f32 %v6043_v6, %v919_v13 }
 0x3d7   :  { %v6047_v8 = vpop.f32.mrb[2].mxu1  ;;  %v7785_v32 = vadd.f32 %v6045_v7, %v923_v14 }
 0x3d8   :  { %v6049_v10 = vpop.f32.mrb[3].mxu1  ;;  %v7787_v39 = vadd.f32 %v6047_v8, %v919_v13 }
 0x3d9   :  { %v7789_v40 = vadd.f32 %v6049_v10, %v923_v14 }
 0x3dd   :  { %v6053_v15 = vpop.f32.mrb[4].mxu1 }
 0x3de   :  { %v6689_v16 = vpop.f32.mrb[4].mxu0  ;;  %v7791_v17 = vadd.f32 %v6053_v15, %v919_v13  ;;  %v6055_v18 = vpop.f32.mrb[5].mxu1 }
 0x3df   :  { %v6691_v19 = vpop.f32.mrb[5].mxu0  ;;  %v7794_v20 = vadd.f32 %v6055_v18, %v923_v14  ;;  %v6057_v21 = vpop.f32.mrb[6].mxu1 }
 0x3e0   :  { %v6693_v22 = vpop.f32.mrb[6].mxu0  ;;  %v7792_v23 = vadd.f32 %v7791_v17, %v6689_v16  ;;  %v7797_v24 = vadd.f32 %v6057_v21, %v919_v13  ;;  %v6059_v25 = vpop.f32.mrb[7].mxu1 }
 0x3e1   :  { %v6695_v26 = vpop.f32.mrb[7].mxu0  ;;  %v7795_v27 = vadd.f32 %v7794_v20, %v6691_v19  ;;  %v7800_v28 = vadd.f32 %v6059_v25, %v923_v14 }
 0x3e2   :  { %v7798_v29 = vadd.f32 %v7797_v24, %v6693_v22 }
 0x3e3   :  { %v7801_v30 = vadd.f32 %v7800_v28, %v6695_v26 }
 0x415   :  { %v6742_v34 = vpop.f32.mrb[8].mxu1 }
 0x416   :  { %v6732_v33 = vpop.f32.mrb[0].mxu0  ;;  %v7793_v36 = vadd.f32 %v7792_v23, %v6742_v34  ;;  %v6744_v38 = vpop.f32.mrb[9].mxu1 }
 0x417   :  { %v7784_v35 = vadd.f32 %v7783_v31, %v6732_v33  ;;  %v6734_v37 = vpop.f32.mrb[1].mxu0  ;;  %v7796_v42 = vadd.f32 %v7795_v27, %v6744_v38  ;;  %v6746_v44 = vpop.f32.mrb[10].mxu1 }
 0x418   :  { %v7786_v41 = vadd.f32 %v7785_v32, %v6734_v37  ;;  %v6736_v43 = vpop.f32.mrb[2].mxu0  ;;  %v6755_v47 = vmax.f32 %v7793_v36, 0.0  ;;  %v6791_v48 = vsub.f32 0.0, %v7793_v36  ;;  %v6748_v50 = vpop.f32.mrb[11].mxu1  ;;  %v7799_v58 = vadd.f32 %v7798_v29, %v6746_v44 }
 0x419   :  { %v6751_v45 = vmax.f32 %v7784_v35, 0.0  ;;  %v6787_v46 = vsub.f32 0.0, %v7784_v35  ;;  %v6738_v49 = vpop.f32.mrb[3].mxu0  ;;  %v6756_v53 = vmax.f32 %v7796_v42, 0.0  ;;  %v6792_v54 = vsub.f32 0.0, %v7796_v42 }
 0x41a   :  { %v6752_v51 = vmax.f32 %v7786_v41, 0.0  ;;  %v6788_v52 = vsub.f32 0.0, %v7786_v41  ;;  %v6799_v56 = vmax.f32 %v6791_v48, 0.0  ;;  %v7788_v57 = vadd.f32 %v7787_v39, %v6736_v43 }
 0x41b   :  { %v6795_v55 = vmax.f32 %v6787_v46, 0.0  ;;  %v7745_v61 = vpack.c.bf16 %v6756_v53, %v6755_v47  ;;  %v6800_v62 = vmax.f32 %v6792_v54, 0.0  ;;  %v6757_v1 = vmax.f32 %v7799_v58, 0.0 }
 0x41c   :  { %v7743_v59 = vpack.c.bf16 %v6752_v51, %v6751_v45  ;;  %v6796_v60 = vmax.f32 %v6788_v52, 0.0  ;;  %v6753_v63 = vmax.f32 %v7788_v57, 0.0  ;;  %v6789_v0 = vsub.f32 0.0, %v7788_v57 }
 0x41d   :  { %v6793_v2 = vsub.f32 0.0, %v7799_v58  ;;  %6785 = vst [vmem:[%s12083_s3 + $0x20] sm:$0xff] %v7745_v61  ;;  %v7749_v4 = vpack.c.bf16 %v6800_v62, %v6799_v56  ;;  %v7790_v5 = vadd.f32 %v7789_v40, %v6738_v49  ;;  %v7802_v6 = vadd.f32 %v7801_v30, %v6748_v50 }
 0x41e   :  { %6783 = vst [vmem:[%s12083_s3] sm:$0xff] %v7743_v59  ;;  %v7747_v3 = vpack.c.bf16 %v6796_v60, %v6795_v55  ;;  %v6797_v7 = vmax.f32 %v6789_v0, 0.0 }
 0x41f   :  { %v6801_v8 = vmax.f32 %v6793_v2, 0.0  ;;  %6829 = vst [vmem:[%s12083_s3 + $0x28] sm:$0xff] %v7749_v4  ;;  %v6754_v9 = vmax.f32 %v7790_v5, 0.0  ;;  %v6790_v10 = vsub.f32 0.0, %v7790_v5  ;;  %v6758_v11 = vmax.f32 %v7802_v6, 0.0 }
 0x420   :  { %6827 = vst [vmem:[%s12083_s3 + $0x8] sm:$0xff] %v7747_v3  ;;  %v6794_v12 = vsub.f32 0.0, %v7802_v6 }
 0x421   :  { %v7744_v13 = vpack.c.bf16 %v6754_v9, %v6753_v63  ;;  %v6798_v14 = vmax.f32 %v6790_v10, 0.0  ;;  %v7746_v15 = vpack.c.bf16 %v6758_v11, %v6757_v1 }
 0x422   :  { %v6802_v16 = vmax.f32 %v6794_v12, 0.0 }
 0x423   :  { %6784 = vst [vmem:[%s12083_s3 + $0x10] sm:$0xff] %v7744_v13  ;;  %v7748_v17 = vpack.c.bf16 %v6798_v14, %v6797_v7  ;;  %6786 = vst [vmem:[%s12083_s3 + $0x30] sm:$0xff] %v7746_v15 }
 0x424   :  { %v7750_v18 = vpack.c.bf16 %v6802_v16, %v6801_v8 }
 0x425   :  { %6828 = vst [vmem:[%s12083_s3 + $0x18] sm:$0xff] %v7748_v17 }
 0x426   :  { %6830 = vst [vmem:[%s12083_s3 + $0x38] sm:$0xff] %v7750_v18 }

</bundles_post_ra>
